<compile_context>
chip_gen: v7x
topology: tpu7x:2x2x1
jax: 0.10.0
libtpu: 0.0.40
codegen_flags: <defaults>
</compile_context>

<pallas_src>
import functools

import jax
import jax.numpy as jnp
from jax.experimental import pallas as pl
from jax.experimental.pallas import tpu as pltpu

MM_DTYPE = jnp.bfloat16  # matmul-operand dtype (MXU-native on v5e/v6e/v7x)


# ----------------------------- Pallas kernel ------------------------------ #
def lstm_kernel(x_ref, len_ref, wih_ref, whh_ref, bias_ref, wout_ref,
                bout_ref, out_ref, xg_ref, *, seq_len, batch, hidden):
    """Single invocation: prologue input-projection matmul, unrolled time loop,
    final Linear + log_softmax.

    x_ref    : (T*B, E)  bf16   time-major embedded tokens (row = t*B + b)
    len_ref  : (B, 1)    int32  sequence lengths
    wih_ref  : (E, 4H)   bf16   W_ih^T
    whh_ref  : (H, 4H)   bf16   W_hh^T
    bias_ref : (1, 4H)   f32    b_ih + b_hh
    wout_ref : (H, CP)   bf16   W_out^T padded to CP=128 lanes (pad cols = 0)
    bout_ref : (1, CP)   f32    b_out padded with -1e30 on pad columns
    out_ref  : (B, CP)   f32    padded log-probs
    xg_ref   : (T*B, 4H) f32    scratch: precomputed input projection
    """
    H = hidden

    # ---- Prologue: input projection for ALL timesteps in one MXU call. ----
    # (T*B, E) @ (E, 4H) + bias, accumulated in f32.
    xg_ref[...] = (
        jnp.dot(x_ref[...], wih_ref[...], preferred_element_type=jnp.float32)
        + bias_ref[...])

    mm_dtype = whh_ref.dtype

    # Loop-invariant values hoisted off the serial h->h path:
    #  * whh : single load; expresses W_hh weight-stationarity across the
    #    unrolled steps so the compiler can hoist the MXU weight pushes.
    #  * lens: one (B,1) int32 vreg replaces the old (T*B,1) f32 mask slab
    #    (removes a 127/128-wasted per-step vld and a 64 KiB buffer).
    # TODO(synk): if a bundle dump shows Mosaic still re-pushes the four
    # (256,256) W_hh tiles every step, switch to explicit
    # pltpu.matmul_push_rhs / matmul_acc_lhs / matmul_pop (tiles fully resident
    # on v6e/v7x, double-buffered pushes overlapped with gate math on v5e).
    whh = whh_ref[...]
    lens = len_ref[...]                                 # (B, 1) int32

    # ---- Recurrence: only h @ W_hh^T per step on the serial path. ----
    def step(t, carry):
        h, c = carry                                    # (B, H) f32 each
        row = pl.multiple_of(t * batch, batch)          # sublane-aligned start
        gates = xg_ref[pl.ds(row, batch), :] + jnp.dot(
            h.astype(mm_dtype), whh,
            preferred_element_type=jnp.float32)         # (B, 4H) f32

        # PyTorch gate order: i, f, g, o.  H is a multiple of 128, so every
        # slice below is vreg-aligned (no sub-lane extracts).
        i_g = jax.nn.sigmoid(gates[:, 0 * H:1 * H])
        f_g = jax.nn.sigmoid(gates[:, 1 * H:2 * H])
        g_g = jnp.tanh(gates[:, 2 * H:3 * H])
        o_g = jax.nn.sigmoid(gates[:, 3 * H:4 * H])

        c_new = f_g * c + i_g * g_g
        h_new = o_g * jnp.tanh(c_new)

        # pack_padded_sequence emulation: only advance state while t < length.
        valid = lens > t                                # (B, 1) bool
        return (jnp.where(valid, h_new, h), jnp.where(valid, c_new, c))

    h0 = jnp.zeros((batch, H), jnp.float32)
    c0 = jnp.zeros((batch, H), jnp.float32)
    # Full unroll at short T (LLO scheduling visibility); cap for long T to
    # avoid blowing instruction memory / compile time.
    unroll = seq_len if seq_len <= 16 else 8
    h, _ = jax.lax.fori_loop(0, seq_len, step, (h0, c0), unroll=unroll)

    # ---- Final Linear + log_softmax on a lane-dense (B, 128) block. ----
    logits = jnp.dot(h.astype(mm_dtype), wout_ref[...],
                     preferred_element_type=jnp.float32) + bout_ref[...]
    m = jnp.max(logits, axis=-1, keepdims=True)
    lse = m + jnp.log(jnp.sum(jnp.exp(logits - m), axis=-1, keepdims=True))
    out_ref[...] = logits - lse                         # pad cols ~ -1e30, sliced off


# ------------------------------ JAX wrapper -------------------------------- #
@jax.jit
def lstm_forward(inputs, lengths, emb_table, w_ih, w_hh, b_ih, b_hh,
                 w_out, b_out):
    """inputs:[B,T] int32 token ids, lengths:[B] int32 -> [B, C] log-probs."""
    B, T = inputs.shape
    E = emb_table.shape[1]
    H = w_hh.shape[1]
    C = w_out.shape[0]
    CP = ((C + 127) // 128) * 128          # lane-dense padded class dim

    # Embedding lookup (glue) + time-major flatten: row t*B + b <-> (t, b).
    x = jnp.take(emb_table, inputs, axis=0)                  # (B, T, E)
    x = jnp.swapaxes(x, 0, 1).reshape(T * B, E).astype(MM_DTYPE)

    lens2d = lengths.astype(jnp.int32).reshape(B, 1)         # (B, 1)

    # Pre-transposed (row-major MXU) weights; biases folded together.
    wih_t = w_ih.T.astype(MM_DTYPE)                          # (E, 4H)
    whh_t = w_hh.T.astype(MM_DTYPE)                          # (H, 4H)
    bias = (b_ih + b_hh).reshape(1, 4 * H).astype(jnp.float32)
    wout_t = jnp.pad(w_out.T.astype(MM_DTYPE), ((0, 0), (0, CP - C)))  # (H, CP)
    bout = jnp.pad(b_out.reshape(1, C).astype(jnp.float32),
                   ((0, 0), (0, CP - C)), constant_values=-1e30)       # (1, CP)

    # VMEM budget from the actual footprint (with 2x headroom for compiler
    # temporaries), instead of a fixed 32 MiB.
    footprint = (
        T * B * E * 2            # x (bf16)
        + B * 128 * 4            # lengths (lane-padded int32)
        + E * 4 * H * 2          # W_ih^T (bf16)
        + H * 4 * H * 2          # W_hh^T (bf16)
        + 4 * H * 4              # folded bias (f32)
        + H * CP * 2 + CP * 4    # W_out^T + padded b_out
        + B * CP * 4             # output block (f32)
        + T * B * 4 * H * 4)     # xg scratch (f32)
    vmem_limit = int(min(max(2 * footprint, 4 * 1024 * 1024),
                         128 * 1024 * 1024))
    # TODO(synk): at large T*B store xg in bf16 and/or pipeline the prologue
    # projection over time chunks so the slab stays within v7x's 64 MiB VMEM.

    kernel = functools.partial(lstm_kernel, seq_len=T, batch=B, hidden=H)
    vmem = lambda: pl.BlockSpec(memory_space=pltpu.MemorySpace.VMEM)

    out = pl.pallas_call(
        kernel,
        out_shape=jax.ShapeDtypeStruct((B, CP), jnp.float32),
        in_specs=[vmem() for _ in range(7)],
        out_specs=vmem(),
        scratch_shapes=[pltpu.VMEM((T * B, 4 * H), jnp.float32)],  # x-projection
        compiler_params=pltpu.CompilerParams(vmem_limit_bytes=vmem_limit),
    )(x, lens2d, wih_t, whh_t, bias, wout_t, bout)

    return out[:, :C]


# --------------------------- pure-JAX reference ----------------------------- #
@jax.jit
def reference_forward(inputs, lengths, emb_table, w_ih, w_hh, b_ih, b_hh,
                      w_out, b_out):
    """Mirrors the kernel math (bf16 matmul operands, f32 accumulation)."""
    x = jnp.take(emb_table, inputs, axis=0).astype(MM_DTYPE)  # (B, T, E)
    B, T, _ = x.shape
    H = w_hh.shape[1]
    wih_t = w_ih.T.astype(MM_DTYPE)
    whh_t = w_hh.T.astype(MM_DTYPE)
    wout_t = w_out.T.astype(MM_DTYPE)
    bias = (b_ih + b_hh)[None, :].astype(jnp.float32)

    h0 = jnp.zeros((B, H), jnp.float32)
    c0 = jnp.zeros((B, H), jnp.float32)

    def step(carry, inp):
        h, c = carry
        x_t, t = inp
        gates = ((jnp.dot(x_t, wih_t, preferred_element_type=jnp.float32)
                  + bias)
                 + jnp.dot(h.astype(MM_DTYPE), whh_t,
                           preferred_element_type=jnp.float32))
        i, f, g, o = jnp.split(gates, 4, axis=-1)
        i, f, o = jax.nn.sigmoid(i), jax.nn.sigmoid(f), jax.nn.sigmoid(o)
        g = jnp.tanh(g)
        c_new = f * c + i * g
        h_new = o * jnp.tanh(c_new)
        valid = (lengths > t)[:, None]
        return (jnp.where(valid, h_new, h), jnp.where(valid, c_new, c)), None

    (h, _), _ = jax.lax.scan(step, (h0, c0),
                             (jnp.swapaxes(x, 0, 1), jnp.arange(T)))
    logits = jnp.dot(h.astype(MM_DTYPE), wout_t,
                     preferred_element_type=jnp.float32) + b_out[None, :]
    return jax.nn.log_softmax(logits, axis=-1)


# ---------------------------------- main ----------------------------------- #
if __name__ == "__main__":
    # Module-native feature sizes (embedding_dim=128, hidden_dim=256, C=2);
    # small vocab / batch / sequence for the test.
    VOCAB = 100
    EMBED = 128
    HIDDEN = 256
    NUM_CLASS = 2
    B, T = 8, 16

    key = jax.random.PRNGKey(0)
    keys = jax.random.split(key, 10)

    emb_table = jax.random.normal(keys[0], (VOCAB, EMBED), jnp.float32)
    k = 1.0 / jnp.sqrt(HIDDEN)
    w_ih = jax.random.uniform(keys[1], (4 * HIDDEN, EMBED), jnp.float32, -k, k)
    w_hh = jax.random.uniform(keys[2], (4 * HIDDEN, HIDDEN), jnp.float32, -k, k)
    b_ih = jax.random.uniform(keys[3], (4 * HIDDEN,), jnp.float32, -k, k)
    b_hh = jax.random.uniform(keys[4], (4 * HIDDEN,), jnp.float32, -k, k)
    w_out = jax.random.uniform(keys[5], (NUM_CLASS, HIDDEN), jnp.float32, -k, k)
    b_out = jax.random.uniform(keys[6], (NUM_CLASS,), jnp.float32, -k, k)

    inputs = jax.random.randint(keys[7], (B, T), 0, VOCAB, jnp.int32)
    lengths = jax.random.randint(keys[8], (B,), 1, T + 1, jnp.int32)

    log_probs = lstm_forward(inputs, lengths, emb_table, w_ih, w_hh,
                             b_ih, b_hh, w_out, b_out)
    log_probs = jax.block_until_ready(log_probs)

    ref = reference_forward(inputs, lengths, emb_table, w_ih, w_hh,
                            b_ih, b_hh, w_out, b_out)
    ref = jax.block_until_ready(ref)

    assert log_probs.shape == (B, NUM_CLASS)
    assert jnp.allclose(log_probs, ref, atol=5e-3, rtol=5e-3), (
        "mismatch vs pure-JAX reference")

    print("KERNEL_OK")
</pallas_src>

<mosaic_0001>
module attributes {stable_mosaic.version = 11 : i64} {
  func.func @lstm_kernel(%arg0: memref<128x128xbf16, #tpu.memory_space<vmem>>, %arg1: memref<8x1xi32, #tpu.memory_space<vmem>>, %arg2: memref<128x1024xbf16, #tpu.memory_space<vmem>>, %arg3: memref<256x1024xbf16, #tpu.memory_space<vmem>>, %arg4: memref<1x1024xf32, #tpu.memory_space<vmem>>, %arg5: memref<256x128xbf16, #tpu.memory_space<vmem>>, %arg6: memref<1x128xf32, #tpu.memory_space<vmem>>, %arg7: memref<8x128xf32, #tpu.memory_space<vmem>>, %arg8: memref<128x1024xf32, #tpu.memory_space<vmem>>) attributes {dimension_semantics = [], scalar_prefetch = 0 : i64, scratch_operands = 1 : i64, tpu.core_type = #tpu.core_type<tc>} {
    %c0 = arith.constant 0 : index
    %c0_0 = arith.constant 0 : index
    %0 = vector.load %arg0[%c0, %c0_0] : memref<128x128xbf16, #tpu.memory_space<vmem>>, vector<128x128xbf16>
    %c0_1 = arith.constant 0 : index
    %c0_2 = arith.constant 0 : index
    %1 = vector.load %arg2[%c0_1, %c0_2] : memref<128x1024xbf16, #tpu.memory_space<vmem>>, vector<128x1024xbf16>
    %cst = arith.constant dense<0.000000e+00> : vector<128x1024xf32>
    %2 = tpu.matmul %0, %1, %cst {dimension_numbers = #tpu.dot_dimension_numbers<[1], [0], [0], [1], [0, 0, 1, 1], [], []>} : vector<128x128xbf16>, vector<128x1024xbf16>, vector<128x1024xf32> -> vector<128x1024xf32>
    %c0_3 = arith.constant 0 : index
    %c0_4 = arith.constant 0 : index
    %3 = vector.load %arg4[%c0_3, %c0_4] : memref<1x1024xf32, #tpu.memory_space<vmem>>, vector<1x1024xf32>
    %4 = vector.broadcast %3 : vector<1x1024xf32> to vector<128x1024xf32>
    %5 = arith.addf %2, %4 : vector<128x1024xf32>
    %c0_5 = arith.constant 0 : index
    %c0_6 = arith.constant 0 : index
    %6 = vector.load %arg8[%c0_5, %c0_6] : memref<128x1024xf32, #tpu.memory_space<vmem>>, vector<128x1024xf32>
    tpu.vector_store %arg8[%c0_5, %c0_6], %5 {strides = array<i32>} : memref<128x1024xf32, #tpu.memory_space<vmem>>, vector<128x1024xf32>,
    %c0_7 = arith.constant 0 : index
    %c0_8 = arith.constant 0 : index
    %7 = vector.load %arg3[%c0_7, %c0_8] : memref<256x1024xbf16, #tpu.memory_space<vmem>>, vector<256x1024xbf16>
    %c0_9 = arith.constant 0 : index
    %c0_10 = arith.constant 0 : index
    %8 = vector.load %arg1[%c0_9, %c0_10] : memref<8x1xi32, #tpu.memory_space<vmem>>, vector<8x1xi32>
    %cst_11 = arith.constant 0.000000e+00 : f32
    %9 = vector.broadcast %cst_11 : f32 to vector<8x256xf32>
    %cst_12 = arith.constant 0.000000e+00 : f32
    %10 = vector.broadcast %cst_12 : f32 to vector<8x256xf32>
    %c0_i32 = arith.constant 0 : i32
    %c8_i32 = arith.constant 8 : i32
    %11 = arith.muli %c0_i32, %c8_i32 : i32
    %12 = tpu.assume_multiple %11, 8 : i32
    %13 = arith.index_cast %12 : i32 to index
    %c0_13 = arith.constant 0 : index
    %14 = vector.load %arg8[%13, %c0_13] : memref<128x1024xf32, #tpu.memory_space<vmem>>, vector<8x1024xf32>
    %15 = arith.truncf %9 : vector<8x256xf32> to vector<8x256xbf16>
    %cst_14 = arith.constant dense<0.000000e+00> : vector<8x1024xf32>
    %16 = tpu.matmul %15, %7, %cst_14 {dimension_numbers = #tpu.dot_dimension_numbers<[1], [0], [0], [1], [0, 0, 1, 1], [], []>} : vector<8x256xbf16>, vector<256x1024xbf16>, vector<8x1024xf32> -> vector<8x1024xf32>
    %17 = arith.addf %14, %16 : vector<8x1024xf32>
    %18 = vector.extract_strided_slice %17 {offsets = [0, 0], sizes = [8, 256], strides = [1, 1]} : vector<8x1024xf32> to vector<8x256xf32>
    %19 = arith.negf %18 : vector<8x256xf32>
    %20 = math.exp %19 : vector<8x256xf32>
    %cst_15 = arith.constant 1.000000e+00 : f32
    %21 = vector.broadcast %cst_15 : f32 to vector<8x256xf32>
    %22 = arith.addf %21, %20 : vector<8x256xf32>
    %23 = arith.divf %21, %22 : vector<8x256xf32>
    %24 = vector.extract_strided_slice %17 {offsets = [0, 256], sizes = [8, 256], strides = [1, 1]} : vector<8x1024xf32> to vector<8x256xf32>
    %25 = arith.negf %24 : vector<8x256xf32>
    %26 = math.exp %25 : vector<8x256xf32>
    %cst_16 = arith.constant 1.000000e+00 : f32
    %27 = vector.broadcast %cst_16 : f32 to vector<8x256xf32>
    %28 = arith.addf %27, %26 : vector<8x256xf32>
    %29 = arith.divf %27, %28 : vector<8x256xf32>
    %30 = vector.extract_strided_slice %17 {offsets = [0, 512], sizes = [8, 256], strides = [1, 1]} : vector<8x1024xf32> to vector<8x256xf32>
    %31 = math.tanh %30 : vector<8x256xf32>
    %32 = vector.extract_strided_slice %17 {offsets = [0, 768], sizes = [8, 256], strides = [1, 1]} : vector<8x1024xf32> to vector<8x256xf32>
    %33 = arith.negf %32 : vector<8x256xf32>
    %34 = math.exp %33 : vector<8x256xf32>
    %cst_17 = arith.constant 1.000000e+00 : f32
    %35 = vector.broadcast %cst_17 : f32 to vector<8x256xf32>
    %36 = arith.addf %35, %34 : vector<8x256xf32>
    %37 = arith.divf %35, %36 : vector<8x256xf32>
    %38 = arith.mulf %29, %10 : vector<8x256xf32>
    %39 = arith.mulf %23, %31 : vector<8x256xf32>
    %40 = arith.addf %38, %39 : vector<8x256xf32>
    %41 = math.tanh %40 : vector<8x256xf32>
    %42 = arith.mulf %37, %41 : vector<8x256xf32>
    %43 = vector.broadcast %c0_i32 : i32 to vector<8x1xi32>
    %44 = arith.cmpi sgt, %8, %43 : vector<8x1xi32>
    %45 = vector.shape_cast %44 : vector<8x1xi1> to vector<8x1xi1>
    %46 = vector.broadcast %45 : vector<8x1xi1> to vector<8x256xi1>
    %47 = arith.select %46, %42, %9 : vector<8x256xi1>, vector<8x256xf32>
    %48 = vector.shape_cast %44 : vector<8x1xi1> to vector<8x1xi1>
    %49 = vector.broadcast %48 : vector<8x1xi1> to vector<8x256xi1>
    %50 = arith.select %49, %40, %10 : vector<8x256xi1>, vector<8x256xf32>
    %c1_i32 = arith.constant 1 : i32
    %c8_i32_18 = arith.constant 8 : i32
    %51 = arith.muli %c1_i32, %c8_i32_18 : i32
    %52 = tpu.assume_multiple %51, 8 : i32
    %53 = arith.index_cast %52 : i32 to index
    %c0_19 = arith.constant 0 : index
    %54 = vector.load %arg8[%53, %c0_19] : memref<128x1024xf32, #tpu.memory_space<vmem>>, vector<8x1024xf32>
    %55 = arith.truncf %47 : vector<8x256xf32> to vector<8x256xbf16>
    %cst_20 = arith.constant dense<0.000000e+00> : vector<8x1024xf32>
    %56 = tpu.matmul %55, %7, %cst_20 {dimension_numbers = #tpu.dot_dimension_numbers<[1], [0], [0], [1], [0, 0, 1, 1], [], []>} : vector<8x256xbf16>, vector<256x1024xbf16>, vector<8x1024xf32> -> vector<8x1024xf32>
    %57 = arith.addf %54, %56 : vector<8x1024xf32>
    %58 = vector.extract_strided_slice %57 {offsets = [0, 0], sizes = [8, 256], strides = [1, 1]} : vector<8x1024xf32> to vector<8x256xf32>
    %59 = arith.negf %58 : vector<8x256xf32>
    %60 = math.exp %59 : vector<8x256xf32>
    %cst_21 = arith.constant 1.000000e+00 : f32
    %61 = vector.broadcast %cst_21 : f32 to vector<8x256xf32>
    %62 = arith.addf %61, %60 : vector<8x256xf32>
    %63 = arith.divf %61, %62 : vector<8x256xf32>
    %64 = vector.extract_strided_slice %57 {offsets = [0, 256], sizes = [8, 256], strides = [1, 1]} : vector<8x1024xf32> to vector<8x256xf32>
    %65 = arith.negf %64 : vector<8x256xf32>
    %66 = math.exp %65 : vector<8x256xf32>
    %cst_22 = arith.constant 1.000000e+00 : f32
    %67 = vector.broadcast %cst_22 : f32 to vector<8x256xf32>
    %68 = arith.addf %67, %66 : vector<8x256xf32>
    %69 = arith.divf %67, %68 : vector<8x256xf32>
    %70 = vector.extract_strided_slice %57 {offsets = [0, 512], sizes = [8, 256], strides = [1, 1]} : vector<8x1024xf32> to vector<8x256xf32>
    %71 = math.tanh %70 : vector<8x256xf32>
    %72 = vector.extract_strided_slice %57 {offsets = [0, 768], sizes = [8, 256], strides = [1, 1]} : vector<8x1024xf32> to vector<8x256xf32>
    %73 = arith.negf %72 : vector<8x256xf32>
    %74 = math.exp %73 : vector<8x256xf32>
    %cst_23 = arith.constant 1.000000e+00 : f32
    %75 = vector.broadcast %cst_23 : f32 to vector<8x256xf32>
    %76 = arith.addf %75, %74 : vector<8x256xf32>
    %77 = arith.divf %75, %76 : vector<8x256xf32>
    %78 = arith.mulf %69, %50 : vector<8x256xf32>
    %79 = arith.mulf %63, %71 : vector<8x256xf32>
    %80 = arith.addf %78, %79 : vector<8x256xf32>
    %81 = math.tanh %80 : vector<8x256xf32>
    %82 = arith.mulf %77, %81 : vector<8x256xf32>
    %83 = vector.broadcast %c1_i32 : i32 to vector<8x1xi32>
    %84 = arith.cmpi sgt, %8, %83 : vector<8x1xi32>
    %85 = vector.shape_cast %84 : vector<8x1xi1> to vector<8x1xi1>
    %86 = vector.broadcast %85 : vector<8x1xi1> to vector<8x256xi1>
    %87 = arith.select %86, %82, %47 : vector<8x256xi1>, vector<8x256xf32>
    %88 = vector.shape_cast %84 : vector<8x1xi1> to vector<8x1xi1>
    %89 = vector.broadcast %88 : vector<8x1xi1> to vector<8x256xi1>
    %90 = arith.select %89, %80, %50 : vector<8x256xi1>, vector<8x256xf32>
    %c2_i32 = arith.constant 2 : i32
    %c8_i32_24 = arith.constant 8 : i32
    %91 = arith.muli %c2_i32, %c8_i32_24 : i32
    %92 = tpu.assume_multiple %91, 8 : i32
    %93 = arith.index_cast %92 : i32 to index
    %c0_25 = arith.constant 0 : index
    %94 = vector.load %arg8[%93, %c0_25] : memref<128x1024xf32, #tpu.memory_space<vmem>>, vector<8x1024xf32>
    %95 = arith.truncf %87 : vector<8x256xf32> to vector<8x256xbf16>
    %cst_26 = arith.constant dense<0.000000e+00> : vector<8x1024xf32>
    %96 = tpu.matmul %95, %7, %cst_26 {dimension_numbers = #tpu.dot_dimension_numbers<[1], [0], [0], [1], [0, 0, 1, 1], [], []>} : vector<8x256xbf16>, vector<256x1024xbf16>, vector<8x1024xf32> -> vector<8x1024xf32>
    %97 = arith.addf %94, %96 : vector<8x1024xf32>
    %98 = vector.extract_strided_slice %97 {offsets = [0, 0], sizes = [8, 256], strides = [1, 1]} : vector<8x1024xf32> to vector<8x256xf32>
    %99 = arith.negf %98 : vector<8x256xf32>
    %100 = math.exp %99 : vector<8x256xf32>
    %cst_27 = arith.constant 1.000000e+00 : f32
    %101 = vector.broadcast %cst_27 : f32 to vector<8x256xf32>
    %102 = arith.addf %101, %100 : vector<8x256xf32>
    %103 = arith.divf %101, %102 : vector<8x256xf32>
    %104 = vector.extract_strided_slice %97 {offsets = [0, 256], sizes = [8, 256], strides = [1, 1]} : vector<8x1024xf32> to vector<8x256xf32>
    %105 = arith.negf %104 : vector<8x256xf32>
    %106 = math.exp %105 : vector<8x256xf32>
    %cst_28 = arith.constant 1.000000e+00 : f32
    %107 = vector.broadcast %cst_28 : f32 to vector<8x256xf32>
    %108 = arith.addf %107, %106 : vector<8x256xf32>
    %109 = arith.divf %107, %108 : vector<8x256xf32>
    %110 = vector.extract_strided_slice %97 {offsets = [0, 512], sizes = [8, 256], strides = [1, 1]} : vector<8x1024xf32> to vector<8x256xf32>
    %111 = math.tanh %110 : vector<8x256xf32>
    %112 = vector.extract_strided_slice %97 {offsets = [0, 768], sizes = [8, 256], strides = [1, 1]} : vector<8x1024xf32> to vector<8x256xf32>
    %113 = arith.negf %112 : vector<8x256xf32>
    %114 = math.exp %113 : vector<8x256xf32>
    %cst_29 = arith.constant 1.000000e+00 : f32
    %115 = vector.broadcast %cst_29 : f32 to vector<8x256xf32>
    %116 = arith.addf %115, %114 : vector<8x256xf32>
    %117 = arith.divf %115, %116 : vector<8x256xf32>
    %118 = arith.mulf %109, %90 : vector<8x256xf32>
    %119 = arith.mulf %103, %111 : vector<8x256xf32>
    %120 = arith.addf %118, %119 : vector<8x256xf32>
    %121 = math.tanh %120 : vector<8x256xf32>
    %122 = arith.mulf %117, %121 : vector<8x256xf32>
    %123 = vector.broadcast %c2_i32 : i32 to vector<8x1xi32>
    %124 = arith.cmpi sgt, %8, %123 : vector<8x1xi32>
    %125 = vector.shape_cast %124 : vector<8x1xi1> to vector<8x1xi1>
    %126 = vector.broadcast %125 : vector<8x1xi1> to vector<8x256xi1>
    %127 = arith.select %126, %122, %87 : vector<8x256xi1>, vector<8x256xf32>
    %128 = vector.shape_cast %124 : vector<8x1xi1> to vector<8x1xi1>
    %129 = vector.broadcast %128 : vector<8x1xi1> to vector<8x256xi1>
    %130 = arith.select %129, %120, %90 : vector<8x256xi1>, vector<8x256xf32>
    %c3_i32 = arith.constant 3 : i32
    %c8_i32_30 = arith.constant 8 : i32
    %131 = arith.muli %c3_i32, %c8_i32_30 : i32
    %132 = tpu.assume_multiple %131, 8 : i32
    %133 = arith.index_cast %132 : i32 to index
    %c0_31 = arith.constant 0 : index
    %134 = vector.load %arg8[%133, %c0_31] : memref<128x1024xf32, #tpu.memory_space<vmem>>, vector<8x1024xf32>
    %135 = arith.truncf %127 : vector<8x256xf32> to vector<8x256xbf16>
    %cst_32 = arith.constant dense<0.000000e+00> : vector<8x1024xf32>
    %136 = tpu.matmul %135, %7, %cst_32 {dimension_numbers = #tpu.dot_dimension_numbers<[1], [0], [0], [1], [0, 0, 1, 1], [], []>} : vector<8x256xbf16>, vector<256x1024xbf16>, vector<8x1024xf32> -> vector<8x1024xf32>
    %137 = arith.addf %134, %136 : vector<8x1024xf32>
    %138 = vector.extract_strided_slice %137 {offsets = [0, 0], sizes = [8, 256], strides = [1, 1]} : vector<8x1024xf32> to vector<8x256xf32>
    %139 = arith.negf %138 : vector<8x256xf32>
    %140 = math.exp %139 : vector<8x256xf32>
    %cst_33 = arith.constant 1.000000e+00 : f32
    %141 = vector.broadcast %cst_33 : f32 to vector<8x256xf32>
    %142 = arith.addf %141, %140 : vector<8x256xf32>
    %143 = arith.divf %141, %142 : vector<8x256xf32>
    %144 = vector.extract_strided_slice %137 {offsets = [0, 256], sizes = [8, 256], strides = [1, 1]} : vector<8x1024xf32> to vector<8x256xf32>
    %145 = arith.negf %144 : vector<8x256xf32>
    %146 = math.exp %145 : vector<8x256xf32>
    %cst_34 = arith.constant 1.000000e+00 : f32
    %147 = vector.broadcast %cst_34 : f32 to vector<8x256xf32>
    %148 = arith.addf %147, %146 : vector<8x256xf32>
    %149 = arith.divf %147, %148 : vector<8x256xf32>
    %150 = vector.extract_strided_slice %137 {offsets = [0, 512], sizes = [8, 256], strides = [1, 1]} : vector<8x1024xf32> to vector<8x256xf32>
    %151 = math.tanh %150 : vector<8x256xf32>
    %152 = vector.extract_strided_slice %137 {offsets = [0, 768], sizes = [8, 256], strides = [1, 1]} : vector<8x1024xf32> to vector<8x256xf32>
    %153 = arith.negf %152 : vector<8x256xf32>
    %154 = math.exp %153 : vector<8x256xf32>
    %cst_35 = arith.constant 1.000000e+00 : f32
    %155 = vector.broadcast %cst_35 : f32 to vector<8x256xf32>
    %156 = arith.addf %155, %154 : vector<8x256xf32>
    %157 = arith.divf %155, %156 : vector<8x256xf32>
    %158 = arith.mulf %149, %130 : vector<8x256xf32>
    %159 = arith.mulf %143, %151 : vector<8x256xf32>
    %160 = arith.addf %158, %159 : vector<8x256xf32>
    %161 = math.tanh %160 : vector<8x256xf32>
    %162 = arith.mulf %157, %161 : vector<8x256xf32>
    %163 = vector.broadcast %c3_i32 : i32 to vector<8x1xi32>
    %164 = arith.cmpi sgt, %8, %163 : vector<8x1xi32>
    %165 = vector.shape_cast %164 : vector<8x1xi1> to vector<8x1xi1>
    %166 = vector.broadcast %165 : vector<8x1xi1> to vector<8x256xi1>
    %167 = arith.select %166, %162, %127 : vector<8x256xi1>, vector<8x256xf32>
    %168 = vector.shape_cast %164 : vector<8x1xi1> to vector<8x1xi1>
    %169 = vector.broadcast %168 : vector<8x1xi1> to vector<8x256xi1>
    %170 = arith.select %169, %160, %130 : vector<8x256xi1>, vector<8x256xf32>
    %c4_i32 = arith.constant 4 : i32
    %c8_i32_36 = arith.constant 8 : i32
    %171 = arith.muli %c4_i32, %c8_i32_36 : i32
    %172 = tpu.assume_multiple %171, 8 : i32
    %173 = arith.index_cast %172 : i32 to index
    %c0_37 = arith.constant 0 : index
    %174 = vector.load %arg8[%173, %c0_37] : memref<128x1024xf32, #tpu.memory_space<vmem>>, vector<8x1024xf32>
    %175 = arith.truncf %167 : vector<8x256xf32> to vector<8x256xbf16>
    %cst_38 = arith.constant dense<0.000000e+00> : vector<8x1024xf32>
    %176 = tpu.matmul %175, %7, %cst_38 {dimension_numbers = #tpu.dot_dimension_numbers<[1], [0], [0], [1], [0, 0, 1, 1], [], []>} : vector<8x256xbf16>, vector<256x1024xbf16>, vector<8x1024xf32> -> vector<8x1024xf32>
    %177 = arith.addf %174, %176 : vector<8x1024xf32>
    %178 = vector.extract_strided_slice %177 {offsets = [0, 0], sizes = [8, 256], strides = [1, 1]} : vector<8x1024xf32> to vector<8x256xf32>
    %179 = arith.negf %178 : vector<8x256xf32>
    %180 = math.exp %179 : vector<8x256xf32>
    %cst_39 = arith.constant 1.000000e+00 : f32
    %181 = vector.broadcast %cst_39 : f32 to vector<8x256xf32>
    %182 = arith.addf %181, %180 : vector<8x256xf32>
    %183 = arith.divf %181, %182 : vector<8x256xf32>
    %184 = vector.extract_strided_slice %177 {offsets = [0, 256], sizes = [8, 256], strides = [1, 1]} : vector<8x1024xf32> to vector<8x256xf32>
    %185 = arith.negf %184 : vector<8x256xf32>
    %186 = math.exp %185 : vector<8x256xf32>
    %cst_40 = arith.constant 1.000000e+00 : f32
    %187 = vector.broadcast %cst_40 : f32 to vector<8x256xf32>
    %188 = arith.addf %187, %186 : vector<8x256xf32>
    %189 = arith.divf %187, %188 : vector<8x256xf32>
    %190 = vector.extract_strided_slice %177 {offsets = [0, 512], sizes = [8, 256], strides = [1, 1]} : vector<8x1024xf32> to vector<8x256xf32>
    %191 = math.tanh %190 : vector<8x256xf32>
    %192 = vector.extract_strided_slice %177 {offsets = [0, 768], sizes = [8, 256], strides = [1, 1]} : vector<8x1024xf32> to vector<8x256xf32>
    %193 = arith.negf %192 : vector<8x256xf32>
    %194 = math.exp %193 : vector<8x256xf32>
    %cst_41 = arith.constant 1.000000e+00 : f32
    %195 = vector.broadcast %cst_41 : f32 to vector<8x256xf32>
    %196 = arith.addf %195, %194 : vector<8x256xf32>
    %197 = arith.divf %195, %196 : vector<8x256xf32>
    %198 = arith.mulf %189, %170 : vector<8x256xf32>
    %199 = arith.mulf %183, %191 : vector<8x256xf32>
    %200 = arith.addf %198, %199 : vector<8x256xf32>
    %201 = math.tanh %200 : vector<8x256xf32>
    %202 = arith.mulf %197, %201 : vector<8x256xf32>
    %203 = vector.broadcast %c4_i32 : i32 to vector<8x1xi32>
    %204 = arith.cmpi sgt, %8, %203 : vector<8x1xi32>
    %205 = vector.shape_cast %204 : vector<8x1xi1> to vector<8x1xi1>
    %206 = vector.broadcast %205 : vector<8x1xi1> to vector<8x256xi1>
    %207 = arith.select %206, %202, %167 : vector<8x256xi1>, vector<8x256xf32>
    %208 = vector.shape_cast %204 : vector<8x1xi1> to vector<8x1xi1>
    %209 = vector.broadcast %208 : vector<8x1xi1> to vector<8x256xi1>
    %210 = arith.select %209, %200, %170 : vector<8x256xi1>, vector<8x256xf32>
    %c5_i32 = arith.constant 5 : i32
    %c8_i32_42 = arith.constant 8 : i32
    %211 = arith.muli %c5_i32, %c8_i32_42 : i32
    %212 = tpu.assume_multiple %211, 8 : i32
    %213 = arith.index_cast %212 : i32 to index
    %c0_43 = arith.constant 0 : index
    %214 = vector.load %arg8[%213, %c0_43] : memref<128x1024xf32, #tpu.memory_space<vmem>>, vector<8x1024xf32>
    %215 = arith.truncf %207 : vector<8x256xf32> to vector<8x256xbf16>
    %cst_44 = arith.constant dense<0.000000e+00> : vector<8x1024xf32>
    %216 = tpu.matmul %215, %7, %cst_44 {dimension_numbers = #tpu.dot_dimension_numbers<[1], [0], [0], [1], [0, 0, 1, 1], [], []>} : vector<8x256xbf16>, vector<256x1024xbf16>, vector<8x1024xf32> -> vector<8x1024xf32>
    %217 = arith.addf %214, %216 : vector<8x1024xf32>
    %218 = vector.extract_strided_slice %217 {offsets = [0, 0], sizes = [8, 256], strides = [1, 1]} : vector<8x1024xf32> to vector<8x256xf32>
    %219 = arith.negf %218 : vector<8x256xf32>
    %220 = math.exp %219 : vector<8x256xf32>
    %cst_45 = arith.constant 1.000000e+00 : f32
    %221 = vector.broadcast %cst_45 : f32 to vector<8x256xf32>
    %222 = arith.addf %221, %220 : vector<8x256xf32>
    %223 = arith.divf %221, %222 : vector<8x256xf32>
    %224 = vector.extract_strided_slice %217 {offsets = [0, 256], sizes = [8, 256], strides = [1, 1]} : vector<8x1024xf32> to vector<8x256xf32>
    %225 = arith.negf %224 : vector<8x256xf32>
    %226 = math.exp %225 : vector<8x256xf32>
    %cst_46 = arith.constant 1.000000e+00 : f32
    %227 = vector.broadcast %cst_46 : f32 to vector<8x256xf32>
    %228 = arith.addf %227, %226 : vector<8x256xf32>
    %229 = arith.divf %227, %228 : vector<8x256xf32>
    %230 = vector.extract_strided_slice %217 {offsets = [0, 512], sizes = [8, 256], strides = [1, 1]} : vector<8x1024xf32> to vector<8x256xf32>
    %231 = math.tanh %230 : vector<8x256xf32>
    %232 = vector.extract_strided_slice %217 {offsets = [0, 768], sizes = [8, 256], strides = [1, 1]} : vector<8x1024xf32> to vector<8x256xf32>
    %233 = arith.negf %232 : vector<8x256xf32>
    %234 = math.exp %233 : vector<8x256xf32>
    %cst_47 = arith.constant 1.000000e+00 : f32
    %235 = vector.broadcast %cst_47 : f32 to vector<8x256xf32>
    %236 = arith.addf %235, %234 : vector<8x256xf32>
    %237 = arith.divf %235, %236 : vector<8x256xf32>
    %238 = arith.mulf %229, %210 : vector<8x256xf32>
    %239 = arith.mulf %223, %231 : vector<8x256xf32>
    %240 = arith.addf %238, %239 : vector<8x256xf32>
    %241 = math.tanh %240 : vector<8x256xf32>
    %242 = arith.mulf %237, %241 : vector<8x256xf32>
    %243 = vector.broadcast %c5_i32 : i32 to vector<8x1xi32>
    %244 = arith.cmpi sgt, %8, %243 : vector<8x1xi32>
    %245 = vector.shape_cast %244 : vector<8x1xi1> to vector<8x1xi1>
    %246 = vector.broadcast %245 : vector<8x1xi1> to vector<8x256xi1>
    %247 = arith.select %246, %242, %207 : vector<8x256xi1>, vector<8x256xf32>
    %248 = vector.shape_cast %244 : vector<8x1xi1> to vector<8x1xi1>
    %249 = vector.broadcast %248 : vector<8x1xi1> to vector<8x256xi1>
    %250 = arith.select %249, %240, %210 : vector<8x256xi1>, vector<8x256xf32>
    %c6_i32 = arith.constant 6 : i32
    %c8_i32_48 = arith.constant 8 : i32
    %251 = arith.muli %c6_i32, %c8_i32_48 : i32
    %252 = tpu.assume_multiple %251, 8 : i32
    %253 = arith.index_cast %252 : i32 to index
    %c0_49 = arith.constant 0 : index
    %254 = vector.load %arg8[%253, %c0_49] : memref<128x1024xf32, #tpu.memory_space<vmem>>, vector<8x1024xf32>
    %255 = arith.truncf %247 : vector<8x256xf32> to vector<8x256xbf16>
    %cst_50 = arith.constant dense<0.000000e+00> : vector<8x1024xf32>
    %256 = tpu.matmul %255, %7, %cst_50 {dimension_numbers = #tpu.dot_dimension_numbers<[1], [0], [0], [1], [0, 0, 1, 1], [], []>} : vector<8x256xbf16>, vector<256x1024xbf16>, vector<8x1024xf32> -> vector<8x1024xf32>
    %257 = arith.addf %254, %256 : vector<8x1024xf32>
    %258 = vector.extract_strided_slice %257 {offsets = [0, 0], sizes = [8, 256], strides = [1, 1]} : vector<8x1024xf32> to vector<8x256xf32>
    %259 = arith.negf %258 : vector<8x256xf32>
    %260 = math.exp %259 : vector<8x256xf32>
    %cst_51 = arith.constant 1.000000e+00 : f32
    %261 = vector.broadcast %cst_51 : f32 to vector<8x256xf32>
    %262 = arith.addf %261, %260 : vector<8x256xf32>
    %263 = arith.divf %261, %262 : vector<8x256xf32>
    %264 = vector.extract_strided_slice %257 {offsets = [0, 256], sizes = [8, 256], strides = [1, 1]} : vector<8x1024xf32> to vector<8x256xf32>
    %265 = arith.negf %264 : vector<8x256xf32>
    %266 = math.exp %265 : vector<8x256xf32>
    %cst_52 = arith.constant 1.000000e+00 : f32
    %267 = vector.broadcast %cst_52 : f32 to vector<8x256xf32>
    %268 = arith.addf %267, %266 : vector<8x256xf32>
    %269 = arith.divf %267, %268 : vector<8x256xf32>
    %270 = vector.extract_strided_slice %257 {offsets = [0, 512], sizes = [8, 256], strides = [1, 1]} : vector<8x1024xf32> to vector<8x256xf32>
    %271 = math.tanh %270 : vector<8x256xf32>
    %272 = vector.extract_strided_slice %257 {offsets = [0, 768], sizes = [8, 256], strides = [1, 1]} : vector<8x1024xf32> to vector<8x256xf32>
    %273 = arith.negf %272 : vector<8x256xf32>
    %274 = math.exp %273 : vector<8x256xf32>
    %cst_53 = arith.constant 1.000000e+00 : f32
    %275 = vector.broadcast %cst_53 : f32 to vector<8x256xf32>
    %276 = arith.addf %275, %274 : vector<8x256xf32>
    %277 = arith.divf %275, %276 : vector<8x256xf32>
    %278 = arith.mulf %269, %250 : vector<8x256xf32>
    %279 = arith.mulf %263, %271 : vector<8x256xf32>
    %280 = arith.addf %278, %279 : vector<8x256xf32>
    %281 = math.tanh %280 : vector<8x256xf32>
    %282 = arith.mulf %277, %281 : vector<8x256xf32>
    %283 = vector.broadcast %c6_i32 : i32 to vector<8x1xi32>
    %284 = arith.cmpi sgt, %8, %283 : vector<8x1xi32>
    %285 = vector.shape_cast %284 : vector<8x1xi1> to vector<8x1xi1>
    %286 = vector.broadcast %285 : vector<8x1xi1> to vector<8x256xi1>
    %287 = arith.select %286, %282, %247 : vector<8x256xi1>, vector<8x256xf32>
    %288 = vector.shape_cast %284 : vector<8x1xi1> to vector<8x1xi1>
    %289 = vector.broadcast %288 : vector<8x1xi1> to vector<8x256xi1>
    %290 = arith.select %289, %280, %250 : vector<8x256xi1>, vector<8x256xf32>
    %c7_i32 = arith.constant 7 : i32
    %c8_i32_54 = arith.constant 8 : i32
    %291 = arith.muli %c7_i32, %c8_i32_54 : i32
    %292 = tpu.assume_multiple %291, 8 : i32
    %293 = arith.index_cast %292 : i32 to index
    %c0_55 = arith.constant 0 : index
    %294 = vector.load %arg8[%293, %c0_55] : memref<128x1024xf32, #tpu.memory_space<vmem>>, vector<8x1024xf32>
    %295 = arith.truncf %287 : vector<8x256xf32> to vector<8x256xbf16>
    %cst_56 = arith.constant dense<0.000000e+00> : vector<8x1024xf32>
    %296 = tpu.matmul %295, %7, %cst_56 {dimension_numbers = #tpu.dot_dimension_numbers<[1], [0], [0], [1], [0, 0, 1, 1], [], []>} : vector<8x256xbf16>, vector<256x1024xbf16>, vector<8x1024xf32> -> vector<8x1024xf32>
    %297 = arith.addf %294, %296 : vector<8x1024xf32>
    %298 = vector.extract_strided_slice %297 {offsets = [0, 0], sizes = [8, 256], strides = [1, 1]} : vector<8x1024xf32> to vector<8x256xf32>
    %299 = arith.negf %298 : vector<8x256xf32>
    %300 = math.exp %299 : vector<8x256xf32>
    %cst_57 = arith.constant 1.000000e+00 : f32
    %301 = vector.broadcast %cst_57 : f32 to vector<8x256xf32>
    %302 = arith.addf %301, %300 : vector<8x256xf32>
    %303 = arith.divf %301, %302 : vector<8x256xf32>
    %304 = vector.extract_strided_slice %297 {offsets = [0, 256], sizes = [8, 256], strides = [1, 1]} : vector<8x1024xf32> to vector<8x256xf32>
    %305 = arith.negf %304 : vector<8x256xf32>
    %306 = math.exp %305 : vector<8x256xf32>
    %cst_58 = arith.constant 1.000000e+00 : f32
    %307 = vector.broadcast %cst_58 : f32 to vector<8x256xf32>
    %308 = arith.addf %307, %306 : vector<8x256xf32>
    %309 = arith.divf %307, %308 : vector<8x256xf32>
    %310 = vector.extract_strided_slice %297 {offsets = [0, 512], sizes = [8, 256], strides = [1, 1]} : vector<8x1024xf32> to vector<8x256xf32>
    %311 = math.tanh %310 : vector<8x256xf32>
    %312 = vector.extract_strided_slice %297 {offsets = [0, 768], sizes = [8, 256], strides = [1, 1]} : vector<8x1024xf32> to vector<8x256xf32>
    %313 = arith.negf %312 : vector<8x256xf32>
    %314 = math.exp %313 : vector<8x256xf32>
    %cst_59 = arith.constant 1.000000e+00 : f32
    %315 = vector.broadcast %cst_59 : f32 to vector<8x256xf32>
    %316 = arith.addf %315, %314 : vector<8x256xf32>
    %317 = arith.divf %315, %316 : vector<8x256xf32>
    %318 = arith.mulf %309, %290 : vector<8x256xf32>
    %319 = arith.mulf %303, %311 : vector<8x256xf32>
    %320 = arith.addf %318, %319 : vector<8x256xf32>
    %321 = math.tanh %320 : vector<8x256xf32>
    %322 = arith.mulf %317, %321 : vector<8x256xf32>
    %323 = vector.broadcast %c7_i32 : i32 to vector<8x1xi32>
    %324 = arith.cmpi sgt, %8, %323 : vector<8x1xi32>
    %325 = vector.shape_cast %324 : vector<8x1xi1> to vector<8x1xi1>
    %326 = vector.broadcast %325 : vector<8x1xi1> to vector<8x256xi1>
    %327 = arith.select %326, %322, %287 : vector<8x256xi1>, vector<8x256xf32>
    %328 = vector.shape_cast %324 : vector<8x1xi1> to vector<8x1xi1>
    %329 = vector.broadcast %328 : vector<8x1xi1> to vector<8x256xi1>
    %330 = arith.select %329, %320, %290 : vector<8x256xi1>, vector<8x256xf32>
    %c8_i32_60 = arith.constant 8 : i32
    %c8_i32_61 = arith.constant 8 : i32
    %331 = arith.muli %c8_i32_60, %c8_i32_61 : i32
    %332 = tpu.assume_multiple %331, 8 : i32
    %333 = arith.index_cast %332 : i32 to index
    %c0_62 = arith.constant 0 : index
    %334 = vector.load %arg8[%333, %c0_62] : memref<128x1024xf32, #tpu.memory_space<vmem>>, vector<8x1024xf32>
    %335 = arith.truncf %327 : vector<8x256xf32> to vector<8x256xbf16>
    %cst_63 = arith.constant dense<0.000000e+00> : vector<8x1024xf32>
    %336 = tpu.matmul %335, %7, %cst_63 {dimension_numbers = #tpu.dot_dimension_numbers<[1], [0], [0], [1], [0, 0, 1, 1], [], []>} : vector<8x256xbf16>, vector<256x1024xbf16>, vector<8x1024xf32> -> vector<8x1024xf32>
    %337 = arith.addf %334, %336 : vector<8x1024xf32>
    %338 = vector.extract_strided_slice %337 {offsets = [0, 0], sizes = [8, 256], strides = [1, 1]} : vector<8x1024xf32> to vector<8x256xf32>
    %339 = arith.negf %338 : vector<8x256xf32>
    %340 = math.exp %339 : vector<8x256xf32>
    %cst_64 = arith.constant 1.000000e+00 : f32
    %341 = vector.broadcast %cst_64 : f32 to vector<8x256xf32>
    %342 = arith.addf %341, %340 : vector<8x256xf32>
    %343 = arith.divf %341, %342 : vector<8x256xf32>
    %344 = vector.extract_strided_slice %337 {offsets = [0, 256], sizes = [8, 256], strides = [1, 1]} : vector<8x1024xf32> to vector<8x256xf32>
    %345 = arith.negf %344 : vector<8x256xf32>
    %346 = math.exp %345 : vector<8x256xf32>
    %cst_65 = arith.constant 1.000000e+00 : f32
    %347 = vector.broadcast %cst_65 : f32 to vector<8x256xf32>
    %348 = arith.addf %347, %346 : vector<8x256xf32>
    %349 = arith.divf %347, %348 : vector<8x256xf32>
    %350 = vector.extract_strided_slice %337 {offsets = [0, 512], sizes = [8, 256], strides = [1, 1]} : vector<8x1024xf32> to vector<8x256xf32>
    %351 = math.tanh %350 : vector<8x256xf32>
    %352 = vector.extract_strided_slice %337 {offsets = [0, 768], sizes = [8, 256], strides = [1, 1]} : vector<8x1024xf32> to vector<8x256xf32>
    %353 = arith.negf %352 : vector<8x256xf32>
    %354 = math.exp %353 : vector<8x256xf32>
    %cst_66 = arith.constant 1.000000e+00 : f32
    %355 = vector.broadcast %cst_66 : f32 to vector<8x256xf32>
    %356 = arith.addf %355, %354 : vector<8x256xf32>
    %357 = arith.divf %355, %356 : vector<8x256xf32>
    %358 = arith.mulf %349, %330 : vector<8x256xf32>
    %359 = arith.mulf %343, %351 : vector<8x256xf32>
    %360 = arith.addf %358, %359 : vector<8x256xf32>
    %361 = math.tanh %360 : vector<8x256xf32>
    %362 = arith.mulf %357, %361 : vector<8x256xf32>
    %363 = vector.broadcast %c8_i32_60 : i32 to vector<8x1xi32>
    %364 = arith.cmpi sgt, %8, %363 : vector<8x1xi32>
    %365 = vector.shape_cast %364 : vector<8x1xi1> to vector<8x1xi1>
    %366 = vector.broadcast %365 : vector<8x1xi1> to vector<8x256xi1>
    %367 = arith.select %366, %362, %327 : vector<8x256xi1>, vector<8x256xf32>
    %368 = vector.shape_cast %364 : vector<8x1xi1> to vector<8x1xi1>
    %369 = vector.broadcast %368 : vector<8x1xi1> to vector<8x256xi1>
    %370 = arith.select %369, %360, %330 : vector<8x256xi1>, vector<8x256xf32>
    %c9_i32 = arith.constant 9 : i32
    %c8_i32_67 = arith.constant 8 : i32
    %371 = arith.muli %c9_i32, %c8_i32_67 : i32
    %372 = tpu.assume_multiple %371, 8 : i32
    %373 = arith.index_cast %372 : i32 to index
    %c0_68 = arith.constant 0 : index
    %374 = vector.load %arg8[%373, %c0_68] : memref<128x1024xf32, #tpu.memory_space<vmem>>, vector<8x1024xf32>
    %375 = arith.truncf %367 : vector<8x256xf32> to vector<8x256xbf16>
    %cst_69 = arith.constant dense<0.000000e+00> : vector<8x1024xf32>
    %376 = tpu.matmul %375, %7, %cst_69 {dimension_numbers = #tpu.dot_dimension_numbers<[1], [0], [0], [1], [0, 0, 1, 1], [], []>} : vector<8x256xbf16>, vector<256x1024xbf16>, vector<8x1024xf32> -> vector<8x1024xf32>
    %377 = arith.addf %374, %376 : vector<8x1024xf32>
    %378 = vector.extract_strided_slice %377 {offsets = [0, 0], sizes = [8, 256], strides = [1, 1]} : vector<8x1024xf32> to vector<8x256xf32>
    %379 = arith.negf %378 : vector<8x256xf32>
    %380 = math.exp %379 : vector<8x256xf32>
    %cst_70 = arith.constant 1.000000e+00 : f32
    %381 = vector.broadcast %cst_70 : f32 to vector<8x256xf32>
    %382 = arith.addf %381, %380 : vector<8x256xf32>
    %383 = arith.divf %381, %382 : vector<8x256xf32>
    %384 = vector.extract_strided_slice %377 {offsets = [0, 256], sizes = [8, 256], strides = [1, 1]} : vector<8x1024xf32> to vector<8x256xf32>
    %385 = arith.negf %384 : vector<8x256xf32>
    %386 = math.exp %385 : vector<8x256xf32>
    %cst_71 = arith.constant 1.000000e+00 : f32
    %387 = vector.broadcast %cst_71 : f32 to vector<8x256xf32>
    %388 = arith.addf %387, %386 : vector<8x256xf32>
    %389 = arith.divf %387, %388 : vector<8x256xf32>
    %390 = vector.extract_strided_slice %377 {offsets = [0, 512], sizes = [8, 256], strides = [1, 1]} : vector<8x1024xf32> to vector<8x256xf32>
    %391 = math.tanh %390 : vector<8x256xf32>
    %392 = vector.extract_strided_slice %377 {offsets = [0, 768], sizes = [8, 256], strides = [1, 1]} : vector<8x1024xf32> to vector<8x256xf32>
    %393 = arith.negf %392 : vector<8x256xf32>
    %394 = math.exp %393 : vector<8x256xf32>
    %cst_72 = arith.constant 1.000000e+00 : f32
    %395 = vector.broadcast %cst_72 : f32 to vector<8x256xf32>
    %396 = arith.addf %395, %394 : vector<8x256xf32>
    %397 = arith.divf %395, %396 : vector<8x256xf32>
    %398 = arith.mulf %389, %370 : vector<8x256xf32>
    %399 = arith.mulf %383, %391 : vector<8x256xf32>
    %400 = arith.addf %398, %399 : vector<8x256xf32>
    %401 = math.tanh %400 : vector<8x256xf32>
    %402 = arith.mulf %397, %401 : vector<8x256xf32>
    %403 = vector.broadcast %c9_i32 : i32 to vector<8x1xi32>
    %404 = arith.cmpi sgt, %8, %403 : vector<8x1xi32>
    %405 = vector.shape_cast %404 : vector<8x1xi1> to vector<8x1xi1>
    %406 = vector.broadcast %405 : vector<8x1xi1> to vector<8x256xi1>
    %407 = arith.select %406, %402, %367 : vector<8x256xi1>, vector<8x256xf32>
    %408 = vector.shape_cast %404 : vector<8x1xi1> to vector<8x1xi1>
    %409 = vector.broadcast %408 : vector<8x1xi1> to vector<8x256xi1>
    %410 = arith.select %409, %400, %370 : vector<8x256xi1>, vector<8x256xf32>
    %c10_i32 = arith.constant 10 : i32
    %c8_i32_73 = arith.constant 8 : i32
    %411 = arith.muli %c10_i32, %c8_i32_73 : i32
    %412 = tpu.assume_multiple %411, 8 : i32
    %413 = arith.index_cast %412 : i32 to index
    %c0_74 = arith.constant 0 : index
    %414 = vector.load %arg8[%413, %c0_74] : memref<128x1024xf32, #tpu.memory_space<vmem>>, vector<8x1024xf32>
    %415 = arith.truncf %407 : vector<8x256xf32> to vector<8x256xbf16>
    %cst_75 = arith.constant dense<0.000000e+00> : vector<8x1024xf32>
    %416 = tpu.matmul %415, %7, %cst_75 {dimension_numbers = #tpu.dot_dimension_numbers<[1], [0], [0], [1], [0, 0, 1, 1], [], []>} : vector<8x256xbf16>, vector<256x1024xbf16>, vector<8x1024xf32> -> vector<8x1024xf32>
    %417 = arith.addf %414, %416 : vector<8x1024xf32>
    %418 = vector.extract_strided_slice %417 {offsets = [0, 0], sizes = [8, 256], strides = [1, 1]} : vector<8x1024xf32> to vector<8x256xf32>
    %419 = arith.negf %418 : vector<8x256xf32>
    %420 = math.exp %419 : vector<8x256xf32>
    %cst_76 = arith.constant 1.000000e+00 : f32
    %421 = vector.broadcast %cst_76 : f32 to vector<8x256xf32>
    %422 = arith.addf %421, %420 : vector<8x256xf32>
    %423 = arith.divf %421, %422 : vector<8x256xf32>
    %424 = vector.extract_strided_slice %417 {offsets = [0, 256], sizes = [8, 256], strides = [1, 1]} : vector<8x1024xf32> to vector<8x256xf32>
    %425 = arith.negf %424 : vector<8x256xf32>
    %426 = math.exp %425 : vector<8x256xf32>
    %cst_77 = arith.constant 1.000000e+00 : f32
    %427 = vector.broadcast %cst_77 : f32 to vector<8x256xf32>
    %428 = arith.addf %427, %426 : vector<8x256xf32>
    %429 = arith.divf %427, %428 : vector<8x256xf32>
    %430 = vector.extract_strided_slice %417 {offsets = [0, 512], sizes = [8, 256], strides = [1, 1]} : vector<8x1024xf32> to vector<8x256xf32>
    %431 = math.tanh %430 : vector<8x256xf32>
    %432 = vector.extract_strided_slice %417 {offsets = [0, 768], sizes = [8, 256], strides = [1, 1]} : vector<8x1024xf32> to vector<8x256xf32>
    %433 = arith.negf %432 : vector<8x256xf32>
    %434 = math.exp %433 : vector<8x256xf32>
    %cst_78 = arith.constant 1.000000e+00 : f32
    %435 = vector.broadcast %cst_78 : f32 to vector<8x256xf32>
    %436 = arith.addf %435, %434 : vector<8x256xf32>
    %437 = arith.divf %435, %436 : vector<8x256xf32>
    %438 = arith.mulf %429, %410 : vector<8x256xf32>
    %439 = arith.mulf %423, %431 : vector<8x256xf32>
    %440 = arith.addf %438, %439 : vector<8x256xf32>
    %441 = math.tanh %440 : vector<8x256xf32>
    %442 = arith.mulf %437, %441 : vector<8x256xf32>
    %443 = vector.broadcast %c10_i32 : i32 to vector<8x1xi32>
    %444 = arith.cmpi sgt, %8, %443 : vector<8x1xi32>
    %445 = vector.shape_cast %444 : vector<8x1xi1> to vector<8x1xi1>
    %446 = vector.broadcast %445 : vector<8x1xi1> to vector<8x256xi1>
    %447 = arith.select %446, %442, %407 : vector<8x256xi1>, vector<8x256xf32>
    %448 = vector.shape_cast %444 : vector<8x1xi1> to vector<8x1xi1>
    %449 = vector.broadcast %448 : vector<8x1xi1> to vector<8x256xi1>
    %450 = arith.select %449, %440, %410 : vector<8x256xi1>, vector<8x256xf32>
    %c11_i32 = arith.constant 11 : i32
    %c8_i32_79 = arith.constant 8 : i32
    %451 = arith.muli %c11_i32, %c8_i32_79 : i32
    %452 = tpu.assume_multiple %451, 8 : i32
    %453 = arith.index_cast %452 : i32 to index
    %c0_80 = arith.constant 0 : index
    %454 = vector.load %arg8[%453, %c0_80] : memref<128x1024xf32, #tpu.memory_space<vmem>>, vector<8x1024xf32>
    %455 = arith.truncf %447 : vector<8x256xf32> to vector<8x256xbf16>
    %cst_81 = arith.constant dense<0.000000e+00> : vector<8x1024xf32>
    %456 = tpu.matmul %455, %7, %cst_81 {dimension_numbers = #tpu.dot_dimension_numbers<[1], [0], [0], [1], [0, 0, 1, 1], [], []>} : vector<8x256xbf16>, vector<256x1024xbf16>, vector<8x1024xf32> -> vector<8x1024xf32>
    %457 = arith.addf %454, %456 : vector<8x1024xf32>
    %458 = vector.extract_strided_slice %457 {offsets = [0, 0], sizes = [8, 256], strides = [1, 1]} : vector<8x1024xf32> to vector<8x256xf32>
    %459 = arith.negf %458 : vector<8x256xf32>
    %460 = math.exp %459 : vector<8x256xf32>
    %cst_82 = arith.constant 1.000000e+00 : f32
    %461 = vector.broadcast %cst_82 : f32 to vector<8x256xf32>
    %462 = arith.addf %461, %460 : vector<8x256xf32>
    %463 = arith.divf %461, %462 : vector<8x256xf32>
    %464 = vector.extract_strided_slice %457 {offsets = [0, 256], sizes = [8, 256], strides = [1, 1]} : vector<8x1024xf32> to vector<8x256xf32>
    %465 = arith.negf %464 : vector<8x256xf32>
    %466 = math.exp %465 : vector<8x256xf32>
    %cst_83 = arith.constant 1.000000e+00 : f32
    %467 = vector.broadcast %cst_83 : f32 to vector<8x256xf32>
    %468 = arith.addf %467, %466 : vector<8x256xf32>
    %469 = arith.divf %467, %468 : vector<8x256xf32>
    %470 = vector.extract_strided_slice %457 {offsets = [0, 512], sizes = [8, 256], strides = [1, 1]} : vector<8x1024xf32> to vector<8x256xf32>
    %471 = math.tanh %470 : vector<8x256xf32>
    %472 = vector.extract_strided_slice %457 {offsets = [0, 768], sizes = [8, 256], strides = [1, 1]} : vector<8x1024xf32> to vector<8x256xf32>
    %473 = arith.negf %472 : vector<8x256xf32>
    %474 = math.exp %473 : vector<8x256xf32>
    %cst_84 = arith.constant 1.000000e+00 : f32
    %475 = vector.broadcast %cst_84 : f32 to vector<8x256xf32>
    %476 = arith.addf %475, %474 : vector<8x256xf32>
    %477 = arith.divf %475, %476 : vector<8x256xf32>
    %478 = arith.mulf %469, %450 : vector<8x256xf32>
    %479 = arith.mulf %463, %471 : vector<8x256xf32>
    %480 = arith.addf %478, %479 : vector<8x256xf32>
    %481 = math.tanh %480 : vector<8x256xf32>
    %482 = arith.mulf %477, %481 : vector<8x256xf32>
    %483 = vector.broadcast %c11_i32 : i32 to vector<8x1xi32>
    %484 = arith.cmpi sgt, %8, %483 : vector<8x1xi32>
    %485 = vector.shape_cast %484 : vector<8x1xi1> to vector<8x1xi1>
    %486 = vector.broadcast %485 : vector<8x1xi1> to vector<8x256xi1>
    %487 = arith.select %486, %482, %447 : vector<8x256xi1>, vector<8x256xf32>
    %488 = vector.shape_cast %484 : vector<8x1xi1> to vector<8x1xi1>
    %489 = vector.broadcast %488 : vector<8x1xi1> to vector<8x256xi1>
    %490 = arith.select %489, %480, %450 : vector<8x256xi1>, vector<8x256xf32>
    %c12_i32 = arith.constant 12 : i32
    %c8_i32_85 = arith.constant 8 : i32
    %491 = arith.muli %c12_i32, %c8_i32_85 : i32
    %492 = tpu.assume_multiple %491, 8 : i32
    %493 = arith.index_cast %492 : i32 to index
    %c0_86 = arith.constant 0 : index
    %494 = vector.load %arg8[%493, %c0_86] : memref<128x1024xf32, #tpu.memory_space<vmem>>, vector<8x1024xf32>
    %495 = arith.truncf %487 : vector<8x256xf32> to vector<8x256xbf16>
    %cst_87 = arith.constant dense<0.000000e+00> : vector<8x1024xf32>
    %496 = tpu.matmul %495, %7, %cst_87 {dimension_numbers = #tpu.dot_dimension_numbers<[1], [0], [0], [1], [0, 0, 1, 1], [], []>} : vector<8x256xbf16>, vector<256x1024xbf16>, vector<8x1024xf32> -> vector<8x1024xf32>
    %497 = arith.addf %494, %496 : vector<8x1024xf32>
    %498 = vector.extract_strided_slice %497 {offsets = [0, 0], sizes = [8, 256], strides = [1, 1]} : vector<8x1024xf32> to vector<8x256xf32>
    %499 = arith.negf %498 : vector<8x256xf32>
    %500 = math.exp %499 : vector<8x256xf32>
    %cst_88 = arith.constant 1.000000e+00 : f32
    %501 = vector.broadcast %cst_88 : f32 to vector<8x256xf32>
    %502 = arith.addf %501, %500 : vector<8x256xf32>
    %503 = arith.divf %501, %502 : vector<8x256xf32>
    %504 = vector.extract_strided_slice %497 {offsets = [0, 256], sizes = [8, 256], strides = [1, 1]} : vector<8x1024xf32> to vector<8x256xf32>
    %505 = arith.negf %504 : vector<8x256xf32>
    %506 = math.exp %505 : vector<8x256xf32>
    %cst_89 = arith.constant 1.000000e+00 : f32
    %507 = vector.broadcast %cst_89 : f32 to vector<8x256xf32>
    %508 = arith.addf %507, %506 : vector<8x256xf32>
    %509 = arith.divf %507, %508 : vector<8x256xf32>
    %510 = vector.extract_strided_slice %497 {offsets = [0, 512], sizes = [8, 256], strides = [1, 1]} : vector<8x1024xf32> to vector<8x256xf32>
    %511 = math.tanh %510 : vector<8x256xf32>
    %512 = vector.extract_strided_slice %497 {offsets = [0, 768], sizes = [8, 256], strides = [1, 1]} : vector<8x1024xf32> to vector<8x256xf32>
    %513 = arith.negf %512 : vector<8x256xf32>
    %514 = math.exp %513 : vector<8x256xf32>
    %cst_90 = arith.constant 1.000000e+00 : f32
    %515 = vector.broadcast %cst_90 : f32 to vector<8x256xf32>
    %516 = arith.addf %515, %514 : vector<8x256xf32>
    %517 = arith.divf %515, %516 : vector<8x256xf32>
    %518 = arith.mulf %509, %490 : vector<8x256xf32>
    %519 = arith.mulf %503, %511 : vector<8x256xf32>
    %520 = arith.addf %518, %519 : vector<8x256xf32>
    %521 = math.tanh %520 : vector<8x256xf32>
    %522 = arith.mulf %517, %521 : vector<8x256xf32>
    %523 = vector.broadcast %c12_i32 : i32 to vector<8x1xi32>
    %524 = arith.cmpi sgt, %8, %523 : vector<8x1xi32>
    %525 = vector.shape_cast %524 : vector<8x1xi1> to vector<8x1xi1>
    %526 = vector.broadcast %525 : vector<8x1xi1> to vector<8x256xi1>
    %527 = arith.select %526, %522, %487 : vector<8x256xi1>, vector<8x256xf32>
    %528 = vector.shape_cast %524 : vector<8x1xi1> to vector<8x1xi1>
    %529 = vector.broadcast %528 : vector<8x1xi1> to vector<8x256xi1>
    %530 = arith.select %529, %520, %490 : vector<8x256xi1>, vector<8x256xf32>
    %c13_i32 = arith.constant 13 : i32
    %c8_i32_91 = arith.constant 8 : i32
    %531 = arith.muli %c13_i32, %c8_i32_91 : i32
    %532 = tpu.assume_multiple %531, 8 : i32
    %533 = arith.index_cast %532 : i32 to index
    %c0_92 = arith.constant 0 : index
    %534 = vector.load %arg8[%533, %c0_92] : memref<128x1024xf32, #tpu.memory_space<vmem>>, vector<8x1024xf32>
    %535 = arith.truncf %527 : vector<8x256xf32> to vector<8x256xbf16>
    %cst_93 = arith.constant dense<0.000000e+00> : vector<8x1024xf32>
    %536 = tpu.matmul %535, %7, %cst_93 {dimension_numbers = #tpu.dot_dimension_numbers<[1], [0], [0], [1], [0, 0, 1, 1], [], []>} : vector<8x256xbf16>, vector<256x1024xbf16>, vector<8x1024xf32> -> vector<8x1024xf32>
    %537 = arith.addf %534, %536 : vector<8x1024xf32>
    %538 = vector.extract_strided_slice %537 {offsets = [0, 0], sizes = [8, 256], strides = [1, 1]} : vector<8x1024xf32> to vector<8x256xf32>
    %539 = arith.negf %538 : vector<8x256xf32>
    %540 = math.exp %539 : vector<8x256xf32>
    %cst_94 = arith.constant 1.000000e+00 : f32
    %541 = vector.broadcast %cst_94 : f32 to vector<8x256xf32>
    %542 = arith.addf %541, %540 : vector<8x256xf32>
    %543 = arith.divf %541, %542 : vector<8x256xf32>
    %544 = vector.extract_strided_slice %537 {offsets = [0, 256], sizes = [8, 256], strides = [1, 1]} : vector<8x1024xf32> to vector<8x256xf32>
    %545 = arith.negf %544 : vector<8x256xf32>
    %546 = math.exp %545 : vector<8x256xf32>
    %cst_95 = arith.constant 1.000000e+00 : f32
    %547 = vector.broadcast %cst_95 : f32 to vector<8x256xf32>
    %548 = arith.addf %547, %546 : vector<8x256xf32>
    %549 = arith.divf %547, %548 : vector<8x256xf32>
    %550 = vector.extract_strided_slice %537 {offsets = [0, 512], sizes = [8, 256], strides = [1, 1]} : vector<8x1024xf32> to vector<8x256xf32>
    %551 = math.tanh %550 : vector<8x256xf32>
    %552 = vector.extract_strided_slice %537 {offsets = [0, 768], sizes = [8, 256], strides = [1, 1]} : vector<8x1024xf32> to vector<8x256xf32>
    %553 = arith.negf %552 : vector<8x256xf32>
    %554 = math.exp %553 : vector<8x256xf32>
    %cst_96 = arith.constant 1.000000e+00 : f32
    %555 = vector.broadcast %cst_96 : f32 to vector<8x256xf32>
    %556 = arith.addf %555, %554 : vector<8x256xf32>
    %557 = arith.divf %555, %556 : vector<8x256xf32>
    %558 = arith.mulf %549, %530 : vector<8x256xf32>
    %559 = arith.mulf %543, %551 : vector<8x256xf32>
    %560 = arith.addf %558, %559 : vector<8x256xf32>
    %561 = math.tanh %560 : vector<8x256xf32>
    %562 = arith.mulf %557, %561 : vector<8x256xf32>
    %563 = vector.broadcast %c13_i32 : i32 to vector<8x1xi32>
    %564 = arith.cmpi sgt, %8, %563 : vector<8x1xi32>
    %565 = vector.shape_cast %564 : vector<8x1xi1> to vector<8x1xi1>
    %566 = vector.broadcast %565 : vector<8x1xi1> to vector<8x256xi1>
    %567 = arith.select %566, %562, %527 : vector<8x256xi1>, vector<8x256xf32>
    %568 = vector.shape_cast %564 : vector<8x1xi1> to vector<8x1xi1>
    %569 = vector.broadcast %568 : vector<8x1xi1> to vector<8x256xi1>
    %570 = arith.select %569, %560, %530 : vector<8x256xi1>, vector<8x256xf32>
    %c14_i32 = arith.constant 14 : i32
    %c8_i32_97 = arith.constant 8 : i32
    %571 = arith.muli %c14_i32, %c8_i32_97 : i32
    %572 = tpu.assume_multiple %571, 8 : i32
    %573 = arith.index_cast %572 : i32 to index
    %c0_98 = arith.constant 0 : index
    %574 = vector.load %arg8[%573, %c0_98] : memref<128x1024xf32, #tpu.memory_space<vmem>>, vector<8x1024xf32>
    %575 = arith.truncf %567 : vector<8x256xf32> to vector<8x256xbf16>
    %cst_99 = arith.constant dense<0.000000e+00> : vector<8x1024xf32>
    %576 = tpu.matmul %575, %7, %cst_99 {dimension_numbers = #tpu.dot_dimension_numbers<[1], [0], [0], [1], [0, 0, 1, 1], [], []>} : vector<8x256xbf16>, vector<256x1024xbf16>, vector<8x1024xf32> -> vector<8x1024xf32>
    %577 = arith.addf %574, %576 : vector<8x1024xf32>
    %578 = vector.extract_strided_slice %577 {offsets = [0, 0], sizes = [8, 256], strides = [1, 1]} : vector<8x1024xf32> to vector<8x256xf32>
    %579 = arith.negf %578 : vector<8x256xf32>
    %580 = math.exp %579 : vector<8x256xf32>
    %cst_100 = arith.constant 1.000000e+00 : f32
    %581 = vector.broadcast %cst_100 : f32 to vector<8x256xf32>
    %582 = arith.addf %581, %580 : vector<8x256xf32>
    %583 = arith.divf %581, %582 : vector<8x256xf32>
    %584 = vector.extract_strided_slice %577 {offsets = [0, 256], sizes = [8, 256], strides = [1, 1]} : vector<8x1024xf32> to vector<8x256xf32>
    %585 = arith.negf %584 : vector<8x256xf32>
    %586 = math.exp %585 : vector<8x256xf32>
    %cst_101 = arith.constant 1.000000e+00 : f32
    %587 = vector.broadcast %cst_101 : f32 to vector<8x256xf32>
    %588 = arith.addf %587, %586 : vector<8x256xf32>
    %589 = arith.divf %587, %588 : vector<8x256xf32>
    %590 = vector.extract_strided_slice %577 {offsets = [0, 512], sizes = [8, 256], strides = [1, 1]} : vector<8x1024xf32> to vector<8x256xf32>
    %591 = math.tanh %590 : vector<8x256xf32>
    %592 = vector.extract_strided_slice %577 {offsets = [0, 768], sizes = [8, 256], strides = [1, 1]} : vector<8x1024xf32> to vector<8x256xf32>
    %593 = arith.negf %592 : vector<8x256xf32>
    %594 = math.exp %593 : vector<8x256xf32>
    %cst_102 = arith.constant 1.000000e+00 : f32
    %595 = vector.broadcast %cst_102 : f32 to vector<8x256xf32>
    %596 = arith.addf %595, %594 : vector<8x256xf32>
    %597 = arith.divf %595, %596 : vector<8x256xf32>
    %598 = arith.mulf %589, %570 : vector<8x256xf32>
    %599 = arith.mulf %583, %591 : vector<8x256xf32>
    %600 = arith.addf %598, %599 : vector<8x256xf32>
    %601 = math.tanh %600 : vector<8x256xf32>
    %602 = arith.mulf %597, %601 : vector<8x256xf32>
    %603 = vector.broadcast %c14_i32 : i32 to vector<8x1xi32>
    %604 = arith.cmpi sgt, %8, %603 : vector<8x1xi32>
    %605 = vector.shape_cast %604 : vector<8x1xi1> to vector<8x1xi1>
    %606 = vector.broadcast %605 : vector<8x1xi1> to vector<8x256xi1>
    %607 = arith.select %606, %602, %567 : vector<8x256xi1>, vector<8x256xf32>
    %608 = vector.shape_cast %604 : vector<8x1xi1> to vector<8x1xi1>
    %609 = vector.broadcast %608 : vector<8x1xi1> to vector<8x256xi1>
    %610 = arith.select %609, %600, %570 : vector<8x256xi1>, vector<8x256xf32>
    %c15_i32 = arith.constant 15 : i32
    %c8_i32_103 = arith.constant 8 : i32
    %611 = arith.muli %c15_i32, %c8_i32_103 : i32
    %612 = tpu.assume_multiple %611, 8 : i32
    %613 = arith.index_cast %612 : i32 to index
    %c0_104 = arith.constant 0 : index
    %614 = vector.load %arg8[%613, %c0_104] : memref<128x1024xf32, #tpu.memory_space<vmem>>, vector<8x1024xf32>
    %615 = arith.truncf %607 : vector<8x256xf32> to vector<8x256xbf16>
    %cst_105 = arith.constant dense<0.000000e+00> : vector<8x1024xf32>
    %616 = tpu.matmul %615, %7, %cst_105 {dimension_numbers = #tpu.dot_dimension_numbers<[1], [0], [0], [1], [0, 0, 1, 1], [], []>} : vector<8x256xbf16>, vector<256x1024xbf16>, vector<8x1024xf32> -> vector<8x1024xf32>
    %617 = arith.addf %614, %616 : vector<8x1024xf32>
    %618 = vector.extract_strided_slice %617 {offsets = [0, 0], sizes = [8, 256], strides = [1, 1]} : vector<8x1024xf32> to vector<8x256xf32>
    %619 = arith.negf %618 : vector<8x256xf32>
    %620 = math.exp %619 : vector<8x256xf32>
    %cst_106 = arith.constant 1.000000e+00 : f32
    %621 = vector.broadcast %cst_106 : f32 to vector<8x256xf32>
    %622 = arith.addf %621, %620 : vector<8x256xf32>
    %623 = arith.divf %621, %622 : vector<8x256xf32>
    %624 = vector.extract_strided_slice %617 {offsets = [0, 256], sizes = [8, 256], strides = [1, 1]} : vector<8x1024xf32> to vector<8x256xf32>
    %625 = arith.negf %624 : vector<8x256xf32>
    %626 = math.exp %625 : vector<8x256xf32>
    %cst_107 = arith.constant 1.000000e+00 : f32
    %627 = vector.broadcast %cst_107 : f32 to vector<8x256xf32>
    %628 = arith.addf %627, %626 : vector<8x256xf32>
    %629 = arith.divf %627, %628 : vector<8x256xf32>
    %630 = vector.extract_strided_slice %617 {offsets = [0, 512], sizes = [8, 256], strides = [1, 1]} : vector<8x1024xf32> to vector<8x256xf32>
    %631 = math.tanh %630 : vector<8x256xf32>
    %632 = vector.extract_strided_slice %617 {offsets = [0, 768], sizes = [8, 256], strides = [1, 1]} : vector<8x1024xf32> to vector<8x256xf32>
    %633 = arith.negf %632 : vector<8x256xf32>
    %634 = math.exp %633 : vector<8x256xf32>
    %cst_108 = arith.constant 1.000000e+00 : f32
    %635 = vector.broadcast %cst_108 : f32 to vector<8x256xf32>
    %636 = arith.addf %635, %634 : vector<8x256xf32>
    %637 = arith.divf %635, %636 : vector<8x256xf32>
    %638 = arith.mulf %629, %610 : vector<8x256xf32>
    %639 = arith.mulf %623, %631 : vector<8x256xf32>
    %640 = arith.addf %638, %639 : vector<8x256xf32>
    %641 = math.tanh %640 : vector<8x256xf32>
    %642 = arith.mulf %637, %641 : vector<8x256xf32>
    %643 = vector.broadcast %c15_i32 : i32 to vector<8x1xi32>
    %644 = arith.cmpi sgt, %8, %643 : vector<8x1xi32>
    %645 = vector.shape_cast %644 : vector<8x1xi1> to vector<8x1xi1>
    %646 = vector.broadcast %645 : vector<8x1xi1> to vector<8x256xi1>
    %647 = arith.select %646, %642, %607 : vector<8x256xi1>, vector<8x256xf32>
    %648 = vector.shape_cast %644 : vector<8x1xi1> to vector<8x1xi1>
    %649 = vector.broadcast %648 : vector<8x1xi1> to vector<8x256xi1>
    %650 = arith.select %649, %640, %610 : vector<8x256xi1>, vector<8x256xf32>
    %c16_i32 = arith.constant 16 : i32
    %651 = arith.truncf %647 : vector<8x256xf32> to vector<8x256xbf16>
    %c0_109 = arith.constant 0 : index
    %c0_110 = arith.constant 0 : index
    %652 = vector.load %arg5[%c0_109, %c0_110] : memref<256x128xbf16, #tpu.memory_space<vmem>>, vector<256x128xbf16>
    %cst_111 = arith.constant dense<0.000000e+00> : vector<8x128xf32>
    %653 = tpu.matmul %651, %652, %cst_111 {dimension_numbers = #tpu.dot_dimension_numbers<[1], [0], [0], [1], [0, 0, 1, 1], [], []>} : vector<8x256xbf16>, vector<256x128xbf16>, vector<8x128xf32> -> vector<8x128xf32>
    %c0_112 = arith.constant 0 : index
    %c0_113 = arith.constant 0 : index
    %654 = vector.load %arg6[%c0_112, %c0_113] : memref<1x128xf32, #tpu.memory_space<vmem>>, vector<1x128xf32>
    %655 = vector.broadcast %654 : vector<1x128xf32> to vector<8x128xf32>
    %656 = arith.addf %653, %655 : vector<8x128xf32>
    %cst_114 = arith.constant dense<0xFF800000> : vector<8xf32>
    %657 = vector.multi_reduction <maximumf>, %656, %cst_114 [1] : vector<8x128xf32> to vector<8xf32>
    %658 = vector.shape_cast %657 : vector<8xf32> to vector<8x1xf32>
    %659 = vector.broadcast %658 : vector<8x1xf32> to vector<8x128xf32>
    %660 = arith.subf %656, %659 : vector<8x128xf32>
    %661 = math.exp %660 : vector<8x128xf32>
    %cst_115 = arith.constant dense<0.000000e+00> : vector<8xf32>
    %662 = vector.multi_reduction <add>, %661, %cst_115 [1] : vector<8x128xf32> to vector<8xf32>
    %663 = vector.shape_cast %662 : vector<8xf32> to vector<8x1xf32>
    %664 = math.log %663 : vector<8x1xf32>
    %665 = arith.addf %658, %664 : vector<8x1xf32>
    %666 = vector.broadcast %665 : vector<8x1xf32> to vector<8x128xf32>
    %667 = arith.subf %656, %666 : vector<8x128xf32>
    %c0_116 = arith.constant 0 : index
    %c0_117 = arith.constant 0 : index
    %668 = vector.load %arg7[%c0_116, %c0_117] : memref<8x128xf32, #tpu.memory_space<vmem>>, vector<8x128xf32>
    tpu.vector_store %arg7[%c0_116, %c0_117], %667 {strides = array<i32>} : memref<8x128xf32, #tpu.memory_space<vmem>>, vector<8x128xf32>,
    return
  }
}

</mosaic_0001>

<bundles_post_ra>
// kernel: lstm_forward.1
= control target key start
LH: loop header
LB: loop body
LE: loop exit
PB: predicated region body
PF: predicated region fallthrough
CT: control target
= control target key end

     0   :  { %v11003_v3 = vmov 0   ;;  %s10995_s2 = inlined_call_operand.vmem [shape: bf16[128,1024], index: 2, kind: input, shape index: {}]   ;;  %s10996_s0 = inlined_call_operand.vmem [shape: bf16[128,128], index: 0, kind: input, shape index: {}]   ;;  %s10997_s3 = inlined_call_operand.vmem [shape: bf16[256,1024], index: 3, kind: input, shape index: {}]   ;;  %s10998_s1 = inlined_call_operand.vmem [shape: s32[8,1], index: 1, kind: input, shape index: {}]   ;;  %s10999_s4 = inlined_call_operand.vmem [shape: f32[1,1024], index: 4, kind: input, shape index: {}]   ;;  %s11000_s5 = inlined_call_operand.vmem [shape: bf16[256,128], index: 5, kind: input, shape index: {}]   ;;  %s11001_s6 = inlined_call_operand.vmem [shape: f32[1,128], index: 6, kind: input, shape index: {}]   ;;  %s11002_s7 = inlined_call_operand.vmem [shape: f32[8,128], index: 7, kind: output, shape index: {}]  }
   0x1   :  { %v43_v0 = vld [vmem:[%s10995_s2] sm:$0xff]  ;;  %v44_v2 = vld [vmem:[%s10995_s2 + $0x8] sm:$0xff]  ;;  %549 = vmatprep.mubr.bf16.mxu0 %v11003_v3  ;;  %662 = vmatprep.mubr.bf16.mxu1 %v11003_v3  ;;  %v45_v63 = vld [vmem:[%s10995_s2 + $0x10] sm:$0xff] }
   0x2   :  { %v47_v1 = vld [vmem:[%s10995_s2 + $0x20] sm:$0xff]  ;;  %v48_v5 = vld [vmem:[%s10995_s2 + $0x28] sm:$0xff]  ;;  %6318 = vset.pattern.permute.xlu0 %v11003_v3  ;;  %6319 = vset.pattern.permute.xlu1 %v11003_v3 }
   0x3   :  { %v5967_v4 = vcombine.high %v43_v0, %v47_v1  ;;  %v5966_v6 = vcombine.low %v43_v0, %v47_v1  ;;  %v51_v7 = vld [vmem:[%s10995_s2 + $0x40] sm:$0xff]  ;;  %v5969_v9 = vcombine.high %v44_v2, %v48_v5  ;;  %v5968_v10 = vcombine.low %v44_v2, %v48_v5  ;;  %v52_v12 = vld [vmem:[%s10995_s2 + $0x48] sm:$0xff]  ;;  %v49_v0 = vld [vmem:[%s10995_s2 + $0x30] sm:$0xff] }
   0x4   :  { %v55_v8 = vld [vmem:[%s10995_s2 + $0x60] sm:$0xff]  ;;  %v56_v13 = vld [vmem:[%s10995_s2 + $0x68] sm:$0xff]  ;;  %v46_v1 = vld [vmem:[%s10995_s2 + $0x18] sm:$0xff] }
   0x5   :  { %v5975_v11 = vcombine.high %v51_v7, %v55_v8  ;;  %v59_v14 = vld [vmem:[%s10995_s2 + $0x80] sm:$0xff]  ;;  %517 = vmatprep.subr.bf16.mxu0 %v5967_v4  ;;  %v5977_v15 = vcombine.high %v52_v12, %v56_v13  ;;  %v60_v17 = vld [vmem:[%s10995_s2 + $0x88] sm:$0xff]  ;;  %630 = vmatprep.subr.bf16.mxu1 %v5969_v9  ;;  %v5974_v19 = vcombine.low %v51_v7, %v55_v8  ;;  %v50_v2 = vld [vmem:[%s10995_s2 + $0x38] sm:$0xff] }
   0x6   :  { %v63_v16 = vld [vmem:[%s10995_s2 + $0xa0] sm:$0xff]  ;;  %v64_v18 = vld [vmem:[%s10995_s2 + $0xa8] sm:$0xff]  ;;  %518 = vmatpush1.bf16.msra.mxu0 %v5966_v6  ;;  %631 = vmatpush1.bf16.msra.mxu1 %v5968_v10  ;;  %v5976_v20 = vcombine.low %v52_v12, %v56_v13  ;;  %v5971_v6 = vcombine.high %v45_v63, %v49_v0  ;;  %v5973_v7 = vcombine.high %v46_v1, %v50_v2  ;;  %v53_v9 = vld [vmem:[%s10995_s2 + $0x50] sm:$0xff] }
   0x7   :  { %519 = vmatprep.subr.bf16.mxu0 %v5975_v11  ;;  %v5983_v21 = vcombine.high %v59_v14, %v63_v16  ;;  %632 = vmatprep.subr.bf16.mxu1 %v5977_v15  ;;  %v5985_v22 = vcombine.high %v60_v17, %v64_v18  ;;  %v67_v23 = vld [vmem:[%s10995_s2 + $0xc0] sm:$0xff]  ;;  %v68_v25 = vld [vmem:[%s10995_s2 + $0xc8] sm:$0xff]  ;;  %v5982_v27 = vcombine.low %v59_v14, %v63_v16  ;;  %v57_v10 = vld [vmem:[%s10995_s2 + $0x70] sm:$0xff] }
   0x8   :  { %v71_v24 = vld [vmem:[%s10995_s2 + $0xe0] sm:$0xff]  ;;  %v72_v26 = vld [vmem:[%s10995_s2 + $0xe8] sm:$0xff]  ;;  %v5984_v28 = vcombine.low %v60_v17, %v64_v18  ;;  %v5970_v11 = vcombine.low %v45_v63, %v49_v0  ;;  %v54_v12 = vld [vmem:[%s10995_s2 + $0x58] sm:$0xff]  ;;  %v5972_v14 = vcombine.low %v46_v1, %v50_v2  ;;  %v5979_v15 = vcombine.high %v53_v9, %v57_v10 }
   0x9   :  { %v5991_v29 = vcombine.high %v67_v23, %v71_v24  ;;  %v5993_v30 = vcombine.high %v68_v25, %v72_v26  ;;  %v75_v31 = vld [vmem:[%s10995_s2 + $0x100] sm:$0xff]  ;;  %v76_v33 = vld [vmem:[%s10995_s2 + $0x108] sm:$0xff]  ;;  %v5990_v35 = vcombine.low %v67_v23, %v71_v24  ;;  %v5992_v36 = vcombine.low %v68_v25, %v72_v26  ;;  %v58_v13 = vld [vmem:[%s10995_s2 + $0x78] sm:$0xff] }
   0xa   :  { %520 = vmatpush1.bf16.msra.mxu0 %v5974_v19  ;;  %633 = vmatpush1.bf16.msra.mxu1 %v5976_v20  ;;  %v79_v32 = vld [vmem:[%s10995_s2 + $0x120] sm:$0xff]  ;;  %v80_v34 = vld [vmem:[%s10995_s2 + $0x128] sm:$0xff]  ;;  %v61_v16 = vld [vmem:[%s10995_s2 + $0x90] sm:$0xff]  ;;  %v5981_v18 = vcombine.high %v54_v12, %v58_v13 }
   0xb   :  { %521 = vmatprep.subr.bf16.mxu0 %v5983_v21  ;;  %634 = vmatprep.subr.bf16.mxu1 %v5985_v22  ;;  %v5999_v37 = vcombine.high %v75_v31, %v79_v32  ;;  %v6001_v38 = vcombine.high %v76_v33, %v80_v34  ;;  %v83_v39 = vld [vmem:[%s10995_s2 + $0x140] sm:$0xff]  ;;  %v84_v41 = vld [vmem:[%s10995_s2 + $0x148] sm:$0xff]  ;;  %v5998_v43 = vcombine.low %v75_v31, %v79_v32  ;;  %v65_v17 = vld [vmem:[%s10995_s2 + $0xb0] sm:$0xff] }
   0xc   :  { %v87_v40 = vld [vmem:[%s10995_s2 + $0x160] sm:$0xff]  ;;  %v88_v42 = vld [vmem:[%s10995_s2 + $0x168] sm:$0xff]  ;;  %v6000_v44 = vcombine.low %v76_v33, %v80_v34  ;;  %v62_v19 = vld [vmem:[%s10995_s2 + $0x98] sm:$0xff]  ;;  %v5978_v21 = vcombine.low %v53_v9, %v57_v10  ;;  %v5980_v22 = vcombine.low %v54_v12, %v58_v13  ;;  %v5987_v23 = vcombine.high %v61_v16, %v65_v17 }
   0xd   :  { %v6007_v45 = vcombine.high %v83_v39, %v87_v40  ;;  %v6009_v46 = vcombine.high %v84_v41, %v88_v42  ;;  %v91_v47 = vld [vmem:[%s10995_s2 + $0x180] sm:$0xff]  ;;  %v92_v49 = vld [vmem:[%s10995_s2 + $0x188] sm:$0xff]  ;;  %v6006_v51 = vcombine.low %v83_v39, %v87_v40  ;;  %v6008_v52 = vcombine.low %v84_v41, %v88_v42  ;;  %v66_v20 = vld [vmem:[%s10995_s2 + $0xb8] sm:$0xff] }
   0xe   :  { %522 = vmatpush1.bf16.msra.mxu0 %v5982_v27  ;;  %635 = vmatpush1.bf16.msra.mxu1 %v5984_v28  ;;  %v95_v48 = vld [vmem:[%s10995_s2 + $0x1a0] sm:$0xff]  ;;  %v96_v50 = vld [vmem:[%s10995_s2 + $0x1a8] sm:$0xff]  ;;  %v5989_v24 = vcombine.high %v62_v19, %v66_v20  ;;  %v69_v26 = vld [vmem:[%s10995_s2 + $0xd0] sm:$0xff]  ;;  %v5988_v31 = vcombine.low %v62_v19, %v66_v20 }
   0xf   :  { %523 = vmatprep.subr.bf16.mxu0 %v5991_v29  ;;  %636 = vmatprep.subr.bf16.mxu1 %v5993_v30  ;;  %v6015_v53 = vcombine.high %v91_v47, %v95_v48  ;;  %v99_v54 = vld [vmem:[%s10995_s2 + $0x1c0] sm:$0xff]  ;;  %v6017_v55 = vcombine.high %v92_v49, %v96_v50  ;;  %v100_v57 = vld [vmem:[%s10995_s2 + $0x1c8] sm:$0xff]  ;;  %v6014_v59 = vcombine.low %v91_v47, %v95_v48  ;;  %v73_v27 = vld [vmem:[%s10995_s2 + $0xf0] sm:$0xff] }
  0x10   :  { %v103_v56 = vld [vmem:[%s10995_s2 + $0x1e0] sm:$0xff]  ;;  %v104_v58 = vld [vmem:[%s10995_s2 + $0x1e8] sm:$0xff]  ;;  %v6016_v60 = vcombine.low %v92_v49, %v96_v50  ;;  %v70_v28 = vld [vmem:[%s10995_s2 + $0xd8] sm:$0xff]  ;;  %v5986_v30 = vcombine.low %v61_v16, %v65_v17  ;;  %v5995_v32 = vcombine.high %v69_v26, %v73_v27 }
  0x11   :  { %v6023_v61 = vcombine.high %v99_v54, %v103_v56  ;;  %v6025_v62 = vcombine.high %v100_v57, %v104_v58  ;;  %v6022_v4 = vcombine.low %v99_v54, %v103_v56  ;;  %v6024_v5 = vcombine.low %v100_v57, %v104_v58  ;;  %v7017_v8 = vld [vmem:[%s10996_s0] sm:$0xff]   ;;  %v7050_v25 = vld [vmem:[%s10996_s0 + $0x8] sm:$0xff]   ;;  %v74_v29 = vld [vmem:[%s10995_s2 + $0xf8] sm:$0xff] }
  0x12   :  { %524 = vmatpush1.bf16.msra.mxu0 %v5990_v35  ;;  %637 = vmatpush1.bf16.msra.mxu1 %v5992_v36  ;;  %v5997_v33 = vcombine.high %v70_v28, %v74_v29  ;;  %v77_v34 = vld [vmem:[%s10995_s2 + $0x110] sm:$0xff]  ;;  %v78_v36 = vld [vmem:[%s10995_s2 + $0x118] sm:$0xff]  ;;  %v5996_v39 = vcombine.low %v70_v28, %v74_v29  ;;  %v1102_v9 = vld [vmem:[%s10997_s3 + $0x28] sm:$0xff] }
  0x13   :  { %525 = vmatprep.subr.bf16.mxu0 %v5999_v37  ;;  %638 = vmatprep.subr.bf16.mxu1 %v6001_v38  ;;  %v81_v35 = vld [vmem:[%s10995_s2 + $0x130] sm:$0xff]  ;;  %v82_v37 = vld [vmem:[%s10995_s2 + $0x138] sm:$0xff]  ;;  %v5994_v38 = vcombine.low %v69_v26, %v73_v27  ;;  %v7151_v13 = vld [vmem:[%s10996_s0 + $0x20] sm:$0xff]  }
  0x14   :  { %v6003_v40 = vcombine.high %v77_v34, %v81_v35  ;;  %v7083_v41 = vld [vmem:[%s10996_s0 + $0x10] sm:$0xff]   ;;  %v6005_v42 = vcombine.high %v78_v36, %v82_v37  ;;  %v6002_v47 = vcombine.low %v77_v34, %v81_v35  ;;  %v6004_v48 = vcombine.low %v78_v36, %v82_v37  ;;  %v98_v54 = vld [vmem:[%s10995_s2 + $0x1b8] sm:$0xff]  ;;  %v1109_v19 = vld [vmem:[%s10997_s3 + $0x60] sm:$0xff] }
  0x15   :  { %v7116_v58 = vld [vmem:[%s10996_s0 + $0x18] sm:$0xff]   ;;  %v7173_v16 = vld [vmem:[%s10996_s0 + $0x30] sm:$0xff]   ;;  %v1106_v20 = vld [vmem:[%s10997_s3 + $0x48] sm:$0xff] }
  0x16   :  { %526 = vmatpush1.bf16.msra.mxu0 %v5998_v43  ;;  %639 = vmatpush1.bf16.msra.mxu1 %v6000_v44  ;;  %v85_v43 = vld [vmem:[%s10995_s2 + $0x150] sm:$0xff]  ;;  %v106_v63 = vld [vmem:[%s10995_s2 + $0x1f8] sm:$0xff]  ;;  %v1113_v27 = vld [vmem:[%s10997_s3 + $0x80] sm:$0xff] }
  0x17   :  { %527 = vmatprep.subr.bf16.mxu0 %v6007_v45  ;;  %640 = vmatprep.subr.bf16.mxu1 %v6009_v46  ;;  %v89_v44 = vld [vmem:[%s10995_s2 + $0x170] sm:$0xff]  ;;  %v86_v45 = vld [vmem:[%s10995_s2 + $0x158] sm:$0xff]  ;;  %v1117_v28 = vld [vmem:[%s10997_s3 + $0xa0] sm:$0xff] }
  0x18   :  { %v90_v46 = vld [vmem:[%s10995_s2 + $0x178] sm:$0xff]  ;;  %v6011_v49 = vcombine.high %v85_v43, %v89_v44  ;;  %v1114_v29 = vld [vmem:[%s10997_s3 + $0x88] sm:$0xff]  ;;  %v1125_v35 = vld [vmem:[%s10997_s3 + $0xe0] sm:$0xff] }
  0x19   :  { %v6013_v50 = vcombine.high %v86_v45, %v90_v46  ;;  %v6012_v56 = vcombine.low %v86_v45, %v90_v46  ;;  %v7182_v17 = vld [vmem:[%s10996_s0 + $0x38] sm:$0xff]   ;;  %v1122_v36 = vld [vmem:[%s10997_s3 + $0xc8] sm:$0xff] }
  0x1a   :  { %528 = vmatpush1.bf16.msra.mxu0 %v6006_v51  ;;  %641 = vmatpush1.bf16.msra.mxu1 %v6008_v52  ;;  %v93_v51 = vld [vmem:[%s10995_s2 + $0x190] sm:$0xff]  ;;  %v1126_v37 = vld [vmem:[%s10997_s3 + $0xe8] sm:$0xff] }
  0x1b   :  { %529 = vmatprep.subr.bf16.mxu0 %v6015_v53  ;;  %642 = vmatprep.subr.bf16.mxu1 %v6017_v55  ;;  %v97_v52 = vld [vmem:[%s10995_s2 + $0x1b0] sm:$0xff]  ;;  %v94_v53 = vld [vmem:[%s10995_s2 + $0x198] sm:$0xff]  ;;  %v6010_v55 = vcombine.low %v85_v43, %v89_v44  ;;  %v1129_v43 = vld [vmem:[%s10997_s3 + $0x100] sm:$0xff] }
  0x1c   :  { %v6019_v57 = vcombine.high %v93_v51, %v97_v52  ;;  %v6018_v0 = vcombine.low %v93_v51, %v97_v52  ;;  %v6020_v1 = vcombine.low %v94_v53, %v98_v54  ;;  %v1133_v44 = vld [vmem:[%s10997_s3 + $0x120] sm:$0xff]  ;;  %v1130_v45 = vld [vmem:[%s10997_s3 + $0x108] sm:$0xff] }
  0x1d   :  { %v1134_v46 = vld [vmem:[%s10997_s3 + $0x128] sm:$0xff]  ;;  %v1141_v51 = vld [vmem:[%s10997_s3 + $0x160] sm:$0xff] }
  0x1e   :  { %530 = vmatpush1.bf16.msra.mxu0 %v6014_v59  ;;  %643 = vmatpush1.bf16.msra.mxu1 %v6016_v60  ;;  %v6021_v59 = vcombine.high %v94_v53, %v98_v54  ;;  %v101_v60 = vld [vmem:[%s10995_s2 + $0x1d0] sm:$0xff]  ;;  %v1138_v52 = vld [vmem:[%s10997_s3 + $0x148] sm:$0xff]  ;;  %v7301_v54 = vcombine.low %v1129_v43, %v1133_v44 }
  0x1f   :  { %531 = vmatprep.subr.bf16.mxu0 %v6023_v61  ;;  %644 = vmatprep.subr.bf16.mxu1 %v6025_v62  ;;  %v105_v61 = vld [vmem:[%s10995_s2 + $0x1f0] sm:$0xff]  ;;  %v102_v62 = vld [vmem:[%s10995_s2 + $0x1d8] sm:$0xff]  ;;  %v1142_v53 = vld [vmem:[%s10997_s3 + $0x168] sm:$0xff] }
  0x20   :  { %v6027_v2 = vcombine.high %v101_v60, %v105_v61  ;;  %v6026_v10 = vcombine.low %v101_v60, %v105_v61  ;;  %11293 = vst [vmem:[#allocation21_spill] sm:$0xff] %v7301_v54  ;;  %v1149_v60 = vld [vmem:[%s10997_s3 + $0x1a0] sm:$0xff]  ;;  %v1146_v61 = vld [vmem:[%s10997_s3 + $0x188] sm:$0xff] }
  0x22   :  { %532 = vmatpush1.bf16.msra.mxu0 %v6022_v4  ;;  %645 = vmatpush1.bf16.msra.mxu1 %v6024_v5  ;;  %v6029_v4 = vcombine.high %v102_v62, %v106_v63  ;;  %v1097_v5 = vld [vmem:[%s10997_s3] sm:$0xff] }
  0x23   :  { %743 = vmatprep.subr.bf16.mxu0 %v5971_v6  ;;  %856 = vmatprep.subr.bf16.mxu1 %v5973_v7  ;;  %v1101_v6 = vld [vmem:[%s10997_s3 + $0x20] sm:$0xff]  ;;  %v1098_v7 = vld [vmem:[%s10997_s3 + $0x8] sm:$0xff] }
  0x24   :  { %v7146_v12 = vcombine.high %v1097_v5, %v1101_v6 }
  0x25   :  { %550 = vmatmul.mubr.bf16.vlgmr.msra.gmra.mrb[0].mxu0 %v7017_v8  ;;  %663 = vmatmul.mubr.bf16.vlgmr.msra.gmra.mrb[0].mxu1 %v7017_v8 }
  0x26   :  { %744 = vmatpush1.bf16.msra.mxu0 %v5970_v11  ;;  %857 = vmatpush1.bf16.msra.mxu1 %v5972_v14  ;;  %v6028_v11 = vcombine.low %v102_v62, %v106_v63  ;;  %11275 = vst [vmem:[#allocation3_spill] sm:$0xff] %v7146_v12  ;;  %v7153_v14 = vcombine.high %v1098_v7, %v1102_v9  ;;  %v1150_v62 = vld [vmem:[%s10997_s3 + $0x1a8] sm:$0xff] }
  0x27   :  { %559 = vmatprep.mubr.bf16.mxu0 %v11003_v3  ;;  %672 = vmatprep.mubr.bf16.mxu1 %v11003_v3 }
  0x28   :  { %745 = vmatprep.subr.bf16.mxu0 %v5979_v15  ;;  %858 = vmatprep.subr.bf16.mxu1 %v5981_v18  ;;  %11276 = vst [vmem:[#allocation4_spill] sm:$0xff] %v7153_v14  ;;  %v7164_v15 = vld [vmem:[%s10996_s0 + $0x28] sm:$0xff]   ;;  %v1105_v18 = vld [vmem:[%s10997_s3 + $0x40] sm:$0xff] }
  0x2a   :  { %746 = vmatpush1.bf16.msra.mxu0 %v5978_v21  ;;  %859 = vmatpush1.bf16.msra.mxu1 %v5980_v22  ;;  %v1110_v21 = vld [vmem:[%s10997_s3 + $0x68] sm:$0xff]  ;;  %v7200_v22 = vcombine.low %v1097_v5, %v1101_v6 }
  0x2b   :  { %747 = vmatprep.subr.bf16.mxu0 %v5987_v23  ;;  %860 = vmatprep.subr.bf16.mxu1 %v5989_v24  ;;  %v7202_v23 = vcombine.low %v1098_v7, %v1102_v9  ;;  %v7204_v24 = vcombine.high %v1105_v18, %v1109_v19  ;;  %v7206_v26 = vcombine.high %v1106_v20, %v1110_v21  ;;  %v1154_v5 = vld [vmem:[%s10997_s3 + $0x1c8] sm:$0xff] }
  0x2c   :  { %11277 = vst [vmem:[#allocation5_spill] sm:$0xff] %v7200_v22  ;;  %v1158_v6 = vld [vmem:[%s10997_s3 + $0x1e8] sm:$0xff]  ;;  %v7357_v9 = vcombine.low %v1146_v61, %v1150_v62 }
  0x2d   :  { %560 = vmatmul.mubr.bf16.gmra.mrb[4].mxu0 %v7050_v25  ;;  %673 = vmatmul.mubr.bf16.gmra.mrb[4].mxu1 %v7050_v25  ;;  %11278 = vst [vmem:[#allocation6_spill] sm:$0xff] %v7202_v23  ;;  %11279 = vst [vmem:[#allocation7_spill] sm:$0xff] %v7204_v24 }
  0x2e   :  { %569 = vmatprep.mubr.bf16.mxu0 %v11003_v3  ;;  %682 = vmatprep.mubr.bf16.mxu1 %v11003_v3  ;;  %11280 = vst [vmem:[#allocation8_spill] sm:$0xff] %v7206_v26  ;;  %11302 = vst [vmem:[#allocation30_spill] sm:$0xff] %v7357_v9 }
  0x2f   :  { %748 = vmatpush1.bf16.msra.mxu0 %v5986_v30  ;;  %861 = vmatpush1.bf16.msra.mxu1 %v5988_v31  ;;  %v1118_v30 = vld [vmem:[%s10997_s3 + $0xa8] sm:$0xff]  ;;  %v7223_v31 = vcombine.low %v1105_v18, %v1109_v19  ;;  %v1161_v18 = vld [vmem:[%s10997_s3 + $0x200] sm:$0xff] }
  0x30   :  { %749 = vmatprep.subr.bf16.mxu0 %v5995_v32  ;;  %862 = vmatprep.subr.bf16.mxu1 %v5997_v33  ;;  %v7227_v32 = vcombine.low %v1106_v20, %v1110_v21  ;;  %v7229_v33 = vcombine.high %v1113_v27, %v1117_v28  ;;  %v7233_v34 = vcombine.high %v1114_v29, %v1118_v30  ;;  %v1165_v19 = vld [vmem:[%s10997_s3 + $0x220] sm:$0xff]  ;;  %v1162_v20 = vld [vmem:[%s10997_s3 + $0x208] sm:$0xff] }
  0x31   :  { %11281 = vst [vmem:[#allocation9_spill] sm:$0xff] %v7223_v31  ;;  %v1166_v21 = vld [vmem:[%s10997_s3 + $0x228] sm:$0xff] }
  0x32   :  { %11282 = vst [vmem:[#allocation10_spill] sm:$0xff] %v7227_v32  ;;  %11283 = vst [vmem:[#allocation11_spill] sm:$0xff] %v7229_v33 }
  0x33   :  { %750 = vmatpush1.bf16.msra.mxu0 %v5994_v38  ;;  %863 = vmatpush1.bf16.msra.mxu1 %v5996_v39  ;;  %11284 = vst [vmem:[#allocation12_spill] sm:$0xff] %v7233_v34  ;;  %v7249_v38 = vcombine.low %v1113_v27, %v1117_v28  ;;  %v7253_v39 = vcombine.low %v1114_v29, %v1118_v30 }
  0x34   :  { %751 = vmatprep.subr.bf16.mxu0 %v6003_v40  ;;  %864 = vmatprep.subr.bf16.mxu1 %v6005_v42  ;;  %v7258_v42 = vcombine.high %v1122_v36, %v1126_v37  ;;  %v7383_v28 = vcombine.low %v1154_v5, %v1158_v6  ;;  %v7385_v29 = vcombine.high %v1161_v18, %v1165_v19 }
  0x35   :  { %570 = vmatmul.mubr.bf16.gmra.mrb[8].mxu0 %v7083_v41  ;;  %683 = vmatmul.mubr.bf16.gmra.mrb[8].mxu1 %v7083_v41  ;;  %11285 = vst [vmem:[#allocation13_spill] sm:$0xff] %v7249_v38  ;;  %11286 = vst [vmem:[#allocation14_spill] sm:$0xff] %v7253_v39  ;;  %v7389_v30 = vcombine.high %v1162_v20, %v1166_v21 }
  0x36   :  { %579 = vmatprep.mubr.bf16.mxu0 %v11003_v3  ;;  %692 = vmatprep.mubr.bf16.mxu1 %v11003_v3  ;;  %11288 = vst [vmem:[#allocation16_spill] sm:$0xff] %v7258_v42  ;;  %11306 = vst [vmem:[#allocation34_spill] sm:$0xff] %v7383_v28 }
  0x37   :  { %752 = vmatpush1.bf16.msra.mxu0 %v6002_v47  ;;  %865 = vmatpush1.bf16.msra.mxu1 %v6004_v48  ;;  %v7279_v48 = vcombine.low %v1122_v36, %v1126_v37  ;;  %11307 = vst [vmem:[#allocation35_spill] sm:$0xff] %v7385_v29  ;;  %11308 = vst [vmem:[#allocation36_spill] sm:$0xff] %v7389_v30  ;;  %v1174_v36 = vld [vmem:[%s10997_s3 + $0x268] sm:$0xff]  ;;  %v7405_v37 = vcombine.low %v1161_v18, %v1165_v19 }
  0x38   :  { %753 = vmatprep.subr.bf16.mxu0 %v6011_v49  ;;  %866 = vmatprep.subr.bf16.mxu1 %v6013_v50  ;;  %v7281_v49 = vcombine.high %v1129_v43, %v1133_v44  ;;  %v7285_v50 = vcombine.high %v1130_v45, %v1134_v46  ;;  %v7409_v43 = vcombine.low %v1162_v20, %v1166_v21  ;;  %v1193_v20 = vld [vmem:[%s10997_s3 + $0x300] sm:$0xff] }
  0x39   :  { %11290 = vst [vmem:[#allocation18_spill] sm:$0xff] %v7279_v48  ;;  %11309 = vst [vmem:[#allocation37_spill] sm:$0xff] %v7405_v37  ;;  %v1197_v21 = vld [vmem:[%s10997_s3 + $0x320] sm:$0xff] }
  0x3a   :  { %11291 = vst [vmem:[#allocation19_spill] sm:$0xff] %v7281_v49  ;;  %11292 = vst [vmem:[#allocation20_spill] sm:$0xff] %v7285_v50 }
  0x3b   :  { %754 = vmatpush1.bf16.msra.mxu0 %v6010_v55  ;;  %867 = vmatpush1.bf16.msra.mxu1 %v6012_v56  ;;  %v7305_v55 = vcombine.low %v1130_v45, %v1134_v46  ;;  %11310 = vst [vmem:[#allocation38_spill] sm:$0xff] %v7409_v43  ;;  %v1177_v46 = vld [vmem:[%s10997_s3 + $0x280] sm:$0xff] }
  0x3c   :  { %755 = vmatprep.subr.bf16.mxu0 %v6019_v57  ;;  %868 = vmatprep.subr.bf16.mxu1 %v6021_v59  ;;  %v7310_v57 = vcombine.high %v1138_v52, %v1142_v53  ;;  %v1145_v59 = vld [vmem:[%s10997_s3 + $0x180] sm:$0xff] }
  0x3d   :  { %580 = vmatmul.mubr.bf16.gmra.mrb[12].mxu0 %v7116_v58  ;;  %693 = vmatmul.mubr.bf16.gmra.mrb[12].mxu1 %v7116_v58  ;;  %11294 = vst [vmem:[#allocation22_spill] sm:$0xff] %v7305_v55  ;;  %v7353_v7 = vcombine.low %v1145_v59, %v1149_v60 }
  0x3e   :  { %589 = vmatprep.mubr.bf16.mxu0 %v11003_v3  ;;  %702 = vmatprep.mubr.bf16.mxu1 %v11003_v3  ;;  %11296 = vst [vmem:[#allocation24_spill] sm:$0xff] %v7310_v57 }
  0x3f   :  { %756 = vmatpush1.bf16.msra.mxu0 %v6018_v0  ;;  %869 = vmatpush1.bf16.msra.mxu1 %v6020_v1  ;;  %v7331_v0 = vcombine.low %v1138_v52, %v1142_v53  ;;  %v7333_v1 = vcombine.high %v1145_v59, %v1149_v60  ;;  %11301 = vst [vmem:[#allocation29_spill] sm:$0xff] %v7353_v7  ;;  %v1182_v52 = vld [vmem:[%s10997_s3 + $0x2a8] sm:$0xff] }
  0x40   :  { %757 = vmatprep.subr.bf16.mxu0 %v6027_v2  ;;  %870 = vmatprep.subr.bf16.mxu1 %v6029_v4  ;;  %v7337_v2 = vcombine.high %v1146_v61, %v1150_v62  ;;  %v1157_v4 = vld [vmem:[%s10997_s3 + $0x1e0] sm:$0xff] }
  0x41   :  { %11298 = vst [vmem:[#allocation26_spill] sm:$0xff] %v7331_v0  ;;  %11299 = vst [vmem:[#allocation27_spill] sm:$0xff] %v7333_v1  ;;  %v1189_v62 = vld [vmem:[%s10997_s3 + $0x2e0] sm:$0xff] }
  0x42   :  { %11300 = vst [vmem:[#allocation28_spill] sm:$0xff] %v7337_v2 }
  0x43   :  { %758 = vmatpush1.bf16.msra.mxu0 %v6026_v10  ;;  %871 = vmatpush1.bf16.msra.mxu1 %v6028_v11  ;;  %v7362_v11 = vcombine.high %v1154_v5, %v1158_v6 }
  0x44   :  { %1877 = vmatprep.subr.bf16.mxu0 %v7146_v12  ;;  %1918 = vmatprep.subr.bf16.mxu1 %v7153_v14 }
  0x45   :  { %590 = vmatmul.mubr.bf16.gmra.mrb[16].mxu0 %v7151_v13  ;;  %703 = vmatmul.mubr.bf16.gmra.mrb[16].mxu1 %v7151_v13  ;;  %11304 = vst [vmem:[#allocation32_spill] sm:$0xff] %v7362_v11 }
  0x46   :  { %599 = vmatprep.mubr.bf16.mxu0 %v11003_v3  ;;  %712 = vmatprep.mubr.bf16.mxu1 %v11003_v3 }
  0x4d   :  { %600 = vmatmul.mubr.bf16.gmra.mrb[20].mxu0 %v7164_v15  ;;  %713 = vmatmul.mubr.bf16.gmra.mrb[20].mxu1 %v7164_v15 }
  0x4e   :  { %609 = vmatprep.mubr.bf16.mxu0 %v11003_v3  ;;  %722 = vmatprep.mubr.bf16.mxu1 %v11003_v3 }
  0x55   :  { %610 = vmatmul.mubr.bf16.gmra.mrb[24].mxu0 %v7173_v16  ;;  %723 = vmatmul.mubr.bf16.gmra.mrb[24].mxu1 %v7173_v16 }
  0x56   :  { %619 = vmatprep.mubr.bf16.mxu0 %v11003_v3  ;;  %732 = vmatprep.mubr.bf16.mxu1 %v11003_v3 }
  0x5d   :  { %620 = vmatmul.mubr.bf16.gmra.mrb[28].mxu0 %v7182_v17  ;;  %733 = vmatmul.mubr.bf16.gmra.mrb[28].mxu1 %v7182_v17 }
  0x5e   :  { %775 = vmatprep.mubr.bf16.mxu0 %v11003_v3  ;;  %888 = vmatprep.mubr.bf16.mxu1 %v11003_v3 }
  0x65   :  { %776 = vmatmul.mubr.bf16.vlgmr.msra.gmra.mrb[32].mxu0 %v7017_v8  ;;  %889 = vmatmul.mubr.bf16.vlgmr.msra.gmra.mrb[32].mxu1 %v7017_v8  ;;  %v1121_v8 = vld [vmem:[%s10997_s3 + $0xc0] sm:$0xff] }
  0x66   :  { %1878 = vmatpush1.bf16.msra.mxu0 %v7200_v22  ;;  %1919 = vmatpush1.bf16.msra.mxu1 %v7202_v23  ;;  %v7255_v40 = vcombine.high %v1121_v8, %v1125_v35  ;;  %v7275_v47 = vcombine.low %v1121_v8, %v1125_v35  ;;  %v1173_v8 = vld [vmem:[%s10997_s3 + $0x260] sm:$0xff]  ;;  %v1170_v35 = vld [vmem:[%s10997_s3 + $0x248] sm:$0xff] }
  0x67   :  { %1879 = vmatprep.subr.bf16.mxu0 %v7204_v24  ;;  %1920 = vmatprep.subr.bf16.mxu1 %v7206_v26  ;;  %v7414_v45 = vcombine.high %v1170_v35, %v1174_v36  ;;  %v7435_v59 = vcombine.low %v1170_v35, %v1174_v36 }
  0x68   :  { %785 = vmatprep.mubr.bf16.mxu0 %v11003_v3  ;;  %898 = vmatprep.mubr.bf16.mxu1 %v11003_v3  ;;  %11287 = vst [vmem:[#allocation15_spill] sm:$0xff] %v7255_v40  ;;  %11289 = vst [vmem:[#allocation17_spill] sm:$0xff] %v7275_v47 }
  0x69   :  { %11312 = vst [vmem:[#allocation40_spill] sm:$0xff] %v7414_v45  ;;  %11314 = vst [vmem:[#allocation42_spill] sm:$0xff] %v7435_v59 }
  0x6a   :  { %1880 = vmatpush1.bf16.msra.mxu0 %v7223_v31  ;;  %1921 = vmatpush1.bf16.msra.mxu1 %v7227_v32 }
  0x6b   :  { %1881 = vmatprep.subr.bf16.mxu0 %v7229_v33  ;;  %1922 = vmatprep.subr.bf16.mxu1 %v7233_v34 }
  0x6d   :  { %786 = vmatmul.mubr.bf16.gmra.mrb[36].mxu0 %v7050_v25  ;;  %899 = vmatmul.mubr.bf16.gmra.mrb[36].mxu1 %v7050_v25  ;;  %v1137_v25 = vld [vmem:[%s10997_s3 + $0x140] sm:$0xff] }
  0x6e   :  { %1882 = vmatpush1.bf16.msra.mxu0 %v7249_v38  ;;  %1923 = vmatpush1.bf16.msra.mxu1 %v7253_v39  ;;  %v7307_v56 = vcombine.high %v1137_v25, %v1141_v51  ;;  %v7327_v63 = vcombine.low %v1137_v25, %v1141_v51  ;;  %v1181_v25 = vld [vmem:[%s10997_s3 + $0x2a0] sm:$0xff]  ;;  %v1178_v51 = vld [vmem:[%s10997_s3 + $0x288] sm:$0xff] }
  0x6f   :  { %1883 = vmatprep.subr.bf16.mxu0 %v7255_v40  ;;  %1924 = vmatprep.subr.bf16.mxu1 %v7258_v42  ;;  %v7437_v60 = vcombine.high %v1177_v46, %v1181_v25  ;;  %v7441_v61 = vcombine.high %v1178_v51, %v1182_v52  ;;  %v7457_v5 = vcombine.low %v1177_v46, %v1181_v25 }
  0x70   :  { %795 = vmatprep.mubr.bf16.mxu0 %v11003_v3  ;;  %908 = vmatprep.mubr.bf16.mxu1 %v11003_v3  ;;  %11295 = vst [vmem:[#allocation23_spill] sm:$0xff] %v7307_v56  ;;  %11297 = vst [vmem:[#allocation25_spill] sm:$0xff] %v7327_v63  ;;  %v7461_v6 = vcombine.low %v1178_v51, %v1182_v52  ;;  %v7489_v46 = vcombine.high %v1193_v20, %v1197_v21  ;;  %v1205_v51 = vld [vmem:[%s10997_s3 + $0x360] sm:$0xff]  ;;  %v1202_v52 = vld [vmem:[%s10997_s3 + $0x348] sm:$0xff] }
  0x71   :  { %11315 = vst [vmem:[#allocation43_spill] sm:$0xff] %v7437_v60  ;;  %11316 = vst [vmem:[#allocation44_spill] sm:$0xff] %v7441_v61 }
  0x72   :  { %1884 = vmatpush1.bf16.msra.mxu0 %v7275_v47  ;;  %1925 = vmatpush1.bf16.msra.mxu1 %v7279_v48  ;;  %11317 = vst [vmem:[#allocation45_spill] sm:$0xff] %v7457_v5  ;;  %11318 = vst [vmem:[#allocation46_spill] sm:$0xff] %v7461_v6 }
  0x73   :  { %1885 = vmatprep.subr.bf16.mxu0 %v7281_v49  ;;  %1926 = vmatprep.subr.bf16.mxu1 %v7285_v50  ;;  %11323 = vst [vmem:[#allocation51_spill] sm:$0xff] %v7489_v46 }
  0x75   :  { %796 = vmatmul.mubr.bf16.gmra.mrb[40].mxu0 %v7083_v41  ;;  %909 = vmatmul.mubr.bf16.gmra.mrb[40].mxu1 %v7083_v41  ;;  %v1153_v41 = vld [vmem:[%s10997_s3 + $0x1c0] sm:$0xff] }
  0x76   :  { %1886 = vmatpush1.bf16.msra.mxu0 %v7301_v54  ;;  %1927 = vmatpush1.bf16.msra.mxu1 %v7305_v55  ;;  %v7359_v10 = vcombine.high %v1153_v41, %v1157_v4  ;;  %v7379_v27 = vcombine.low %v1153_v41, %v1157_v4  ;;  %v1186_v41 = vld [vmem:[%s10997_s3 + $0x2c8] sm:$0xff] }
  0x77   :  { %1887 = vmatprep.subr.bf16.mxu0 %v7307_v56  ;;  %1928 = vmatprep.subr.bf16.mxu1 %v7310_v57  ;;  %v1190_v4 = vld [vmem:[%s10997_s3 + $0x2e8] sm:$0xff] }
  0x78   :  { %805 = vmatprep.mubr.bf16.mxu0 %v11003_v3  ;;  %918 = vmatprep.mubr.bf16.mxu1 %v11003_v3  ;;  %11303 = vst [vmem:[#allocation31_spill] sm:$0xff] %v7359_v10  ;;  %11305 = vst [vmem:[#allocation33_spill] sm:$0xff] %v7379_v27  ;;  %v7466_v19 = vcombine.high %v1186_v41, %v1190_v4  ;;  %v7487_v36 = vcombine.low %v1186_v41, %v1190_v4 }
  0x7a   :  { %1888 = vmatpush1.bf16.msra.mxu0 %v7327_v63  ;;  %1929 = vmatpush1.bf16.msra.mxu1 %v7331_v0  ;;  %11320 = vst [vmem:[#allocation48_spill] sm:$0xff] %v7466_v19  ;;  %11322 = vst [vmem:[#allocation50_spill] sm:$0xff] %v7487_v36 }
  0x7b   :  { %1889 = vmatprep.subr.bf16.mxu0 %v7333_v1  ;;  %1930 = vmatprep.subr.bf16.mxu1 %v7337_v2 }
  0x7d   :  { %806 = vmatmul.mubr.bf16.gmra.mrb[44].mxu0 %v7116_v58  ;;  %919 = vmatmul.mubr.bf16.gmra.mrb[44].mxu1 %v7116_v58  ;;  %v1169_v58 = vld [vmem:[%s10997_s3 + $0x240] sm:$0xff] }
  0x7e   :  { %1890 = vmatpush1.bf16.msra.mxu0 %v7353_v7  ;;  %1931 = vmatpush1.bf16.msra.mxu1 %v7357_v9  ;;  %v7411_v44 = vcombine.high %v1169_v58, %v1173_v8  ;;  %v7431_v53 = vcombine.low %v1169_v58, %v1173_v8  ;;  %v1194_v58 = vld [vmem:[%s10997_s3 + $0x308] sm:$0xff] }
  0x7f   :  { %1891 = vmatprep.subr.bf16.mxu0 %v7359_v10  ;;  %1932 = vmatprep.subr.bf16.mxu1 %v7362_v11  ;;  %v1198_v8 = vld [vmem:[%s10997_s3 + $0x328] sm:$0xff] }
  0x80   :  { %815 = vmatprep.mubr.bf16.mxu0 %v11003_v3  ;;  %928 = vmatprep.mubr.bf16.mxu1 %v11003_v3  ;;  %11311 = vst [vmem:[#allocation39_spill] sm:$0xff] %v7411_v44  ;;  %11313 = vst [vmem:[#allocation41_spill] sm:$0xff] %v7431_v53  ;;  %v7493_v25 = vcombine.high %v1194_v58, %v1198_v8  ;;  %v7513_v41 = vcombine.low %v1194_v58, %v1198_v8  ;;  %v1214_v58 = vld [vmem:[%s10997_s3 + $0x3a8] sm:$0xff] }
  0x82   :  { %1892 = vmatpush1.bf16.msra.mxu0 %v7379_v27  ;;  %1933 = vmatpush1.bf16.msra.mxu1 %v7383_v28  ;;  %11324 = vst [vmem:[#allocation52_spill] sm:$0xff] %v7493_v25  ;;  %11326 = vst [vmem:[#allocation54_spill] sm:$0xff] %v7513_v41 }
  0x83   :  { %1893 = vmatprep.subr.bf16.mxu0 %v7385_v29  ;;  %1934 = vmatprep.subr.bf16.mxu1 %v7389_v30 }
  0x85   :  { %816 = vmatmul.mubr.bf16.gmra.mrb[48].mxu0 %v7151_v13  ;;  %929 = vmatmul.mubr.bf16.gmra.mrb[48].mxu1 %v7151_v13  ;;  %v1185_v13 = vld [vmem:[%s10997_s3 + $0x2c0] sm:$0xff] }
  0x86   :  { %1894 = vmatpush1.bf16.msra.mxu0 %v7405_v37  ;;  %1935 = vmatpush1.bf16.msra.mxu1 %v7409_v43  ;;  %v7463_v18 = vcombine.high %v1185_v13, %v1189_v62  ;;  %v7483_v35 = vcombine.low %v1185_v13, %v1189_v62  ;;  %v1206_v13 = vld [vmem:[%s10997_s3 + $0x368] sm:$0xff]  ;;  %v7509_v62 = vcombine.low %v1193_v20, %v1197_v21  ;;  %v1213_v20 = vld [vmem:[%s10997_s3 + $0x3a0] sm:$0xff] }
  0x87   :  { %1895 = vmatprep.subr.bf16.mxu0 %v7411_v44  ;;  %1936 = vmatprep.subr.bf16.mxu1 %v7414_v45  ;;  %v1210_v21 = vld [vmem:[%s10997_s3 + $0x388] sm:$0xff] }
  0x88   :  { %825 = vmatprep.mubr.bf16.mxu0 %v11003_v3  ;;  %938 = vmatprep.mubr.bf16.mxu1 %v11003_v3  ;;  %11319 = vst [vmem:[#allocation47_spill] sm:$0xff] %v7463_v18  ;;  %11321 = vst [vmem:[#allocation49_spill] sm:$0xff] %v7483_v35 }
  0x89   :  { %11325 = vst [vmem:[#allocation53_spill] sm:$0xff] %v7509_v62 }
  0x8a   :  { %1896 = vmatpush1.bf16.msra.mxu0 %v7431_v53  ;;  %1937 = vmatpush1.bf16.msra.mxu1 %v7435_v59 }
  0x8b   :  { %1897 = vmatprep.subr.bf16.mxu0 %v7437_v60  ;;  %1938 = vmatprep.subr.bf16.mxu1 %v7441_v61 }
  0x8d   :  { %826 = vmatmul.mubr.bf16.gmra.mrb[52].mxu0 %v7164_v15  ;;  %939 = vmatmul.mubr.bf16.gmra.mrb[52].mxu1 %v7164_v15  ;;  %v1201_v15 = vld [vmem:[%s10997_s3 + $0x340] sm:$0xff] }
  0x8e   :  { %1898 = vmatpush1.bf16.msra.mxu0 %v7457_v5  ;;  %1939 = vmatpush1.bf16.msra.mxu1 %v7461_v6  ;;  %v7515_v4 = vcombine.high %v1201_v15, %v1205_v51  ;;  %v7535_v8 = vcombine.low %v1201_v15, %v1205_v51  ;;  %v1221_v15 = vld [vmem:[%s10997_s3 + $0x3e0] sm:$0xff]  ;;  %v1218_v51 = vld [vmem:[%s10997_s3 + $0x3c8] sm:$0xff] }
  0x8f   :  { %1899 = vmatprep.subr.bf16.mxu0 %v7463_v18  ;;  %1940 = vmatprep.subr.bf16.mxu1 %v7466_v19  ;;  %v1209_v19 = vld [vmem:[%s10997_s3 + $0x380] sm:$0xff] }
  0x90   :  { %835 = vmatprep.mubr.bf16.mxu0 %v11003_v3  ;;  %948 = vmatprep.mubr.bf16.mxu1 %v11003_v3  ;;  %11327 = vst [vmem:[#allocation55_spill] sm:$0xff] %v7515_v4  ;;  %v7518_v3 = vcombine.high %v1202_v52, %v1206_v13  ;;  %11329 = vst [vmem:[#allocation57_spill] sm:$0xff] %v7535_v8 }
  0x92   :  { %1900 = vmatpush1.bf16.msra.mxu0 %v7483_v35  ;;  %1941 = vmatpush1.bf16.msra.mxu1 %v7487_v36  ;;  %11328 = vst [vmem:[#allocation56_spill] sm:$0xff] %v7518_v3  ;;  %v11332_v36 = vmov 0   ;;  %v7545_v35 = vcombine.high %v1210_v21, %v1214_v58 }
  0x93   :  { %1901 = vmatprep.subr.bf16.mxu0 %v7489_v46  ;;  %1942 = vmatprep.subr.bf16.mxu1 %v7493_v25  ;;  %v7539_v25 = vcombine.low %v1202_v52, %v1206_v13  ;;  %v7541_v46 = vcombine.high %v1209_v19, %v1213_v20  ;;  %v1222_v52 = vld [vmem:[%s10997_s3 + $0x3e8] sm:$0xff]  ;;  %v7561_v13 = vcombine.low %v1209_v19, %v1213_v20  ;;  %v1103_v19 = vld [vmem:[%s10997_s3 + $0x30] sm:$0xff]  ;;  %v1100_v20 = vld [vmem:[%s10997_s3 + $0x18] sm:$0xff] }
  0x94   :  { %11333 = vst [vmem:[#allocation60_spill] sm:$0xff] %v7545_v35 }
  0x95   :  { %836 = vmatmul.mubr.bf16.gmra.mrb[56].mxu0 %v7173_v16  ;;  %949 = vmatmul.mubr.bf16.gmra.mrb[56].mxu1 %v7173_v16  ;;  %11330 = vst [vmem:[#allocation58_spill] sm:$0xff] %v7539_v25  ;;  %11331 = vst [vmem:[#allocation59_spill] sm:$0xff] %v7541_v46  ;;  %v1217_v16 = vld [vmem:[%s10997_s3 + $0x3c0] sm:$0xff] }
  0x96   :  { %1902 = vmatpush1.bf16.msra.mxu0 %v7509_v62  ;;  %1943 = vmatpush1.bf16.msra.mxu1 %v7513_v41  ;;  %11334 = vst [vmem:[#allocation61_spill] sm:$0xff] %v7561_v13  ;;  %v7570_v41 = vcombine.high %v1218_v51, %v1222_v52  ;;  %v1099_v62 = vld [vmem:[%s10997_s3 + $0x10] sm:$0xff] }
  0x97   :  { %1903 = vmatprep.subr.bf16.mxu0 %v7515_v4  ;;  %1944 = vmatprep.subr.bf16.mxu1 %v7518_v3  ;;  %v7565_v3 = vcombine.low %v1210_v21, %v1214_v58  ;;  %v7567_v4 = vcombine.high %v1217_v16, %v1221_v15  ;;  %v1104_v21 = vld [vmem:[%s10997_s3 + $0x38] sm:$0xff]  ;;  %v7587_v58 = vcombine.low %v1217_v16, %v1221_v15  ;;  %v1111_v16 = vld [vmem:[%s10997_s3 + $0x70] sm:$0xff] }
  0x98   :  { %845 = vmatprep.mubr.bf16.mxu0 %v11332_v36  ;;  %958 = vmatprep.mubr.bf16.mxu1 %v11332_v36  ;;  %11337 = vst [vmem:[#allocation64_spill] sm:$0xff] %v7570_v41  ;;  %v1108_v15 = vld [vmem:[%s10997_s3 + $0x58] sm:$0xff] }
  0x99   :  { %11335 = vst [vmem:[#allocation62_spill] sm:$0xff] %v7565_v3  ;;  %11336 = vst [vmem:[#allocation63_spill] sm:$0xff] %v7567_v4 }
  0x9a   :  { %1904 = vmatpush1.bf16.msra.mxu0 %v7535_v8  ;;  %1945 = vmatpush1.bf16.msra.mxu1 %v7539_v25  ;;  %11338 = vst [vmem:[#allocation65_spill] sm:$0xff] %v7587_v58  ;;  %v7597_v25 = vcombine.high %v1100_v20, %v1104_v21 }
  0x9b   :  { %1905 = vmatprep.subr.bf16.mxu0 %v7541_v46  ;;  %1946 = vmatprep.subr.bf16.mxu1 %v7545_v35  ;;  %v7591_v35 = vcombine.low %v1218_v51, %v1222_v52  ;;  %v7593_v46 = vcombine.high %v1099_v62, %v1103_v19  ;;  %v1112_v51 = vld [vmem:[%s10997_s3 + $0x78] sm:$0xff]  ;;  %v7613_v52 = vcombine.low %v1099_v62, %v1103_v19  ;;  %v1119_v62 = vld [vmem:[%s10997_s3 + $0xb0] sm:$0xff] }
  0x9c   :  { %11341 = vst [vmem:[#allocation68_spill] sm:$0xff] %v7597_v25  ;;  %v1116_v19 = vld [vmem:[%s10997_s3 + $0x98] sm:$0xff] }
  0x9d   :  { %846 = vmatmul.mubr.bf16.gmra.mrb[60].mxu0 %v7182_v17  ;;  %959 = vmatmul.mubr.bf16.gmra.mrb[60].mxu1 %v7182_v17  ;;  %11339 = vst [vmem:[#allocation66_spill] sm:$0xff] %v7591_v35  ;;  %11340 = vst [vmem:[#allocation67_spill] sm:$0xff] %v7593_v46  ;;  %v1107_v17 = vld [vmem:[%s10997_s3 + $0x50] sm:$0xff] }
  0x9e   :  { %1906 = vmatpush1.bf16.msra.mxu0 %v7561_v13  ;;  %1947 = vmatpush1.bf16.msra.mxu1 %v7565_v3  ;;  %11342 = vst [vmem:[#allocation69_spill] sm:$0xff] %v7613_v52  ;;  %v7622_v3 = vcombine.high %v1108_v15, %v1112_v51  ;;  %v1115_v13 = vld [vmem:[%s10997_s3 + $0x90] sm:$0xff] }
  0x9f   :  { %1907 = vmatprep.subr.bf16.mxu0 %v7567_v4  ;;  %1948 = vmatprep.subr.bf16.mxu1 %v7570_v41  ;;  %v7617_v41 = vcombine.low %v1100_v20, %v1104_v21  ;;  %v7619_v4 = vcombine.high %v1107_v17, %v1111_v16  ;;  %v1120_v20 = vld [vmem:[%s10997_s3 + $0xb8] sm:$0xff]  ;;  %v7639_v21 = vcombine.low %v1107_v17, %v1111_v16  ;;  %v1127_v17 = vld [vmem:[%s10997_s3 + $0xf0] sm:$0xff] }
  0xa0   :  { %1909 = vmatprep.mubr.bf16.mxu0 %v11332_v36  ;;  %1950 = vmatprep.mubr.bf16.mxu1 %v11332_v36  ;;  %11345 = vst [vmem:[#allocation72_spill] sm:$0xff] %v7622_v3  ;;  %v1124_v16 = vld [vmem:[%s10997_s3 + $0xd8] sm:$0xff] }
  0xa1   :  { %11343 = vst [vmem:[#allocation70_spill] sm:$0xff] %v7617_v41  ;;  %11344 = vst [vmem:[#allocation71_spill] sm:$0xff] %v7619_v4 }
  0xa2   :  { %1908 = vmatpush1.bf16.msra.mxu0 %v7587_v58  ;;  %1949 = vmatpush1.bf16.msra.mxu1 %v7591_v35  ;;  %11346 = vst [vmem:[#allocation73_spill] sm:$0xff] %v7639_v21  ;;  %v7648_v35 = vcombine.high %v1116_v19, %v1120_v20  ;;  %v1123_v58 = vld [vmem:[%s10997_s3 + $0xd0] sm:$0xff] }
  0xa3   :  { %1959 = vmatprep.subr.bf16.mxu0 %v7593_v46  ;;  %2000 = vmatprep.subr.bf16.mxu1 %v7597_v25  ;;  %v7643_v25 = vcombine.low %v1108_v15, %v1112_v51  ;;  %v7645_v46 = vcombine.high %v1115_v13, %v1119_v62  ;;  %v1128_v15 = vld [vmem:[%s10997_s3 + $0xf8] sm:$0xff]  ;;  %v7665_v51 = vcombine.low %v1115_v13, %v1119_v62  ;;  %v1135_v13 = vld [vmem:[%s10997_s3 + $0x130] sm:$0xff] }
  0xa4   :  { %11349 = vst [vmem:[#allocation76_spill] sm:$0xff] %v7648_v35  ;;  %v1132_v62 = vld [vmem:[%s10997_s3 + $0x118] sm:$0xff] }
  0xa5   :  { %1910 = vmatmul.mubr.bf16.vlgmr.msra.gmra.mrb[64].mxu0 %v11332_v36  ;;  %1951 = vmatmul.mubr.bf16.vlgmr.msra.gmra.mrb[64].mxu1 %v11332_v36  ;;  %11347 = vst [vmem:[#allocation74_spill] sm:$0xff] %v7643_v25  ;;  %11348 = vst [vmem:[#allocation75_spill] sm:$0xff] %v7645_v46 }
  0xa6   :  { %1960 = vmatpush1.bf16.msra.mxu0 %v7613_v52  ;;  %2001 = vmatpush1.bf16.msra.mxu1 %v7617_v41  ;;  %11350 = vst [vmem:[#allocation77_spill] sm:$0xff] %v7665_v51  ;;  %v7674_v41 = vcombine.high %v1124_v16, %v1128_v15  ;;  %v1131_v52 = vld [vmem:[%s10997_s3 + $0x110] sm:$0xff] }
  0xa7   :  { %1961 = vmatprep.subr.bf16.mxu0 %v7619_v4  ;;  %2002 = vmatprep.subr.bf16.mxu1 %v7622_v3  ;;  %v7669_v3 = vcombine.low %v1116_v19, %v1120_v20  ;;  %v7671_v4 = vcombine.high %v1123_v58, %v1127_v17  ;;  %v1136_v19 = vld [vmem:[%s10997_s3 + $0x138] sm:$0xff]  ;;  %v7689_v20 = vcombine.low %v1123_v58, %v1127_v17  ;;  %v1143_v58 = vld [vmem:[%s10997_s3 + $0x170] sm:$0xff] }
  0xa8   :  { %1991 = vmatprep.mubr.bf16.mxu0 %v11332_v36  ;;  %2032 = vmatprep.mubr.bf16.mxu1 %v11332_v36  ;;  %11353 = vst [vmem:[#allocation80_spill] sm:$0xff] %v7674_v41  ;;  %v1140_v17 = vld [vmem:[%s10997_s3 + $0x158] sm:$0xff] }
  0xa9   :  { %11351 = vst [vmem:[#allocation78_spill] sm:$0xff] %v7669_v3  ;;  %11352 = vst [vmem:[#allocation79_spill] sm:$0xff] %v7671_v4 }
  0xaa   :  { %1962 = vmatpush1.bf16.msra.mxu0 %v7639_v21  ;;  %2003 = vmatpush1.bf16.msra.mxu1 %v7643_v25  ;;  %11354 = vst [vmem:[#allocation81_spill] sm:$0xff] %v7689_v20  ;;  %v7698_v25 = vcombine.high %v1132_v62, %v1136_v19  ;;  %v1139_v21 = vld [vmem:[%s10997_s3 + $0x150] sm:$0xff] }
  0xab   :  { %1963 = vmatprep.subr.bf16.mxu0 %v7645_v46  ;;  %2004 = vmatprep.subr.bf16.mxu1 %v7648_v35  ;;  %v7693_v35 = vcombine.low %v1124_v16, %v1128_v15  ;;  %v7695_v46 = vcombine.high %v1131_v52, %v1135_v13  ;;  %v1144_v16 = vld [vmem:[%s10997_s3 + $0x178] sm:$0xff]  ;;  %v7713_v15 = vcombine.low %v1131_v52, %v1135_v13  ;;  %v1151_v52 = vld [vmem:[%s10997_s3 + $0x1b0] sm:$0xff] }
  0xac   :  { %11357 = vst [vmem:[#allocation84_spill] sm:$0xff] %v7698_v25  ;;  %v1148_v13 = vld [vmem:[%s10997_s3 + $0x198] sm:$0xff] }
  0xad   :  { %11355 = vst [vmem:[#allocation82_spill] sm:$0xff] %v7693_v35  ;;  %11356 = vst [vmem:[#allocation83_spill] sm:$0xff] %v7695_v46 }
  0xae   :  { %1964 = vmatpush1.bf16.msra.mxu0 %v7665_v51  ;;  %2005 = vmatpush1.bf16.msra.mxu1 %v7669_v3  ;;  %11358 = vst [vmem:[#allocation85_spill] sm:$0xff] %v7713_v15  ;;  %v7722_v3 = vcombine.high %v1140_v17, %v1144_v16  ;;  %v1147_v51 = vld [vmem:[%s10997_s3 + $0x190] sm:$0xff] }
  0xaf   :  { %1965 = vmatprep.subr.bf16.mxu0 %v7671_v4  ;;  %2006 = vmatprep.subr.bf16.mxu1 %v7674_v41  ;;  %v7717_v41 = vcombine.low %v1132_v62, %v1136_v19  ;;  %v7719_v4 = vcombine.high %v1139_v21, %v1143_v58  ;;  %v1152_v62 = vld [vmem:[%s10997_s3 + $0x1b8] sm:$0xff]  ;;  %v7737_v19 = vcombine.low %v1139_v21, %v1143_v58  ;;  %v1159_v21 = vld [vmem:[%s10997_s3 + $0x1f0] sm:$0xff] }
  0xb0   :  { %11361 = vst [vmem:[#allocation88_spill] sm:$0xff] %v7722_v3  ;;  %v1156_v58 = vld [vmem:[%s10997_s3 + $0x1d8] sm:$0xff] }
  0xb1   :  { %11359 = vst [vmem:[#allocation86_spill] sm:$0xff] %v7717_v41  ;;  %11360 = vst [vmem:[#allocation87_spill] sm:$0xff] %v7719_v4 }
  0xb2   :  { %1966 = vmatpush1.bf16.msra.mxu0 %v7689_v20  ;;  %2007 = vmatpush1.bf16.msra.mxu1 %v7693_v35  ;;  %11362 = vst [vmem:[#allocation89_spill] sm:$0xff] %v7737_v19  ;;  %v7746_v35 = vcombine.high %v1148_v13, %v1152_v62  ;;  %v1155_v20 = vld [vmem:[%s10997_s3 + $0x1d0] sm:$0xff] }
  0xb3   :  { %1967 = vmatprep.subr.bf16.mxu0 %v7695_v46  ;;  %2008 = vmatprep.subr.bf16.mxu1 %v7698_v25  ;;  %v7741_v25 = vcombine.low %v1140_v17, %v1144_v16  ;;  %v7743_v46 = vcombine.high %v1147_v51, %v1151_v52  ;;  %v1160_v17 = vld [vmem:[%s10997_s3 + $0x1f8] sm:$0xff]  ;;  %v7761_v16 = vcombine.low %v1147_v51, %v1151_v52  ;;  %v1163_v51 = vld [vmem:[%s10997_s3 + $0x210] sm:$0xff] }
  0xb4   :  { %11365 = vst [vmem:[#allocation92_spill] sm:$0xff] %v7746_v35  ;;  %v1167_v52 = vld [vmem:[%s10997_s3 + $0x230] sm:$0xff] }
  0xb5   :  { %11363 = vst [vmem:[#allocation90_spill] sm:$0xff] %v7741_v25  ;;  %11364 = vst [vmem:[#allocation91_spill] sm:$0xff] %v7743_v46  ;;  %v7800_v8 = vcombine.high %v1163_v51, %v1167_v52 }
  0xb6   :  { %1968 = vmatpush1.bf16.msra.mxu0 %v7713_v15  ;;  %2009 = vmatpush1.bf16.msra.mxu1 %v7717_v41  ;;  %11366 = vst [vmem:[#allocation93_spill] sm:$0xff] %v7761_v16  ;;  %v7772_v41 = vcombine.high %v1155_v20, %v1159_v21  ;;  %v7798_v15 = vcombine.low %v1156_v58, %v1160_v17 }
  0xb7   :  { %1969 = vmatprep.subr.bf16.mxu0 %v7719_v4  ;;  %2010 = vmatprep.subr.bf16.mxu1 %v7722_v3  ;;  %v7766_v3 = vld [vmem:[%s10998_s1] sm:$0xff]  ;;  %v7770_v4 = vcombine.low %v1148_v13, %v1152_v62  ;;  %v1164_v13 = vld [vmem:[%s10997_s3 + $0x218] sm:$0xff]  ;;  %11372 = vst [vmem:[#allocation99_spill] sm:$0xff] %v7800_v8 }
  0xb8   :  { %11368 = vst [vmem:[#allocation95_spill] sm:$0xff] %v7772_v41  ;;  %vm2097_vm0 = vcmp.gt.s32.totalorder %v7766_v3, 0  ;;  %v1168_v62 = vld [vmem:[%s10997_s3 + $0x238] sm:$0xff]  ;;  %vm2340_vm1 = vcmp.gt.s32.totalorder %v7766_v3, 1  ;;  %11371 = vst [vmem:[#allocation98_spill] sm:$0xff] %v7798_v15  ;;  %vm3069_vm2 = vcmp.gt.s32.totalorder %v7766_v3, 4 }
  0xb9   :  { %11367 = vst [vmem:[#allocation94_spill] sm:$0xff] %v7770_v4  ;;  %v7803_v18 = vcombine.high %v1164_v13, %v1168_v62  ;;  %vm3555_vm3 = vcmp.gt.s32.totalorder %v7766_v3, 6  ;;  %vm4041_vm4 = vcmp.gt.s32.totalorder %v7766_v3, 8  ;;  %vm4527_vm5 = vcmp.gt.s32.totalorder %v7766_v3, 10 }
  0xba   :  { %1970 = vmatpush1.bf16.msra.mxu0 %v7737_v19  ;;  %2011 = vmatpush1.bf16.msra.mxu1 %v7741_v25  ;;  %v7776_v19 = vcombine.high %v1156_v58, %v1160_v17  ;;  %v2341_v25 = vsel %vm2340_vm1, 1, %v11332_v36  ;;  %v1176_v58 = vld [vmem:[%s10997_s3 + $0x278] sm:$0xff]  ;;  %v7818_v17 = vcombine.low %v1163_v51, %v1167_v52  ;;  %v1183_v51 = vld [vmem:[%s10997_s3 + $0x2b0] sm:$0xff]  ;;  %v3070_v52 = vsel %vm3069_vm2, 1, %v11332_v36 }
  0xbb   :  { %1971 = vmatprep.subr.bf16.mxu0 %v7743_v46  ;;  %2012 = vmatprep.subr.bf16.mxu1 %v7746_v35  ;;  %v2098_v46 = vsel %vm2097_vm0, 1, %v11332_v36  ;;  %v7793_v35 = vcombine.low %v1155_v20, %v1159_v21  ;;  %11373 = vst [vmem:[#allocation100_spill] sm:$0xff] %v7803_v18  ;;  %v1175_v20 = vld [vmem:[%s10997_s3 + $0x270] sm:$0xff]  ;;  %v1172_v21 = vld [vmem:[%s10997_s3 + $0x258] sm:$0xff]  ;;  %vm5013_vm6 = vcmp.gt.s32.totalorder %v7766_v3, 12  ;;  %vm5499_vm7 = vcmp.gt.s32.totalorder %v7766_v3, 14 }
  0xbc   :  { %11369 = vst [vmem:[#allocation96_spill] sm:$0xff] %v7776_v19  ;;  %2100 = vperm.xlu0 %6318, %v2098_v46   ;;  %v1171_v46 = vld [vmem:[%s10997_s3 + $0x250] sm:$0xff]  ;;  %11374 = vst [vmem:[#allocation101_spill] sm:$0xff] %v7818_v17 }
  0xbd   :  { %11370 = vst [vmem:[#allocation97_spill] sm:$0xff] %v7793_v35  ;;  %v1219_v3 = vld [vmem:[%s10997_s3 + $0x3d0] sm:$0xff] }
  0xbe   :  { %1972 = vmatpush1.bf16.msra.mxu0 %v7761_v16  ;;  %2013 = vmatpush1.bf16.msra.mxu1 %v7770_v4  ;;  %v7828_v4 = vcombine.high %v1172_v21, %v1176_v58 }
  0xbf   :  { %1973 = vmatprep.subr.bf16.mxu0 %v7772_v41  ;;  %2014 = vmatprep.subr.bf16.mxu1 %v7776_v19  ;;  %v7822_v19 = vcombine.low %v1164_v13, %v1168_v62  ;;  %v7824_v41 = vcombine.high %v1171_v46, %v1175_v20  ;;  %v1180_v13 = vld [vmem:[%s10997_s3 + $0x298] sm:$0xff] }
  0xc0   :  { %2343 = vperm.xlu0 %6318, %v2341_v25   ;;  %11377 = vst [vmem:[#allocation104_spill] sm:$0xff] %v7828_v4  ;;  %v1179_v25 = vld [vmem:[%s10997_s3 + $0x290] sm:$0xff]  ;;  %v1184_v62 = vld [vmem:[%s10997_s3 + $0x2b8] sm:$0xff] }
  0xc1   :  { %11375 = vst [vmem:[#allocation102_spill] sm:$0xff] %v7822_v19  ;;  %11376 = vst [vmem:[#allocation103_spill] sm:$0xff] %v7824_v41  ;;  %v7855_v16 = vcombine.high %v1180_v13, %v1184_v62 }
  0xc2   :  { %1974 = vmatpush1.bf16.msra.mxu0 %v7793_v35  ;;  %2015 = vmatpush1.bf16.msra.mxu1 %v7798_v15  ;;  %v7850_v15 = vcombine.low %v1172_v21, %v1176_v58  ;;  %v7852_v35 = vcombine.high %v1179_v25, %v1183_v51  ;;  %v1192_v21 = vld [vmem:[%s10997_s3 + $0x2f8] sm:$0xff]  ;;  %v7870_v58 = vcombine.low %v1179_v25, %v1183_v51  ;;  %v1199_v25 = vld [vmem:[%s10997_s3 + $0x330] sm:$0xff]  ;;  %v4042_v51 = vsel %vm4041_vm4, 1, %v11332_v36 }
  0xc3   :  { %1975 = vmatprep.subr.bf16.mxu0 %v7800_v8  ;;  %2016 = vmatprep.subr.bf16.mxu1 %v7803_v18  ;;  %v7845_v18 = vcombine.low %v1171_v46, %v1175_v20  ;;  %v3556_v8 = vsel %vm3555_vm3, 1, %v11332_v36  ;;  %11381 = vst [vmem:[#allocation108_spill] sm:$0xff] %v7855_v16  ;;  %v1191_v46 = vld [vmem:[%s10997_s3 + $0x2f0] sm:$0xff]  ;;  %v1188_v20 = vld [vmem:[%s10997_s3 + $0x2d8] sm:$0xff] }
  0xc4   :  { %3072 = vperm.xlu0 %6318, %v3070_v52   ;;  %11379 = vst [vmem:[#allocation106_spill] sm:$0xff] %v7850_v15  ;;  %11380 = vst [vmem:[#allocation107_spill] sm:$0xff] %v7852_v35  ;;  %v1187_v52 = vld [vmem:[%s10997_s3 + $0x2d0] sm:$0xff] }
  0xc5   :  { %11378 = vst [vmem:[#allocation105_spill] sm:$0xff] %v7845_v18  ;;  %11382 = vst [vmem:[#allocation109_spill] sm:$0xff] %v7870_v58 }
  0xc6   :  { %1976 = vmatpush1.bf16.msra.mxu0 %v7818_v17  ;;  %2017 = vmatpush1.bf16.msra.mxu1 %v7822_v19  ;;  %v7880_v19 = vcombine.high %v1188_v20, %v1192_v21 }
  0xc7   :  { %1977 = vmatprep.subr.bf16.mxu0 %v7824_v41  ;;  %2018 = vmatprep.subr.bf16.mxu1 %v7828_v4  ;;  %v7874_v4 = vcombine.low %v1180_v13, %v1184_v62  ;;  %v7876_v41 = vcombine.high %v1187_v52, %v1191_v46  ;;  %v1196_v13 = vld [vmem:[%s10997_s3 + $0x318] sm:$0xff] }
  0xc8   :  { %3558 = vperm.xlu0 %6318, %v3556_v8   ;;  %11385 = vst [vmem:[#allocation112_spill] sm:$0xff] %v7880_v19  ;;  %v1195_v8 = vld [vmem:[%s10997_s3 + $0x310] sm:$0xff]  ;;  %v1200_v62 = vld [vmem:[%s10997_s3 + $0x338] sm:$0xff] }
  0xc9   :  { %11383 = vst [vmem:[#allocation110_spill] sm:$0xff] %v7874_v4  ;;  %11384 = vst [vmem:[#allocation111_spill] sm:$0xff] %v7876_v41  ;;  %v7907_v17 = vcombine.high %v1196_v13, %v1200_v62 }
  0xca   :  { %1978 = vmatpush1.bf16.msra.mxu0 %v7845_v18  ;;  %2019 = vmatpush1.bf16.msra.mxu1 %v7850_v15  ;;  %v7902_v15 = vcombine.low %v1188_v20, %v1192_v21  ;;  %v7904_v18 = vcombine.high %v1195_v8, %v1199_v25  ;;  %v1208_v20 = vld [vmem:[%s10997_s3 + $0x378] sm:$0xff]  ;;  %v7922_v21 = vcombine.low %v1195_v8, %v1199_v25  ;;  %v1215_v8 = vld [vmem:[%s10997_s3 + $0x3b0] sm:$0xff]  ;;  %v5014_v25 = vsel %vm5013_vm6, 1, %v11332_v36 }
  0xcb   :  { %1979 = vmatprep.subr.bf16.mxu0 %v7852_v35  ;;  %2020 = vmatprep.subr.bf16.mxu1 %v7855_v16  ;;  %v7897_v16 = vcombine.low %v1187_v52, %v1191_v46  ;;  %v4528_v35 = vsel %vm4527_vm5, 1, %v11332_v36  ;;  %11389 = vst [vmem:[#allocation116_spill] sm:$0xff] %v7907_v17  ;;  %v1207_v52 = vld [vmem:[%s10997_s3 + $0x370] sm:$0xff]  ;;  %v1204_v46 = vld [vmem:[%s10997_s3 + $0x358] sm:$0xff] }
  0xcc   :  { %4044 = vperm.xlu0 %6318, %v4042_v51   ;;  %11387 = vst [vmem:[#allocation114_spill] sm:$0xff] %v7902_v15  ;;  %11388 = vst [vmem:[#allocation115_spill] sm:$0xff] %v7904_v18  ;;  %v1203_v51 = vld [vmem:[%s10997_s3 + $0x350] sm:$0xff] }
  0xcd   :  { %11386 = vst [vmem:[#allocation113_spill] sm:$0xff] %v7897_v16  ;;  %11390 = vst [vmem:[#allocation117_spill] sm:$0xff] %v7922_v21 }
  0xce   :  { %1980 = vmatpush1.bf16.msra.mxu0 %v7870_v58  ;;  %2021 = vmatpush1.bf16.msra.mxu1 %v7874_v4  ;;  %v7932_v4 = vcombine.high %v1204_v46, %v1208_v20 }
  0xcf   :  { %1981 = vmatprep.subr.bf16.mxu0 %v7876_v41  ;;  %2022 = vmatprep.subr.bf16.mxu1 %v7880_v19  ;;  %v7926_v19 = vcombine.low %v1196_v13, %v1200_v62  ;;  %v7928_v41 = vcombine.high %v1203_v51, %v1207_v52  ;;  %v1212_v13 = vld [vmem:[%s10997_s3 + $0x398] sm:$0xff] }
  0xd0   :  { %4530 = vperm.xlu0 %6318, %v4528_v35   ;;  %11393 = vst [vmem:[#allocation120_spill] sm:$0xff] %v7932_v4  ;;  %v1211_v35 = vld [vmem:[%s10997_s3 + $0x390] sm:$0xff]  ;;  %v1216_v62 = vld [vmem:[%s10997_s3 + $0x3b8] sm:$0xff] }
  0xd1   :  { %11391 = vst [vmem:[#allocation118_spill] sm:$0xff] %v7926_v19  ;;  %11392 = vst [vmem:[#allocation119_spill] sm:$0xff] %v7928_v41  ;;  %v7959_v58 = vcombine.high %v1212_v13, %v1216_v62 }
  0xd2   :  { %1982 = vmatpush1.bf16.msra.mxu0 %v7897_v16  ;;  %2023 = vmatpush1.bf16.msra.mxu1 %v7902_v15  ;;  %v7954_v15 = vcombine.low %v1204_v46, %v1208_v20  ;;  %v7956_v16 = vcombine.high %v1211_v35, %v1215_v8  ;;  %v1224_v46 = vld [vmem:[%s10997_s3 + $0x3f8] sm:$0xff]  ;;  %v7974_v20 = vcombine.low %v1211_v35, %v1215_v8  ;;  %v109_v35 = vlaneseq }
  0xd3   :  { %1983 = vmatprep.subr.bf16.mxu0 %v7904_v18  ;;  %2024 = vmatprep.subr.bf16.mxu1 %v7907_v17  ;;  %v7949_v17 = vcombine.low %v1203_v51, %v1207_v52  ;;  %v5500_v18 = vsel %vm5499_vm7, 1, %v11332_v36  ;;  %11397 = vst [vmem:[#allocation124_spill] sm:$0xff] %v7959_v58  ;;  %v1223_v51 = vld [vmem:[%s10997_s3 + $0x3f0] sm:$0xff]  ;;  %v1220_v52 = vld [vmem:[%s10997_s3 + $0x3d8] sm:$0xff] }
  0xd4   :  { %5016 = vperm.xlu0 %6318, %v5014_v25   ;;  %11395 = vst [vmem:[#allocation122_spill] sm:$0xff] %v7954_v15  ;;  %11396 = vst [vmem:[#allocation123_spill] sm:$0xff] %v7956_v16  ;;  %v7978_v25 = vcombine.low %v1212_v13, %v1216_v62  ;;  %v8011_v8 = vshrl.u32 %v109_v35, 7  ;;  %v8021_v62 = vld [vmem:[%s10999_s4] sm:$0xff] }
  0xd5   :  { %11394 = vst [vmem:[#allocation121_spill] sm:$0xff] %v7949_v17  ;;  %11398 = vst [vmem:[#allocation125_spill] sm:$0xff] %v7974_v20 }
  0xd6   :  { %1984 = vmatpush1.bf16.msra.mxu0 %v7922_v21  ;;  %2025 = vmatpush1.bf16.msra.mxu1 %v7926_v19  ;;  %11399 = vst [vmem:[#allocation126_spill] sm:$0xff] %v7978_v25  ;;  %v7986_v19 = vcombine.low %v1219_v3, %v1223_v51  ;;  %v111_v13 = vsub.s32 0, %v8011_v8 }
  0xd7   :  { %1985 = vmatprep.subr.bf16.mxu0 %v7928_v41  ;;  %2026 = vmatprep.subr.bf16.mxu1 %v7932_v4  ;;  %v7980_v4 = vcombine.high %v1219_v3, %v1223_v51  ;;  %v7983_v41 = vcombine.high %v1220_v52, %v1224_v46  ;;  %v119_v3 = vsub.s32 2, %v8011_v8  ;;  %v115_v51 = vsub.s32 1, %v8011_v8 }
  0xd8   :  { %5502 = vperm.xlu0 %6318, %v5500_v18   ;;  %11402 = vst [vmem:[#allocation129_spill] sm:$0xff] %v7986_v19  ;;  %v7990_v18 = vcombine.low %v1220_v52, %v1224_v46  ;;  %v123_v52 = vsub.s32 3, %v8011_v8  ;;  %v8033_v35 = vrot.slane %v8021_v62, %v111_v13 }
  0xd9   :  { %11400 = vst [vmem:[#allocation127_spill] sm:$0xff] %v7980_v4  ;;  %11401 = vst [vmem:[#allocation128_spill] sm:$0xff] %v7983_v41 }
  0xda   :  { %1986 = vmatpush1.bf16.msra.mxu0 %v7949_v17  ;;  %2027 = vmatpush1.bf16.msra.mxu1 %v7954_v15  ;;  %11403 = vst [vmem:[#allocation130_spill] sm:$0xff] %v7990_v18 }
  0xdb   :  { %1987 = vmatprep.subr.bf16.mxu0 %v7956_v16  ;;  %2028 = vmatprep.subr.bf16.mxu1 %v7959_v58 }
  0xde   :  { %1988 = vmatpush1.bf16.msra.mxu0 %v7974_v20  ;;  %2029 = vmatpush1.bf16.msra.mxu1 %v7978_v25 }
  0xdf   :  { %1989 = vmatprep.subr.bf16.mxu0 %v7980_v4  ;;  %2030 = vmatprep.subr.bf16.mxu1 %v7983_v41 }
  0xe2   :  { %1990 = vmatpush1.bf16.msra.mxu0 %v7986_v19  ;;  %2031 = vmatpush1.bf16.msra.mxu1 %v7990_v18 }
  0xe3   :  { %2120 = vmatprep.subr.bf16.mxu0 %v7146_v12  ;;  %2161 = vmatprep.subr.bf16.mxu1 %v7153_v14 }
  0xe5   :  { %1992 = vmatmul.mubr.bf16.vlgmr.msra.gmra.mrb[68].mxu0 %v11332_v36  ;;  %2033 = vmatmul.mubr.bf16.vlgmr.msra.gmra.mrb[68].mxu1 %v11332_v36 }
  0xe6   :  { %2121 = vmatpush1.bf16.msra.mxu0 %v7200_v22  ;;  %2162 = vmatpush1.bf16.msra.mxu1 %v7202_v23 }
  0xe7   :  { %2122 = vmatprep.subr.bf16.mxu0 %v7204_v24  ;;  %2163 = vmatprep.subr.bf16.mxu1 %v7206_v26 }
  0xea   :  { %2123 = vmatpush1.bf16.msra.mxu0 %v7223_v31  ;;  %2164 = vmatpush1.bf16.msra.mxu1 %v7227_v32 }
  0xeb   :  { %2124 = vmatprep.subr.bf16.mxu0 %v7229_v33  ;;  %2165 = vmatprep.subr.bf16.mxu1 %v7233_v34 }
  0xee   :  { %2125 = vmatpush1.bf16.msra.mxu0 %v7249_v38  ;;  %2166 = vmatpush1.bf16.msra.mxu1 %v7253_v39 }
  0xef   :  { %2126 = vmatprep.subr.bf16.mxu0 %v7255_v40  ;;  %2167 = vmatprep.subr.bf16.mxu1 %v7258_v42 }
  0xf2   :  { %2127 = vmatpush1.bf16.msra.mxu0 %v7275_v47  ;;  %2168 = vmatpush1.bf16.msra.mxu1 %v7279_v48 }
  0xf3   :  { %2128 = vmatprep.subr.bf16.mxu0 %v7281_v49  ;;  %2169 = vmatprep.subr.bf16.mxu1 %v7285_v50  ;;  %v8040_v49 = vrot.slane %v8021_v62, %v119_v3 }
  0xf6   :  { %2129 = vmatpush1.bf16.msra.mxu0 %v7301_v54  ;;  %2170 = vmatpush1.bf16.msra.mxu1 %v7305_v55  ;;  %v8043_v54 = vrot.slane %v8021_v62, %v115_v51 }
  0xf7   :  { %2130 = vmatprep.subr.bf16.mxu0 %v7307_v56  ;;  %2171 = vmatprep.subr.bf16.mxu1 %v7310_v57  ;;  %v8049_v57 = vrot.slane %v8021_v62, %v123_v52 }
  0xf8   :  { %v8029_v46 = vpop.f32.mrb[0].mxu0  ;;  %v8035_v36 = vpop.f32.mrb[0].mxu1 }
  0xf9   :  { %v8037_v50 = vpop.f32.mrb[1].mxu0  ;;  %v8045_v55 = vpop.f32.mrb[1].mxu1 }
  0xfa   :  { %v555_v56 = vpop.f32.mrb[2].mxu0  ;;  %2131 = vmatpush1.bf16.msra.mxu0 %v7327_v63  ;;  %v668_v48 = vpop.f32.mrb[2].mxu1  ;;  %2172 = vmatpush1.bf16.msra.mxu1 %v7331_v0 }
  0xfb   :  { %v8052_v13 = vadd.f32 %v555_v56, %v8033_v35  ;;  %v557_v47 = vpop.f32.mrb[3].mxu0  ;;  %2132 = vmatprep.subr.bf16.mxu0 %v7333_v1  ;;  %v8057_v3 = vadd.f32 %v668_v48, %v8040_v49  ;;  %v670_v42 = vpop.f32.mrb[3].mxu1  ;;  %2173 = vmatprep.subr.bf16.mxu1 %v7337_v2 }
  0xfc   :  { %v8060_v51 = vadd.f32 %v557_v47, %v8043_v54  ;;  %v8064_v52 = vadd.f32 %v670_v42, %v8049_v57 }
  0xfd   :  { %11404 = vst [vmem:[#allocation131_spill] sm:$0xff] %v8052_v13  ;;  %11405 = vst [vmem:[#allocation132_spill] sm:$0xff] %v8057_v3 }
  0xfe   :  { %11406 = vst [vmem:[#allocation133_spill] sm:$0xff] %v8060_v51  ;;  %11407 = vst [vmem:[#allocation134_spill] sm:$0xff] %v8064_v52  ;;  %2133 = vmatpush1.bf16.msra.mxu0 %v7353_v7  ;;  %2174 = vmatpush1.bf16.msra.mxu1 %v7357_v9 }
  0xff   :  { %2134 = vmatprep.subr.bf16.mxu0 %v7359_v10  ;;  %2175 = vmatprep.subr.bf16.mxu1 %v7362_v11 }
 0x100   :  { %v561_v56 = vpop.f32.mrb[4].mxu0  ;;  %v674_v47 = vpop.f32.mrb[4].mxu1 }
 0x101   :  { %v8071_v48 = vadd.f32 %v561_v56, %v8033_v35  ;;  %v563_v51 = vpop.f32.mrb[5].mxu0  ;;  %v8074_v3 = vadd.f32 %v674_v47, %v8040_v49  ;;  %v676_v52 = vpop.f32.mrb[5].mxu1 }
 0x102   :  { %v8077_v42 = vadd.f32 %v563_v51, %v8043_v54  ;;  %v565_v13 = vpop.f32.mrb[6].mxu0  ;;  %2135 = vmatpush1.bf16.msra.mxu0 %v7379_v27  ;;  %v8081_v10 = vadd.f32 %v676_v52, %v8049_v57  ;;  %v678_v56 = vpop.f32.mrb[6].mxu1  ;;  %2176 = vmatpush1.bf16.msra.mxu1 %v7383_v28 }
 0x103   :  { %11408 = vst [vmem:[#allocation135_spill] sm:$0xff] %v8071_v48  ;;  %11409 = vst [vmem:[#allocation136_spill] sm:$0xff] %v8074_v3  ;;  %v8084_v11 = vadd.f32 %v565_v13, %v8033_v35  ;;  %v567_v48 = vpop.f32.mrb[7].mxu0  ;;  %2136 = vmatprep.subr.bf16.mxu0 %v7385_v29  ;;  %v8089_v47 = vadd.f32 %v678_v56, %v8040_v49  ;;  %2177 = vmatprep.subr.bf16.mxu1 %v7389_v30 }
 0x104   :  { %11410 = vst [vmem:[#allocation137_spill] sm:$0xff] %v8077_v42  ;;  %11411 = vst [vmem:[#allocation138_spill] sm:$0xff] %v8081_v10  ;;  %v8092_v51 = vadd.f32 %v567_v48, %v8043_v54  ;;  %v680_v42 = vpop.f32.mrb[7].mxu1 }
 0x105   :  { %11412 = vst [vmem:[#allocation139_spill] sm:$0xff] %v8084_v11  ;;  %11413 = vst [vmem:[#allocation140_spill] sm:$0xff] %v8089_v47  ;;  %v8096_v52 = vadd.f32 %v680_v42, %v8049_v57 }
 0x106   :  { %11414 = vst [vmem:[#allocation141_spill] sm:$0xff] %v8092_v51  ;;  %2137 = vmatpush1.bf16.msra.mxu0 %v7405_v37  ;;  %2178 = vmatpush1.bf16.msra.mxu1 %v7409_v43 }
 0x107   :  { %11415 = vst [vmem:[#allocation142_spill] sm:$0xff] %v8096_v52  ;;  %2138 = vmatprep.subr.bf16.mxu0 %v7411_v44  ;;  %2179 = vmatprep.subr.bf16.mxu1 %v7414_v45 }
 0x108   :  { %v571_v13 = vpop.f32.mrb[8].mxu0  ;;  %v684_v48 = vpop.f32.mrb[8].mxu1 }
 0x109   :  { %v8103_v56 = vadd.f32 %v571_v13, %v8033_v35  ;;  %v573_v51 = vpop.f32.mrb[9].mxu0  ;;  %v8106_v47 = vadd.f32 %v684_v48, %v8040_v49  ;;  %v686_v52 = vpop.f32.mrb[9].mxu1 }
 0x10a   :  { %v8109_v42 = vadd.f32 %v573_v51, %v8043_v54  ;;  %v575_v11 = vpop.f32.mrb[10].mxu0  ;;  %2139 = vmatpush1.bf16.msra.mxu0 %v7431_v53  ;;  %v8113_v10 = vadd.f32 %v686_v52, %v8049_v57  ;;  %v688_v13 = vpop.f32.mrb[10].mxu1  ;;  %2180 = vmatpush1.bf16.msra.mxu1 %v7435_v59 }
 0x10b   :  { %11416 = vst [vmem:[#allocation143_spill] sm:$0xff] %v8103_v56  ;;  %11417 = vst [vmem:[#allocation144_spill] sm:$0xff] %v8106_v47  ;;  %v8116_v3 = vadd.f32 %v575_v11, %v8033_v35  ;;  %v577_v56 = vpop.f32.mrb[11].mxu0  ;;  %2140 = vmatprep.subr.bf16.mxu0 %v7437_v60  ;;  %v8121_v48 = vadd.f32 %v688_v13, %v8040_v49  ;;  %2181 = vmatprep.subr.bf16.mxu1 %v7441_v61  ;;  %v11424_v11 = vld [vmem:[#allocation47_spill] sm:$0xff] }
 0x10c   :  { %11418 = vst [vmem:[#allocation145_spill] sm:$0xff] %v8109_v42  ;;  %11419 = vst [vmem:[#allocation146_spill] sm:$0xff] %v8113_v10  ;;  %v8124_v51 = vadd.f32 %v577_v56, %v8043_v54  ;;  %v690_v42 = vpop.f32.mrb[11].mxu1  ;;  %v11425_v10 = vld [vmem:[#allocation48_spill] sm:$0xff]  ;;  %v11433_v61 = vld [vmem:[#allocation51_spill] sm:$0xff] }
 0x10d   :  { %11420 = vst [vmem:[#allocation147_spill] sm:$0xff] %v8116_v3  ;;  %11421 = vst [vmem:[#allocation148_spill] sm:$0xff] %v8121_v48  ;;  %v8128_v52 = vadd.f32 %v690_v42, %v8049_v57 }
 0x10e   :  { %11422 = vst [vmem:[#allocation149_spill] sm:$0xff] %v8124_v51  ;;  %2141 = vmatpush1.bf16.msra.mxu0 %v7457_v5  ;;  %2182 = vmatpush1.bf16.msra.mxu1 %v7461_v6  ;;  %v11429_v5 = vld [vmem:[#allocation49_spill] sm:$0xff]  ;;  %v11432_v6 = vld [vmem:[#allocation50_spill] sm:$0xff] }
 0x10f   :  { %11423 = vst [vmem:[#allocation150_spill] sm:$0xff] %v8128_v52  ;;  %2142 = vmatprep.subr.bf16.mxu0 %v11424_v11  ;;  %2183 = vmatprep.subr.bf16.mxu1 %v11425_v10 }
 0x110   :  { %v581_v3 = vpop.f32.mrb[12].mxu0  ;;  %v694_v56 = vpop.f32.mrb[12].mxu1 }
 0x111   :  { %v8135_v13 = vadd.f32 %v581_v3, %v8033_v35  ;;  %v583_v51 = vpop.f32.mrb[13].mxu0  ;;  %v8138_v48 = vadd.f32 %v694_v56, %v8040_v49  ;;  %v696_v52 = vpop.f32.mrb[13].mxu1 }
 0x112   :  { %v8141_v42 = vadd.f32 %v583_v51, %v8043_v54  ;;  %v585_v47 = vpop.f32.mrb[14].mxu0  ;;  %2143 = vmatpush1.bf16.msra.mxu0 %v11429_v5  ;;  %v8145_v11 = vadd.f32 %v696_v52, %v8049_v57  ;;  %v698_v3 = vpop.f32.mrb[14].mxu1  ;;  %2184 = vmatpush1.bf16.msra.mxu1 %v11432_v6  ;;  %v11449_v5 = vld [vmem:[#allocation59_spill] sm:$0xff] }
 0x113   :  { %11426 = vst [vmem:[#allocation151_spill] sm:$0xff] %v8135_v13  ;;  %11427 = vst [vmem:[#allocation152_spill] sm:$0xff] %v8138_v48  ;;  %v8148_v10 = vadd.f32 %v585_v47, %v8033_v35  ;;  %v587_v13 = vpop.f32.mrb[15].mxu0  ;;  %2144 = vmatprep.subr.bf16.mxu0 %v11433_v61  ;;  %v8153_v56 = vadd.f32 %v698_v3, %v8040_v49  ;;  %v11436_v48 = vld [vmem:[#allocation52_spill] sm:$0xff]  ;;  %v11438_v47 = vld [vmem:[#allocation53_spill] sm:$0xff] }
 0x114   :  { %11428 = vst [vmem:[#allocation153_spill] sm:$0xff] %v8141_v42  ;;  %11430 = vst [vmem:[#allocation154_spill] sm:$0xff] %v8145_v11  ;;  %v8156_v51 = vadd.f32 %v587_v13, %v8043_v54  ;;  %v700_v42 = vpop.f32.mrb[15].mxu1  ;;  %2185 = vmatprep.subr.bf16.mxu1 %v11436_v48  ;;  %v11440_v11 = vld [vmem:[#allocation55_spill] sm:$0xff]  ;;  %v11441_v61 = vld [vmem:[#allocation56_spill] sm:$0xff] }
 0x115   :  { %11431 = vst [vmem:[#allocation155_spill] sm:$0xff] %v8148_v10  ;;  %11434 = vst [vmem:[#allocation156_spill] sm:$0xff] %v8153_v56  ;;  %v8160_v52 = vadd.f32 %v700_v42, %v8049_v57  ;;  %v11439_v10 = vld [vmem:[#allocation54_spill] sm:$0xff]  ;;  %v11445_v48 = vld [vmem:[#allocation57_spill] sm:$0xff] }
 0x116   :  { %11435 = vst [vmem:[#allocation157_spill] sm:$0xff] %v8156_v51  ;;  %2145 = vmatpush1.bf16.msra.mxu0 %v11438_v47  ;;  %2186 = vmatpush1.bf16.msra.mxu1 %v11439_v10  ;;  %v11448_v10 = vld [vmem:[#allocation58_spill] sm:$0xff] }
 0x117   :  { %11437 = vst [vmem:[#allocation158_spill] sm:$0xff] %v8160_v52  ;;  %2146 = vmatprep.subr.bf16.mxu0 %v11440_v11  ;;  %2187 = vmatprep.subr.bf16.mxu1 %v11441_v61 }
 0x118   :  { %v591_v6 = vpop.f32.mrb[16].mxu0  ;;  %v704_v13 = vpop.f32.mrb[16].mxu1 }
 0x119   :  { %v8167_v3 = vadd.f32 %v591_v6, %v8033_v35  ;;  %v593_v51 = vpop.f32.mrb[17].mxu0  ;;  %v8170_v56 = vadd.f32 %v704_v13, %v8040_v49  ;;  %v706_v52 = vpop.f32.mrb[17].mxu1 }
 0x11a   :  { %v8173_v42 = vadd.f32 %v593_v51, %v8043_v54  ;;  %v595_v47 = vpop.f32.mrb[18].mxu0  ;;  %2147 = vmatpush1.bf16.msra.mxu0 %v11445_v48  ;;  %v8177_v11 = vadd.f32 %v706_v52, %v8049_v57  ;;  %v708_v6 = vpop.f32.mrb[18].mxu1  ;;  %2188 = vmatpush1.bf16.msra.mxu1 %v11448_v10  ;;  %v11465_v48 = vld [vmem:[#allocation67_spill] sm:$0xff] }
 0x11b   :  { %11442 = vst [vmem:[#allocation159_spill] sm:$0xff] %v8167_v3  ;;  %11443 = vst [vmem:[#allocation160_spill] sm:$0xff] %v8170_v56  ;;  %v8180_v61 = vadd.f32 %v595_v47, %v8033_v35  ;;  %v597_v3 = vpop.f32.mrb[19].mxu0  ;;  %2148 = vmatprep.subr.bf16.mxu0 %v11449_v5  ;;  %v8185_v13 = vadd.f32 %v708_v6, %v8040_v49  ;;  %v11452_v56 = vld [vmem:[#allocation60_spill] sm:$0xff]  ;;  %v11454_v47 = vld [vmem:[#allocation61_spill] sm:$0xff] }
 0x11c   :  { %11444 = vst [vmem:[#allocation161_spill] sm:$0xff] %v8173_v42  ;;  %11446 = vst [vmem:[#allocation162_spill] sm:$0xff] %v8177_v11  ;;  %v8188_v51 = vadd.f32 %v597_v3, %v8043_v54  ;;  %v710_v42 = vpop.f32.mrb[19].mxu1  ;;  %2189 = vmatprep.subr.bf16.mxu1 %v11452_v56  ;;  %v11456_v11 = vld [vmem:[#allocation63_spill] sm:$0xff]  ;;  %v11457_v5 = vld [vmem:[#allocation64_spill] sm:$0xff] }
 0x11d   :  { %11447 = vst [vmem:[#allocation163_spill] sm:$0xff] %v8180_v61  ;;  %11450 = vst [vmem:[#allocation164_spill] sm:$0xff] %v8185_v13  ;;  %v8192_v52 = vadd.f32 %v710_v42, %v8049_v57  ;;  %v11455_v61 = vld [vmem:[#allocation62_spill] sm:$0xff]  ;;  %v11461_v56 = vld [vmem:[#allocation65_spill] sm:$0xff] }
 0x11e   :  { %11451 = vst [vmem:[#allocation165_spill] sm:$0xff] %v8188_v51  ;;  %2149 = vmatpush1.bf16.msra.mxu0 %v11454_v47  ;;  %2190 = vmatpush1.bf16.msra.mxu1 %v11455_v61  ;;  %v11464_v61 = vld [vmem:[#allocation66_spill] sm:$0xff] }
 0x11f   :  { %11453 = vst [vmem:[#allocation166_spill] sm:$0xff] %v8192_v52  ;;  %2150 = vmatprep.subr.bf16.mxu0 %v11456_v11  ;;  %2191 = vmatprep.subr.bf16.mxu1 %v11457_v5 }
 0x120   :  { %v601_v10 = vpop.f32.mrb[20].mxu0  ;;  %v714_v3 = vpop.f32.mrb[20].mxu1 }
 0x121   :  { %v8199_v6 = vadd.f32 %v601_v10, %v8033_v35  ;;  %v603_v51 = vpop.f32.mrb[21].mxu0  ;;  %v8202_v13 = vadd.f32 %v714_v3, %v8040_v49  ;;  %v716_v52 = vpop.f32.mrb[21].mxu1 }
 0x122   :  { %v8205_v42 = vadd.f32 %v603_v51, %v8043_v54  ;;  %v605_v47 = vpop.f32.mrb[22].mxu0  ;;  %2151 = vmatpush1.bf16.msra.mxu0 %v11461_v56  ;;  %v8209_v11 = vadd.f32 %v716_v52, %v8049_v57  ;;  %v718_v10 = vpop.f32.mrb[22].mxu1  ;;  %2192 = vmatpush1.bf16.msra.mxu1 %v11464_v61 }
 0x123   :  { %11458 = vst [vmem:[#allocation167_spill] sm:$0xff] %v8199_v6  ;;  %11459 = vst [vmem:[#allocation168_spill] sm:$0xff] %v8202_v13  ;;  %v8212_v5 = vadd.f32 %v605_v47, %v8033_v35  ;;  %v607_v6 = vpop.f32.mrb[23].mxu0  ;;  %2202 = vmatprep.subr.bf16.mxu0 %v11465_v48  ;;  %v8217_v3 = vadd.f32 %v718_v10, %v8040_v49  ;;  %v11468_v13 = vld [vmem:[#allocation68_spill] sm:$0xff] }
 0x124   :  { %11460 = vst [vmem:[#allocation169_spill] sm:$0xff] %v8205_v42  ;;  %11462 = vst [vmem:[#allocation170_spill] sm:$0xff] %v8209_v11  ;;  %v8220_v51 = vadd.f32 %v607_v6, %v8043_v54  ;;  %v720_v42 = vpop.f32.mrb[23].mxu1  ;;  %2243 = vmatprep.subr.bf16.mxu1 %v11468_v13 }
 0x125   :  { %11463 = vst [vmem:[#allocation171_spill] sm:$0xff] %v8212_v5  ;;  %11466 = vst [vmem:[#allocation172_spill] sm:$0xff] %v8217_v3  ;;  %v8224_v52 = vadd.f32 %v720_v42, %v8049_v57 }
 0x126   :  { %11467 = vst [vmem:[#allocation173_spill] sm:$0xff] %v8220_v51 }
 0x127   :  { %11469 = vst [vmem:[#allocation174_spill] sm:$0xff] %v8224_v52 }
 0x128   :  { %v611_v47 = vpop.f32.mrb[24].mxu0  ;;  %v724_v11 = vpop.f32.mrb[24].mxu1 }
 0x129   :  { %v8227_v5 = vadd.f32 %v611_v47, %v8033_v35  ;;  %v613_v61 = vpop.f32.mrb[25].mxu0  ;;  %v8230_v48 = vadd.f32 %v724_v11, %v8040_v49  ;;  %v726_v6 = vpop.f32.mrb[25].mxu1 }
 0x12a   :  { %v8233_v10 = vadd.f32 %v613_v61, %v8043_v54  ;;  %v615_v51 = vpop.f32.mrb[26].mxu0  ;;  %v8236_v3 = vadd.f32 %v726_v6, %v8049_v57  ;;  %v728_v52 = vpop.f32.mrb[26].mxu1 }
 0x12b   :  { %11470 = vst [vmem:[#allocation175_spill] sm:$0xff] %v8227_v5  ;;  %11471 = vst [vmem:[#allocation176_spill] sm:$0xff] %v8230_v48  ;;  %v8239_v42 = vadd.f32 %v615_v51, %v8033_v35  ;;  %v617_v13 = vpop.f32.mrb[27].mxu0  ;;  %v8242_v47 = vadd.f32 %v728_v52, %v8040_v49  ;;  %v730_v11 = vpop.f32.mrb[27].mxu1 }
 0x12c   :  { %11472 = vst [vmem:[#allocation177_spill] sm:$0xff] %v8233_v10  ;;  %11473 = vst [vmem:[#allocation178_spill] sm:$0xff] %v8236_v3  ;;  %v8245_v5 = vadd.f32 %v617_v13, %v8043_v54  ;;  %v8248_v61 = vadd.f32 %v730_v11, %v8049_v57 }
 0x12d   :  { %11474 = vst [vmem:[#allocation179_spill] sm:$0xff] %v8239_v42  ;;  %11475 = vst [vmem:[#allocation180_spill] sm:$0xff] %v8242_v47 }
 0x12e   :  { %11476 = vst [vmem:[#allocation181_spill] sm:$0xff] %v8245_v5  ;;  %11477 = vst [vmem:[#allocation182_spill] sm:$0xff] %v8248_v61 }
 0x130   :  { %v621_v10 = vpop.f32.mrb[28].mxu0  ;;  %v734_v6 = vpop.f32.mrb[28].mxu1 }
 0x131   :  { %v8251_v48 = vadd.f32 %v621_v10, %v8033_v35  ;;  %v623_v3 = vpop.f32.mrb[29].mxu0  ;;  %v8254_v51 = vadd.f32 %v734_v6, %v8040_v49  ;;  %v736_v52 = vpop.f32.mrb[29].mxu1 }
 0x132   :  { %v8257_v42 = vadd.f32 %v623_v3, %v8043_v54  ;;  %v625_v47 = vpop.f32.mrb[30].mxu0  ;;  %v8260_v13 = vadd.f32 %v736_v52, %v8049_v57  ;;  %v738_v61 = vpop.f32.mrb[30].mxu1  ;;  %v135_v52 = vsub.s32 6, %v8011_v8 }
 0x133   :  { %11478 = vst [vmem:[#allocation183_spill] sm:$0xff] %v8251_v48  ;;  %11479 = vst [vmem:[#allocation184_spill] sm:$0xff] %v8254_v51  ;;  %v8263_v11 = vadd.f32 %v625_v47, %v8033_v35  ;;  %v627_v5 = vpop.f32.mrb[31].mxu0  ;;  %v8266_v10 = vadd.f32 %v738_v61, %v8040_v49  ;;  %v740_v6 = vpop.f32.mrb[31].mxu1  ;;  %v139_v47 = vsub.s32 7, %v8011_v8 }
 0x134   :  { %11480 = vst [vmem:[#allocation185_spill] sm:$0xff] %v8257_v42  ;;  %11481 = vst [vmem:[#allocation186_spill] sm:$0xff] %v8260_v13  ;;  %v8269_v48 = vadd.f32 %v627_v5, %v8043_v54  ;;  %v8272_v3 = vadd.f32 %v740_v6, %v8049_v57  ;;  %v127_v42 = vsub.s32 4, %v8011_v8  ;;  %v131_v13 = vsub.s32 5, %v8011_v8 }
 0x135   :  { %11482 = vst [vmem:[#allocation187_spill] sm:$0xff] %v8263_v11  ;;  %11483 = vst [vmem:[#allocation188_spill] sm:$0xff] %v8266_v10  ;;  %v8288_v6 = vrot.slane %v8021_v62, %v135_v52  ;;  %v8296_v8 = vrot.slane %v8021_v62, %v139_v47 }
 0x136   :  { %11484 = vst [vmem:[#allocation189_spill] sm:$0xff] %v8269_v48  ;;  %11485 = vst [vmem:[#allocation190_spill] sm:$0xff] %v8272_v3  ;;  %v8281_v61 = vrot.slane %v8021_v62, %v127_v42  ;;  %v8291_v3 = vrot.slane %v8021_v62, %v131_v13 }
 0x138   :  { %v8278_v11 = vpop.f32.mrb[32].mxu0  ;;  %v8283_v10 = vpop.f32.mrb[32].mxu1 }
 0x139   :  { %v8285_v5 = vpop.f32.mrb[33].mxu0  ;;  %v8293_v48 = vpop.f32.mrb[33].mxu1 }
 0x13a   :  { %v781_v51 = vpop.f32.mrb[34].mxu0  ;;  %v894_v42 = vpop.f32.mrb[34].mxu1 }
 0x13b   :  { %v8299_v56 = vadd.f32 %v781_v51, %v8281_v61  ;;  %v783_v60 = vpop.f32.mrb[35].mxu0  ;;  %v8302_v59 = vadd.f32 %v894_v42, %v8288_v6  ;;  %v896_v53 = vpop.f32.mrb[35].mxu1 }
 0x13c   :  { %v8305_v52 = vadd.f32 %v783_v60, %v8291_v3  ;;  %v8308_v13 = vadd.f32 %v896_v53, %v8296_v8 }
 0x13d   :  { %11486 = vst [vmem:[#allocation191_spill] sm:$0xff] %v8299_v56  ;;  %11487 = vst [vmem:[#allocation192_spill] sm:$0xff] %v8302_v59 }
 0x13e   :  { %11488 = vst [vmem:[#allocation193_spill] sm:$0xff] %v8305_v52  ;;  %11489 = vst [vmem:[#allocation194_spill] sm:$0xff] %v8308_v13 }
 0x140   :  { %v787_v45 = vpop.f32.mrb[36].mxu0  ;;  %v900_v62 = vpop.f32.mrb[36].mxu1 }
 0x141   :  { %v8311_v44 = vadd.f32 %v787_v45, %v8281_v61  ;;  %v789_v47 = vpop.f32.mrb[37].mxu0  ;;  %v8314_v51 = vadd.f32 %v900_v62, %v8288_v6  ;;  %v902_v42 = vpop.f32.mrb[37].mxu1 }
 0x142   :  { %v8317_v56 = vadd.f32 %v789_v47, %v8291_v3  ;;  %v791_v59 = vpop.f32.mrb[38].mxu0  ;;  %v8320_v60 = vadd.f32 %v902_v42, %v8296_v8  ;;  %v904_v13 = vpop.f32.mrb[38].mxu1 }
 0x143   :  { %11490 = vst [vmem:[#allocation195_spill] sm:$0xff] %v8311_v44  ;;  %11491 = vst [vmem:[#allocation196_spill] sm:$0xff] %v8314_v51  ;;  %v8323_v53 = vadd.f32 %v791_v59, %v8281_v61  ;;  %v793_v52 = vpop.f32.mrb[39].mxu0  ;;  %v8326_v45 = vadd.f32 %v904_v13, %v8288_v6  ;;  %v906_v62 = vpop.f32.mrb[39].mxu1 }
 0x144   :  { %11492 = vst [vmem:[#allocation197_spill] sm:$0xff] %v8317_v56  ;;  %11493 = vst [vmem:[#allocation198_spill] sm:$0xff] %v8320_v60  ;;  %v8329_v44 = vadd.f32 %v793_v52, %v8291_v3  ;;  %v8332_v47 = vadd.f32 %v906_v62, %v8296_v8 }
 0x145   :  { %11494 = vst [vmem:[#allocation199_spill] sm:$0xff] %v8323_v53  ;;  %11495 = vst [vmem:[#allocation200_spill] sm:$0xff] %v8326_v45 }
 0x146   :  { %11496 = vst [vmem:[#allocation201_spill] sm:$0xff] %v8329_v44  ;;  %11497 = vst [vmem:[#allocation202_spill] sm:$0xff] %v8332_v47 }
 0x148   :  { %v797_v56 = vpop.f32.mrb[40].mxu0  ;;  %v910_v42 = vpop.f32.mrb[40].mxu1 }
 0x149   :  { %v8335_v51 = vadd.f32 %v797_v56, %v8281_v61  ;;  %v799_v60 = vpop.f32.mrb[41].mxu0  ;;  %v8338_v59 = vadd.f32 %v910_v42, %v8288_v6  ;;  %v912_v13 = vpop.f32.mrb[41].mxu1 }
 0x14a   :  { %v8341_v53 = vadd.f32 %v799_v60, %v8291_v3  ;;  %v801_v45 = vpop.f32.mrb[42].mxu0  ;;  %v8344_v52 = vadd.f32 %v912_v13, %v8296_v8  ;;  %v914_v47 = vpop.f32.mrb[42].mxu1 }
 0x14b   :  { %11498 = vst [vmem:[#allocation203_spill] sm:$0xff] %v8335_v51  ;;  %11499 = vst [vmem:[#allocation204_spill] sm:$0xff] %v8338_v59  ;;  %v8347_v62 = vadd.f32 %v801_v45, %v8281_v61  ;;  %v803_v44 = vpop.f32.mrb[43].mxu0  ;;  %v8350_v56 = vadd.f32 %v914_v47, %v8288_v6  ;;  %v916_v42 = vpop.f32.mrb[43].mxu1 }
 0x14c   :  { %11500 = vst [vmem:[#allocation205_spill] sm:$0xff] %v8341_v53  ;;  %11501 = vst [vmem:[#allocation206_spill] sm:$0xff] %v8344_v52  ;;  %v8353_v51 = vadd.f32 %v803_v44, %v8291_v3  ;;  %v8356_v60 = vadd.f32 %v916_v42, %v8296_v8 }
 0x14d   :  { %11502 = vst [vmem:[#allocation207_spill] sm:$0xff] %v8347_v62  ;;  %11503 = vst [vmem:[#allocation208_spill] sm:$0xff] %v8350_v56 }
 0x14e   :  { %11504 = vst [vmem:[#allocation209_spill] sm:$0xff] %v8353_v51  ;;  %11505 = vst [vmem:[#allocation210_spill] sm:$0xff] %v8356_v60 }
 0x150   :  { %v807_v53 = vpop.f32.mrb[44].mxu0  ;;  %v920_v13 = vpop.f32.mrb[44].mxu1 }
 0x151   :  { %v8359_v59 = vadd.f32 %v807_v53, %v8281_v61  ;;  %v809_v52 = vpop.f32.mrb[45].mxu0  ;;  %v8362_v45 = vadd.f32 %v920_v13, %v8288_v6  ;;  %v922_v47 = vpop.f32.mrb[45].mxu1 }
 0x152   :  { %v8365_v62 = vadd.f32 %v809_v52, %v8291_v3  ;;  %v811_v56 = vpop.f32.mrb[46].mxu0  ;;  %v8368_v44 = vadd.f32 %v922_v47, %v8296_v8  ;;  %v924_v60 = vpop.f32.mrb[46].mxu1 }
 0x153   :  { %11506 = vst [vmem:[#allocation211_spill] sm:$0xff] %v8359_v59  ;;  %11507 = vst [vmem:[#allocation212_spill] sm:$0xff] %v8362_v45  ;;  %v8371_v42 = vadd.f32 %v811_v56, %v8281_v61  ;;  %v813_v51 = vpop.f32.mrb[47].mxu0  ;;  %v8374_v53 = vadd.f32 %v924_v60, %v8288_v6  ;;  %v926_v13 = vpop.f32.mrb[47].mxu1 }
 0x154   :  { %11508 = vst [vmem:[#allocation213_spill] sm:$0xff] %v8365_v62  ;;  %11509 = vst [vmem:[#allocation214_spill] sm:$0xff] %v8368_v44  ;;  %v8377_v59 = vadd.f32 %v813_v51, %v8291_v3  ;;  %v8380_v52 = vadd.f32 %v926_v13, %v8296_v8 }
 0x155   :  { %11510 = vst [vmem:[#allocation215_spill] sm:$0xff] %v8371_v42  ;;  %11511 = vst [vmem:[#allocation216_spill] sm:$0xff] %v8374_v53 }
 0x156   :  { %11512 = vst [vmem:[#allocation217_spill] sm:$0xff] %v8377_v59  ;;  %11513 = vst [vmem:[#allocation218_spill] sm:$0xff] %v8380_v52 }
 0x158   :  { %v817_v62 = vpop.f32.mrb[48].mxu0  ;;  %v930_v47 = vpop.f32.mrb[48].mxu1 }
 0x159   :  { %v8383_v45 = vadd.f32 %v817_v62, %v8281_v61  ;;  %v819_v44 = vpop.f32.mrb[49].mxu0  ;;  %v8386_v56 = vadd.f32 %v930_v47, %v8288_v6  ;;  %v932_v60 = vpop.f32.mrb[49].mxu1 }
 0x15a   :  { %v8389_v42 = vadd.f32 %v819_v44, %v8291_v3  ;;  %v821_v53 = vpop.f32.mrb[50].mxu0  ;;  %v8392_v51 = vadd.f32 %v932_v60, %v8296_v8  ;;  %v934_v52 = vpop.f32.mrb[50].mxu1 }
 0x15b   :  { %11514 = vst [vmem:[#allocation219_spill] sm:$0xff] %v8383_v45  ;;  %11515 = vst [vmem:[#allocation220_spill] sm:$0xff] %v8386_v56  ;;  %v8395_v13 = vadd.f32 %v821_v53, %v8281_v61  ;;  %v823_v59 = vpop.f32.mrb[51].mxu0  ;;  %v8398_v62 = vadd.f32 %v934_v52, %v8288_v6  ;;  %v936_v47 = vpop.f32.mrb[51].mxu1 }
 0x15c   :  { %11516 = vst [vmem:[#allocation221_spill] sm:$0xff] %v8389_v42  ;;  %11517 = vst [vmem:[#allocation222_spill] sm:$0xff] %v8392_v51  ;;  %v8401_v45 = vadd.f32 %v823_v59, %v8291_v3  ;;  %v8404_v44 = vadd.f32 %v936_v47, %v8296_v8 }
 0x15d   :  { %11518 = vst [vmem:[#allocation223_spill] sm:$0xff] %v8395_v13  ;;  %11519 = vst [vmem:[#allocation224_spill] sm:$0xff] %v8398_v62 }
 0x15e   :  { %11520 = vst [vmem:[#allocation225_spill] sm:$0xff] %v8401_v45  ;;  %11521 = vst [vmem:[#allocation226_spill] sm:$0xff] %v8404_v44 }
 0x160   :  { %v827_v42 = vpop.f32.mrb[52].mxu0  ;;  %v940_v60 = vpop.f32.mrb[52].mxu1 }
 0x161   :  { %v8407_v56 = vadd.f32 %v827_v42, %v8281_v61  ;;  %v829_v51 = vpop.f32.mrb[53].mxu0  ;;  %v8410_v53 = vadd.f32 %v940_v60, %v8288_v6  ;;  %v942_v52 = vpop.f32.mrb[53].mxu1 }
 0x162   :  { %v8413_v13 = vadd.f32 %v829_v51, %v8291_v3  ;;  %v831_v62 = vpop.f32.mrb[54].mxu0  ;;  %v8416_v59 = vadd.f32 %v942_v52, %v8296_v8  ;;  %v944_v44 = vpop.f32.mrb[54].mxu1 }
 0x163   :  { %11522 = vst [vmem:[#allocation227_spill] sm:$0xff] %v8407_v56  ;;  %11523 = vst [vmem:[#allocation228_spill] sm:$0xff] %v8410_v53  ;;  %v8419_v47 = vadd.f32 %v831_v62, %v8281_v61  ;;  %v833_v45 = vpop.f32.mrb[55].mxu0  ;;  %v8422_v42 = vadd.f32 %v944_v44, %v8288_v6  ;;  %v946_v60 = vpop.f32.mrb[55].mxu1 }
 0x164   :  { %11524 = vst [vmem:[#allocation229_spill] sm:$0xff] %v8413_v13  ;;  %11525 = vst [vmem:[#allocation230_spill] sm:$0xff] %v8416_v59  ;;  %v8425_v56 = vadd.f32 %v833_v45, %v8291_v3  ;;  %v8428_v51 = vadd.f32 %v946_v60, %v8296_v8 }
 0x165   :  { %11526 = vst [vmem:[#allocation231_spill] sm:$0xff] %v8419_v47  ;;  %11527 = vst [vmem:[#allocation232_spill] sm:$0xff] %v8422_v42 }
 0x166   :  { %11528 = vst [vmem:[#allocation233_spill] sm:$0xff] %v8425_v56  ;;  %11529 = vst [vmem:[#allocation234_spill] sm:$0xff] %v8428_v51 }
 0x168   :  { %v837_v13 = vpop.f32.mrb[56].mxu0  ;;  %v950_v52 = vpop.f32.mrb[56].mxu1 }
 0x169   :  { %v8431_v53 = vadd.f32 %v837_v13, %v8281_v61  ;;  %v839_v59 = vpop.f32.mrb[57].mxu0  ;;  %v8434_v62 = vadd.f32 %v950_v52, %v8288_v6  ;;  %v952_v44 = vpop.f32.mrb[57].mxu1 }
 0x16a   :  { %v8437_v47 = vadd.f32 %v839_v59, %v8291_v3  ;;  %v841_v42 = vpop.f32.mrb[58].mxu0  ;;  %v8440_v45 = vadd.f32 %v952_v44, %v8296_v8  ;;  %v954_v51 = vpop.f32.mrb[58].mxu1 }
 0x16b   :  { %11530 = vst [vmem:[#allocation235_spill] sm:$0xff] %v8431_v53  ;;  %11531 = vst [vmem:[#allocation236_spill] sm:$0xff] %v8434_v62  ;;  %v8443_v60 = vadd.f32 %v841_v42, %v8281_v61  ;;  %v843_v56 = vpop.f32.mrb[59].mxu0  ;;  %v8446_v13 = vadd.f32 %v954_v51, %v8288_v6  ;;  %v956_v52 = vpop.f32.mrb[59].mxu1 }
 0x16c   :  { %11532 = vst [vmem:[#allocation237_spill] sm:$0xff] %v8437_v47  ;;  %11533 = vst [vmem:[#allocation238_spill] sm:$0xff] %v8440_v45  ;;  %v8449_v53 = vadd.f32 %v843_v56, %v8291_v3  ;;  %v8452_v59 = vadd.f32 %v956_v52, %v8296_v8 }
 0x16d   :  { %11534 = vst [vmem:[#allocation239_spill] sm:$0xff] %v8443_v60  ;;  %11535 = vst [vmem:[#allocation240_spill] sm:$0xff] %v8446_v13 }
 0x16e   :  { %11536 = vst [vmem:[#allocation241_spill] sm:$0xff] %v8449_v53  ;;  %11537 = vst [vmem:[#allocation242_spill] sm:$0xff] %v8452_v59 }
 0x170   :  { %v847_v47 = vpop.f32.mrb[60].mxu0  ;;  %v960_v44 = vpop.f32.mrb[60].mxu1 }
 0x171   :  { %v8455_v62 = vadd.f32 %v847_v47, %v8281_v61  ;;  %v849_v45 = vpop.f32.mrb[61].mxu0  ;;  %v8458_v42 = vadd.f32 %v960_v44, %v8288_v6  ;;  %v962_v51 = vpop.f32.mrb[61].mxu1 }
 0x172   :  { %v8461_v60 = vadd.f32 %v849_v45, %v8291_v3  ;;  %v851_v13 = vpop.f32.mrb[62].mxu0  ;;  %v8464_v56 = vadd.f32 %v962_v51, %v8296_v8  ;;  %v964_v59 = vpop.f32.mrb[62].mxu1  ;;  %v665_v51 = vadd.f32 %v8035_v36, %v8040_v49 }
 0x173   :  { %11538 = vst [vmem:[#allocation243_spill] sm:$0xff] %v8455_v62  ;;  %11539 = vst [vmem:[#allocation244_spill] sm:$0xff] %v8458_v42  ;;  %v8467_v52 = vadd.f32 %v851_v13, %v8281_v61  ;;  %v853_v53 = vpop.f32.mrb[63].mxu0  ;;  %v8470_v47 = vadd.f32 %v964_v59, %v8288_v6  ;;  %v966_v44 = vpop.f32.mrb[63].mxu1  ;;  %v554_v13 = vadd.f32 %v8037_v50, %v8043_v54 }
 0x174   :  { %11540 = vst [vmem:[#allocation245_spill] sm:$0xff] %v8461_v60  ;;  %11541 = vst [vmem:[#allocation246_spill] sm:$0xff] %v8464_v56  ;;  %v8473_v62 = vadd.f32 %v853_v53, %v8291_v3  ;;  %v8476_v45 = vadd.f32 %v966_v44, %v8296_v8  ;;  %v552_v60 = vadd.f32 %v8029_v46, %v8033_v35 }
 0x175   :  { %11542 = vst [vmem:[#allocation247_spill] sm:$0xff] %v8467_v52  ;;  %11543 = vst [vmem:[#allocation248_spill] sm:$0xff] %v8470_v47  ;;  %v667_v59 = vadd.f32 %v8045_v55, %v8049_v57 }
 0x176   :  { %11544 = vst [vmem:[#allocation249_spill] sm:$0xff] %v8473_v62  ;;  %11545 = vst [vmem:[#allocation250_spill] sm:$0xff] %v8476_v45 }
 0x178   :  { %v1911_v52 = vpop.f32.mrb[64].mxu0  ;;  %v1952_v53 = vpop.f32.mrb[64].mxu1 }
 0x179   :  { %v2041_v47 = vadd.f32 %v1911_v52, %v552_v60  ;;  %v1913_v62 = vpop.f32.mrb[65].mxu0  ;;  %v2043_v56 = vadd.f32 %v1952_v53, %v665_v51  ;;  %v1954_v44 = vpop.f32.mrb[65].mxu1 }
 0x17a   :  { %v2042_v42 = vadd.f32 %v1913_v62, %v554_v13  ;;  %v1915_v45 = vpop.f32.mrb[66].mxu0  ;;  %v2044_v43 = vadd.f32 %v1954_v44, %v667_v59  ;;  %v1956_v37 = vpop.f32.mrb[66].mxu1 }
 0x17b   :  { %v1916_v46 = vpop.f32.mrb[67].mxu0  ;;  %v1957_v35 = vpop.f32.mrb[67].mxu1  ;;  %v6158_v30 = vmul.f32 -1.442695, %v2041_v47  ;;  %v6160_v49 = vmul.f32 -1.442695, %v2043_v56  ;;  %v778_v37 = vadd.f32 %v8278_v11, %v8281_v61 }
 0x17c   :  { %v6159_v36 = vmul.f32 -1.442695, %v2042_v42  ;;  %v6161_v29 = vmul.f32 -1.442695, %v2044_v43  ;;  %v891_v42 = vadd.f32 %v8283_v10, %v8288_v6  ;;  %v893_v43 = vadd.f32 %v8293_v48, %v8296_v8 }
 0x17d   :  { %6344 = vpow2.f32 %v6158_v30  ;;  %v780_v30 = vadd.f32 %v8285_v5, %v8291_v3 }
 0x17e   :  { %6346 = vpow2.f32 %v6160_v49 }
 0x17f   :  { %6348 = vpow2.f32 %v6159_v36 }
 0x180   :  { %6350 = vpow2.f32 %v6161_v29 }
 0x187   :  { %v6345_v50 = vpop.eup %6344 }
 0x188   :  { %v6347_v54 = vpop.eup %6346  ;;  %v2055_v60 = vadd.f32 1.0, %v6345_v50 }
 0x189   :  { %v6349_v55 = vpop.eup %6348  ;;  %v2067_v62 = vadd.f32 1.0, %v6347_v54 }
 0x18a   :  { %v6351_v57 = vpop.eup %6350  ;;  %v2056_v52 = vadd.f32 1.0, %v6349_v55  ;;  %6352 = vrcp.f32 %v2055_v60 }
 0x18b   :  { %v2068_v45 = vadd.f32 1.0, %v6351_v57  ;;  %6354 = vrcp.f32 %v2067_v62 }
 0x18c   :  { %6356 = vrcp.f32 %v2056_v52 }
 0x18d   :  { %6358 = vrcp.f32 %v2068_v45 }
 0x194   :  { %v6353_v48 = vpop.eup %6352 }
 0x195   :  { %v6355_v8 = vpop.eup %6354 }
 0x196   :  { %v6357_v46 = vpop.eup %6356  ;;  %v2087_v50 = vmul.f32 0.0, %v6355_v8  ;;  %v11555_v8 = vld [vmem:[#allocation76_spill] sm:$0xff] }
 0x197   :  { %v6359_v35 = vpop.eup %6358 }
 0x198   :  { %v2088_v55 = vmul.f32 0.0, %v6359_v35  ;;  %v11557_v35 = vld [vmem:[#allocation78_spill] sm:$0xff] }
 0x1b8   :  { %v1993_v29 = vpop.f32.mrb[68].mxu0  ;;  %v2034_v47 = vpop.f32.mrb[68].mxu1 }
 0x1b9   :  { %v2045_v56 = vadd.f32 %v1993_v29, %v778_v37  ;;  %v1995_v51 = vpop.f32.mrb[69].mxu0  ;;  %v2047_v13 = vadd.f32 %v2034_v47, %v891_v42  ;;  %v2036_v11 = vpop.f32.mrb[69].mxu1 }
 0x1ba   :  { %v2046_v59 = vadd.f32 %v1995_v51, %v780_v30  ;;  %v1997_v61 = vpop.f32.mrb[70].mxu0  ;;  %v2048_v53 = vadd.f32 %v2036_v11, %v893_v43  ;;  %v2038_v10 = vpop.f32.mrb[70].mxu1 }
 0x1bb   :  { %6360 = vtanh.f32 %v2045_v56  ;;  %v1998_v6 = vpop.f32.mrb[71].mxu0  ;;  %v6162_v44 = vmul.f32 -1.442695, %v2047_v13  ;;  %v2039_v3 = vpop.f32.mrb[71].mxu1  ;;  %v11549_v10 = vld [vmem:[#allocation70_spill] sm:$0xff] }
 0x1bc   :  { %6362 = vtanh.f32 %v2046_v59  ;;  %v6163_v5 = vmul.f32 -1.442695, %v2048_v53  ;;  %v8502_v51 = vpop.permute.xlu0 %2100  ;;  %v11548_v53 = vld [vmem:[#allocation69_spill] sm:$0xff]  ;;  %v11550_v6 = vld [vmem:[#allocation71_spill] sm:$0xff]  ;;  %v11599_v59 = vld [vmem:[#allocation16_spill] sm:$0xff] }
 0x1bd   :  { %6364 = vpow2.f32 %v6162_v44  ;;  %vm2102_vm8 = vcmp.eq.s32.totalorder %v8502_v51, 1  ;;  %v11551_v44 = vld [vmem:[#allocation72_spill] sm:$0xff]  ;;  %v11552_v3 = vld [vmem:[#allocation73_spill] sm:$0xff] }
 0x1be   :  { %6366 = vpow2.f32 %v6163_v5  ;;  %vm8510_vm9 = vmpackc.low %vm2102_vm8, %vm2102_vm8  ;;  %v11553_v5 = vld [vmem:[#allocation74_spill] sm:$0xff]  ;;  %v11654_v51 = vld [vmem:[#allocation84_spill] sm:$0xff] }
 0x1c5   :  { %v6361_v49 = vpop.eup %6360 }
 0x1c6   :  { %v6363_v36 = vpop.eup %6362  ;;  %v2089_v54 = vmul.f32 %v6361_v49, %v6353_v48  ;;  %v11554_v48 = vld [vmem:[#allocation75_spill] sm:$0xff] }
 0x1c7   :  { %v2090_v57 = vmul.f32 %v6363_v36, %v6357_v46  ;;  %v6365_v60 = vpop.eup %6364  ;;  %v11556_v46 = vld [vmem:[#allocation77_spill] sm:$0xff]  ;;  %v11558_v49 = vld [vmem:[#allocation79_spill] sm:$0xff]  ;;  %v11559_v36 = vld [vmem:[#allocation80_spill] sm:$0xff] }
 0x1c8   :  { %v8494_v62 = vadd.f32 %v2089_v54, %v2087_v50  ;;  %v6367_v52 = vpop.eup %6366  ;;  %v2081_v45 = vadd.f32 1.0, %v6365_v60  ;;  %v11560_v50 = vld [vmem:[#allocation81_spill] sm:$0xff]  ;;  %v11561_v54 = vld [vmem:[#allocation82_spill] sm:$0xff] }
 0x1c9   :  { %v8496_v37 = vadd.f32 %v2090_v57, %v2088_v55  ;;  %v2082_v42 = vadd.f32 1.0, %v6367_v52  ;;  %v11562_v55 = vld [vmem:[#allocation83_spill] sm:$0xff]  ;;  %v11563_v57 = vld [vmem:[#allocation84_spill] sm:$0xff]  ;;  %v11564_v60 = vld [vmem:[#allocation85_spill] sm:$0xff] }
 0x1ca   :  { %6368 = vtanh.f32 %v8494_v62  ;;  %v11565_v52 = vld [vmem:[#allocation86_spill] sm:$0xff] }
 0x1cb   :  { %6370 = vrcp.f32 %v2081_v45  ;;  %v11566_v45 = vld [vmem:[#allocation87_spill] sm:$0xff] }
 0x1cc   :  { %6372 = vrcp.f32 %v2082_v42  ;;  %v11567_v42 = vld [vmem:[#allocation88_spill] sm:$0xff] }
 0x1cd   :  { %6374 = vtanh.f32 %v8496_v37 }
 0x1d4   :  { %v6369_v30 = vpop.eup %6368 }
 0x1d5   :  { %v6371_v29 = vpop.eup %6370 }
 0x1d6   :  { %v6373_v43 = vpop.eup %6372  ;;  %v8500_v56 = vmul.f32 %v6371_v29, %v6369_v30  ;;  %v11568_v30 = vld [vmem:[#allocation89_spill] sm:$0xff]  ;;  %v11569_v29 = vld [vmem:[#allocation90_spill] sm:$0xff] }
 0x1d7   :  { %v6375_v47 = vpop.eup %6374 }
 0x1d8   :  { %v8504_v13 = vmul.f32 %v6375_v47, %v6373_v43  ;;  %v8518_v61 = vpack.c.bf16 %v8500_v56, %v8500_v56  ;;  %v11570_v43 = vld [vmem:[#allocation91_spill] sm:$0xff]  ;;  %v11571_v47 = vld [vmem:[#allocation92_spill] sm:$0xff] }
 0x1da   :  { %v6165_v11 = vpack.c.bf16 %v8504_v13, %v8504_v13 }
 0x1dc   :  { %6166 = vmatprep.mubr.msk.bf16.mxu0 %vm8510_vm9, %v6165_v11  ;;  %6172 = vmatprep.mubr.msk.bf16.mxu1 %vm8510_vm9, %v6165_v11 }
 0x1dd   :  { %6169 = vmatmul.mubr.msk.bf16.vlgmr.msra.gmra.mrb[72].mxu0 %vm8510_vm9, %v8518_v61  ;;  %6175 = vmatmul.mubr.msk.bf16.vlgmr.msra.gmra.mrb[72].mxu1 %vm8510_vm9, %v8518_v61 }
 0x1de   :  { %2203 = vmatpush1.bf16.msra.mxu0 %v11548_v53  ;;  %2244 = vmatpush1.bf16.msra.mxu1 %v11549_v10 }
 0x1df   :  { %6178 = vmatprep.mubr.msk.bf16.mxu0 %vm8510_vm9, %v6165_v11  ;;  %6184 = vmatprep.mubr.msk.bf16.mxu1 %vm8510_vm9, %v6165_v11  ;;  %v11572_v11 = vld [vmem:[#allocation93_spill] sm:$0xff] }
 0x1e0   :  { %2204 = vmatprep.subr.bf16.mxu0 %v11550_v6  ;;  %2245 = vmatprep.subr.bf16.mxu1 %v11551_v44 }
 0x1e2   :  { %2205 = vmatpush1.bf16.msra.mxu0 %v11552_v3  ;;  %2246 = vmatpush1.bf16.msra.mxu1 %v11553_v5 }
 0x1e3   :  { %2206 = vmatprep.subr.bf16.mxu0 %v11554_v48  ;;  %2247 = vmatprep.subr.bf16.mxu1 %v11555_v8 }
 0x1e6   :  { %2207 = vmatpush1.bf16.msra.mxu0 %v11556_v46  ;;  %2248 = vmatpush1.bf16.msra.mxu1 %v11557_v35 }
 0x1e7   :  { %2208 = vmatprep.subr.bf16.mxu0 %v11558_v49  ;;  %2249 = vmatprep.subr.bf16.mxu1 %v11559_v36 }
 0x1ea   :  { %2209 = vmatpush1.bf16.msra.mxu0 %v11560_v50  ;;  %2250 = vmatpush1.bf16.msra.mxu1 %v11561_v54 }
 0x1eb   :  { %2210 = vmatprep.subr.bf16.mxu0 %v11562_v55  ;;  %2251 = vmatprep.subr.bf16.mxu1 %v11563_v57  ;;  %v11573_v55 = vld [vmem:[#allocation94_spill] sm:$0xff]  ;;  %v11574_v57 = vld [vmem:[#allocation95_spill] sm:$0xff] }
 0x1ee   :  { %2211 = vmatpush1.bf16.msra.mxu0 %v11564_v60  ;;  %2252 = vmatpush1.bf16.msra.mxu1 %v11565_v52  ;;  %v11575_v60 = vld [vmem:[#allocation96_spill] sm:$0xff]  ;;  %v11576_v52 = vld [vmem:[#allocation97_spill] sm:$0xff] }
 0x1ef   :  { %2212 = vmatprep.subr.bf16.mxu0 %v11566_v45  ;;  %2253 = vmatprep.subr.bf16.mxu1 %v11567_v42  ;;  %v11577_v45 = vld [vmem:[#allocation98_spill] sm:$0xff]  ;;  %v11578_v42 = vld [vmem:[#allocation99_spill] sm:$0xff] }
 0x1f2   :  { %2213 = vmatpush1.bf16.msra.mxu0 %v11568_v30  ;;  %2254 = vmatpush1.bf16.msra.mxu1 %v11569_v29  ;;  %v11579_v30 = vld [vmem:[#allocation100_spill] sm:$0xff]  ;;  %v11580_v29 = vld [vmem:[#allocation101_spill] sm:$0xff] }
 0x1f3   :  { %2214 = vmatprep.subr.bf16.mxu0 %v11570_v43  ;;  %2255 = vmatprep.subr.bf16.mxu1 %v11571_v47  ;;  %v11581_v43 = vld [vmem:[#allocation102_spill] sm:$0xff]  ;;  %v11582_v47 = vld [vmem:[#allocation103_spill] sm:$0xff] }
 0x1f6   :  { %2215 = vmatpush1.bf16.msra.mxu0 %v11572_v11  ;;  %2256 = vmatpush1.bf16.msra.mxu1 %v11573_v55  ;;  %v11583_v11 = vld [vmem:[#allocation104_spill] sm:$0xff]  ;;  %v11584_v55 = vld [vmem:[#allocation105_spill] sm:$0xff] }
 0x1f7   :  { %2216 = vmatprep.subr.bf16.mxu0 %v11574_v57  ;;  %2257 = vmatprep.subr.bf16.mxu1 %v11575_v60  ;;  %v11585_v57 = vld [vmem:[#allocation106_spill] sm:$0xff]  ;;  %v11586_v60 = vld [vmem:[#allocation107_spill] sm:$0xff] }
 0x1fa   :  { %2217 = vmatpush1.bf16.msra.mxu0 %v11576_v52  ;;  %2258 = vmatpush1.bf16.msra.mxu1 %v11577_v45  ;;  %v11587_v52 = vld [vmem:[#allocation108_spill] sm:$0xff]  ;;  %v11588_v45 = vld [vmem:[#allocation109_spill] sm:$0xff] }
 0x1fb   :  { %2218 = vmatprep.subr.bf16.mxu0 %v11578_v42  ;;  %2259 = vmatprep.subr.bf16.mxu1 %v11579_v30  ;;  %v11589_v42 = vld [vmem:[#allocation110_spill] sm:$0xff]  ;;  %v11590_v30 = vld [vmem:[#allocation111_spill] sm:$0xff] }
 0x1fe   :  { %2219 = vmatpush1.bf16.msra.mxu0 %v11580_v29  ;;  %2260 = vmatpush1.bf16.msra.mxu1 %v11581_v43  ;;  %v11591_v29 = vld [vmem:[#allocation112_spill] sm:$0xff]  ;;  %v11592_v43 = vld [vmem:[#allocation113_spill] sm:$0xff] }
 0x1ff   :  { %2220 = vmatprep.subr.bf16.mxu0 %v11582_v47  ;;  %2261 = vmatprep.subr.bf16.mxu1 %v11583_v11  ;;  %v11593_v47 = vld [vmem:[#allocation114_spill] sm:$0xff]  ;;  %v11594_v11 = vld [vmem:[#allocation115_spill] sm:$0xff] }
 0x202   :  { %2221 = vmatpush1.bf16.msra.mxu0 %v11584_v55  ;;  %2262 = vmatpush1.bf16.msra.mxu1 %v11585_v57  ;;  %v11595_v55 = vld [vmem:[#allocation116_spill] sm:$0xff] }
 0x203   :  { %2222 = vmatprep.subr.bf16.mxu0 %v11586_v60  ;;  %2263 = vmatprep.subr.bf16.mxu1 %v11587_v52  ;;  %v11596_v60 = vld [vmem:[#allocation118_spill] sm:$0xff]  ;;  %v11597_v52 = vld [vmem:[#allocation119_spill] sm:$0xff] }
 0x206   :  { %2223 = vmatpush1.bf16.msra.mxu0 %v11588_v45  ;;  %2264 = vmatpush1.bf16.msra.mxu1 %v11589_v42  ;;  %v11598_v45 = vld [vmem:[#allocation120_spill] sm:$0xff] }
 0x207   :  { %2224 = vmatprep.subr.bf16.mxu0 %v11590_v30  ;;  %2265 = vmatprep.subr.bf16.mxu1 %v11591_v29 }
 0x20a   :  { %2225 = vmatpush1.bf16.msra.mxu0 %v11592_v43  ;;  %2266 = vmatpush1.bf16.msra.mxu1 %v11593_v47 }
 0x20b   :  { %2226 = vmatprep.subr.bf16.mxu0 %v11594_v11  ;;  %2267 = vmatprep.subr.bf16.mxu1 %v11595_v55 }
 0x20e   :  { %2227 = vmatpush1.bf16.msra.mxu0 %v7922_v21  ;;  %2268 = vmatpush1.bf16.msra.mxu1 %v11596_v60 }
 0x20f   :  { %2228 = vmatprep.subr.bf16.mxu0 %v11597_v52  ;;  %2269 = vmatprep.subr.bf16.mxu1 %v11598_v45 }
 0x212   :  { %2229 = vmatpush1.bf16.msra.mxu0 %v7949_v17  ;;  %2270 = vmatpush1.bf16.msra.mxu1 %v7954_v15 }
 0x213   :  { %2230 = vmatprep.subr.bf16.mxu0 %v7956_v16  ;;  %2271 = vmatprep.subr.bf16.mxu1 %v7959_v58 }
 0x216   :  { %2231 = vmatpush1.bf16.msra.mxu0 %v7974_v20  ;;  %2272 = vmatpush1.bf16.msra.mxu1 %v7978_v25 }
 0x217   :  { %2232 = vmatprep.subr.bf16.mxu0 %v7980_v4  ;;  %2273 = vmatprep.subr.bf16.mxu1 %v7983_v41 }
 0x21a   :  { %2233 = vmatpush1.bf16.msra.mxu0 %v7986_v19  ;;  %2274 = vmatpush1.bf16.msra.mxu1 %v7990_v18 }
 0x21b   :  { %2363 = vmatprep.subr.bf16.mxu0 %v7146_v12  ;;  %2404 = vmatprep.subr.bf16.mxu1 %v7153_v14 }
 0x21d   :  { %6181 = vmatmul.mubr.msk.bf16.vlgmr.msra.gmra.mrb[76].mxu0 %vm8510_vm9, %v8518_v61  ;;  %6187 = vmatmul.mubr.msk.bf16.vlgmr.msra.gmra.mrb[76].mxu1 %vm8510_vm9, %v8518_v61  ;;  %v11600_v61 = vld [vmem:[#allocation17_spill] sm:$0xff] }
 0x21e   :  { %2364 = vmatpush1.bf16.msra.mxu0 %v7200_v22  ;;  %2405 = vmatpush1.bf16.msra.mxu1 %v7202_v23 }
 0x21f   :  { %2365 = vmatprep.subr.bf16.mxu0 %v7204_v24  ;;  %2406 = vmatprep.subr.bf16.mxu1 %v7206_v26  ;;  %v11601_v24 = vld [vmem:[#allocation18_spill] sm:$0xff]  ;;  %v11602_v26 = vld [vmem:[#allocation19_spill] sm:$0xff] }
 0x222   :  { %2366 = vmatpush1.bf16.msra.mxu0 %v7223_v31  ;;  %2407 = vmatpush1.bf16.msra.mxu1 %v7227_v32  ;;  %v11603_v31 = vld [vmem:[#allocation20_spill] sm:$0xff]  ;;  %v11604_v32 = vld [vmem:[#allocation21_spill] sm:$0xff] }
 0x223   :  { %2367 = vmatprep.subr.bf16.mxu0 %v7229_v33  ;;  %2408 = vmatprep.subr.bf16.mxu1 %v7233_v34  ;;  %v11605_v33 = vld [vmem:[#allocation22_spill] sm:$0xff]  ;;  %v11606_v34 = vld [vmem:[#allocation23_spill] sm:$0xff] }
 0x226   :  { %2368 = vmatpush1.bf16.msra.mxu0 %v7249_v38  ;;  %2409 = vmatpush1.bf16.msra.mxu1 %v7253_v39  ;;  %v11607_v38 = vld [vmem:[#allocation24_spill] sm:$0xff] }
 0x227   :  { %2369 = vmatprep.subr.bf16.mxu0 %v7255_v40  ;;  %2410 = vmatprep.subr.bf16.mxu1 %v11599_v59 }
 0x22a   :  { %2370 = vmatpush1.bf16.msra.mxu0 %v11600_v61  ;;  %2411 = vmatpush1.bf16.msra.mxu1 %v11601_v24  ;;  %v11646_v24 = vld [vmem:[#allocation133_spill] sm:$0xff]  ;;  %v11647_v61 = vld [vmem:[#allocation134_spill] sm:$0xff] }
 0x22b   :  { %2371 = vmatprep.subr.bf16.mxu0 %v11602_v26  ;;  %2412 = vmatprep.subr.bf16.mxu1 %v11603_v31  ;;  %v11608_v31 = vld [vmem:[#allocation31_spill] sm:$0xff] }
 0x22e   :  { %2372 = vmatpush1.bf16.msra.mxu0 %v11604_v32  ;;  %2413 = vmatpush1.bf16.msra.mxu1 %v11605_v33  ;;  %v11609_v32 = vld [vmem:[#allocation32_spill] sm:$0xff] }
 0x22f   :  { %2373 = vmatprep.subr.bf16.mxu0 %v11606_v34  ;;  %2414 = vmatprep.subr.bf16.mxu1 %v11607_v38  ;;  %v11610_v38 = vld [vmem:[#allocation35_spill] sm:$0xff]  ;;  %v11645_v33 = vld [vmem:[#allocation132_spill] sm:$0xff] }
 0x230   :  { %v11644_v34 = vld [vmem:[#allocation131_spill] sm:$0xff] }
 0x232   :  { %2374 = vmatpush1.bf16.msra.mxu0 %v7327_v63  ;;  %2415 = vmatpush1.bf16.msra.mxu1 %v7331_v0  ;;  %v11611_v63 = vld [vmem:[#allocation36_spill] sm:$0xff]  ;;  %v11612_v0 = vld [vmem:[#allocation37_spill] sm:$0xff] }
 0x233   :  { %2375 = vmatprep.subr.bf16.mxu0 %v7333_v1  ;;  %2416 = vmatprep.subr.bf16.mxu1 %v7337_v2  ;;  %v11613_v1 = vld [vmem:[#allocation38_spill] sm:$0xff]  ;;  %v11614_v2 = vld [vmem:[#allocation39_spill] sm:$0xff] }
 0x236   :  { %2376 = vmatpush1.bf16.msra.mxu0 %v7353_v7  ;;  %2417 = vmatpush1.bf16.msra.mxu1 %v7357_v9  ;;  %v11615_v7 = vld [vmem:[#allocation40_spill] sm:$0xff]  ;;  %v11616_v9 = vld [vmem:[#allocation41_spill] sm:$0xff] }
 0x237   :  { %2377 = vmatprep.subr.bf16.mxu0 %v11608_v31  ;;  %2418 = vmatprep.subr.bf16.mxu1 %v11609_v32  ;;  %v11617_v31 = vld [vmem:[#allocation42_spill] sm:$0xff]  ;;  %v11618_v32 = vld [vmem:[#allocation43_spill] sm:$0xff] }
 0x23a   :  { %2378 = vmatpush1.bf16.msra.mxu0 %v7379_v27  ;;  %2419 = vmatpush1.bf16.msra.mxu1 %v7383_v28  ;;  %v11619_v27 = vld [vmem:[#allocation44_spill] sm:$0xff]  ;;  %v11620_v28 = vld [vmem:[#allocation45_spill] sm:$0xff] }
 0x23b   :  { %2379 = vmatprep.subr.bf16.mxu0 %v11610_v38  ;;  %2420 = vmatprep.subr.bf16.mxu1 %v11611_v63  ;;  %v11621_v38 = vld [vmem:[#allocation46_spill] sm:$0xff]  ;;  %v11622_v63 = vld [vmem:[#allocation47_spill] sm:$0xff] }
 0x23e   :  { %2380 = vmatpush1.bf16.msra.mxu0 %v11612_v0  ;;  %2421 = vmatpush1.bf16.msra.mxu1 %v11613_v1  ;;  %v11623_v0 = vld [vmem:[#allocation48_spill] sm:$0xff]  ;;  %v11624_v1 = vld [vmem:[#allocation49_spill] sm:$0xff] }
 0x23f   :  { %2381 = vmatprep.subr.bf16.mxu0 %v11614_v2  ;;  %2422 = vmatprep.subr.bf16.mxu1 %v11615_v7  ;;  %v11625_v2 = vld [vmem:[#allocation50_spill] sm:$0xff]  ;;  %v11626_v7 = vld [vmem:[#allocation51_spill] sm:$0xff] }
 0x242   :  { %2382 = vmatpush1.bf16.msra.mxu0 %v11616_v9  ;;  %2423 = vmatpush1.bf16.msra.mxu1 %v11617_v31  ;;  %v11627_v9 = vld [vmem:[#allocation52_spill] sm:$0xff]  ;;  %v11628_v31 = vld [vmem:[#allocation53_spill] sm:$0xff] }
 0x243   :  { %2383 = vmatprep.subr.bf16.mxu0 %v11618_v32  ;;  %2424 = vmatprep.subr.bf16.mxu1 %v11619_v27  ;;  %v11629_v32 = vld [vmem:[#allocation54_spill] sm:$0xff]  ;;  %v11630_v27 = vld [vmem:[#allocation55_spill] sm:$0xff] }
 0x246   :  { %2384 = vmatpush1.bf16.msra.mxu0 %v11620_v28  ;;  %2425 = vmatpush1.bf16.msra.mxu1 %v11621_v38  ;;  %v11631_v28 = vld [vmem:[#allocation56_spill] sm:$0xff]  ;;  %v11632_v38 = vld [vmem:[#allocation57_spill] sm:$0xff] }
 0x247   :  { %2385 = vmatprep.subr.bf16.mxu0 %v11622_v63  ;;  %2426 = vmatprep.subr.bf16.mxu1 %v11623_v0  ;;  %v11633_v63 = vld [vmem:[#allocation58_spill] sm:$0xff]  ;;  %v11634_v0 = vld [vmem:[#allocation59_spill] sm:$0xff] }
 0x24a   :  { %2386 = vmatpush1.bf16.msra.mxu0 %v11624_v1  ;;  %2427 = vmatpush1.bf16.msra.mxu1 %v11625_v2  ;;  %v11635_v1 = vld [vmem:[#allocation60_spill] sm:$0xff]  ;;  %v11636_v2 = vld [vmem:[#allocation61_spill] sm:$0xff] }
 0x24b   :  { %2387 = vmatprep.subr.bf16.mxu0 %v11626_v7  ;;  %2428 = vmatprep.subr.bf16.mxu1 %v11627_v9  ;;  %v11637_v7 = vld [vmem:[#allocation62_spill] sm:$0xff]  ;;  %v11638_v9 = vld [vmem:[#allocation63_spill] sm:$0xff] }
 0x24e   :  { %2388 = vmatpush1.bf16.msra.mxu0 %v11628_v31  ;;  %2429 = vmatpush1.bf16.msra.mxu1 %v11629_v32  ;;  %v11639_v31 = vld [vmem:[#allocation64_spill] sm:$0xff]  ;;  %v11640_v32 = vld [vmem:[#allocation65_spill] sm:$0xff] }
 0x24f   :  { %2389 = vmatprep.subr.bf16.mxu0 %v11630_v27  ;;  %2430 = vmatprep.subr.bf16.mxu1 %v11631_v28  ;;  %v11641_v27 = vld [vmem:[#allocation66_spill] sm:$0xff]  ;;  %v11642_v28 = vld [vmem:[#allocation67_spill] sm:$0xff] }
 0x252   :  { %2390 = vmatpush1.bf16.msra.mxu0 %v11632_v38  ;;  %2431 = vmatpush1.bf16.msra.mxu1 %v11633_v63  ;;  %v11643_v38 = vld [vmem:[#allocation68_spill] sm:$0xff] }
 0x253   :  { %2391 = vmatprep.subr.bf16.mxu0 %v11634_v0  ;;  %2432 = vmatprep.subr.bf16.mxu1 %v11635_v1 }
 0x256   :  { %2392 = vmatpush1.bf16.msra.mxu0 %v11636_v2  ;;  %2433 = vmatpush1.bf16.msra.mxu1 %v11637_v7 }
 0x257   :  { %2393 = vmatprep.subr.bf16.mxu0 %v11638_v9  ;;  %2434 = vmatprep.subr.bf16.mxu1 %v11639_v31 }
 0x25a   :  { %2394 = vmatpush1.bf16.msra.mxu0 %v11640_v32  ;;  %2435 = vmatpush1.bf16.msra.mxu1 %v11641_v27 }
 0x25b   :  { %2445 = vmatprep.subr.bf16.mxu0 %v11642_v28  ;;  %2486 = vmatprep.subr.bf16.mxu1 %v11643_v38 }
 0x2b0   :  { %v2154_v63 = vpop.f32.mrb[72].mxu0  ;;  %v2195_v0 = vpop.f32.mrb[72].mxu1 }
 0x2b1   :  { %v2284_v1 = vadd.f32 %v2154_v63, %v11644_v34  ;;  %v2286_v2 = vadd.f32 %v2195_v0, %v11645_v33  ;;  %v2156_v26 = vpop.f32.mrb[73].mxu0  ;;  %v2197_v7 = vpop.f32.mrb[73].mxu1 }
 0x2b2   :  { %v2285_v9 = vadd.f32 %v2156_v26, %v11646_v24  ;;  %v2287_v31 = vadd.f32 %v2197_v7, %v11647_v61  ;;  %v2158_v59 = vpop.f32.mrb[74].mxu0  ;;  %v2199_v32 = vpop.f32.mrb[74].mxu1  ;;  %v8675_v24 = vsel %vm2102_vm8, %v8494_v62, 0.0 }
 0x2b3   :  { %v6190_v40 = vmul.f32 -1.442695, %v2286_v2  ;;  %v2159_v27 = vpop.f32.mrb[75].mxu0  ;;  %v2200_v39 = vpop.f32.mrb[75].mxu1  ;;  %v6188_v63 = vmul.f32 -1.442695, %v2284_v1 }
 0x2b4   :  { %v6191_v28 = vmul.f32 -1.442695, %v2287_v31  ;;  %v8683_v31 = vsel %vm2102_vm8, %v8496_v37, 0.0  ;;  %v6189_v0 = vmul.f32 -1.442695, %v2285_v9 }
 0x2b5   :  { %6376 = vpow2.f32 %v6190_v40 }
 0x2b6   :  { %6378 = vpow2.f32 %v6191_v28 }
 0x2bf   :  { %v6377_v38 = vpop.eup %6376 }
 0x2c0   :  { %v2310_v23 = vadd.f32 1.0, %v6377_v38  ;;  %v6379_v22 = vpop.eup %6378 }
 0x2c1   :  { %v2311_v34 = vadd.f32 1.0, %v6379_v22  ;;  %v6860_v22 = vld [vmem:[%s10998_s1] sm:$0xff] }
 0x2c2   :  { %6380 = vrcp.f32 %v2310_v23  ;;  %vm2583_vm10 = vcmp.gt.s32.totalorder %v6860_v22, 2  ;;  %vm2826_vm11 = vcmp.gt.s32.totalorder %v6860_v22, 3  ;;  %v11648_v23 = vmov 0  }
 0x2c3   :  { %6382 = vrcp.f32 %v2311_v34  ;;  %v2584_v39 = vsel %vm2583_vm10, 1, %v11648_v23  ;;  %v2827_v40 = vsel %vm2826_vm11, 1, %v11648_v23  ;;  %vm3312_vm12 = vcmp.gt.s32.totalorder %v6860_v22, 5 }
 0x2c4   :  { %2586 = vperm.xlu1 %6319, %v2584_v39   ;;  %v3313_v2 = vsel %vm3312_vm12, 1, %v11648_v23  ;;  %vm3798_vm13 = vcmp.gt.s32.totalorder %v6860_v22, 7  ;;  %6384 = vpow2.f32 %v6188_v63  ;;  %vm4284_vm14 = vcmp.gt.s32.totalorder %v6860_v22, 9  ;;  %v11650_v39 = vld [vmem:[#allocation192_spill] sm:$0xff] }
 0x2c5   :  { %6386 = vpow2.f32 %v6189_v0  ;;  %v3799_v7 = vsel %vm3798_vm13, 1, %v11648_v23  ;;  %v4285_v27 = vsel %vm4284_vm14, 1, %v11648_v23  ;;  %vm4770_vm15 = vcmp.gt.s32.totalorder %v6860_v22, 11 }
 0x2c6   :  { %v4771_v28 = vsel %vm4770_vm15, 1, %v11648_v23  ;;  %vm5256_vm0 = vcmp.gt.s32.totalorder %v6860_v22, 13  ;;  %vm5742_vm1 = vcmp.gt.s32.totalorder %v6860_v22, 15 }
 0x2c7   :  { %v5257_v37 = vsel %vm5256_vm0, 1, %v11648_v23 }
 0x2c8   :  { %2829 = vperm.xlu1 %6319, %v2827_v40  }
 0x2cc   :  { %v6381_v33 = vpop.eup %6380  ;;  %3315 = vperm.xlu1 %6319, %v3313_v2   ;;  %v5743_v2 = vsel %vm5742_vm1, 1, %v11648_v23 }
 0x2cd   :  { %v8678_v26 = vmul.f32 %v6381_v33, %v8675_v24  ;;  %v6383_v32 = vpop.eup %6382  ;;  %v11649_v33 = vld [vmem:[#allocation191_spill] sm:$0xff] }
 0x2ce   :  { %v8686_v38 = vmul.f32 %v6383_v32, %v8683_v31  ;;  %v6385_v62 = vpop.eup %6384 }
 0x2cf   :  { %v6387_v1 = vpop.eup %6386  ;;  %v2298_v9 = vadd.f32 1.0, %v6385_v62 }
 0x2d0   :  { %3801 = vperm.xlu1 %6319, %v3799_v7   ;;  %v2299_v59 = vadd.f32 1.0, %v6387_v1  ;;  %v11651_v7 = vld [vmem:[#allocation193_spill] sm:$0xff] }
 0x2d1   :  { %6388 = vrcp.f32 %v2298_v9 }
 0x2d2   :  { %6390 = vrcp.f32 %v2299_v59 }
 0x2d4   :  { %4287 = vperm.xlu1 %6319, %v4285_v27  }
 0x2d8   :  { %4773 = vperm.xlu1 %6319, %v4771_v28   ;;  %v11652_v28 = vld [vmem:[#allocation194_spill] sm:$0xff] }
 0x2dc   :  { %5259 = vperm.xlu1 %6319, %v5257_v37  }
 0x2e0   :  { %5745 = vperm.xlu1 %6319, %v5743_v2  }
 0x2f0   :  { %v2236_v61 = vpop.f32.mrb[76].mxu0  ;;  %v2277_v34 = vpop.f32.mrb[76].mxu1 }
 0x2f1   :  { %v2288_v32 = vadd.f32 %v2236_v61, %v11649_v33  ;;  %v2290_v40 = vadd.f32 %v2277_v34, %v11650_v39  ;;  %v2238_v63 = vpop.f32.mrb[77].mxu0  ;;  %v2279_v0 = vpop.f32.mrb[77].mxu1 }
 0x2f2   :  { %v2289_v27 = vadd.f32 %v2238_v63, %v11651_v7  ;;  %v2291_v62 = vadd.f32 %v2279_v0, %v11652_v28  ;;  %v2240_v14 = vpop.f32.mrb[78].mxu0  ;;  %v2281_v1 = vpop.f32.mrb[78].mxu1 }
 0x2f3   :  { %6392 = vtanh.f32 %v2288_v32  ;;  %v6192_v22 = vmul.f32 -1.442695, %v2290_v40  ;;  %v2241_v12 = vpop.f32.mrb[79].mxu0  ;;  %v2282_v37 = vpop.f32.mrb[79].mxu1 }
 0x2f4   :  { %6394 = vtanh.f32 %v2289_v27  ;;  %v6193_v9 = vmul.f32 -1.442695, %v2291_v62  ;;  %v6389_v61 = vpop.eup %6388  ;;  %v2344_v0 = vpop.permute.xlu0 %2343 }
 0x2f5   :  { %6396 = vpow2.f32 %v6192_v22  ;;  %v6391_v34 = vpop.eup %6390  ;;  %vm2345_vm2 = vcmp.eq.s32.totalorder %v2344_v0, 1  ;;  %v11662_v0 = vld [vmem:[#allocation92_spill] sm:$0xff] }
 0x2f6   :  { %6398 = vpow2.f32 %v6193_v9 }
 0x2fd   :  { %v6393_v33 = vpop.eup %6392 }
 0x2fe   :  { %v6395_v23 = vpop.eup %6394  ;;  %v2332_v59 = vmul.f32 %v6393_v33, %v6389_v61  ;;  %v11656_v33 = vld [vmem:[#allocation86_spill] sm:$0xff] }
 0x2ff   :  { %v6397_v39 = vpop.eup %6396  ;;  %v2333_v63 = vmul.f32 %v6395_v23, %v6391_v34  ;;  %v11657_v23 = vld [vmem:[#allocation87_spill] sm:$0xff] }
 0x300   :  { %v6399_v7 = vpop.eup %6398  ;;  %v2334_v14 = vadd.f32 %v2332_v59, %v8678_v26  ;;  %v2324_v32 = vadd.f32 1.0, %v6397_v39  ;;  %v11658_v59 = vld [vmem:[#allocation88_spill] sm:$0xff]  ;;  %v11659_v39 = vld [vmem:[#allocation89_spill] sm:$0xff] }
 0x301   :  { %v2335_v12 = vadd.f32 %v2333_v63, %v8686_v38  ;;  %v2325_v40 = vadd.f32 1.0, %v6399_v7  ;;  %v2103_v38 = vsel %vm2102_vm8, %v8500_v56, 0.0  ;;  %v11653_v56 = vld [vmem:[#allocation83_spill] sm:$0xff]  ;;  %v11660_v63 = vld [vmem:[#allocation90_spill] sm:$0xff] }
 0x302   :  { %6400 = vtanh.f32 %v2334_v14  ;;  %v8707_v2 = vsel %vm2345_vm2, %v2334_v14, %v8675_v24  ;;  %v11661_v7 = vld [vmem:[#allocation91_spill] sm:$0xff]  ;;  %v11663_v14 = vld [vmem:[#allocation93_spill] sm:$0xff] }
 0x303   :  { %6402 = vrcp.f32 %v2324_v32  ;;  %v8711_v27 = vsel %vm2345_vm2, %v2335_v12, %v8683_v31  ;;  %v2104_v31 = vsel %vm2102_vm8, %v8504_v13, 0.0  ;;  %v11655_v13 = vld [vmem:[#allocation85_spill] sm:$0xff]  ;;  %v11664_v32 = vld [vmem:[#allocation94_spill] sm:$0xff] }
 0x304   :  { %6404 = vtanh.f32 %v2335_v12  ;;  %v11665_v12 = vld [vmem:[#allocation95_spill] sm:$0xff] }
 0x305   :  { %6406 = vrcp.f32 %v2325_v40  ;;  %v11666_v40 = vld [vmem:[#allocation96_spill] sm:$0xff] }
 0x30c   :  { %v6401_v28 = vpop.eup %6400 }
 0x30d   :  { %v6403_v62 = vpop.eup %6402 }
 0x30e   :  { %v6405_v26 = vpop.eup %6404  ;;  %v2338_v1 = vmul.f32 %v6403_v62, %v6401_v28  ;;  %v11667_v28 = vld [vmem:[#allocation97_spill] sm:$0xff]  ;;  %v11668_v62 = vld [vmem:[#allocation98_spill] sm:$0xff] }
 0x30f   :  { %v6407_v22 = vpop.eup %6406 }
 0x310   :  { %v2339_v37 = vmul.f32 %v6407_v22, %v6405_v26  ;;  %v8717_v24 = vsel %vm2345_vm2, %v2338_v1, %v2103_v38  ;;  %v11669_v26 = vld [vmem:[#allocation99_spill] sm:$0xff]  ;;  %v11670_v1 = vld [vmem:[#allocation100_spill] sm:$0xff]  ;;  %v11671_v22 = vld [vmem:[#allocation101_spill] sm:$0xff] }
 0x311   :  { %v8729_v34 = vpack.c.bf16 %v8717_v24, %v8717_v24  ;;  %v11672_v38 = vld [vmem:[#allocation102_spill] sm:$0xff] }
 0x312   :  { %v8723_v9 = vsel %vm2345_vm2, %v2339_v37, %v2104_v31  ;;  %v11673_v37 = vld [vmem:[#allocation103_spill] sm:$0xff]  ;;  %v11674_v31 = vld [vmem:[#allocation104_spill] sm:$0xff] }
 0x313   :  { %v2362_v61 = vpack.c.bf16 %v8723_v9, %v8723_v9 }
 0x315   :  { %2395 = vmatprep.mubr.bf16.mxu0 %v2362_v61  ;;  %2436 = vmatprep.mubr.bf16.mxu1 %v2362_v61 }
 0x316   :  { %2396 = vmatmul.mubr.bf16.vlgmr.msra.gmra.mrb[80].mxu0 %v8729_v34  ;;  %2437 = vmatmul.mubr.bf16.vlgmr.msra.gmra.mrb[80].mxu1 %v8729_v34 }
 0x317   :  { %2446 = vmatpush1.bf16.msra.mxu0 %v11548_v53  ;;  %2487 = vmatpush1.bf16.msra.mxu1 %v11549_v10 }
 0x318   :  { %2477 = vmatprep.mubr.bf16.mxu0 %v2362_v61  ;;  %2518 = vmatprep.mubr.bf16.mxu1 %v2362_v61  ;;  %v11675_v61 = vld [vmem:[#allocation105_spill] sm:$0xff] }
 0x319   :  { %2447 = vmatprep.subr.bf16.mxu0 %v11550_v6  ;;  %2488 = vmatprep.subr.bf16.mxu1 %v11551_v44 }
 0x31b   :  { %2448 = vmatpush1.bf16.msra.mxu0 %v11552_v3  ;;  %2489 = vmatpush1.bf16.msra.mxu1 %v11553_v5 }
 0x31c   :  { %2449 = vmatprep.subr.bf16.mxu0 %v11554_v48  ;;  %2490 = vmatprep.subr.bf16.mxu1 %v11555_v8 }
 0x31f   :  { %2450 = vmatpush1.bf16.msra.mxu0 %v11556_v46  ;;  %2491 = vmatpush1.bf16.msra.mxu1 %v11557_v35 }
 0x320   :  { %2451 = vmatprep.subr.bf16.mxu0 %v11558_v49  ;;  %2492 = vmatprep.subr.bf16.mxu1 %v11559_v36 }
 0x323   :  { %2452 = vmatpush1.bf16.msra.mxu0 %v11560_v50  ;;  %2493 = vmatpush1.bf16.msra.mxu1 %v11561_v54 }
 0x324   :  { %2453 = vmatprep.subr.bf16.mxu0 %v11653_v56  ;;  %2494 = vmatprep.subr.bf16.mxu1 %v11654_v51 }
 0x327   :  { %2454 = vmatpush1.bf16.msra.mxu0 %v11655_v13  ;;  %2495 = vmatpush1.bf16.msra.mxu1 %v11656_v33 }
 0x328   :  { %2455 = vmatprep.subr.bf16.mxu0 %v11657_v23  ;;  %2496 = vmatprep.subr.bf16.mxu1 %v11658_v59 }
 0x32b   :  { %2456 = vmatpush1.bf16.msra.mxu0 %v11659_v39  ;;  %2497 = vmatpush1.bf16.msra.mxu1 %v11660_v63 }
 0x32c   :  { %2457 = vmatprep.subr.bf16.mxu0 %v11661_v7  ;;  %2498 = vmatprep.subr.bf16.mxu1 %v11662_v0 }
 0x32f   :  { %2458 = vmatpush1.bf16.msra.mxu0 %v11663_v14  ;;  %2499 = vmatpush1.bf16.msra.mxu1 %v11664_v32 }
 0x330   :  { %2459 = vmatprep.subr.bf16.mxu0 %v11665_v12  ;;  %2500 = vmatprep.subr.bf16.mxu1 %v11666_v40  ;;  %v11676_v40 = vld [vmem:[#allocation107_spill] sm:$0xff] }
 0x333   :  { %2460 = vmatpush1.bf16.msra.mxu0 %v11667_v28  ;;  %2501 = vmatpush1.bf16.msra.mxu1 %v11668_v62  ;;  %v11677_v28 = vld [vmem:[#allocation108_spill] sm:$0xff]  ;;  %v11678_v62 = vld [vmem:[#allocation109_spill] sm:$0xff] }
 0x334   :  { %2461 = vmatprep.subr.bf16.mxu0 %v11669_v26  ;;  %2502 = vmatprep.subr.bf16.mxu1 %v11670_v1 }
 0x337   :  { %2462 = vmatpush1.bf16.msra.mxu0 %v11671_v22  ;;  %2503 = vmatpush1.bf16.msra.mxu1 %v11672_v38 }
 0x338   :  { %2463 = vmatprep.subr.bf16.mxu0 %v11673_v37  ;;  %2504 = vmatprep.subr.bf16.mxu1 %v11674_v31 }
 0x33b   :  { %2464 = vmatpush1.bf16.msra.mxu0 %v11675_v61  ;;  %2505 = vmatpush1.bf16.msra.mxu1 %v11585_v57 }
 0x33c   :  { %2465 = vmatprep.subr.bf16.mxu0 %v11676_v40  ;;  %2506 = vmatprep.subr.bf16.mxu1 %v11677_v28 }
 0x33f   :  { %2466 = vmatpush1.bf16.msra.mxu0 %v11678_v62  ;;  %2507 = vmatpush1.bf16.msra.mxu1 %v11589_v42 }
 0x340   :  { %2467 = vmatprep.subr.bf16.mxu0 %v11590_v30  ;;  %2508 = vmatprep.subr.bf16.mxu1 %v11591_v29 }
 0x343   :  { %2468 = vmatpush1.bf16.msra.mxu0 %v11592_v43  ;;  %2509 = vmatpush1.bf16.msra.mxu1 %v11593_v47 }
 0x344   :  { %2469 = vmatprep.subr.bf16.mxu0 %v11594_v11  ;;  %2510 = vmatprep.subr.bf16.mxu1 %v11595_v55  ;;  %v11748_v55 = vld [vmem:[#allocation138_spill] sm:$0xff] }
 0x347   :  { %2470 = vmatpush1.bf16.msra.mxu0 %v7922_v21  ;;  %2511 = vmatpush1.bf16.msra.mxu1 %v11596_v60  ;;  %v11747_v21 = vld [vmem:[#allocation137_spill] sm:$0xff] }
 0x348   :  { %2471 = vmatprep.subr.bf16.mxu0 %v11597_v52  ;;  %2512 = vmatprep.subr.bf16.mxu1 %v11598_v45  ;;  %v11679_v45 = vld [vmem:[#allocation3_spill] sm:$0xff]  ;;  %v11746_v52 = vld [vmem:[#allocation136_spill] sm:$0xff] }
 0x34b   :  { %2472 = vmatpush1.bf16.msra.mxu0 %v7949_v17  ;;  %2513 = vmatpush1.bf16.msra.mxu1 %v7954_v15  ;;  %v11680_v17 = vld [vmem:[#allocation4_spill] sm:$0xff]  ;;  %v11745_v15 = vld [vmem:[#allocation135_spill] sm:$0xff] }
 0x34c   :  { %2473 = vmatprep.subr.bf16.mxu0 %v7956_v16  ;;  %2514 = vmatprep.subr.bf16.mxu1 %v7959_v58  ;;  %v11681_v58 = vld [vmem:[#allocation5_spill] sm:$0xff]  ;;  %v11690_v16 = vld [vmem:[#allocation14_spill] sm:$0xff] }
 0x34f   :  { %2474 = vmatpush1.bf16.msra.mxu0 %v7974_v20  ;;  %2515 = vmatpush1.bf16.msra.mxu1 %v7978_v25  ;;  %v11682_v20 = vld [vmem:[#allocation6_spill] sm:$0xff]  ;;  %v11683_v25 = vld [vmem:[#allocation7_spill] sm:$0xff] }
 0x350   :  { %2475 = vmatprep.subr.bf16.mxu0 %v7980_v4  ;;  %2516 = vmatprep.subr.bf16.mxu1 %v7983_v41  ;;  %v11684_v4 = vld [vmem:[#allocation8_spill] sm:$0xff]  ;;  %v11685_v41 = vld [vmem:[#allocation9_spill] sm:$0xff] }
 0x353   :  { %2476 = vmatpush1.bf16.msra.mxu0 %v7986_v19  ;;  %2517 = vmatpush1.bf16.msra.mxu1 %v7990_v18  ;;  %v11686_v19 = vld [vmem:[#allocation10_spill] sm:$0xff]  ;;  %v11687_v18 = vld [vmem:[#allocation11_spill] sm:$0xff] }
 0x354   :  { %2606 = vmatprep.subr.bf16.mxu0 %v11679_v45  ;;  %2647 = vmatprep.subr.bf16.mxu1 %v11680_v17  ;;  %v11688_v45 = vld [vmem:[#allocation12_spill] sm:$0xff]  ;;  %v11689_v17 = vld [vmem:[#allocation13_spill] sm:$0xff] }
 0x356   :  { %2478 = vmatmul.mubr.bf16.vlgmr.msra.gmra.mrb[84].mxu0 %v8729_v34  ;;  %2519 = vmatmul.mubr.bf16.vlgmr.msra.gmra.mrb[84].mxu1 %v8729_v34  ;;  %v11691_v34 = vld [vmem:[#allocation15_spill] sm:$0xff] }
 0x357   :  { %2607 = vmatpush1.bf16.msra.mxu0 %v11681_v58  ;;  %2648 = vmatpush1.bf16.msra.mxu1 %v11682_v20  ;;  %v11692_v58 = vld [vmem:[#allocation16_spill] sm:$0xff]  ;;  %v11693_v20 = vld [vmem:[#allocation17_spill] sm:$0xff] }
 0x358   :  { %2608 = vmatprep.subr.bf16.mxu0 %v11683_v25  ;;  %2649 = vmatprep.subr.bf16.mxu1 %v11684_v4  ;;  %v11694_v25 = vld [vmem:[#allocation18_spill] sm:$0xff]  ;;  %v11695_v4 = vld [vmem:[#allocation19_spill] sm:$0xff] }
 0x35b   :  { %2609 = vmatpush1.bf16.msra.mxu0 %v11685_v41  ;;  %2650 = vmatpush1.bf16.msra.mxu1 %v11686_v19  ;;  %v11696_v41 = vld [vmem:[#allocation20_spill] sm:$0xff]  ;;  %v11697_v19 = vld [vmem:[#allocation21_spill] sm:$0xff] }
 0x35c   :  { %2610 = vmatprep.subr.bf16.mxu0 %v11687_v18  ;;  %2651 = vmatprep.subr.bf16.mxu1 %v11688_v45  ;;  %v11698_v18 = vld [vmem:[#allocation22_spill] sm:$0xff]  ;;  %v11699_v45 = vld [vmem:[#allocation23_spill] sm:$0xff] }
 0x35f   :  { %2611 = vmatpush1.bf16.msra.mxu0 %v11689_v17  ;;  %2652 = vmatpush1.bf16.msra.mxu1 %v11690_v16  ;;  %v11700_v17 = vld [vmem:[#allocation24_spill] sm:$0xff]  ;;  %v11701_v16 = vld [vmem:[#allocation25_spill] sm:$0xff] }
 0x360   :  { %2612 = vmatprep.subr.bf16.mxu0 %v11691_v34  ;;  %2653 = vmatprep.subr.bf16.mxu1 %v11692_v58  ;;  %v11702_v34 = vld [vmem:[#allocation26_spill] sm:$0xff]  ;;  %v11703_v58 = vld [vmem:[#allocation27_spill] sm:$0xff] }
 0x363   :  { %2613 = vmatpush1.bf16.msra.mxu0 %v11693_v20  ;;  %2654 = vmatpush1.bf16.msra.mxu1 %v11694_v25  ;;  %v11704_v20 = vld [vmem:[#allocation28_spill] sm:$0xff]  ;;  %v11705_v25 = vld [vmem:[#allocation29_spill] sm:$0xff] }
 0x364   :  { %2614 = vmatprep.subr.bf16.mxu0 %v11695_v4  ;;  %2655 = vmatprep.subr.bf16.mxu1 %v11696_v41  ;;  %v11706_v4 = vld [vmem:[#allocation30_spill] sm:$0xff]  ;;  %v11707_v41 = vld [vmem:[#allocation31_spill] sm:$0xff] }
 0x367   :  { %2615 = vmatpush1.bf16.msra.mxu0 %v11697_v19  ;;  %2656 = vmatpush1.bf16.msra.mxu1 %v11698_v18  ;;  %v11708_v19 = vld [vmem:[#allocation32_spill] sm:$0xff]  ;;  %v11709_v18 = vld [vmem:[#allocation33_spill] sm:$0xff] }
 0x368   :  { %2616 = vmatprep.subr.bf16.mxu0 %v11699_v45  ;;  %2657 = vmatprep.subr.bf16.mxu1 %v11700_v17  ;;  %v11710_v45 = vld [vmem:[#allocation34_spill] sm:$0xff]  ;;  %v11711_v17 = vld [vmem:[#allocation35_spill] sm:$0xff] }
 0x36b   :  { %2617 = vmatpush1.bf16.msra.mxu0 %v11701_v16  ;;  %2658 = vmatpush1.bf16.msra.mxu1 %v11702_v34  ;;  %v11712_v16 = vld [vmem:[#allocation36_spill] sm:$0xff]  ;;  %v11713_v34 = vld [vmem:[#allocation37_spill] sm:$0xff] }
 0x36c   :  { %2618 = vmatprep.subr.bf16.mxu0 %v11703_v58  ;;  %2659 = vmatprep.subr.bf16.mxu1 %v11704_v20  ;;  %v11714_v58 = vld [vmem:[#allocation38_spill] sm:$0xff]  ;;  %v11715_v20 = vld [vmem:[#allocation39_spill] sm:$0xff] }
 0x36f   :  { %2619 = vmatpush1.bf16.msra.mxu0 %v11705_v25  ;;  %2660 = vmatpush1.bf16.msra.mxu1 %v11706_v4  ;;  %v11716_v25 = vld [vmem:[#allocation40_spill] sm:$0xff]  ;;  %v11717_v4 = vld [vmem:[#allocation41_spill] sm:$0xff] }
 0x370   :  { %2620 = vmatprep.subr.bf16.mxu0 %v11707_v41  ;;  %2661 = vmatprep.subr.bf16.mxu1 %v11708_v19  ;;  %v11718_v41 = vld [vmem:[#allocation42_spill] sm:$0xff]  ;;  %v11719_v19 = vld [vmem:[#allocation43_spill] sm:$0xff] }
 0x373   :  { %2621 = vmatpush1.bf16.msra.mxu0 %v11709_v18  ;;  %2662 = vmatpush1.bf16.msra.mxu1 %v11710_v45  ;;  %v11720_v18 = vld [vmem:[#allocation44_spill] sm:$0xff]  ;;  %v11721_v45 = vld [vmem:[#allocation45_spill] sm:$0xff] }
 0x374   :  { %2622 = vmatprep.subr.bf16.mxu0 %v11711_v17  ;;  %2663 = vmatprep.subr.bf16.mxu1 %v11712_v16  ;;  %v11722_v17 = vld [vmem:[#allocation46_spill] sm:$0xff]  ;;  %v11723_v16 = vld [vmem:[#allocation47_spill] sm:$0xff] }
 0x377   :  { %2623 = vmatpush1.bf16.msra.mxu0 %v11713_v34  ;;  %2664 = vmatpush1.bf16.msra.mxu1 %v11714_v58  ;;  %v11724_v34 = vld [vmem:[#allocation48_spill] sm:$0xff]  ;;  %v11725_v58 = vld [vmem:[#allocation49_spill] sm:$0xff] }
 0x378   :  { %2624 = vmatprep.subr.bf16.mxu0 %v11715_v20  ;;  %2665 = vmatprep.subr.bf16.mxu1 %v11716_v25  ;;  %v11726_v20 = vld [vmem:[#allocation50_spill] sm:$0xff]  ;;  %v11727_v25 = vld [vmem:[#allocation51_spill] sm:$0xff] }
 0x37b   :  { %2625 = vmatpush1.bf16.msra.mxu0 %v11717_v4  ;;  %2666 = vmatpush1.bf16.msra.mxu1 %v11718_v41  ;;  %v11728_v4 = vld [vmem:[#allocation52_spill] sm:$0xff]  ;;  %v11729_v41 = vld [vmem:[#allocation53_spill] sm:$0xff] }
 0x37c   :  { %2626 = vmatprep.subr.bf16.mxu0 %v11719_v19  ;;  %2667 = vmatprep.subr.bf16.mxu1 %v11720_v18  ;;  %v11730_v19 = vld [vmem:[#allocation54_spill] sm:$0xff]  ;;  %v11731_v18 = vld [vmem:[#allocation55_spill] sm:$0xff] }
 0x37f   :  { %2627 = vmatpush1.bf16.msra.mxu0 %v11721_v45  ;;  %2668 = vmatpush1.bf16.msra.mxu1 %v11722_v17  ;;  %v11732_v45 = vld [vmem:[#allocation56_spill] sm:$0xff]  ;;  %v11733_v17 = vld [vmem:[#allocation57_spill] sm:$0xff] }
 0x380   :  { %2628 = vmatprep.subr.bf16.mxu0 %v11723_v16  ;;  %2669 = vmatprep.subr.bf16.mxu1 %v11724_v34  ;;  %v11734_v16 = vld [vmem:[#allocation58_spill] sm:$0xff]  ;;  %v11735_v34 = vld [vmem:[#allocation59_spill] sm:$0xff] }
 0x383   :  { %2629 = vmatpush1.bf16.msra.mxu0 %v11725_v58  ;;  %2670 = vmatpush1.bf16.msra.mxu1 %v11726_v20  ;;  %v11736_v58 = vld [vmem:[#allocation60_spill] sm:$0xff]  ;;  %v11737_v20 = vld [vmem:[#allocation61_spill] sm:$0xff] }
 0x384   :  { %2630 = vmatprep.subr.bf16.mxu0 %v11727_v25  ;;  %2671 = vmatprep.subr.bf16.mxu1 %v11728_v4  ;;  %v11738_v25 = vld [vmem:[#allocation62_spill] sm:$0xff]  ;;  %v11739_v4 = vld [vmem:[#allocation63_spill] sm:$0xff] }
 0x387   :  { %2631 = vmatpush1.bf16.msra.mxu0 %v11729_v41  ;;  %2672 = vmatpush1.bf16.msra.mxu1 %v11730_v19  ;;  %v11740_v41 = vld [vmem:[#allocation64_spill] sm:$0xff]  ;;  %v11741_v19 = vld [vmem:[#allocation65_spill] sm:$0xff] }
 0x388   :  { %2632 = vmatprep.subr.bf16.mxu0 %v11731_v18  ;;  %2673 = vmatprep.subr.bf16.mxu1 %v11732_v45  ;;  %v11742_v18 = vld [vmem:[#allocation66_spill] sm:$0xff]  ;;  %v11743_v45 = vld [vmem:[#allocation67_spill] sm:$0xff] }
 0x38b   :  { %2633 = vmatpush1.bf16.msra.mxu0 %v11733_v17  ;;  %2674 = vmatpush1.bf16.msra.mxu1 %v11734_v16  ;;  %v11744_v17 = vld [vmem:[#allocation68_spill] sm:$0xff] }
 0x38c   :  { %2634 = vmatprep.subr.bf16.mxu0 %v11735_v34  ;;  %2675 = vmatprep.subr.bf16.mxu1 %v11736_v58 }
 0x38f   :  { %2635 = vmatpush1.bf16.msra.mxu0 %v11737_v20  ;;  %2676 = vmatpush1.bf16.msra.mxu1 %v11738_v25 }
 0x390   :  { %2636 = vmatprep.subr.bf16.mxu0 %v11739_v4  ;;  %2677 = vmatprep.subr.bf16.mxu1 %v11740_v41 }
 0x393   :  { %2637 = vmatpush1.bf16.msra.mxu0 %v11741_v19  ;;  %2678 = vmatpush1.bf16.msra.mxu1 %v11742_v18 }
 0x394   :  { %2688 = vmatprep.subr.bf16.mxu0 %v11743_v45  ;;  %2729 = vmatprep.subr.bf16.mxu1 %v11744_v17 }
 0x3e9   :  { %v2397_v16 = vpop.f32.mrb[80].mxu0  ;;  %v2438_v34 = vpop.f32.mrb[80].mxu1 }
 0x3ea   :  { %v2527_v58 = vadd.f32 %v2397_v16, %v11745_v15  ;;  %v2529_v20 = vadd.f32 %v2438_v34, %v11746_v52  ;;  %v2399_v60 = vpop.f32.mrb[81].mxu0  ;;  %v2440_v25 = vpop.f32.mrb[81].mxu1 }
 0x3eb   :  { %v2528_v4 = vadd.f32 %v2399_v60, %v11747_v21  ;;  %v2530_v41 = vadd.f32 %v2440_v25, %v11748_v55  ;;  %v2401_v11 = vpop.f32.mrb[82].mxu0  ;;  %v2442_v19 = vpop.f32.mrb[82].mxu1 }
 0x3ec   :  { %v6196_v47 = vmul.f32 -1.442695, %v2529_v20  ;;  %v2402_v18 = vpop.f32.mrb[83].mxu0  ;;  %v2443_v43 = vpop.f32.mrb[83].mxu1  ;;  %v6194_v55 = vmul.f32 -1.442695, %v2527_v58 }
 0x3ed   :  { %v6197_v45 = vmul.f32 -1.442695, %v2530_v41  ;;  %v6195_v19 = vmul.f32 -1.442695, %v2528_v4  ;;  %v11750_v43 = vld [vmem:[#allocation196_spill] sm:$0xff]  ;;  %v11752_v58 = vld [vmem:[#allocation198_spill] sm:$0xff] }
 0x3ee   :  { %6408 = vpow2.f32 %v6196_v47 }
 0x3ef   :  { %6410 = vpow2.f32 %v6197_v45 }
 0x3f8   :  { %v6409_v17 = vpop.eup %6408 }
 0x3f9   :  { %v2553_v29 = vadd.f32 1.0, %v6409_v17  ;;  %v6411_v30 = vpop.eup %6410 }
 0x3fa   :  { %v2554_v15 = vadd.f32 1.0, %v6411_v30 }
 0x3fb   :  { %6412 = vrcp.f32 %v2553_v29  ;;  %v11749_v29 = vld [vmem:[#allocation195_spill] sm:$0xff] }
 0x3fc   :  { %6414 = vrcp.f32 %v2554_v15  ;;  %v11751_v15 = vld [vmem:[#allocation197_spill] sm:$0xff] }
 0x3fd   :  { %6416 = vpow2.f32 %v6194_v55 }
 0x3fe   :  { %6418 = vpow2.f32 %v6195_v19 }
 0x405   :  { %v6413_v16 = vpop.eup %6412 }
 0x406   :  { %v2573_v52 = vmul.f32 %v6413_v16, %v8707_v2  ;;  %v6415_v21 = vpop.eup %6414 }
 0x407   :  { %v2574_v25 = vmul.f32 %v6415_v21, %v8711_v27  ;;  %v6417_v20 = vpop.eup %6416 }
 0x408   :  { %v6419_v41 = vpop.eup %6418  ;;  %v2541_v18 = vadd.f32 1.0, %v6417_v20 }
 0x409   :  { %v2542_v60 = vadd.f32 1.0, %v6419_v41 }
 0x40a   :  { %6420 = vrcp.f32 %v2541_v18 }
 0x40b   :  { %6422 = vrcp.f32 %v2542_v60 }
 0x414   :  { %v6421_v18 = vpop.eup %6420 }
 0x429   :  { %v2479_v45 = vpop.f32.mrb[84].mxu0  ;;  %v2520_v17 = vpop.f32.mrb[84].mxu1 }
 0x42a   :  { %v2531_v30 = vadd.f32 %v2479_v45, %v11749_v29  ;;  %v2533_v47 = vadd.f32 %v2520_v17, %v11750_v43  ;;  %v2481_v11 = vpop.f32.mrb[85].mxu0  ;;  %v2522_v34 = vpop.f32.mrb[85].mxu1 }
 0x42b   :  { %v2532_v16 = vadd.f32 %v2481_v11, %v11751_v15  ;;  %v2534_v4 = vadd.f32 %v2522_v34, %v11752_v58  ;;  %v2483_v21 = vpop.f32.mrb[86].mxu0  ;;  %v2524_v55 = vpop.f32.mrb[86].mxu1 }
 0x42c   :  { %6424 = vtanh.f32 %v2531_v30  ;;  %v6198_v19 = vmul.f32 -1.442695, %v2533_v47  ;;  %v2484_v20 = vpop.f32.mrb[87].mxu0  ;;  %v2525_v41 = vpop.f32.mrb[87].mxu1 }
 0x42d   :  { %6426 = vtanh.f32 %v2532_v16  ;;  %v6199_v42 = vmul.f32 -1.442695, %v2534_v4  ;;  %v6423_v45 = vpop.eup %6422  ;;  %v2587_v43 = vpop.permute.xlu1 %2586  ;;  %v11755_v41 = vld [vmem:[#allocation98_spill] sm:$0xff] }
 0x42e   :  { %6428 = vpow2.f32 %v6198_v19  ;;  %vm2588_vm3 = vcmp.eq.s32.totalorder %v2587_v43, 1  ;;  %v11760_v43 = vld [vmem:[#allocation113_spill] sm:$0xff] }
 0x42f   :  { %6430 = vpow2.f32 %v6199_v42 }
 0x436   :  { %v6425_v17 = vpop.eup %6424 }
 0x437   :  { %v6427_v29 = vpop.eup %6426  ;;  %v2575_v60 = vmul.f32 %v6425_v17, %v6421_v18  ;;  %v11756_v18 = vld [vmem:[#allocation109_spill] sm:$0xff]  ;;  %v11758_v17 = vld [vmem:[#allocation111_spill] sm:$0xff] }
 0x438   :  { %v6429_v62 = vpop.eup %6428  ;;  %v2576_v11 = vmul.f32 %v6427_v29, %v6423_v45  ;;  %v11757_v45 = vld [vmem:[#allocation110_spill] sm:$0xff]  ;;  %v11759_v29 = vld [vmem:[#allocation112_spill] sm:$0xff] }
 0x439   :  { %v6431_v34 = vpop.eup %6430  ;;  %v2567_v15 = vadd.f32 1.0, %v6429_v62  ;;  %v2577_v58 = vadd.f32 %v2575_v60, %v2573_v52  ;;  %v11761_v60 = vld [vmem:[#allocation114_spill] sm:$0xff] }
 0x43a   :  { %v2568_v30 = vadd.f32 1.0, %v6431_v34  ;;  %v2578_v47 = vadd.f32 %v2576_v11, %v2574_v25  ;;  %v11762_v11 = vld [vmem:[#allocation115_spill] sm:$0xff]  ;;  %v11763_v34 = vld [vmem:[#allocation116_spill] sm:$0xff] }
 0x43b   :  { %6432 = vrcp.f32 %v2567_v15  ;;  %v8875_v16 = vsel %vm2588_vm3, %v2577_v58, %v8707_v2  ;;  %v11764_v15 = vld [vmem:[#allocation117_spill] sm:$0xff] }
 0x43c   :  { %6434 = vrcp.f32 %v2568_v30  ;;  %v8879_v42 = vsel %vm2588_vm3, %v2578_v47, %v8711_v27  ;;  %v11766_v30 = vld [vmem:[#allocation119_spill] sm:$0xff] }
 0x43d   :  { %6436 = vtanh.f32 %v2577_v58  ;;  %v11765_v58 = vld [vmem:[#allocation118_spill] sm:$0xff] }
 0x43e   :  { %6438 = vtanh.f32 %v2578_v47  ;;  %v11767_v47 = vld [vmem:[#allocation120_spill] sm:$0xff] }
 0x445   :  { %v6433_v4 = vpop.eup %6432 }
 0x446   :  { %v6435_v21 = vpop.eup %6434 }
 0x447   :  { %v6437_v55 = vpop.eup %6436 }
 0x448   :  { %v6439_v19 = vpop.eup %6438  ;;  %v2581_v62 = vmul.f32 %v6437_v55, %v6433_v4  ;;  %v11768_v4 = vld [vmem:[#allocation121_spill] sm:$0xff]  ;;  %v11770_v55 = vld [vmem:[#allocation123_spill] sm:$0xff] }
 0x449   :  { %v2582_v52 = vmul.f32 %v6439_v19, %v6435_v21  ;;  %v11769_v21 = vld [vmem:[#allocation122_spill] sm:$0xff]  ;;  %v11771_v19 = vld [vmem:[#allocation124_spill] sm:$0xff] }
 0x44a   :  { %v8883_v25 = vsel %vm2588_vm3, %v2581_v62, %v8717_v24  ;;  %v11753_v24 = vld [vmem:[#allocation96_spill] sm:$0xff]  ;;  %v11772_v62 = vld [vmem:[#allocation125_spill] sm:$0xff] }
 0x44b   :  { %v8887_v2 = vsel %vm2588_vm3, %v2582_v52, %v8723_v9  ;;  %v8893_v20 = vpack.c.bf16 %v8883_v25, %v8883_v25  ;;  %v11754_v9 = vld [vmem:[#allocation97_spill] sm:$0xff]  ;;  %v11773_v52 = vld [vmem:[#allocation126_spill] sm:$0xff] }
 0x44c   :  { %v2605_v27 = vpack.c.bf16 %v8887_v2, %v8887_v2 }
 0x44e   :  { %2638 = vmatprep.mubr.bf16.mxu0 %v2605_v27  ;;  %2679 = vmatprep.mubr.bf16.mxu1 %v2605_v27 }
 0x44f   :  { %2639 = vmatmul.mubr.bf16.vlgmr.msra.gmra.mrb[88].mxu0 %v8893_v20  ;;  %2680 = vmatmul.mubr.bf16.vlgmr.msra.gmra.mrb[88].mxu1 %v8893_v20 }
 0x450   :  { %2689 = vmatpush1.bf16.msra.mxu0 %v11548_v53  ;;  %2730 = vmatpush1.bf16.msra.mxu1 %v11549_v10 }
 0x451   :  { %2720 = vmatprep.mubr.bf16.mxu0 %v2605_v27  ;;  %2761 = vmatprep.mubr.bf16.mxu1 %v2605_v27  ;;  %v11774_v27 = vld [vmem:[#allocation127_spill] sm:$0xff] }
 0x452   :  { %2690 = vmatprep.subr.bf16.mxu0 %v11550_v6  ;;  %2731 = vmatprep.subr.bf16.mxu1 %v11551_v44 }
 0x454   :  { %2691 = vmatpush1.bf16.msra.mxu0 %v11552_v3  ;;  %2732 = vmatpush1.bf16.msra.mxu1 %v11553_v5 }
 0x455   :  { %2692 = vmatprep.subr.bf16.mxu0 %v11554_v48  ;;  %2733 = vmatprep.subr.bf16.mxu1 %v11555_v8 }
 0x458   :  { %2693 = vmatpush1.bf16.msra.mxu0 %v11556_v46  ;;  %2734 = vmatpush1.bf16.msra.mxu1 %v11557_v35 }
 0x459   :  { %2694 = vmatprep.subr.bf16.mxu0 %v11558_v49  ;;  %2735 = vmatprep.subr.bf16.mxu1 %v11559_v36 }
 0x45c   :  { %2695 = vmatpush1.bf16.msra.mxu0 %v11560_v50  ;;  %2736 = vmatpush1.bf16.msra.mxu1 %v11561_v54 }
 0x45d   :  { %2696 = vmatprep.subr.bf16.mxu0 %v11653_v56  ;;  %2737 = vmatprep.subr.bf16.mxu1 %v11654_v51 }
 0x460   :  { %2697 = vmatpush1.bf16.msra.mxu0 %v11655_v13  ;;  %2738 = vmatpush1.bf16.msra.mxu1 %v11656_v33 }
 0x461   :  { %2698 = vmatprep.subr.bf16.mxu0 %v11657_v23  ;;  %2739 = vmatprep.subr.bf16.mxu1 %v11658_v59 }
 0x464   :  { %2699 = vmatpush1.bf16.msra.mxu0 %v11659_v39  ;;  %2740 = vmatpush1.bf16.msra.mxu1 %v11660_v63 }
 0x465   :  { %2700 = vmatprep.subr.bf16.mxu0 %v11661_v7  ;;  %2741 = vmatprep.subr.bf16.mxu1 %v11662_v0 }
 0x468   :  { %2701 = vmatpush1.bf16.msra.mxu0 %v11663_v14  ;;  %2742 = vmatpush1.bf16.msra.mxu1 %v11664_v32 }
 0x469   :  { %2702 = vmatprep.subr.bf16.mxu0 %v11665_v12  ;;  %2743 = vmatprep.subr.bf16.mxu1 %v11753_v24 }
 0x46c   :  { %2703 = vmatpush1.bf16.msra.mxu0 %v11754_v9  ;;  %2744 = vmatpush1.bf16.msra.mxu1 %v11755_v41 }
 0x46d   :  { %2704 = vmatprep.subr.bf16.mxu0 %v11669_v26  ;;  %2745 = vmatprep.subr.bf16.mxu1 %v11670_v1 }
 0x470   :  { %2705 = vmatpush1.bf16.msra.mxu0 %v11671_v22  ;;  %2746 = vmatpush1.bf16.msra.mxu1 %v11672_v38 }
 0x471   :  { %2706 = vmatprep.subr.bf16.mxu0 %v11673_v37  ;;  %2747 = vmatprep.subr.bf16.mxu1 %v11674_v31 }
 0x474   :  { %2707 = vmatpush1.bf16.msra.mxu0 %v11675_v61  ;;  %2748 = vmatpush1.bf16.msra.mxu1 %v11585_v57 }
 0x475   :  { %2708 = vmatprep.subr.bf16.mxu0 %v11676_v40  ;;  %2749 = vmatprep.subr.bf16.mxu1 %v11677_v28 }
 0x478   :  { %2709 = vmatpush1.bf16.msra.mxu0 %v11756_v18  ;;  %2750 = vmatpush1.bf16.msra.mxu1 %v11757_v45 }
 0x479   :  { %2710 = vmatprep.subr.bf16.mxu0 %v11758_v17  ;;  %2751 = vmatprep.subr.bf16.mxu1 %v11759_v29 }
 0x47c   :  { %2711 = vmatpush1.bf16.msra.mxu0 %v11760_v43  ;;  %2752 = vmatpush1.bf16.msra.mxu1 %v11761_v60  ;;  %v11846_v60 = vld [vmem:[#allocation141_spill] sm:$0xff]  ;;  %v11847_v43 = vld [vmem:[#allocation142_spill] sm:$0xff] }
 0x47d   :  { %2712 = vmatprep.subr.bf16.mxu0 %v11762_v11  ;;  %2753 = vmatprep.subr.bf16.mxu1 %v11763_v34  ;;  %v11845_v34 = vld [vmem:[#allocation140_spill] sm:$0xff] }
 0x480   :  { %2713 = vmatpush1.bf16.msra.mxu0 %v11764_v15  ;;  %2754 = vmatpush1.bf16.msra.mxu1 %v11765_v58  ;;  %v11775_v15 = vld [vmem:[#allocation128_spill] sm:$0xff]  ;;  %v11776_v58 = vld [vmem:[#allocation129_spill] sm:$0xff] }
 0x481   :  { %2714 = vmatprep.subr.bf16.mxu0 %v11766_v30  ;;  %2755 = vmatprep.subr.bf16.mxu1 %v11767_v47  ;;  %v11777_v30 = vld [vmem:[#allocation130_spill] sm:$0xff]  ;;  %v11778_v47 = vld [vmem:[#allocation3_spill] sm:$0xff] }
 0x484   :  { %2715 = vmatpush1.bf16.msra.mxu0 %v11768_v4  ;;  %2756 = vmatpush1.bf16.msra.mxu1 %v11769_v21  ;;  %v11779_v4 = vld [vmem:[#allocation4_spill] sm:$0xff]  ;;  %v11844_v21 = vld [vmem:[#allocation139_spill] sm:$0xff] }
 0x485   :  { %2716 = vmatprep.subr.bf16.mxu0 %v11770_v55  ;;  %2757 = vmatprep.subr.bf16.mxu1 %v11771_v19  ;;  %v11780_v19 = vld [vmem:[#allocation5_spill] sm:$0xff]  ;;  %v11789_v55 = vld [vmem:[#allocation14_spill] sm:$0xff] }
 0x488   :  { %2717 = vmatpush1.bf16.msra.mxu0 %v11772_v62  ;;  %2758 = vmatpush1.bf16.msra.mxu1 %v11773_v52  ;;  %v11781_v62 = vld [vmem:[#allocation6_spill] sm:$0xff]  ;;  %v11782_v52 = vld [vmem:[#allocation7_spill] sm:$0xff] }
 0x489   :  { %2718 = vmatprep.subr.bf16.mxu0 %v11774_v27  ;;  %2759 = vmatprep.subr.bf16.mxu1 %v11775_v15  ;;  %v11783_v27 = vld [vmem:[#allocation8_spill] sm:$0xff]  ;;  %v11784_v15 = vld [vmem:[#allocation9_spill] sm:$0xff] }
 0x48c   :  { %2719 = vmatpush1.bf16.msra.mxu0 %v11776_v58  ;;  %2760 = vmatpush1.bf16.msra.mxu1 %v11777_v30  ;;  %v11785_v58 = vld [vmem:[#allocation10_spill] sm:$0xff]  ;;  %v11786_v30 = vld [vmem:[#allocation11_spill] sm:$0xff] }
 0x48d   :  { %2849 = vmatprep.subr.bf16.mxu0 %v11778_v47  ;;  %2890 = vmatprep.subr.bf16.mxu1 %v11779_v4  ;;  %v11787_v47 = vld [vmem:[#allocation12_spill] sm:$0xff]  ;;  %v11788_v4 = vld [vmem:[#allocation13_spill] sm:$0xff] }
 0x48f   :  { %2721 = vmatmul.mubr.bf16.vlgmr.msra.gmra.mrb[92].mxu0 %v8893_v20  ;;  %2762 = vmatmul.mubr.bf16.vlgmr.msra.gmra.mrb[92].mxu1 %v8893_v20  ;;  %v11790_v20 = vld [vmem:[#allocation15_spill] sm:$0xff] }
 0x490   :  { %2850 = vmatpush1.bf16.msra.mxu0 %v11780_v19  ;;  %2891 = vmatpush1.bf16.msra.mxu1 %v11781_v62  ;;  %v11791_v19 = vld [vmem:[#allocation16_spill] sm:$0xff]  ;;  %v11792_v62 = vld [vmem:[#allocation17_spill] sm:$0xff] }
 0x491   :  { %2851 = vmatprep.subr.bf16.mxu0 %v11782_v52  ;;  %2892 = vmatprep.subr.bf16.mxu1 %v11783_v27  ;;  %v11793_v52 = vld [vmem:[#allocation18_spill] sm:$0xff]  ;;  %v11794_v27 = vld [vmem:[#allocation19_spill] sm:$0xff] }
 0x494   :  { %2852 = vmatpush1.bf16.msra.mxu0 %v11784_v15  ;;  %2893 = vmatpush1.bf16.msra.mxu1 %v11785_v58  ;;  %v11795_v15 = vld [vmem:[#allocation20_spill] sm:$0xff]  ;;  %v11796_v58 = vld [vmem:[#allocation21_spill] sm:$0xff] }
 0x495   :  { %2853 = vmatprep.subr.bf16.mxu0 %v11786_v30  ;;  %2894 = vmatprep.subr.bf16.mxu1 %v11787_v47  ;;  %v11797_v30 = vld [vmem:[#allocation22_spill] sm:$0xff]  ;;  %v11798_v47 = vld [vmem:[#allocation23_spill] sm:$0xff] }
 0x498   :  { %2854 = vmatpush1.bf16.msra.mxu0 %v11788_v4  ;;  %2895 = vmatpush1.bf16.msra.mxu1 %v11789_v55  ;;  %v11799_v4 = vld [vmem:[#allocation24_spill] sm:$0xff]  ;;  %v11800_v55 = vld [vmem:[#allocation25_spill] sm:$0xff] }
 0x499   :  { %2855 = vmatprep.subr.bf16.mxu0 %v11790_v20  ;;  %2896 = vmatprep.subr.bf16.mxu1 %v11791_v19  ;;  %v11801_v20 = vld [vmem:[#allocation26_spill] sm:$0xff]  ;;  %v11802_v19 = vld [vmem:[#allocation27_spill] sm:$0xff] }
 0x49c   :  { %2856 = vmatpush1.bf16.msra.mxu0 %v11792_v62  ;;  %2897 = vmatpush1.bf16.msra.mxu1 %v11793_v52  ;;  %v11803_v62 = vld [vmem:[#allocation28_spill] sm:$0xff]  ;;  %v11804_v52 = vld [vmem:[#allocation29_spill] sm:$0xff] }
 0x49d   :  { %2857 = vmatprep.subr.bf16.mxu0 %v11794_v27  ;;  %2898 = vmatprep.subr.bf16.mxu1 %v11795_v15  ;;  %v11805_v27 = vld [vmem:[#allocation30_spill] sm:$0xff]  ;;  %v11806_v15 = vld [vmem:[#allocation31_spill] sm:$0xff] }
 0x4a0   :  { %2858 = vmatpush1.bf16.msra.mxu0 %v11796_v58  ;;  %2899 = vmatpush1.bf16.msra.mxu1 %v11797_v30  ;;  %v11807_v58 = vld [vmem:[#allocation32_spill] sm:$0xff]  ;;  %v11808_v30 = vld [vmem:[#allocation33_spill] sm:$0xff] }
 0x4a1   :  { %2859 = vmatprep.subr.bf16.mxu0 %v11798_v47  ;;  %2900 = vmatprep.subr.bf16.mxu1 %v11799_v4  ;;  %v11809_v47 = vld [vmem:[#allocation34_spill] sm:$0xff]  ;;  %v11810_v4 = vld [vmem:[#allocation35_spill] sm:$0xff] }
 0x4a4   :  { %2860 = vmatpush1.bf16.msra.mxu0 %v11800_v55  ;;  %2901 = vmatpush1.bf16.msra.mxu1 %v11801_v20  ;;  %v11811_v55 = vld [vmem:[#allocation36_spill] sm:$0xff]  ;;  %v11812_v20 = vld [vmem:[#allocation37_spill] sm:$0xff] }
 0x4a5   :  { %2861 = vmatprep.subr.bf16.mxu0 %v11802_v19  ;;  %2902 = vmatprep.subr.bf16.mxu1 %v11803_v62  ;;  %v11813_v19 = vld [vmem:[#allocation38_spill] sm:$0xff]  ;;  %v11814_v62 = vld [vmem:[#allocation39_spill] sm:$0xff] }
 0x4a8   :  { %2862 = vmatpush1.bf16.msra.mxu0 %v11804_v52  ;;  %2903 = vmatpush1.bf16.msra.mxu1 %v11805_v27  ;;  %v11815_v52 = vld [vmem:[#allocation40_spill] sm:$0xff]  ;;  %v11816_v27 = vld [vmem:[#allocation41_spill] sm:$0xff] }
 0x4a9   :  { %2863 = vmatprep.subr.bf16.mxu0 %v11806_v15  ;;  %2904 = vmatprep.subr.bf16.mxu1 %v11807_v58  ;;  %v11817_v15 = vld [vmem:[#allocation42_spill] sm:$0xff]  ;;  %v11818_v58 = vld [vmem:[#allocation43_spill] sm:$0xff] }
 0x4ac   :  { %2864 = vmatpush1.bf16.msra.mxu0 %v11808_v30  ;;  %2905 = vmatpush1.bf16.msra.mxu1 %v11809_v47  ;;  %v11819_v30 = vld [vmem:[#allocation44_spill] sm:$0xff]  ;;  %v11820_v47 = vld [vmem:[#allocation45_spill] sm:$0xff] }
 0x4ad   :  { %2865 = vmatprep.subr.bf16.mxu0 %v11810_v4  ;;  %2906 = vmatprep.subr.bf16.mxu1 %v11811_v55  ;;  %v11821_v4 = vld [vmem:[#allocation46_spill] sm:$0xff]  ;;  %v11822_v55 = vld [vmem:[#allocation47_spill] sm:$0xff] }
 0x4b0   :  { %2866 = vmatpush1.bf16.msra.mxu0 %v11812_v20  ;;  %2907 = vmatpush1.bf16.msra.mxu1 %v11813_v19  ;;  %v11823_v20 = vld [vmem:[#allocation48_spill] sm:$0xff]  ;;  %v11824_v19 = vld [vmem:[#allocation49_spill] sm:$0xff] }
 0x4b1   :  { %2867 = vmatprep.subr.bf16.mxu0 %v11814_v62  ;;  %2908 = vmatprep.subr.bf16.mxu1 %v11815_v52  ;;  %v11825_v62 = vld [vmem:[#allocation50_spill] sm:$0xff]  ;;  %v11826_v52 = vld [vmem:[#allocation51_spill] sm:$0xff] }
 0x4b4   :  { %2868 = vmatpush1.bf16.msra.mxu0 %v11816_v27  ;;  %2909 = vmatpush1.bf16.msra.mxu1 %v11817_v15  ;;  %v11827_v27 = vld [vmem:[#allocation52_spill] sm:$0xff]  ;;  %v11828_v15 = vld [vmem:[#allocation53_spill] sm:$0xff] }
 0x4b5   :  { %2869 = vmatprep.subr.bf16.mxu0 %v11818_v58  ;;  %2910 = vmatprep.subr.bf16.mxu1 %v11819_v30  ;;  %v11829_v58 = vld [vmem:[#allocation54_spill] sm:$0xff]  ;;  %v11830_v30 = vld [vmem:[#allocation55_spill] sm:$0xff] }
 0x4b8   :  { %2870 = vmatpush1.bf16.msra.mxu0 %v11820_v47  ;;  %2911 = vmatpush1.bf16.msra.mxu1 %v11821_v4  ;;  %v11831_v47 = vld [vmem:[#allocation56_spill] sm:$0xff]  ;;  %v11832_v4 = vld [vmem:[#allocation57_spill] sm:$0xff] }
 0x4b9   :  { %2871 = vmatprep.subr.bf16.mxu0 %v11822_v55  ;;  %2912 = vmatprep.subr.bf16.mxu1 %v11823_v20  ;;  %v11833_v55 = vld [vmem:[#allocation58_spill] sm:$0xff]  ;;  %v11834_v20 = vld [vmem:[#allocation59_spill] sm:$0xff] }
 0x4bc   :  { %2872 = vmatpush1.bf16.msra.mxu0 %v11824_v19  ;;  %2913 = vmatpush1.bf16.msra.mxu1 %v11825_v62  ;;  %v11835_v19 = vld [vmem:[#allocation60_spill] sm:$0xff]  ;;  %v11836_v62 = vld [vmem:[#allocation61_spill] sm:$0xff] }
 0x4bd   :  { %2873 = vmatprep.subr.bf16.mxu0 %v11826_v52  ;;  %2914 = vmatprep.subr.bf16.mxu1 %v11827_v27  ;;  %v11837_v52 = vld [vmem:[#allocation62_spill] sm:$0xff]  ;;  %v11838_v27 = vld [vmem:[#allocation63_spill] sm:$0xff] }
 0x4c0   :  { %2874 = vmatpush1.bf16.msra.mxu0 %v11828_v15  ;;  %2915 = vmatpush1.bf16.msra.mxu1 %v11829_v58  ;;  %v11839_v15 = vld [vmem:[#allocation64_spill] sm:$0xff]  ;;  %v11840_v58 = vld [vmem:[#allocation65_spill] sm:$0xff] }
 0x4c1   :  { %2875 = vmatprep.subr.bf16.mxu0 %v11830_v30  ;;  %2916 = vmatprep.subr.bf16.mxu1 %v11831_v47  ;;  %v11841_v30 = vld [vmem:[#allocation66_spill] sm:$0xff]  ;;  %v11842_v47 = vld [vmem:[#allocation67_spill] sm:$0xff] }
 0x4c4   :  { %2876 = vmatpush1.bf16.msra.mxu0 %v11832_v4  ;;  %2917 = vmatpush1.bf16.msra.mxu1 %v11833_v55  ;;  %v11843_v4 = vld [vmem:[#allocation68_spill] sm:$0xff] }
 0x4c5   :  { %2877 = vmatprep.subr.bf16.mxu0 %v11834_v20  ;;  %2918 = vmatprep.subr.bf16.mxu1 %v11835_v19 }
 0x4c8   :  { %2878 = vmatpush1.bf16.msra.mxu0 %v11836_v62  ;;  %2919 = vmatpush1.bf16.msra.mxu1 %v11837_v52 }
 0x4c9   :  { %2879 = vmatprep.subr.bf16.mxu0 %v11838_v27  ;;  %2920 = vmatprep.subr.bf16.mxu1 %v11839_v15 }
 0x4cc   :  { %2880 = vmatpush1.bf16.msra.mxu0 %v11840_v58  ;;  %2921 = vmatpush1.bf16.msra.mxu1 %v11841_v30 }
 0x4cd   :  { %2931 = vmatprep.subr.bf16.mxu0 %v11842_v47  ;;  %2972 = vmatprep.subr.bf16.mxu1 %v11843_v4 }
 0x522   :  { %v2640_v55 = vpop.f32.mrb[88].mxu0  ;;  %v2681_v20 = vpop.f32.mrb[88].mxu1 }
 0x523   :  { %v2770_v19 = vadd.f32 %v2640_v55, %v11844_v21  ;;  %v2772_v62 = vadd.f32 %v2681_v20, %v11845_v34  ;;  %v2642_v11 = vpop.f32.mrb[89].mxu0  ;;  %v2683_v52 = vpop.f32.mrb[89].mxu1 }
 0x524   :  { %v2771_v27 = vadd.f32 %v2642_v11, %v11846_v60  ;;  %v2773_v15 = vadd.f32 %v2683_v52, %v11847_v43  ;;  %v2644_v29 = vpop.f32.mrb[90].mxu0  ;;  %v2685_v58 = vpop.f32.mrb[90].mxu1 }
 0x525   :  { %v6202_v17 = vmul.f32 -1.442695, %v2772_v62  ;;  %v2645_v30 = vpop.f32.mrb[91].mxu0  ;;  %v2686_v45 = vpop.f32.mrb[91].mxu1  ;;  %v6200_v29 = vmul.f32 -1.442695, %v2770_v19 }
 0x526   :  { %v6203_v47 = vmul.f32 -1.442695, %v2773_v15  ;;  %v6201_v11 = vmul.f32 -1.442695, %v2771_v27  ;;  %v11851_v19 = vld [vmem:[#allocation202_spill] sm:$0xff] }
 0x527   :  { %6440 = vpow2.f32 %v6202_v17 }
 0x528   :  { %6442 = vpow2.f32 %v6203_v47 }
 0x531   :  { %v6441_v4 = vpop.eup %6440 }
 0x532   :  { %v2796_v18 = vadd.f32 1.0, %v6441_v4  ;;  %v6443_v28 = vpop.eup %6442  ;;  %v11849_v4 = vld [vmem:[#allocation200_spill] sm:$0xff] }
 0x533   :  { %v2797_v21 = vadd.f32 1.0, %v6443_v28 }
 0x534   :  { %6444 = vrcp.f32 %v2796_v18  ;;  %v11848_v18 = vld [vmem:[#allocation199_spill] sm:$0xff] }
 0x535   :  { %6446 = vrcp.f32 %v2797_v21  ;;  %v11850_v21 = vld [vmem:[#allocation201_spill] sm:$0xff] }
 0x536   :  { %6448 = vpow2.f32 %v6200_v29 }
 0x537   :  { %6450 = vpow2.f32 %v6201_v11 }
 0x53e   :  { %v6445_v34 = vpop.eup %6444 }
 0x53f   :  { %v2816_v55 = vmul.f32 %v6445_v34, %v8875_v16  ;;  %v6447_v60 = vpop.eup %6446 }
 0x540   :  { %v2817_v43 = vmul.f32 %v6447_v60, %v8879_v42  ;;  %v6449_v45 = vpop.eup %6448 }
 0x541   :  { %v6451_v15 = vpop.eup %6450  ;;  %v2784_v17 = vadd.f32 1.0, %v6449_v45 }
 0x542   :  { %v2785_v58 = vadd.f32 1.0, %v6451_v15 }
 0x543   :  { %6452 = vrcp.f32 %v2784_v17 }
 0x544   :  { %6454 = vrcp.f32 %v2785_v58 }
 0x54d   :  { %v6453_v17 = vpop.eup %6452 }
 0x562   :  { %v2722_v30 = vpop.f32.mrb[92].mxu0  ;;  %v2763_v47 = vpop.f32.mrb[92].mxu1 }
 0x563   :  { %v2774_v28 = vadd.f32 %v2722_v30, %v11848_v18  ;;  %v2776_v62 = vadd.f32 %v2763_v47, %v11849_v4  ;;  %v2724_v52 = vpop.f32.mrb[93].mxu0  ;;  %v2765_v20 = vpop.f32.mrb[93].mxu1 }
 0x564   :  { %v2775_v34 = vadd.f32 %v2724_v52, %v11850_v21  ;;  %v2777_v27 = vadd.f32 %v2765_v20, %v11851_v19  ;;  %v2726_v60 = vpop.f32.mrb[94].mxu0  ;;  %v2767_v29 = vpop.f32.mrb[94].mxu1 }
 0x565   :  { %6456 = vtanh.f32 %v2774_v28  ;;  %v6204_v11 = vmul.f32 -1.442695, %v2776_v62  ;;  %v2727_v45 = vpop.f32.mrb[95].mxu0  ;;  %v2768_v15 = vpop.f32.mrb[95].mxu1 }
 0x566   :  { %6458 = vtanh.f32 %v2775_v34  ;;  %v6205_v40 = vmul.f32 -1.442695, %v2777_v27  ;;  %v6455_v30 = vpop.eup %6454  ;;  %v2830_v21 = vpop.permute.xlu1 %2829  ;;  %v11854_v15 = vld [vmem:[#allocation108_spill] sm:$0xff] }
 0x567   :  { %6460 = vpow2.f32 %v6204_v11  ;;  %vm2831_vm4 = vcmp.eq.s32.totalorder %v2830_v21, 1  ;;  %v11862_v21 = vld [vmem:[#allocation116_spill] sm:$0xff] }
 0x568   :  { %6462 = vpow2.f32 %v6205_v40 }
 0x56f   :  { %v6457_v47 = vpop.eup %6456 }
 0x570   :  { %v6459_v18 = vpop.eup %6458  ;;  %v2818_v4 = vmul.f32 %v6457_v47, %v6453_v17  ;;  %v11855_v17 = vld [vmem:[#allocation109_spill] sm:$0xff]  ;;  %v11857_v47 = vld [vmem:[#allocation111_spill] sm:$0xff] }
 0x571   :  { %v6461_v58 = vpop.eup %6460  ;;  %v2819_v57 = vmul.f32 %v6459_v18, %v6455_v30  ;;  %v11856_v30 = vld [vmem:[#allocation110_spill] sm:$0xff]  ;;  %v11858_v18 = vld [vmem:[#allocation112_spill] sm:$0xff] }
 0x572   :  { %v6463_v52 = vpop.eup %6462  ;;  %v2820_v20 = vadd.f32 %v2818_v4, %v2816_v55  ;;  %v2810_v19 = vadd.f32 1.0, %v6461_v58  ;;  %v11859_v4 = vld [vmem:[#allocation113_spill] sm:$0xff]  ;;  %v11860_v58 = vld [vmem:[#allocation114_spill] sm:$0xff] }
 0x573   :  { %v2821_v28 = vadd.f32 %v2819_v57, %v2817_v43  ;;  %v2811_v62 = vadd.f32 1.0, %v6463_v52  ;;  %v11861_v52 = vld [vmem:[#allocation115_spill] sm:$0xff] }
 0x574   :  { %6464 = vtanh.f32 %v2820_v20  ;;  %v9039_v34 = vsel %vm2831_vm4, %v2820_v20, %v8875_v16  ;;  %v11863_v20 = vld [vmem:[#allocation117_spill] sm:$0xff] }
 0x575   :  { %6466 = vrcp.f32 %v2810_v19  ;;  %v9043_v40 = vsel %vm2831_vm4, %v2821_v28, %v8879_v42  ;;  %v11864_v19 = vld [vmem:[#allocation118_spill] sm:$0xff] }
 0x576   :  { %6468 = vtanh.f32 %v2821_v28  ;;  %v11865_v28 = vld [vmem:[#allocation119_spill] sm:$0xff] }
 0x577   :  { %6470 = vrcp.f32 %v2811_v62  ;;  %v11866_v62 = vld [vmem:[#allocation120_spill] sm:$0xff] }
 0x57e   :  { %v6465_v27 = vpop.eup %6464 }
 0x57f   :  { %v6467_v60 = vpop.eup %6466 }
 0x580   :  { %v6469_v29 = vpop.eup %6468  ;;  %v2824_v55 = vmul.f32 %v6467_v60, %v6465_v27  ;;  %v11867_v27 = vld [vmem:[#allocation121_spill] sm:$0xff]  ;;  %v11868_v60 = vld [vmem:[#allocation122_spill] sm:$0xff] }
 0x581   :  { %v6471_v11 = vpop.eup %6470 }
 0x582   :  { %v2825_v45 = vmul.f32 %v6471_v11, %v6469_v29  ;;  %v9047_v57 = vsel %vm2831_vm4, %v2824_v55, %v8883_v25  ;;  %v11852_v25 = vld [vmem:[#allocation106_spill] sm:$0xff]  ;;  %v11869_v29 = vld [vmem:[#allocation123_spill] sm:$0xff]  ;;  %v11870_v55 = vld [vmem:[#allocation124_spill] sm:$0xff] }
 0x583   :  { %v9057_v43 = vpack.c.bf16 %v9047_v57, %v9047_v57  ;;  %v11871_v11 = vld [vmem:[#allocation125_spill] sm:$0xff] }
 0x584   :  { %v9051_v16 = vsel %vm2831_vm4, %v2825_v45, %v8887_v2  ;;  %v11853_v2 = vld [vmem:[#allocation107_spill] sm:$0xff]  ;;  %v11872_v45 = vld [vmem:[#allocation126_spill] sm:$0xff] }
 0x585   :  { %v2848_v42 = vpack.c.bf16 %v9051_v16, %v9051_v16 }
 0x587   :  { %2881 = vmatprep.mubr.bf16.mxu0 %v2848_v42  ;;  %2922 = vmatprep.mubr.bf16.mxu1 %v2848_v42 }
 0x588   :  { %2882 = vmatmul.mubr.bf16.vlgmr.msra.gmra.mrb[96].mxu0 %v9057_v43  ;;  %2923 = vmatmul.mubr.bf16.vlgmr.msra.gmra.mrb[96].mxu1 %v9057_v43 }
 0x589   :  { %2932 = vmatpush1.bf16.msra.mxu0 %v11548_v53  ;;  %2973 = vmatpush1.bf16.msra.mxu1 %v11549_v10 }
 0x58a   :  { %2963 = vmatprep.mubr.bf16.mxu0 %v2848_v42  ;;  %3004 = vmatprep.mubr.bf16.mxu1 %v2848_v42  ;;  %v11873_v42 = vld [vmem:[#allocation127_spill] sm:$0xff] }
 0x58b   :  { %2933 = vmatprep.subr.bf16.mxu0 %v11550_v6  ;;  %2974 = vmatprep.subr.bf16.mxu1 %v11551_v44 }
 0x58d   :  { %2934 = vmatpush1.bf16.msra.mxu0 %v11552_v3  ;;  %2975 = vmatpush1.bf16.msra.mxu1 %v11553_v5 }
 0x58e   :  { %2935 = vmatprep.subr.bf16.mxu0 %v11554_v48  ;;  %2976 = vmatprep.subr.bf16.mxu1 %v11555_v8 }
 0x591   :  { %2936 = vmatpush1.bf16.msra.mxu0 %v11556_v46  ;;  %2977 = vmatpush1.bf16.msra.mxu1 %v11557_v35 }
 0x592   :  { %2937 = vmatprep.subr.bf16.mxu0 %v11558_v49  ;;  %2978 = vmatprep.subr.bf16.mxu1 %v11559_v36 }
 0x595   :  { %2938 = vmatpush1.bf16.msra.mxu0 %v11560_v50  ;;  %2979 = vmatpush1.bf16.msra.mxu1 %v11561_v54 }
 0x596   :  { %2939 = vmatprep.subr.bf16.mxu0 %v11653_v56  ;;  %2980 = vmatprep.subr.bf16.mxu1 %v11654_v51 }
 0x599   :  { %2940 = vmatpush1.bf16.msra.mxu0 %v11655_v13  ;;  %2981 = vmatpush1.bf16.msra.mxu1 %v11656_v33 }
 0x59a   :  { %2941 = vmatprep.subr.bf16.mxu0 %v11657_v23  ;;  %2982 = vmatprep.subr.bf16.mxu1 %v11658_v59 }
 0x59d   :  { %2942 = vmatpush1.bf16.msra.mxu0 %v11659_v39  ;;  %2983 = vmatpush1.bf16.msra.mxu1 %v11660_v63 }
 0x59e   :  { %2943 = vmatprep.subr.bf16.mxu0 %v11661_v7  ;;  %2984 = vmatprep.subr.bf16.mxu1 %v11662_v0 }
 0x5a1   :  { %2944 = vmatpush1.bf16.msra.mxu0 %v11663_v14  ;;  %2985 = vmatpush1.bf16.msra.mxu1 %v11664_v32 }
 0x5a2   :  { %2945 = vmatprep.subr.bf16.mxu0 %v11665_v12  ;;  %2986 = vmatprep.subr.bf16.mxu1 %v11753_v24 }
 0x5a5   :  { %2946 = vmatpush1.bf16.msra.mxu0 %v11754_v9  ;;  %2987 = vmatpush1.bf16.msra.mxu1 %v11755_v41 }
 0x5a6   :  { %2947 = vmatprep.subr.bf16.mxu0 %v11669_v26  ;;  %2988 = vmatprep.subr.bf16.mxu1 %v11670_v1 }
 0x5a9   :  { %2948 = vmatpush1.bf16.msra.mxu0 %v11671_v22  ;;  %2989 = vmatpush1.bf16.msra.mxu1 %v11672_v38 }
 0x5aa   :  { %2949 = vmatprep.subr.bf16.mxu0 %v11673_v37  ;;  %2990 = vmatprep.subr.bf16.mxu1 %v11674_v31 }
 0x5ad   :  { %2950 = vmatpush1.bf16.msra.mxu0 %v11675_v61  ;;  %2991 = vmatpush1.bf16.msra.mxu1 %v11852_v25 }
 0x5ae   :  { %2951 = vmatprep.subr.bf16.mxu0 %v11853_v2  ;;  %2992 = vmatprep.subr.bf16.mxu1 %v11854_v15 }
 0x5b1   :  { %2952 = vmatpush1.bf16.msra.mxu0 %v11855_v17  ;;  %2993 = vmatpush1.bf16.msra.mxu1 %v11856_v30 }
 0x5b2   :  { %2953 = vmatprep.subr.bf16.mxu0 %v11857_v47  ;;  %2994 = vmatprep.subr.bf16.mxu1 %v11858_v18 }
 0x5b5   :  { %2954 = vmatpush1.bf16.msra.mxu0 %v11859_v4  ;;  %2995 = vmatpush1.bf16.msra.mxu1 %v11860_v58  ;;  %v11945_v58 = vld [vmem:[#allocation145_spill] sm:$0xff]  ;;  %v11946_v4 = vld [vmem:[#allocation146_spill] sm:$0xff] }
 0x5b6   :  { %2955 = vmatprep.subr.bf16.mxu0 %v11861_v52  ;;  %2996 = vmatprep.subr.bf16.mxu1 %v11862_v21  ;;  %v11944_v21 = vld [vmem:[#allocation144_spill] sm:$0xff] }
 0x5b9   :  { %2956 = vmatpush1.bf16.msra.mxu0 %v11863_v20  ;;  %2997 = vmatpush1.bf16.msra.mxu1 %v11864_v19  ;;  %v11874_v20 = vld [vmem:[#allocation128_spill] sm:$0xff]  ;;  %v11875_v19 = vld [vmem:[#allocation129_spill] sm:$0xff] }
 0x5ba   :  { %2957 = vmatprep.subr.bf16.mxu0 %v11865_v28  ;;  %2998 = vmatprep.subr.bf16.mxu1 %v11866_v62  ;;  %v11876_v28 = vld [vmem:[#allocation130_spill] sm:$0xff]  ;;  %v11877_v62 = vld [vmem:[#allocation3_spill] sm:$0xff] }
 0x5bd   :  { %2958 = vmatpush1.bf16.msra.mxu0 %v11867_v27  ;;  %2999 = vmatpush1.bf16.msra.mxu1 %v11868_v60  ;;  %v11878_v27 = vld [vmem:[#allocation4_spill] sm:$0xff]  ;;  %v11943_v60 = vld [vmem:[#allocation143_spill] sm:$0xff] }
 0x5be   :  { %2959 = vmatprep.subr.bf16.mxu0 %v11869_v29  ;;  %3000 = vmatprep.subr.bf16.mxu1 %v11870_v55  ;;  %v11879_v55 = vld [vmem:[#allocation5_spill] sm:$0xff]  ;;  %v11888_v29 = vld [vmem:[#allocation14_spill] sm:$0xff] }
 0x5c1   :  { %2960 = vmatpush1.bf16.msra.mxu0 %v11871_v11  ;;  %3001 = vmatpush1.bf16.msra.mxu1 %v11872_v45  ;;  %v11880_v11 = vld [vmem:[#allocation6_spill] sm:$0xff]  ;;  %v11881_v45 = vld [vmem:[#allocation7_spill] sm:$0xff] }
 0x5c2   :  { %2961 = vmatprep.subr.bf16.mxu0 %v11873_v42  ;;  %3002 = vmatprep.subr.bf16.mxu1 %v11874_v20  ;;  %v11882_v42 = vld [vmem:[#allocation8_spill] sm:$0xff]  ;;  %v11883_v20 = vld [vmem:[#allocation9_spill] sm:$0xff] }
 0x5c5   :  { %2962 = vmatpush1.bf16.msra.mxu0 %v11875_v19  ;;  %3003 = vmatpush1.bf16.msra.mxu1 %v11876_v28  ;;  %v11884_v19 = vld [vmem:[#allocation10_spill] sm:$0xff]  ;;  %v11885_v28 = vld [vmem:[#allocation11_spill] sm:$0xff] }
 0x5c6   :  { %3092 = vmatprep.subr.bf16.mxu0 %v11877_v62  ;;  %3133 = vmatprep.subr.bf16.mxu1 %v11878_v27  ;;  %v11886_v62 = vld [vmem:[#allocation12_spill] sm:$0xff]  ;;  %v11887_v27 = vld [vmem:[#allocation13_spill] sm:$0xff] }
 0x5c8   :  { %2964 = vmatmul.mubr.bf16.vlgmr.msra.gmra.mrb[100].mxu0 %v9057_v43  ;;  %3005 = vmatmul.mubr.bf16.vlgmr.msra.gmra.mrb[100].mxu1 %v9057_v43  ;;  %v11889_v43 = vld [vmem:[#allocation15_spill] sm:$0xff] }
 0x5c9   :  { %3093 = vmatpush1.bf16.msra.mxu0 %v11879_v55  ;;  %3134 = vmatpush1.bf16.msra.mxu1 %v11880_v11  ;;  %v11890_v55 = vld [vmem:[#allocation16_spill] sm:$0xff]  ;;  %v11891_v11 = vld [vmem:[#allocation17_spill] sm:$0xff] }
 0x5ca   :  { %3094 = vmatprep.subr.bf16.mxu0 %v11881_v45  ;;  %3135 = vmatprep.subr.bf16.mxu1 %v11882_v42  ;;  %v11892_v45 = vld [vmem:[#allocation18_spill] sm:$0xff]  ;;  %v11893_v42 = vld [vmem:[#allocation19_spill] sm:$0xff] }
 0x5cd   :  { %3095 = vmatpush1.bf16.msra.mxu0 %v11883_v20  ;;  %3136 = vmatpush1.bf16.msra.mxu1 %v11884_v19  ;;  %v11894_v20 = vld [vmem:[#allocation20_spill] sm:$0xff]  ;;  %v11895_v19 = vld [vmem:[#allocation21_spill] sm:$0xff] }
 0x5ce   :  { %3096 = vmatprep.subr.bf16.mxu0 %v11885_v28  ;;  %3137 = vmatprep.subr.bf16.mxu1 %v11886_v62  ;;  %v11896_v28 = vld [vmem:[#allocation22_spill] sm:$0xff]  ;;  %v11897_v62 = vld [vmem:[#allocation23_spill] sm:$0xff] }
 0x5d1   :  { %3097 = vmatpush1.bf16.msra.mxu0 %v11887_v27  ;;  %3138 = vmatpush1.bf16.msra.mxu1 %v11888_v29  ;;  %v11898_v27 = vld [vmem:[#allocation24_spill] sm:$0xff]  ;;  %v11899_v29 = vld [vmem:[#allocation25_spill] sm:$0xff] }
 0x5d2   :  { %3098 = vmatprep.subr.bf16.mxu0 %v11889_v43  ;;  %3139 = vmatprep.subr.bf16.mxu1 %v11890_v55  ;;  %v11900_v43 = vld [vmem:[#allocation26_spill] sm:$0xff]  ;;  %v11901_v55 = vld [vmem:[#allocation27_spill] sm:$0xff] }
 0x5d5   :  { %3099 = vmatpush1.bf16.msra.mxu0 %v11891_v11  ;;  %3140 = vmatpush1.bf16.msra.mxu1 %v11892_v45  ;;  %v11902_v11 = vld [vmem:[#allocation28_spill] sm:$0xff]  ;;  %v11903_v45 = vld [vmem:[#allocation29_spill] sm:$0xff] }
 0x5d6   :  { %3100 = vmatprep.subr.bf16.mxu0 %v11893_v42  ;;  %3141 = vmatprep.subr.bf16.mxu1 %v11894_v20  ;;  %v11904_v42 = vld [vmem:[#allocation30_spill] sm:$0xff]  ;;  %v11905_v20 = vld [vmem:[#allocation31_spill] sm:$0xff] }
 0x5d9   :  { %3101 = vmatpush1.bf16.msra.mxu0 %v11895_v19  ;;  %3142 = vmatpush1.bf16.msra.mxu1 %v11896_v28  ;;  %v11906_v19 = vld [vmem:[#allocation32_spill] sm:$0xff]  ;;  %v11907_v28 = vld [vmem:[#allocation33_spill] sm:$0xff] }
 0x5da   :  { %3102 = vmatprep.subr.bf16.mxu0 %v11897_v62  ;;  %3143 = vmatprep.subr.bf16.mxu1 %v11898_v27  ;;  %v11908_v62 = vld [vmem:[#allocation34_spill] sm:$0xff]  ;;  %v11909_v27 = vld [vmem:[#allocation35_spill] sm:$0xff] }
 0x5dd   :  { %3103 = vmatpush1.bf16.msra.mxu0 %v11899_v29  ;;  %3144 = vmatpush1.bf16.msra.mxu1 %v11900_v43  ;;  %v11910_v29 = vld [vmem:[#allocation36_spill] sm:$0xff]  ;;  %v11911_v43 = vld [vmem:[#allocation37_spill] sm:$0xff] }
 0x5de   :  { %3104 = vmatprep.subr.bf16.mxu0 %v11901_v55  ;;  %3145 = vmatprep.subr.bf16.mxu1 %v11902_v11  ;;  %v11912_v55 = vld [vmem:[#allocation38_spill] sm:$0xff]  ;;  %v11913_v11 = vld [vmem:[#allocation39_spill] sm:$0xff] }
 0x5e1   :  { %3105 = vmatpush1.bf16.msra.mxu0 %v11903_v45  ;;  %3146 = vmatpush1.bf16.msra.mxu1 %v11904_v42  ;;  %v11914_v45 = vld [vmem:[#allocation40_spill] sm:$0xff]  ;;  %v11915_v42 = vld [vmem:[#allocation41_spill] sm:$0xff] }
 0x5e2   :  { %3106 = vmatprep.subr.bf16.mxu0 %v11905_v20  ;;  %3147 = vmatprep.subr.bf16.mxu1 %v11906_v19  ;;  %v11916_v20 = vld [vmem:[#allocation42_spill] sm:$0xff]  ;;  %v11917_v19 = vld [vmem:[#allocation43_spill] sm:$0xff] }
 0x5e5   :  { %3107 = vmatpush1.bf16.msra.mxu0 %v11907_v28  ;;  %3148 = vmatpush1.bf16.msra.mxu1 %v11908_v62  ;;  %v11918_v28 = vld [vmem:[#allocation44_spill] sm:$0xff]  ;;  %v11919_v62 = vld [vmem:[#allocation45_spill] sm:$0xff] }
 0x5e6   :  { %3108 = vmatprep.subr.bf16.mxu0 %v11909_v27  ;;  %3149 = vmatprep.subr.bf16.mxu1 %v11910_v29  ;;  %v11920_v27 = vld [vmem:[#allocation46_spill] sm:$0xff]  ;;  %v11921_v29 = vld [vmem:[#allocation47_spill] sm:$0xff] }
 0x5e9   :  { %3109 = vmatpush1.bf16.msra.mxu0 %v11911_v43  ;;  %3150 = vmatpush1.bf16.msra.mxu1 %v11912_v55  ;;  %v11922_v43 = vld [vmem:[#allocation48_spill] sm:$0xff]  ;;  %v11923_v55 = vld [vmem:[#allocation49_spill] sm:$0xff] }
 0x5ea   :  { %3110 = vmatprep.subr.bf16.mxu0 %v11913_v11  ;;  %3151 = vmatprep.subr.bf16.mxu1 %v11914_v45  ;;  %v11924_v11 = vld [vmem:[#allocation50_spill] sm:$0xff]  ;;  %v11925_v45 = vld [vmem:[#allocation51_spill] sm:$0xff] }
 0x5ed   :  { %3111 = vmatpush1.bf16.msra.mxu0 %v11915_v42  ;;  %3152 = vmatpush1.bf16.msra.mxu1 %v11916_v20  ;;  %v11926_v42 = vld [vmem:[#allocation52_spill] sm:$0xff]  ;;  %v11927_v20 = vld [vmem:[#allocation53_spill] sm:$0xff] }
 0x5ee   :  { %3112 = vmatprep.subr.bf16.mxu0 %v11917_v19  ;;  %3153 = vmatprep.subr.bf16.mxu1 %v11918_v28  ;;  %v11928_v19 = vld [vmem:[#allocation54_spill] sm:$0xff]  ;;  %v11929_v28 = vld [vmem:[#allocation55_spill] sm:$0xff] }
 0x5f1   :  { %3113 = vmatpush1.bf16.msra.mxu0 %v11919_v62  ;;  %3154 = vmatpush1.bf16.msra.mxu1 %v11920_v27  ;;  %v11930_v62 = vld [vmem:[#allocation56_spill] sm:$0xff]  ;;  %v11931_v27 = vld [vmem:[#allocation57_spill] sm:$0xff] }
 0x5f2   :  { %3114 = vmatprep.subr.bf16.mxu0 %v11921_v29  ;;  %3155 = vmatprep.subr.bf16.mxu1 %v11922_v43  ;;  %v11932_v29 = vld [vmem:[#allocation58_spill] sm:$0xff]  ;;  %v11933_v43 = vld [vmem:[#allocation59_spill] sm:$0xff] }
 0x5f5   :  { %3115 = vmatpush1.bf16.msra.mxu0 %v11923_v55  ;;  %3156 = vmatpush1.bf16.msra.mxu1 %v11924_v11  ;;  %v11934_v55 = vld [vmem:[#allocation60_spill] sm:$0xff]  ;;  %v11935_v11 = vld [vmem:[#allocation61_spill] sm:$0xff] }
 0x5f6   :  { %3116 = vmatprep.subr.bf16.mxu0 %v11925_v45  ;;  %3157 = vmatprep.subr.bf16.mxu1 %v11926_v42  ;;  %v11936_v45 = vld [vmem:[#allocation62_spill] sm:$0xff]  ;;  %v11937_v42 = vld [vmem:[#allocation63_spill] sm:$0xff] }
 0x5f9   :  { %3117 = vmatpush1.bf16.msra.mxu0 %v11927_v20  ;;  %3158 = vmatpush1.bf16.msra.mxu1 %v11928_v19  ;;  %v11938_v20 = vld [vmem:[#allocation64_spill] sm:$0xff]  ;;  %v11939_v19 = vld [vmem:[#allocation65_spill] sm:$0xff] }
 0x5fa   :  { %3118 = vmatprep.subr.bf16.mxu0 %v11929_v28  ;;  %3159 = vmatprep.subr.bf16.mxu1 %v11930_v62  ;;  %v11940_v28 = vld [vmem:[#allocation66_spill] sm:$0xff]  ;;  %v11941_v62 = vld [vmem:[#allocation67_spill] sm:$0xff] }
 0x5fd   :  { %3119 = vmatpush1.bf16.msra.mxu0 %v11931_v27  ;;  %3160 = vmatpush1.bf16.msra.mxu1 %v11932_v29  ;;  %v11942_v27 = vld [vmem:[#allocation68_spill] sm:$0xff] }
 0x5fe   :  { %3120 = vmatprep.subr.bf16.mxu0 %v11933_v43  ;;  %3161 = vmatprep.subr.bf16.mxu1 %v11934_v55 }
 0x601   :  { %3121 = vmatpush1.bf16.msra.mxu0 %v11935_v11  ;;  %3162 = vmatpush1.bf16.msra.mxu1 %v11936_v45 }
 0x602   :  { %3122 = vmatprep.subr.bf16.mxu0 %v11937_v42  ;;  %3163 = vmatprep.subr.bf16.mxu1 %v11938_v20 }
 0x605   :  { %3123 = vmatpush1.bf16.msra.mxu0 %v11939_v19  ;;  %3164 = vmatpush1.bf16.msra.mxu1 %v11940_v28 }
 0x606   :  { %3174 = vmatprep.subr.bf16.mxu0 %v11941_v62  ;;  %3215 = vmatprep.subr.bf16.mxu1 %v11942_v27 }
 0x65b   :  { %v2883_v29 = vpop.f32.mrb[96].mxu0  ;;  %v2924_v43 = vpop.f32.mrb[96].mxu1 }
 0x65c   :  { %v3013_v55 = vadd.f32 %v2883_v29, %v11943_v60  ;;  %v3015_v11 = vadd.f32 %v2924_v43, %v11944_v21  ;;  %v2885_v52 = vpop.f32.mrb[97].mxu0  ;;  %v2926_v45 = vpop.f32.mrb[97].mxu1 }
 0x65d   :  { %v3014_v42 = vadd.f32 %v2885_v52, %v11945_v58  ;;  %v3016_v20 = vadd.f32 %v2926_v45, %v11946_v4  ;;  %v2887_v18 = vpop.f32.mrb[98].mxu0  ;;  %v2928_v19 = vpop.f32.mrb[98].mxu1 }
 0x65e   :  { %v6208_v47 = vmul.f32 -1.442695, %v3015_v11  ;;  %v2888_v28 = vpop.f32.mrb[99].mxu0  ;;  %v2929_v30 = vpop.f32.mrb[99].mxu1  ;;  %v6206_v18 = vmul.f32 -1.442695, %v3013_v55 }
 0x65f   :  { %v6209_v62 = vmul.f32 -1.442695, %v3016_v20  ;;  %v6207_v52 = vmul.f32 -1.442695, %v3014_v42  ;;  %v11950_v55 = vld [vmem:[#allocation206_spill] sm:$0xff] }
 0x660   :  { %6472 = vpow2.f32 %v6208_v47 }
 0x661   :  { %6474 = vpow2.f32 %v6209_v62 }
 0x66a   :  { %v6473_v27 = vpop.eup %6472 }
 0x66b   :  { %v3039_v17 = vadd.f32 1.0, %v6473_v27  ;;  %v6475_v15 = vpop.eup %6474  ;;  %v11948_v27 = vld [vmem:[#allocation204_spill] sm:$0xff] }
 0x66c   :  { %v3040_v60 = vadd.f32 1.0, %v6475_v15 }
 0x66d   :  { %6476 = vrcp.f32 %v3039_v17  ;;  %v11947_v17 = vld [vmem:[#allocation203_spill] sm:$0xff] }
 0x66e   :  { %6478 = vrcp.f32 %v3040_v60  ;;  %v11949_v60 = vld [vmem:[#allocation205_spill] sm:$0xff] }
 0x66f   :  { %6480 = vpow2.f32 %v6206_v18 }
 0x670   :  { %6482 = vpow2.f32 %v6207_v52 }
 0x677   :  { %v6477_v21 = vpop.eup %6476 }
 0x678   :  { %v3059_v29 = vmul.f32 %v6477_v21, %v9039_v34  ;;  %v6479_v58 = vpop.eup %6478 }
 0x679   :  { %v3060_v4 = vmul.f32 %v6479_v58, %v9043_v40  ;;  %v6481_v30 = vpop.eup %6480 }
 0x67a   :  { %v6483_v20 = vpop.eup %6482  ;;  %v3027_v47 = vadd.f32 1.0, %v6481_v30 }
 0x67b   :  { %v3028_v19 = vadd.f32 1.0, %v6483_v20 }
 0x67c   :  { %6484 = vrcp.f32 %v3027_v47 }
 0x67d   :  { %6486 = vrcp.f32 %v3028_v19 }
 0x686   :  { %v6485_v47 = vpop.eup %6484 }
 0x69b   :  { %v2965_v28 = vpop.f32.mrb[100].mxu0  ;;  %v3006_v62 = vpop.f32.mrb[100].mxu1 }
 0x69c   :  { %v3017_v15 = vadd.f32 %v2965_v28, %v11947_v17  ;;  %v3019_v11 = vadd.f32 %v3006_v62, %v11948_v27  ;;  %v2967_v45 = vpop.f32.mrb[101].mxu0  ;;  %v3008_v43 = vpop.f32.mrb[101].mxu1 }
 0x69d   :  { %v3018_v21 = vadd.f32 %v2967_v45, %v11949_v60  ;;  %v3020_v42 = vadd.f32 %v3008_v43, %v11950_v55  ;;  %v2969_v58 = vpop.f32.mrb[102].mxu0  ;;  %v3010_v18 = vpop.f32.mrb[102].mxu1 }
 0x69e   :  { %6488 = vtanh.f32 %v3017_v15  ;;  %v6210_v52 = vmul.f32 -1.442695, %v3019_v11  ;;  %v2970_v30 = vpop.f32.mrb[103].mxu0  ;;  %v3011_v20 = vpop.f32.mrb[103].mxu1 }
 0x69f   :  { %6490 = vtanh.f32 %v3018_v21  ;;  %v6211_v2 = vmul.f32 -1.442695, %v3020_v42  ;;  %v6487_v28 = vpop.eup %6486  ;;  %v3073_v60 = vpop.permute.xlu0 %3072  ;;  %v11953_v20 = vld [vmem:[#allocation108_spill] sm:$0xff] }
 0x6a0   :  { %6492 = vpow2.f32 %v6210_v52  ;;  %vm3074_vm5 = vcmp.eq.s32.totalorder %v3073_v60, 1  ;;  %v11961_v60 = vld [vmem:[#allocation116_spill] sm:$0xff] }
 0x6a1   :  { %6494 = vpow2.f32 %v6211_v2 }
 0x6a8   :  { %v6489_v62 = vpop.eup %6488 }
 0x6a9   :  { %v6491_v17 = vpop.eup %6490  ;;  %v3061_v27 = vmul.f32 %v6489_v62, %v6485_v47  ;;  %v11954_v47 = vld [vmem:[#allocation109_spill] sm:$0xff]  ;;  %v11956_v62 = vld [vmem:[#allocation111_spill] sm:$0xff] }
 0x6aa   :  { %v6493_v19 = vpop.eup %6492  ;;  %v3062_v25 = vmul.f32 %v6491_v17, %v6487_v28  ;;  %v11955_v28 = vld [vmem:[#allocation110_spill] sm:$0xff]  ;;  %v11957_v17 = vld [vmem:[#allocation112_spill] sm:$0xff] }
 0x6ab   :  { %v6495_v45 = vpop.eup %6494  ;;  %v3063_v43 = vadd.f32 %v3061_v27, %v3059_v29  ;;  %v3053_v55 = vadd.f32 1.0, %v6493_v19  ;;  %v11958_v27 = vld [vmem:[#allocation113_spill] sm:$0xff]  ;;  %v11959_v19 = vld [vmem:[#allocation114_spill] sm:$0xff] }
 0x6ac   :  { %v3064_v15 = vadd.f32 %v3062_v25, %v3060_v4  ;;  %v3054_v11 = vadd.f32 1.0, %v6495_v45  ;;  %v11960_v45 = vld [vmem:[#allocation115_spill] sm:$0xff] }
 0x6ad   :  { %6496 = vtanh.f32 %v3063_v43  ;;  %v9203_v21 = vsel %vm3074_vm5, %v3063_v43, %v9039_v34  ;;  %v11962_v43 = vld [vmem:[#allocation117_spill] sm:$0xff] }
 0x6ae   :  { %6498 = vrcp.f32 %v3053_v55  ;;  %v9207_v2 = vsel %vm3074_vm5, %v3064_v15, %v9043_v40  ;;  %v11963_v55 = vld [vmem:[#allocation118_spill] sm:$0xff] }
 0x6af   :  { %6500 = vtanh.f32 %v3064_v15  ;;  %v11964_v15 = vld [vmem:[#allocation119_spill] sm:$0xff] }
 0x6b0   :  { %6502 = vrcp.f32 %v3054_v11  ;;  %v11965_v11 = vld [vmem:[#allocation120_spill] sm:$0xff] }
 0x6b7   :  { %v6497_v42 = vpop.eup %6496 }
 0x6b8   :  { %v6499_v58 = vpop.eup %6498 }
 0x6b9   :  { %v6501_v18 = vpop.eup %6500  ;;  %v3067_v29 = vmul.f32 %v6499_v58, %v6497_v42  ;;  %v11966_v42 = vld [vmem:[#allocation121_spill] sm:$0xff]  ;;  %v11967_v58 = vld [vmem:[#allocation122_spill] sm:$0xff] }
 0x6ba   :  { %v6503_v52 = vpop.eup %6502 }
 0x6bb   :  { %v3068_v30 = vmul.f32 %v6503_v52, %v6501_v18  ;;  %v9211_v25 = vsel %vm3074_vm5, %v3067_v29, %v9047_v57  ;;  %v11951_v57 = vld [vmem:[#allocation106_spill] sm:$0xff]  ;;  %v11968_v18 = vld [vmem:[#allocation123_spill] sm:$0xff]  ;;  %v11969_v29 = vld [vmem:[#allocation124_spill] sm:$0xff] }
 0x6bc   :  { %v9221_v4 = vpack.c.bf16 %v9211_v25, %v9211_v25  ;;  %v11970_v52 = vld [vmem:[#allocation125_spill] sm:$0xff] }
 0x6bd   :  { %v9215_v34 = vsel %vm3074_vm5, %v3068_v30, %v9051_v16  ;;  %v11952_v16 = vld [vmem:[#allocation107_spill] sm:$0xff]  ;;  %v11971_v30 = vld [vmem:[#allocation126_spill] sm:$0xff] }
 0x6be   :  { %v3091_v40 = vpack.c.bf16 %v9215_v34, %v9215_v34 }
 0x6c0   :  { %3124 = vmatprep.mubr.bf16.mxu0 %v3091_v40  ;;  %3165 = vmatprep.mubr.bf16.mxu1 %v3091_v40 }
 0x6c1   :  { %3125 = vmatmul.mubr.bf16.vlgmr.msra.gmra.mrb[104].mxu0 %v9221_v4  ;;  %3166 = vmatmul.mubr.bf16.vlgmr.msra.gmra.mrb[104].mxu1 %v9221_v4 }
 0x6c2   :  { %3175 = vmatpush1.bf16.msra.mxu0 %v11548_v53  ;;  %3216 = vmatpush1.bf16.msra.mxu1 %v11549_v10 }
 0x6c3   :  { %3206 = vmatprep.mubr.bf16.mxu0 %v3091_v40  ;;  %3247 = vmatprep.mubr.bf16.mxu1 %v3091_v40  ;;  %v11972_v40 = vld [vmem:[#allocation127_spill] sm:$0xff] }
 0x6c4   :  { %3176 = vmatprep.subr.bf16.mxu0 %v11550_v6  ;;  %3217 = vmatprep.subr.bf16.mxu1 %v11551_v44 }
 0x6c6   :  { %3177 = vmatpush1.bf16.msra.mxu0 %v11552_v3  ;;  %3218 = vmatpush1.bf16.msra.mxu1 %v11553_v5 }
 0x6c7   :  { %3178 = vmatprep.subr.bf16.mxu0 %v11554_v48  ;;  %3219 = vmatprep.subr.bf16.mxu1 %v11555_v8 }
 0x6ca   :  { %3179 = vmatpush1.bf16.msra.mxu0 %v11556_v46  ;;  %3220 = vmatpush1.bf16.msra.mxu1 %v11557_v35 }
 0x6cb   :  { %3180 = vmatprep.subr.bf16.mxu0 %v11558_v49  ;;  %3221 = vmatprep.subr.bf16.mxu1 %v11559_v36 }
 0x6ce   :  { %3181 = vmatpush1.bf16.msra.mxu0 %v11560_v50  ;;  %3222 = vmatpush1.bf16.msra.mxu1 %v11561_v54 }
 0x6cf   :  { %3182 = vmatprep.subr.bf16.mxu0 %v11653_v56  ;;  %3223 = vmatprep.subr.bf16.mxu1 %v11654_v51 }
 0x6d2   :  { %3183 = vmatpush1.bf16.msra.mxu0 %v11655_v13  ;;  %3224 = vmatpush1.bf16.msra.mxu1 %v11656_v33 }
 0x6d3   :  { %3184 = vmatprep.subr.bf16.mxu0 %v11657_v23  ;;  %3225 = vmatprep.subr.bf16.mxu1 %v11658_v59 }
 0x6d6   :  { %3185 = vmatpush1.bf16.msra.mxu0 %v11659_v39  ;;  %3226 = vmatpush1.bf16.msra.mxu1 %v11660_v63 }
 0x6d7   :  { %3186 = vmatprep.subr.bf16.mxu0 %v11661_v7  ;;  %3227 = vmatprep.subr.bf16.mxu1 %v11662_v0 }
 0x6da   :  { %3187 = vmatpush1.bf16.msra.mxu0 %v11663_v14  ;;  %3228 = vmatpush1.bf16.msra.mxu1 %v11664_v32 }
 0x6db   :  { %3188 = vmatprep.subr.bf16.mxu0 %v11665_v12  ;;  %3229 = vmatprep.subr.bf16.mxu1 %v11753_v24 }
 0x6de   :  { %3189 = vmatpush1.bf16.msra.mxu0 %v11754_v9  ;;  %3230 = vmatpush1.bf16.msra.mxu1 %v11755_v41 }
 0x6df   :  { %3190 = vmatprep.subr.bf16.mxu0 %v11669_v26  ;;  %3231 = vmatprep.subr.bf16.mxu1 %v11670_v1 }
 0x6e2   :  { %3191 = vmatpush1.bf16.msra.mxu0 %v11671_v22  ;;  %3232 = vmatpush1.bf16.msra.mxu1 %v11672_v38 }
 0x6e3   :  { %3192 = vmatprep.subr.bf16.mxu0 %v11673_v37  ;;  %3233 = vmatprep.subr.bf16.mxu1 %v11674_v31 }
 0x6e6   :  { %3193 = vmatpush1.bf16.msra.mxu0 %v11675_v61  ;;  %3234 = vmatpush1.bf16.msra.mxu1 %v11951_v57 }
 0x6e7   :  { %3194 = vmatprep.subr.bf16.mxu0 %v11952_v16  ;;  %3235 = vmatprep.subr.bf16.mxu1 %v11953_v20 }
 0x6ea   :  { %3195 = vmatpush1.bf16.msra.mxu0 %v11954_v47  ;;  %3236 = vmatpush1.bf16.msra.mxu1 %v11955_v28 }
 0x6eb   :  { %3196 = vmatprep.subr.bf16.mxu0 %v11956_v62  ;;  %3237 = vmatprep.subr.bf16.mxu1 %v11957_v17 }
 0x6ee   :  { %3197 = vmatpush1.bf16.msra.mxu0 %v11958_v27  ;;  %3238 = vmatpush1.bf16.msra.mxu1 %v11959_v19  ;;  %v12044_v19 = vld [vmem:[#allocation149_spill] sm:$0xff]  ;;  %v12045_v27 = vld [vmem:[#allocation150_spill] sm:$0xff] }
 0x6ef   :  { %3198 = vmatprep.subr.bf16.mxu0 %v11960_v45  ;;  %3239 = vmatprep.subr.bf16.mxu1 %v11961_v60  ;;  %v12043_v60 = vld [vmem:[#allocation148_spill] sm:$0xff] }
 0x6f2   :  { %3199 = vmatpush1.bf16.msra.mxu0 %v11962_v43  ;;  %3240 = vmatpush1.bf16.msra.mxu1 %v11963_v55  ;;  %v11973_v43 = vld [vmem:[#allocation128_spill] sm:$0xff]  ;;  %v11974_v55 = vld [vmem:[#allocation129_spill] sm:$0xff] }
 0x6f3   :  { %3200 = vmatprep.subr.bf16.mxu0 %v11964_v15  ;;  %3241 = vmatprep.subr.bf16.mxu1 %v11965_v11  ;;  %v11975_v15 = vld [vmem:[#allocation130_spill] sm:$0xff]  ;;  %v11976_v11 = vld [vmem:[#allocation3_spill] sm:$0xff] }
 0x6f6   :  { %3201 = vmatpush1.bf16.msra.mxu0 %v11966_v42  ;;  %3242 = vmatpush1.bf16.msra.mxu1 %v11967_v58  ;;  %v11977_v42 = vld [vmem:[#allocation4_spill] sm:$0xff]  ;;  %v12042_v58 = vld [vmem:[#allocation147_spill] sm:$0xff] }
 0x6f7   :  { %3202 = vmatprep.subr.bf16.mxu0 %v11968_v18  ;;  %3243 = vmatprep.subr.bf16.mxu1 %v11969_v29  ;;  %v11978_v29 = vld [vmem:[#allocation5_spill] sm:$0xff]  ;;  %v11987_v18 = vld [vmem:[#allocation14_spill] sm:$0xff] }
 0x6fa   :  { %3203 = vmatpush1.bf16.msra.mxu0 %v11970_v52  ;;  %3244 = vmatpush1.bf16.msra.mxu1 %v11971_v30  ;;  %v11979_v52 = vld [vmem:[#allocation6_spill] sm:$0xff]  ;;  %v11980_v30 = vld [vmem:[#allocation7_spill] sm:$0xff] }
 0x6fb   :  { %3204 = vmatprep.subr.bf16.mxu0 %v11972_v40  ;;  %3245 = vmatprep.subr.bf16.mxu1 %v11973_v43  ;;  %v11981_v40 = vld [vmem:[#allocation8_spill] sm:$0xff]  ;;  %v11982_v43 = vld [vmem:[#allocation9_spill] sm:$0xff] }
 0x6fe   :  { %3205 = vmatpush1.bf16.msra.mxu0 %v11974_v55  ;;  %3246 = vmatpush1.bf16.msra.mxu1 %v11975_v15  ;;  %v11983_v55 = vld [vmem:[#allocation10_spill] sm:$0xff]  ;;  %v11984_v15 = vld [vmem:[#allocation11_spill] sm:$0xff] }
 0x6ff   :  { %3335 = vmatprep.subr.bf16.mxu0 %v11976_v11  ;;  %3376 = vmatprep.subr.bf16.mxu1 %v11977_v42  ;;  %v11985_v11 = vld [vmem:[#allocation12_spill] sm:$0xff]  ;;  %v11986_v42 = vld [vmem:[#allocation13_spill] sm:$0xff] }
 0x701   :  { %3207 = vmatmul.mubr.bf16.vlgmr.msra.gmra.mrb[108].mxu0 %v9221_v4  ;;  %3248 = vmatmul.mubr.bf16.vlgmr.msra.gmra.mrb[108].mxu1 %v9221_v4  ;;  %v11988_v4 = vld [vmem:[#allocation15_spill] sm:$0xff] }
 0x702   :  { %3336 = vmatpush1.bf16.msra.mxu0 %v11978_v29  ;;  %3377 = vmatpush1.bf16.msra.mxu1 %v11979_v52  ;;  %v11989_v29 = vld [vmem:[#allocation16_spill] sm:$0xff]  ;;  %v11990_v52 = vld [vmem:[#allocation17_spill] sm:$0xff] }
 0x703   :  { %3337 = vmatprep.subr.bf16.mxu0 %v11980_v30  ;;  %3378 = vmatprep.subr.bf16.mxu1 %v11981_v40  ;;  %v11991_v30 = vld [vmem:[#allocation18_spill] sm:$0xff]  ;;  %v11992_v40 = vld [vmem:[#allocation19_spill] sm:$0xff] }
 0x706   :  { %3338 = vmatpush1.bf16.msra.mxu0 %v11982_v43  ;;  %3379 = vmatpush1.bf16.msra.mxu1 %v11983_v55  ;;  %v11993_v43 = vld [vmem:[#allocation20_spill] sm:$0xff]  ;;  %v11994_v55 = vld [vmem:[#allocation21_spill] sm:$0xff] }
 0x707   :  { %3339 = vmatprep.subr.bf16.mxu0 %v11984_v15  ;;  %3380 = vmatprep.subr.bf16.mxu1 %v11985_v11  ;;  %v11995_v15 = vld [vmem:[#allocation22_spill] sm:$0xff]  ;;  %v11996_v11 = vld [vmem:[#allocation23_spill] sm:$0xff] }
 0x70a   :  { %3340 = vmatpush1.bf16.msra.mxu0 %v11986_v42  ;;  %3381 = vmatpush1.bf16.msra.mxu1 %v11987_v18  ;;  %v11997_v42 = vld [vmem:[#allocation24_spill] sm:$0xff]  ;;  %v11998_v18 = vld [vmem:[#allocation25_spill] sm:$0xff] }
 0x70b   :  { %3341 = vmatprep.subr.bf16.mxu0 %v11988_v4  ;;  %3382 = vmatprep.subr.bf16.mxu1 %v11989_v29  ;;  %v11999_v4 = vld [vmem:[#allocation26_spill] sm:$0xff]  ;;  %v12000_v29 = vld [vmem:[#allocation27_spill] sm:$0xff] }
 0x70e   :  { %3342 = vmatpush1.bf16.msra.mxu0 %v11990_v52  ;;  %3383 = vmatpush1.bf16.msra.mxu1 %v11991_v30  ;;  %v12001_v52 = vld [vmem:[#allocation28_spill] sm:$0xff]  ;;  %v12002_v30 = vld [vmem:[#allocation29_spill] sm:$0xff] }
 0x70f   :  { %3343 = vmatprep.subr.bf16.mxu0 %v11992_v40  ;;  %3384 = vmatprep.subr.bf16.mxu1 %v11993_v43  ;;  %v12003_v40 = vld [vmem:[#allocation30_spill] sm:$0xff]  ;;  %v12004_v43 = vld [vmem:[#allocation31_spill] sm:$0xff] }
 0x712   :  { %3344 = vmatpush1.bf16.msra.mxu0 %v11994_v55  ;;  %3385 = vmatpush1.bf16.msra.mxu1 %v11995_v15  ;;  %v12005_v55 = vld [vmem:[#allocation32_spill] sm:$0xff]  ;;  %v12006_v15 = vld [vmem:[#allocation33_spill] sm:$0xff] }
 0x713   :  { %3345 = vmatprep.subr.bf16.mxu0 %v11996_v11  ;;  %3386 = vmatprep.subr.bf16.mxu1 %v11997_v42  ;;  %v12007_v11 = vld [vmem:[#allocation34_spill] sm:$0xff]  ;;  %v12008_v42 = vld [vmem:[#allocation35_spill] sm:$0xff] }
 0x716   :  { %3346 = vmatpush1.bf16.msra.mxu0 %v11998_v18  ;;  %3387 = vmatpush1.bf16.msra.mxu1 %v11999_v4  ;;  %v12009_v18 = vld [vmem:[#allocation36_spill] sm:$0xff]  ;;  %v12010_v4 = vld [vmem:[#allocation37_spill] sm:$0xff] }
 0x717   :  { %3347 = vmatprep.subr.bf16.mxu0 %v12000_v29  ;;  %3388 = vmatprep.subr.bf16.mxu1 %v12001_v52  ;;  %v12011_v29 = vld [vmem:[#allocation38_spill] sm:$0xff]  ;;  %v12012_v52 = vld [vmem:[#allocation39_spill] sm:$0xff] }
 0x71a   :  { %3348 = vmatpush1.bf16.msra.mxu0 %v12002_v30  ;;  %3389 = vmatpush1.bf16.msra.mxu1 %v12003_v40  ;;  %v12013_v30 = vld [vmem:[#allocation40_spill] sm:$0xff]  ;;  %v12014_v40 = vld [vmem:[#allocation41_spill] sm:$0xff] }
 0x71b   :  { %3349 = vmatprep.subr.bf16.mxu0 %v12004_v43  ;;  %3390 = vmatprep.subr.bf16.mxu1 %v12005_v55  ;;  %v12015_v43 = vld [vmem:[#allocation42_spill] sm:$0xff]  ;;  %v12016_v55 = vld [vmem:[#allocation43_spill] sm:$0xff] }
 0x71e   :  { %3350 = vmatpush1.bf16.msra.mxu0 %v12006_v15  ;;  %3391 = vmatpush1.bf16.msra.mxu1 %v12007_v11  ;;  %v12017_v15 = vld [vmem:[#allocation44_spill] sm:$0xff]  ;;  %v12018_v11 = vld [vmem:[#allocation45_spill] sm:$0xff] }
 0x71f   :  { %3351 = vmatprep.subr.bf16.mxu0 %v12008_v42  ;;  %3392 = vmatprep.subr.bf16.mxu1 %v12009_v18  ;;  %v12019_v42 = vld [vmem:[#allocation46_spill] sm:$0xff]  ;;  %v12020_v18 = vld [vmem:[#allocation47_spill] sm:$0xff] }
 0x722   :  { %3352 = vmatpush1.bf16.msra.mxu0 %v12010_v4  ;;  %3393 = vmatpush1.bf16.msra.mxu1 %v12011_v29  ;;  %v12021_v4 = vld [vmem:[#allocation48_spill] sm:$0xff]  ;;  %v12022_v29 = vld [vmem:[#allocation49_spill] sm:$0xff] }
 0x723   :  { %3353 = vmatprep.subr.bf16.mxu0 %v12012_v52  ;;  %3394 = vmatprep.subr.bf16.mxu1 %v12013_v30  ;;  %v12023_v52 = vld [vmem:[#allocation50_spill] sm:$0xff]  ;;  %v12024_v30 = vld [vmem:[#allocation51_spill] sm:$0xff] }
 0x726   :  { %3354 = vmatpush1.bf16.msra.mxu0 %v12014_v40  ;;  %3395 = vmatpush1.bf16.msra.mxu1 %v12015_v43  ;;  %v12025_v40 = vld [vmem:[#allocation52_spill] sm:$0xff]  ;;  %v12026_v43 = vld [vmem:[#allocation53_spill] sm:$0xff] }
 0x727   :  { %3355 = vmatprep.subr.bf16.mxu0 %v12016_v55  ;;  %3396 = vmatprep.subr.bf16.mxu1 %v12017_v15  ;;  %v12027_v55 = vld [vmem:[#allocation54_spill] sm:$0xff]  ;;  %v12028_v15 = vld [vmem:[#allocation55_spill] sm:$0xff] }
 0x72a   :  { %3356 = vmatpush1.bf16.msra.mxu0 %v12018_v11  ;;  %3397 = vmatpush1.bf16.msra.mxu1 %v12019_v42  ;;  %v12029_v11 = vld [vmem:[#allocation56_spill] sm:$0xff]  ;;  %v12030_v42 = vld [vmem:[#allocation57_spill] sm:$0xff] }
 0x72b   :  { %3357 = vmatprep.subr.bf16.mxu0 %v12020_v18  ;;  %3398 = vmatprep.subr.bf16.mxu1 %v12021_v4  ;;  %v12031_v18 = vld [vmem:[#allocation58_spill] sm:$0xff]  ;;  %v12032_v4 = vld [vmem:[#allocation59_spill] sm:$0xff] }
 0x72e   :  { %3358 = vmatpush1.bf16.msra.mxu0 %v12022_v29  ;;  %3399 = vmatpush1.bf16.msra.mxu1 %v12023_v52  ;;  %v12033_v29 = vld [vmem:[#allocation60_spill] sm:$0xff]  ;;  %v12034_v52 = vld [vmem:[#allocation61_spill] sm:$0xff] }
 0x72f   :  { %3359 = vmatprep.subr.bf16.mxu0 %v12024_v30  ;;  %3400 = vmatprep.subr.bf16.mxu1 %v12025_v40  ;;  %v12035_v30 = vld [vmem:[#allocation62_spill] sm:$0xff]  ;;  %v12036_v40 = vld [vmem:[#allocation63_spill] sm:$0xff] }
 0x732   :  { %3360 = vmatpush1.bf16.msra.mxu0 %v12026_v43  ;;  %3401 = vmatpush1.bf16.msra.mxu1 %v12027_v55  ;;  %v12037_v43 = vld [vmem:[#allocation64_spill] sm:$0xff]  ;;  %v12038_v55 = vld [vmem:[#allocation65_spill] sm:$0xff] }
 0x733   :  { %3361 = vmatprep.subr.bf16.mxu0 %v12028_v15  ;;  %3402 = vmatprep.subr.bf16.mxu1 %v12029_v11  ;;  %v12039_v15 = vld [vmem:[#allocation66_spill] sm:$0xff]  ;;  %v12040_v11 = vld [vmem:[#allocation67_spill] sm:$0xff] }
 0x736   :  { %3362 = vmatpush1.bf16.msra.mxu0 %v12030_v42  ;;  %3403 = vmatpush1.bf16.msra.mxu1 %v12031_v18  ;;  %v12041_v42 = vld [vmem:[#allocation68_spill] sm:$0xff] }
 0x737   :  { %3363 = vmatprep.subr.bf16.mxu0 %v12032_v4  ;;  %3404 = vmatprep.subr.bf16.mxu1 %v12033_v29 }
 0x73a   :  { %3364 = vmatpush1.bf16.msra.mxu0 %v12034_v52  ;;  %3405 = vmatpush1.bf16.msra.mxu1 %v12035_v30 }
 0x73b   :  { %3365 = vmatprep.subr.bf16.mxu0 %v12036_v40  ;;  %3406 = vmatprep.subr.bf16.mxu1 %v12037_v43 }
 0x73e   :  { %3366 = vmatpush1.bf16.msra.mxu0 %v12038_v55  ;;  %3407 = vmatpush1.bf16.msra.mxu1 %v12039_v15 }
 0x73f   :  { %3417 = vmatprep.subr.bf16.mxu0 %v12040_v11  ;;  %3458 = vmatprep.subr.bf16.mxu1 %v12041_v42 }
 0x794   :  { %v3126_v18 = vpop.f32.mrb[104].mxu0  ;;  %v3167_v4 = vpop.f32.mrb[104].mxu1 }
 0x795   :  { %v3256_v29 = vadd.f32 %v3126_v18, %v12042_v58  ;;  %v3258_v52 = vadd.f32 %v3167_v4, %v12043_v60  ;;  %v3128_v45 = vpop.f32.mrb[105].mxu0  ;;  %v3169_v30 = vpop.f32.mrb[105].mxu1 }
 0x796   :  { %v3257_v40 = vadd.f32 %v3128_v45, %v12044_v19  ;;  %v3259_v43 = vadd.f32 %v3169_v30, %v12045_v27  ;;  %v3130_v17 = vpop.f32.mrb[106].mxu0  ;;  %v3171_v55 = vpop.f32.mrb[106].mxu1 }
 0x797   :  { %v6214_v62 = vmul.f32 -1.442695, %v3258_v52  ;;  %v3131_v15 = vpop.f32.mrb[107].mxu0  ;;  %v3172_v28 = vpop.f32.mrb[107].mxu1  ;;  %v6212_v17 = vmul.f32 -1.442695, %v3256_v29 }
 0x798   :  { %v6215_v11 = vmul.f32 -1.442695, %v3259_v43  ;;  %v6213_v45 = vmul.f32 -1.442695, %v3257_v40  ;;  %v12049_v29 = vld [vmem:[#allocation210_spill] sm:$0xff] }
 0x799   :  { %6504 = vpow2.f32 %v6214_v62 }
 0x79a   :  { %6506 = vpow2.f32 %v6215_v11 }
 0x7a3   :  { %v6505_v42 = vpop.eup %6504 }
 0x7a4   :  { %v3282_v47 = vadd.f32 1.0, %v6505_v42  ;;  %v6507_v20 = vpop.eup %6506  ;;  %v12047_v42 = vld [vmem:[#allocation208_spill] sm:$0xff] }
 0x7a5   :  { %v3283_v58 = vadd.f32 1.0, %v6507_v20 }
 0x7a6   :  { %6508 = vrcp.f32 %v3282_v47  ;;  %v12046_v47 = vld [vmem:[#allocation207_spill] sm:$0xff] }
 0x7a7   :  { %6510 = vrcp.f32 %v3283_v58  ;;  %v12048_v58 = vld [vmem:[#allocation209_spill] sm:$0xff] }
 0x7a8   :  { %6512 = vpow2.f32 %v6212_v17 }
 0x7a9   :  { %6514 = vpow2.f32 %v6213_v45 }
 0x7b0   :  { %v6509_v60 = vpop.eup %6508 }
 0x7b1   :  { %v3302_v18 = vmul.f32 %v6509_v60, %v9203_v21  ;;  %v6511_v19 = vpop.eup %6510 }
 0x7b2   :  { %v3303_v27 = vmul.f32 %v6511_v19, %v9207_v2  ;;  %v6513_v28 = vpop.eup %6512 }
 0x7b3   :  { %v6515_v43 = vpop.eup %6514  ;;  %v3270_v62 = vadd.f32 1.0, %v6513_v28 }
 0x7b4   :  { %v3271_v55 = vadd.f32 1.0, %v6515_v43 }
 0x7b5   :  { %6516 = vrcp.f32 %v3270_v62 }
 0x7b6   :  { %6518 = vrcp.f32 %v3271_v55 }
 0x7bf   :  { %v6517_v62 = vpop.eup %6516 }
 0x7d4   :  { %v3208_v15 = vpop.f32.mrb[108].mxu0  ;;  %v3249_v11 = vpop.f32.mrb[108].mxu1 }
 0x7d5   :  { %v3260_v20 = vadd.f32 %v3208_v15, %v12046_v47  ;;  %v3262_v52 = vadd.f32 %v3249_v11, %v12047_v42  ;;  %v3210_v30 = vpop.f32.mrb[109].mxu0  ;;  %v3251_v4 = vpop.f32.mrb[109].mxu1 }
 0x7d6   :  { %v3261_v60 = vadd.f32 %v3210_v30, %v12048_v58  ;;  %v3263_v40 = vadd.f32 %v3251_v4, %v12049_v29  ;;  %v3212_v19 = vpop.f32.mrb[110].mxu0  ;;  %v3253_v17 = vpop.f32.mrb[110].mxu1 }
 0x7d7   :  { %6520 = vtanh.f32 %v3260_v20  ;;  %v6216_v45 = vmul.f32 -1.442695, %v3262_v52  ;;  %v3213_v28 = vpop.f32.mrb[111].mxu0  ;;  %v3254_v43 = vpop.f32.mrb[111].mxu1 }
 0x7d8   :  { %6522 = vtanh.f32 %v3261_v60  ;;  %v6217_v16 = vmul.f32 -1.442695, %v3263_v40  ;;  %v6519_v15 = vpop.eup %6518  ;;  %v3316_v58 = vpop.permute.xlu1 %3315  ;;  %v12052_v43 = vld [vmem:[#allocation108_spill] sm:$0xff] }
 0x7d9   :  { %6524 = vpow2.f32 %v6216_v45  ;;  %vm3317_vm6 = vcmp.eq.s32.totalorder %v3316_v58, 1  ;;  %v12060_v58 = vld [vmem:[#allocation116_spill] sm:$0xff] }
 0x7da   :  { %6526 = vpow2.f32 %v6217_v16 }
 0x7e1   :  { %v6521_v11 = vpop.eup %6520 }
 0x7e2   :  { %v6523_v47 = vpop.eup %6522  ;;  %v3304_v42 = vmul.f32 %v6521_v11, %v6517_v62  ;;  %v12053_v62 = vld [vmem:[#allocation109_spill] sm:$0xff]  ;;  %v12055_v11 = vld [vmem:[#allocation111_spill] sm:$0xff] }
 0x7e3   :  { %v6525_v55 = vpop.eup %6524  ;;  %v3305_v57 = vmul.f32 %v6523_v47, %v6519_v15  ;;  %v12054_v15 = vld [vmem:[#allocation110_spill] sm:$0xff]  ;;  %v12056_v47 = vld [vmem:[#allocation112_spill] sm:$0xff] }
 0x7e4   :  { %v6527_v30 = vpop.eup %6526  ;;  %v3306_v4 = vadd.f32 %v3304_v42, %v3302_v18  ;;  %v3296_v29 = vadd.f32 1.0, %v6525_v55  ;;  %v12057_v42 = vld [vmem:[#allocation113_spill] sm:$0xff]  ;;  %v12058_v55 = vld [vmem:[#allocation114_spill] sm:$0xff] }
 0x7e5   :  { %v3307_v20 = vadd.f32 %v3305_v57, %v3303_v27  ;;  %v3297_v52 = vadd.f32 1.0, %v6527_v30  ;;  %v12059_v30 = vld [vmem:[#allocation115_spill] sm:$0xff] }
 0x7e6   :  { %6528 = vtanh.f32 %v3306_v4  ;;  %v9367_v60 = vsel %vm3317_vm6, %v3306_v4, %v9203_v21  ;;  %v12061_v4 = vld [vmem:[#allocation117_spill] sm:$0xff] }
 0x7e7   :  { %6530 = vrcp.f32 %v3296_v29  ;;  %v9371_v16 = vsel %vm3317_vm6, %v3307_v20, %v9207_v2  ;;  %v12062_v29 = vld [vmem:[#allocation118_spill] sm:$0xff] }
 0x7e8   :  { %6532 = vtanh.f32 %v3307_v20  ;;  %v12063_v20 = vld [vmem:[#allocation119_spill] sm:$0xff] }
 0x7e9   :  { %6534 = vrcp.f32 %v3297_v52  ;;  %v12064_v52 = vld [vmem:[#allocation120_spill] sm:$0xff] }
 0x7f0   :  { %v6529_v40 = vpop.eup %6528 }
 0x7f1   :  { %v6531_v19 = vpop.eup %6530 }
 0x7f2   :  { %v6533_v17 = vpop.eup %6532  ;;  %v3310_v18 = vmul.f32 %v6531_v19, %v6529_v40  ;;  %v12065_v40 = vld [vmem:[#allocation121_spill] sm:$0xff]  ;;  %v12066_v19 = vld [vmem:[#allocation122_spill] sm:$0xff] }
 0x7f3   :  { %v6535_v45 = vpop.eup %6534 }
 0x7f4   :  { %v3311_v28 = vmul.f32 %v6535_v45, %v6533_v17  ;;  %v9375_v57 = vsel %vm3317_vm6, %v3310_v18, %v9211_v25  ;;  %v12050_v25 = vld [vmem:[#allocation106_spill] sm:$0xff]  ;;  %v12067_v17 = vld [vmem:[#allocation123_spill] sm:$0xff]  ;;  %v12068_v18 = vld [vmem:[#allocation124_spill] sm:$0xff] }
 0x7f5   :  { %v9385_v27 = vpack.c.bf16 %v9375_v57, %v9375_v57  ;;  %v12069_v45 = vld [vmem:[#allocation125_spill] sm:$0xff] }
 0x7f6   :  { %v9379_v21 = vsel %vm3317_vm6, %v3311_v28, %v9215_v34  ;;  %v12051_v34 = vld [vmem:[#allocation107_spill] sm:$0xff]  ;;  %v12070_v28 = vld [vmem:[#allocation126_spill] sm:$0xff] }
 0x7f7   :  { %v3334_v2 = vpack.c.bf16 %v9379_v21, %v9379_v21 }
 0x7f9   :  { %3367 = vmatprep.mubr.bf16.mxu0 %v3334_v2  ;;  %3408 = vmatprep.mubr.bf16.mxu1 %v3334_v2 }
 0x7fa   :  { %3368 = vmatmul.mubr.bf16.vlgmr.msra.gmra.mrb[112].mxu0 %v9385_v27  ;;  %3409 = vmatmul.mubr.bf16.vlgmr.msra.gmra.mrb[112].mxu1 %v9385_v27 }
 0x7fb   :  { %3418 = vmatpush1.bf16.msra.mxu0 %v11548_v53  ;;  %3459 = vmatpush1.bf16.msra.mxu1 %v11549_v10 }
 0x7fc   :  { %3449 = vmatprep.mubr.bf16.mxu0 %v3334_v2  ;;  %3490 = vmatprep.mubr.bf16.mxu1 %v3334_v2  ;;  %v12071_v2 = vld [vmem:[#allocation127_spill] sm:$0xff] }
 0x7fd   :  { %3419 = vmatprep.subr.bf16.mxu0 %v11550_v6  ;;  %3460 = vmatprep.subr.bf16.mxu1 %v11551_v44 }
 0x7ff   :  { %3420 = vmatpush1.bf16.msra.mxu0 %v11552_v3  ;;  %3461 = vmatpush1.bf16.msra.mxu1 %v11553_v5 }
 0x800   :  { %3421 = vmatprep.subr.bf16.mxu0 %v11554_v48  ;;  %3462 = vmatprep.subr.bf16.mxu1 %v11555_v8 }
 0x803   :  { %3422 = vmatpush1.bf16.msra.mxu0 %v11556_v46  ;;  %3463 = vmatpush1.bf16.msra.mxu1 %v11557_v35 }
 0x804   :  { %3423 = vmatprep.subr.bf16.mxu0 %v11558_v49  ;;  %3464 = vmatprep.subr.bf16.mxu1 %v11559_v36 }
 0x807   :  { %3424 = vmatpush1.bf16.msra.mxu0 %v11560_v50  ;;  %3465 = vmatpush1.bf16.msra.mxu1 %v11561_v54 }
 0x808   :  { %3425 = vmatprep.subr.bf16.mxu0 %v11653_v56  ;;  %3466 = vmatprep.subr.bf16.mxu1 %v11654_v51 }
 0x80b   :  { %3426 = vmatpush1.bf16.msra.mxu0 %v11655_v13  ;;  %3467 = vmatpush1.bf16.msra.mxu1 %v11656_v33 }
 0x80c   :  { %3427 = vmatprep.subr.bf16.mxu0 %v11657_v23  ;;  %3468 = vmatprep.subr.bf16.mxu1 %v11658_v59 }
 0x80f   :  { %3428 = vmatpush1.bf16.msra.mxu0 %v11659_v39  ;;  %3469 = vmatpush1.bf16.msra.mxu1 %v11660_v63 }
 0x810   :  { %3429 = vmatprep.subr.bf16.mxu0 %v11661_v7  ;;  %3470 = vmatprep.subr.bf16.mxu1 %v11662_v0 }
 0x813   :  { %3430 = vmatpush1.bf16.msra.mxu0 %v11663_v14  ;;  %3471 = vmatpush1.bf16.msra.mxu1 %v11664_v32 }
 0x814   :  { %3431 = vmatprep.subr.bf16.mxu0 %v11665_v12  ;;  %3472 = vmatprep.subr.bf16.mxu1 %v11753_v24 }
 0x817   :  { %3432 = vmatpush1.bf16.msra.mxu0 %v11754_v9  ;;  %3473 = vmatpush1.bf16.msra.mxu1 %v11755_v41 }
 0x818   :  { %3433 = vmatprep.subr.bf16.mxu0 %v11669_v26  ;;  %3474 = vmatprep.subr.bf16.mxu1 %v11670_v1 }
 0x81b   :  { %3434 = vmatpush1.bf16.msra.mxu0 %v11671_v22  ;;  %3475 = vmatpush1.bf16.msra.mxu1 %v11672_v38 }
 0x81c   :  { %3435 = vmatprep.subr.bf16.mxu0 %v11673_v37  ;;  %3476 = vmatprep.subr.bf16.mxu1 %v11674_v31 }
 0x81f   :  { %3436 = vmatpush1.bf16.msra.mxu0 %v11675_v61  ;;  %3477 = vmatpush1.bf16.msra.mxu1 %v12050_v25 }
 0x820   :  { %3437 = vmatprep.subr.bf16.mxu0 %v12051_v34  ;;  %3478 = vmatprep.subr.bf16.mxu1 %v12052_v43 }
 0x823   :  { %3438 = vmatpush1.bf16.msra.mxu0 %v12053_v62  ;;  %3479 = vmatpush1.bf16.msra.mxu1 %v12054_v15 }
 0x824   :  { %3439 = vmatprep.subr.bf16.mxu0 %v12055_v11  ;;  %3480 = vmatprep.subr.bf16.mxu1 %v12056_v47 }
 0x827   :  { %3440 = vmatpush1.bf16.msra.mxu0 %v12057_v42  ;;  %3481 = vmatpush1.bf16.msra.mxu1 %v12058_v55  ;;  %v12143_v55 = vld [vmem:[#allocation153_spill] sm:$0xff]  ;;  %v12144_v42 = vld [vmem:[#allocation154_spill] sm:$0xff] }
 0x828   :  { %3441 = vmatprep.subr.bf16.mxu0 %v12059_v30  ;;  %3482 = vmatprep.subr.bf16.mxu1 %v12060_v58  ;;  %v12142_v58 = vld [vmem:[#allocation152_spill] sm:$0xff] }
 0x82b   :  { %3442 = vmatpush1.bf16.msra.mxu0 %v12061_v4  ;;  %3483 = vmatpush1.bf16.msra.mxu1 %v12062_v29  ;;  %v12072_v4 = vld [vmem:[#allocation128_spill] sm:$0xff]  ;;  %v12073_v29 = vld [vmem:[#allocation129_spill] sm:$0xff] }
 0x82c   :  { %3443 = vmatprep.subr.bf16.mxu0 %v12063_v20  ;;  %3484 = vmatprep.subr.bf16.mxu1 %v12064_v52  ;;  %v12074_v20 = vld [vmem:[#allocation130_spill] sm:$0xff]  ;;  %v12075_v52 = vld [vmem:[#allocation3_spill] sm:$0xff] }
 0x82f   :  { %3444 = vmatpush1.bf16.msra.mxu0 %v12065_v40  ;;  %3485 = vmatpush1.bf16.msra.mxu1 %v12066_v19  ;;  %v12076_v40 = vld [vmem:[#allocation4_spill] sm:$0xff]  ;;  %v12141_v19 = vld [vmem:[#allocation151_spill] sm:$0xff] }
 0x830   :  { %3445 = vmatprep.subr.bf16.mxu0 %v12067_v17  ;;  %3486 = vmatprep.subr.bf16.mxu1 %v12068_v18  ;;  %v12077_v18 = vld [vmem:[#allocation5_spill] sm:$0xff]  ;;  %v12086_v17 = vld [vmem:[#allocation14_spill] sm:$0xff] }
 0x833   :  { %3446 = vmatpush1.bf16.msra.mxu0 %v12069_v45  ;;  %3487 = vmatpush1.bf16.msra.mxu1 %v12070_v28  ;;  %v12078_v45 = vld [vmem:[#allocation6_spill] sm:$0xff]  ;;  %v12079_v28 = vld [vmem:[#allocation7_spill] sm:$0xff] }
 0x834   :  { %3447 = vmatprep.subr.bf16.mxu0 %v12071_v2  ;;  %3488 = vmatprep.subr.bf16.mxu1 %v12072_v4  ;;  %v12080_v2 = vld [vmem:[#allocation8_spill] sm:$0xff]  ;;  %v12081_v4 = vld [vmem:[#allocation9_spill] sm:$0xff] }
 0x837   :  { %3448 = vmatpush1.bf16.msra.mxu0 %v12073_v29  ;;  %3489 = vmatpush1.bf16.msra.mxu1 %v12074_v20  ;;  %v12082_v29 = vld [vmem:[#allocation10_spill] sm:$0xff]  ;;  %v12083_v20 = vld [vmem:[#allocation11_spill] sm:$0xff] }
 0x838   :  { %3578 = vmatprep.subr.bf16.mxu0 %v12075_v52  ;;  %3619 = vmatprep.subr.bf16.mxu1 %v12076_v40  ;;  %v12084_v52 = vld [vmem:[#allocation12_spill] sm:$0xff]  ;;  %v12085_v40 = vld [vmem:[#allocation13_spill] sm:$0xff] }
 0x83a   :  { %3450 = vmatmul.mubr.bf16.vlgmr.msra.gmra.mrb[116].mxu0 %v9385_v27  ;;  %3491 = vmatmul.mubr.bf16.vlgmr.msra.gmra.mrb[116].mxu1 %v9385_v27  ;;  %v12087_v27 = vld [vmem:[#allocation15_spill] sm:$0xff] }
 0x83b   :  { %3579 = vmatpush1.bf16.msra.mxu0 %v12077_v18  ;;  %3620 = vmatpush1.bf16.msra.mxu1 %v12078_v45  ;;  %v12088_v18 = vld [vmem:[#allocation16_spill] sm:$0xff]  ;;  %v12089_v45 = vld [vmem:[#allocation17_spill] sm:$0xff] }
 0x83c   :  { %3580 = vmatprep.subr.bf16.mxu0 %v12079_v28  ;;  %3621 = vmatprep.subr.bf16.mxu1 %v12080_v2  ;;  %v12090_v28 = vld [vmem:[#allocation18_spill] sm:$0xff]  ;;  %v12091_v2 = vld [vmem:[#allocation19_spill] sm:$0xff] }
 0x83f   :  { %3581 = vmatpush1.bf16.msra.mxu0 %v12081_v4  ;;  %3622 = vmatpush1.bf16.msra.mxu1 %v12082_v29  ;;  %v12092_v4 = vld [vmem:[#allocation20_spill] sm:$0xff]  ;;  %v12093_v29 = vld [vmem:[#allocation21_spill] sm:$0xff] }
 0x840   :  { %3582 = vmatprep.subr.bf16.mxu0 %v12083_v20  ;;  %3623 = vmatprep.subr.bf16.mxu1 %v12084_v52  ;;  %v12094_v20 = vld [vmem:[#allocation22_spill] sm:$0xff]  ;;  %v12095_v52 = vld [vmem:[#allocation23_spill] sm:$0xff] }
 0x843   :  { %3583 = vmatpush1.bf16.msra.mxu0 %v12085_v40  ;;  %3624 = vmatpush1.bf16.msra.mxu1 %v12086_v17  ;;  %v12096_v40 = vld [vmem:[#allocation24_spill] sm:$0xff]  ;;  %v12097_v17 = vld [vmem:[#allocation25_spill] sm:$0xff] }
 0x844   :  { %3584 = vmatprep.subr.bf16.mxu0 %v12087_v27  ;;  %3625 = vmatprep.subr.bf16.mxu1 %v12088_v18  ;;  %v12098_v27 = vld [vmem:[#allocation26_spill] sm:$0xff]  ;;  %v12099_v18 = vld [vmem:[#allocation27_spill] sm:$0xff] }
 0x847   :  { %3585 = vmatpush1.bf16.msra.mxu0 %v12089_v45  ;;  %3626 = vmatpush1.bf16.msra.mxu1 %v12090_v28  ;;  %v12100_v45 = vld [vmem:[#allocation28_spill] sm:$0xff]  ;;  %v12101_v28 = vld [vmem:[#allocation29_spill] sm:$0xff] }
 0x848   :  { %3586 = vmatprep.subr.bf16.mxu0 %v12091_v2  ;;  %3627 = vmatprep.subr.bf16.mxu1 %v12092_v4  ;;  %v12102_v2 = vld [vmem:[#allocation30_spill] sm:$0xff]  ;;  %v12103_v4 = vld [vmem:[#allocation31_spill] sm:$0xff] }
 0x84b   :  { %3587 = vmatpush1.bf16.msra.mxu0 %v12093_v29  ;;  %3628 = vmatpush1.bf16.msra.mxu1 %v12094_v20  ;;  %v12104_v29 = vld [vmem:[#allocation32_spill] sm:$0xff]  ;;  %v12105_v20 = vld [vmem:[#allocation33_spill] sm:$0xff] }
 0x84c   :  { %3588 = vmatprep.subr.bf16.mxu0 %v12095_v52  ;;  %3629 = vmatprep.subr.bf16.mxu1 %v12096_v40  ;;  %v12106_v52 = vld [vmem:[#allocation34_spill] sm:$0xff]  ;;  %v12107_v40 = vld [vmem:[#allocation35_spill] sm:$0xff] }
 0x84f   :  { %3589 = vmatpush1.bf16.msra.mxu0 %v12097_v17  ;;  %3630 = vmatpush1.bf16.msra.mxu1 %v12098_v27  ;;  %v12108_v17 = vld [vmem:[#allocation36_spill] sm:$0xff]  ;;  %v12109_v27 = vld [vmem:[#allocation37_spill] sm:$0xff] }
 0x850   :  { %3590 = vmatprep.subr.bf16.mxu0 %v12099_v18  ;;  %3631 = vmatprep.subr.bf16.mxu1 %v12100_v45  ;;  %v12110_v18 = vld [vmem:[#allocation38_spill] sm:$0xff]  ;;  %v12111_v45 = vld [vmem:[#allocation39_spill] sm:$0xff] }
 0x853   :  { %3591 = vmatpush1.bf16.msra.mxu0 %v12101_v28  ;;  %3632 = vmatpush1.bf16.msra.mxu1 %v12102_v2  ;;  %v12112_v28 = vld [vmem:[#allocation40_spill] sm:$0xff]  ;;  %v12113_v2 = vld [vmem:[#allocation41_spill] sm:$0xff] }
 0x854   :  { %3592 = vmatprep.subr.bf16.mxu0 %v12103_v4  ;;  %3633 = vmatprep.subr.bf16.mxu1 %v12104_v29  ;;  %v12114_v4 = vld [vmem:[#allocation42_spill] sm:$0xff]  ;;  %v12115_v29 = vld [vmem:[#allocation43_spill] sm:$0xff] }
 0x857   :  { %3593 = vmatpush1.bf16.msra.mxu0 %v12105_v20  ;;  %3634 = vmatpush1.bf16.msra.mxu1 %v12106_v52  ;;  %v12116_v20 = vld [vmem:[#allocation44_spill] sm:$0xff]  ;;  %v12117_v52 = vld [vmem:[#allocation45_spill] sm:$0xff] }
 0x858   :  { %3594 = vmatprep.subr.bf16.mxu0 %v12107_v40  ;;  %3635 = vmatprep.subr.bf16.mxu1 %v12108_v17  ;;  %v12118_v40 = vld [vmem:[#allocation46_spill] sm:$0xff]  ;;  %v12119_v17 = vld [vmem:[#allocation47_spill] sm:$0xff] }
 0x85b   :  { %3595 = vmatpush1.bf16.msra.mxu0 %v12109_v27  ;;  %3636 = vmatpush1.bf16.msra.mxu1 %v12110_v18  ;;  %v12120_v27 = vld [vmem:[#allocation48_spill] sm:$0xff]  ;;  %v12121_v18 = vld [vmem:[#allocation49_spill] sm:$0xff] }
 0x85c   :  { %3596 = vmatprep.subr.bf16.mxu0 %v12111_v45  ;;  %3637 = vmatprep.subr.bf16.mxu1 %v12112_v28  ;;  %v12122_v45 = vld [vmem:[#allocation50_spill] sm:$0xff]  ;;  %v12123_v28 = vld [vmem:[#allocation51_spill] sm:$0xff] }
 0x85f   :  { %3597 = vmatpush1.bf16.msra.mxu0 %v12113_v2  ;;  %3638 = vmatpush1.bf16.msra.mxu1 %v12114_v4  ;;  %v12124_v2 = vld [vmem:[#allocation52_spill] sm:$0xff]  ;;  %v12125_v4 = vld [vmem:[#allocation53_spill] sm:$0xff] }
 0x860   :  { %3598 = vmatprep.subr.bf16.mxu0 %v12115_v29  ;;  %3639 = vmatprep.subr.bf16.mxu1 %v12116_v20  ;;  %v12126_v29 = vld [vmem:[#allocation54_spill] sm:$0xff]  ;;  %v12127_v20 = vld [vmem:[#allocation55_spill] sm:$0xff] }
 0x863   :  { %3599 = vmatpush1.bf16.msra.mxu0 %v12117_v52  ;;  %3640 = vmatpush1.bf16.msra.mxu1 %v12118_v40  ;;  %v12128_v52 = vld [vmem:[#allocation56_spill] sm:$0xff]  ;;  %v12129_v40 = vld [vmem:[#allocation57_spill] sm:$0xff] }
 0x864   :  { %3600 = vmatprep.subr.bf16.mxu0 %v12119_v17  ;;  %3641 = vmatprep.subr.bf16.mxu1 %v12120_v27  ;;  %v12130_v17 = vld [vmem:[#allocation58_spill] sm:$0xff]  ;;  %v12131_v27 = vld [vmem:[#allocation59_spill] sm:$0xff] }
 0x867   :  { %3601 = vmatpush1.bf16.msra.mxu0 %v12121_v18  ;;  %3642 = vmatpush1.bf16.msra.mxu1 %v12122_v45  ;;  %v12132_v18 = vld [vmem:[#allocation60_spill] sm:$0xff]  ;;  %v12133_v45 = vld [vmem:[#allocation61_spill] sm:$0xff] }
 0x868   :  { %3602 = vmatprep.subr.bf16.mxu0 %v12123_v28  ;;  %3643 = vmatprep.subr.bf16.mxu1 %v12124_v2  ;;  %v12134_v28 = vld [vmem:[#allocation62_spill] sm:$0xff]  ;;  %v12135_v2 = vld [vmem:[#allocation63_spill] sm:$0xff] }
 0x86b   :  { %3603 = vmatpush1.bf16.msra.mxu0 %v12125_v4  ;;  %3644 = vmatpush1.bf16.msra.mxu1 %v12126_v29  ;;  %v12136_v4 = vld [vmem:[#allocation64_spill] sm:$0xff]  ;;  %v12137_v29 = vld [vmem:[#allocation65_spill] sm:$0xff] }
 0x86c   :  { %3604 = vmatprep.subr.bf16.mxu0 %v12127_v20  ;;  %3645 = vmatprep.subr.bf16.mxu1 %v12128_v52  ;;  %v12138_v20 = vld [vmem:[#allocation66_spill] sm:$0xff]  ;;  %v12139_v52 = vld [vmem:[#allocation67_spill] sm:$0xff] }
 0x86f   :  { %3605 = vmatpush1.bf16.msra.mxu0 %v12129_v40  ;;  %3646 = vmatpush1.bf16.msra.mxu1 %v12130_v17  ;;  %v12140_v40 = vld [vmem:[#allocation68_spill] sm:$0xff] }
 0x870   :  { %3606 = vmatprep.subr.bf16.mxu0 %v12131_v27  ;;  %3647 = vmatprep.subr.bf16.mxu1 %v12132_v18 }
 0x873   :  { %3607 = vmatpush1.bf16.msra.mxu0 %v12133_v45  ;;  %3648 = vmatpush1.bf16.msra.mxu1 %v12134_v28 }
 0x874   :  { %3608 = vmatprep.subr.bf16.mxu0 %v12135_v2  ;;  %3649 = vmatprep.subr.bf16.mxu1 %v12136_v4 }
 0x877   :  { %3609 = vmatpush1.bf16.msra.mxu0 %v12137_v29  ;;  %3650 = vmatpush1.bf16.msra.mxu1 %v12138_v20 }
 0x878   :  { %3660 = vmatprep.subr.bf16.mxu0 %v12139_v52  ;;  %3701 = vmatprep.subr.bf16.mxu1 %v12140_v40 }
 0x8cd   :  { %v3369_v17 = vpop.f32.mrb[112].mxu0  ;;  %v3410_v27 = vpop.f32.mrb[112].mxu1 }
 0x8ce   :  { %v3499_v18 = vadd.f32 %v3369_v17, %v12141_v19  ;;  %v3501_v45 = vadd.f32 %v3410_v27, %v12142_v58  ;;  %v3371_v30 = vpop.f32.mrb[113].mxu0  ;;  %v3412_v28 = vpop.f32.mrb[113].mxu1 }
 0x8cf   :  { %v3500_v2 = vadd.f32 %v3371_v30, %v12143_v55  ;;  %v3502_v4 = vadd.f32 %v3412_v28, %v12144_v42  ;;  %v3373_v47 = vpop.f32.mrb[114].mxu0  ;;  %v3414_v29 = vpop.f32.mrb[114].mxu1 }
 0x8d0   :  { %v6220_v11 = vmul.f32 -1.442695, %v3501_v45  ;;  %v3374_v20 = vpop.f32.mrb[115].mxu0  ;;  %v3415_v15 = vpop.f32.mrb[115].mxu1  ;;  %v6218_v47 = vmul.f32 -1.442695, %v3499_v18 }
 0x8d1   :  { %v6221_v52 = vmul.f32 -1.442695, %v3502_v4  ;;  %v6219_v30 = vmul.f32 -1.442695, %v3500_v2  ;;  %v12148_v18 = vld [vmem:[#allocation214_spill] sm:$0xff] }
 0x8d2   :  { %6536 = vpow2.f32 %v6220_v11 }
 0x8d3   :  { %6538 = vpow2.f32 %v6221_v52 }
 0x8dc   :  { %v6537_v40 = vpop.eup %6536 }
 0x8dd   :  { %v3525_v62 = vadd.f32 1.0, %v6537_v40  ;;  %v6539_v43 = vpop.eup %6538  ;;  %v12146_v40 = vld [vmem:[#allocation212_spill] sm:$0xff] }
 0x8de   :  { %v3526_v19 = vadd.f32 1.0, %v6539_v43 }
 0x8df   :  { %6540 = vrcp.f32 %v3525_v62  ;;  %v12145_v62 = vld [vmem:[#allocation211_spill] sm:$0xff] }
 0x8e0   :  { %6542 = vrcp.f32 %v3526_v19  ;;  %v12147_v19 = vld [vmem:[#allocation213_spill] sm:$0xff] }
 0x8e1   :  { %6544 = vpow2.f32 %v6218_v47 }
 0x8e2   :  { %6546 = vpow2.f32 %v6219_v30 }
 0x8e9   :  { %v6541_v58 = vpop.eup %6540 }
 0x8ea   :  { %v3545_v17 = vmul.f32 %v6541_v58, %v9367_v60  ;;  %v6543_v55 = vpop.eup %6542 }
 0x8eb   :  { %v3546_v42 = vmul.f32 %v6543_v55, %v9371_v16  ;;  %v6545_v15 = vpop.eup %6544 }
 0x8ec   :  { %v6547_v4 = vpop.eup %6546  ;;  %v3513_v11 = vadd.f32 1.0, %v6545_v15 }
 0x8ed   :  { %v3514_v29 = vadd.f32 1.0, %v6547_v4 }
 0x8ee   :  { %6548 = vrcp.f32 %v3513_v11 }
 0x8ef   :  { %6550 = vrcp.f32 %v3514_v29 }
 0x8f8   :  { %v6549_v11 = vpop.eup %6548 }
 0x90d   :  { %v3451_v20 = vpop.f32.mrb[116].mxu0  ;;  %v3492_v52 = vpop.f32.mrb[116].mxu1 }
 0x90e   :  { %v3503_v43 = vadd.f32 %v3451_v20, %v12145_v62  ;;  %v3505_v45 = vadd.f32 %v3492_v52, %v12146_v40  ;;  %v3453_v28 = vpop.f32.mrb[117].mxu0  ;;  %v3494_v27 = vpop.f32.mrb[117].mxu1 }
 0x90f   :  { %v3504_v58 = vadd.f32 %v3453_v28, %v12147_v19  ;;  %v3506_v2 = vadd.f32 %v3494_v27, %v12148_v18  ;;  %v3455_v55 = vpop.f32.mrb[118].mxu0  ;;  %v3496_v47 = vpop.f32.mrb[118].mxu1 }
 0x910   :  { %6552 = vtanh.f32 %v3503_v43  ;;  %v6222_v30 = vmul.f32 -1.442695, %v3505_v45  ;;  %v3456_v15 = vpop.f32.mrb[119].mxu0  ;;  %v3497_v4 = vpop.f32.mrb[119].mxu1 }
 0x911   :  { %6554 = vtanh.f32 %v3504_v58  ;;  %v6223_v34 = vmul.f32 -1.442695, %v3506_v2  ;;  %v6551_v20 = vpop.eup %6550  ;;  %v3559_v19 = vpop.permute.xlu0 %3558  ;;  %v12151_v4 = vld [vmem:[#allocation108_spill] sm:$0xff] }
 0x912   :  { %6556 = vpow2.f32 %v6222_v30  ;;  %vm3560_vm7 = vcmp.eq.s32.totalorder %v3559_v19, 1  ;;  %v12159_v19 = vld [vmem:[#allocation116_spill] sm:$0xff] }
 0x913   :  { %6558 = vpow2.f32 %v6223_v34 }
 0x91a   :  { %v6553_v52 = vpop.eup %6552 }
 0x91b   :  { %v6555_v62 = vpop.eup %6554  ;;  %v3547_v40 = vmul.f32 %v6553_v52, %v6549_v11  ;;  %v12152_v11 = vld [vmem:[#allocation109_spill] sm:$0xff]  ;;  %v12154_v52 = vld [vmem:[#allocation111_spill] sm:$0xff] }
 0x91c   :  { %v6557_v29 = vpop.eup %6556  ;;  %v3548_v25 = vmul.f32 %v6555_v62, %v6551_v20  ;;  %v12153_v20 = vld [vmem:[#allocation110_spill] sm:$0xff]  ;;  %v12155_v62 = vld [vmem:[#allocation112_spill] sm:$0xff] }
 0x91d   :  { %v6559_v28 = vpop.eup %6558  ;;  %v3549_v27 = vadd.f32 %v3547_v40, %v3545_v17  ;;  %v3539_v18 = vadd.f32 1.0, %v6557_v29  ;;  %v12156_v40 = vld [vmem:[#allocation113_spill] sm:$0xff]  ;;  %v12157_v29 = vld [vmem:[#allocation114_spill] sm:$0xff] }
 0x91e   :  { %v3550_v43 = vadd.f32 %v3548_v25, %v3546_v42  ;;  %v3540_v45 = vadd.f32 1.0, %v6559_v28  ;;  %v12158_v28 = vld [vmem:[#allocation115_spill] sm:$0xff] }
 0x91f   :  { %6560 = vtanh.f32 %v3549_v27  ;;  %v9531_v58 = vsel %vm3560_vm7, %v3549_v27, %v9367_v60  ;;  %v12160_v27 = vld [vmem:[#allocation117_spill] sm:$0xff] }
 0x920   :  { %6562 = vrcp.f32 %v3539_v18  ;;  %v9535_v34 = vsel %vm3560_vm7, %v3550_v43, %v9371_v16  ;;  %v12161_v18 = vld [vmem:[#allocation118_spill] sm:$0xff] }
 0x921   :  { %6564 = vtanh.f32 %v3550_v43  ;;  %v12162_v43 = vld [vmem:[#allocation119_spill] sm:$0xff] }
 0x922   :  { %6566 = vrcp.f32 %v3540_v45  ;;  %v12163_v45 = vld [vmem:[#allocation120_spill] sm:$0xff] }
 0x929   :  { %v6561_v2 = vpop.eup %6560 }
 0x92a   :  { %v6563_v55 = vpop.eup %6562 }
 0x92b   :  { %v6565_v47 = vpop.eup %6564  ;;  %v3553_v17 = vmul.f32 %v6563_v55, %v6561_v2  ;;  %v12164_v2 = vld [vmem:[#allocation121_spill] sm:$0xff]  ;;  %v12165_v55 = vld [vmem:[#allocation122_spill] sm:$0xff] }
 0x92c   :  { %v6567_v30 = vpop.eup %6566 }
 0x92d   :  { %v3554_v15 = vmul.f32 %v6567_v30, %v6565_v47  ;;  %v9539_v25 = vsel %vm3560_vm7, %v3553_v17, %v9375_v57  ;;  %v12149_v57 = vld [vmem:[#allocation106_spill] sm:$0xff]  ;;  %v12166_v47 = vld [vmem:[#allocation123_spill] sm:$0xff]  ;;  %v12167_v17 = vld [vmem:[#allocation124_spill] sm:$0xff] }
 0x92e   :  { %v9549_v42 = vpack.c.bf16 %v9539_v25, %v9539_v25  ;;  %v12168_v30 = vld [vmem:[#allocation125_spill] sm:$0xff] }
 0x92f   :  { %v9543_v60 = vsel %vm3560_vm7, %v3554_v15, %v9379_v21  ;;  %v12150_v21 = vld [vmem:[#allocation107_spill] sm:$0xff]  ;;  %v12169_v15 = vld [vmem:[#allocation126_spill] sm:$0xff] }
 0x930   :  { %v3577_v16 = vpack.c.bf16 %v9543_v60, %v9543_v60 }
 0x932   :  { %3610 = vmatprep.mubr.bf16.mxu0 %v3577_v16  ;;  %3651 = vmatprep.mubr.bf16.mxu1 %v3577_v16 }
 0x933   :  { %3611 = vmatmul.mubr.bf16.vlgmr.msra.gmra.mrb[120].mxu0 %v9549_v42  ;;  %3652 = vmatmul.mubr.bf16.vlgmr.msra.gmra.mrb[120].mxu1 %v9549_v42 }
 0x934   :  { %3661 = vmatpush1.bf16.msra.mxu0 %v11548_v53  ;;  %3702 = vmatpush1.bf16.msra.mxu1 %v11549_v10 }
 0x935   :  { %3692 = vmatprep.mubr.bf16.mxu0 %v3577_v16  ;;  %3733 = vmatprep.mubr.bf16.mxu1 %v3577_v16  ;;  %v12170_v16 = vld [vmem:[#allocation127_spill] sm:$0xff] }
 0x936   :  { %3662 = vmatprep.subr.bf16.mxu0 %v11550_v6  ;;  %3703 = vmatprep.subr.bf16.mxu1 %v11551_v44 }
 0x938   :  { %3663 = vmatpush1.bf16.msra.mxu0 %v11552_v3  ;;  %3704 = vmatpush1.bf16.msra.mxu1 %v11553_v5 }
 0x939   :  { %3664 = vmatprep.subr.bf16.mxu0 %v11554_v48  ;;  %3705 = vmatprep.subr.bf16.mxu1 %v11555_v8 }
 0x93c   :  { %3665 = vmatpush1.bf16.msra.mxu0 %v11556_v46  ;;  %3706 = vmatpush1.bf16.msra.mxu1 %v11557_v35 }
 0x93d   :  { %3666 = vmatprep.subr.bf16.mxu0 %v11558_v49  ;;  %3707 = vmatprep.subr.bf16.mxu1 %v11559_v36 }
 0x940   :  { %3667 = vmatpush1.bf16.msra.mxu0 %v11560_v50  ;;  %3708 = vmatpush1.bf16.msra.mxu1 %v11561_v54 }
 0x941   :  { %3668 = vmatprep.subr.bf16.mxu0 %v11653_v56  ;;  %3709 = vmatprep.subr.bf16.mxu1 %v11654_v51 }
 0x944   :  { %3669 = vmatpush1.bf16.msra.mxu0 %v11655_v13  ;;  %3710 = vmatpush1.bf16.msra.mxu1 %v11656_v33 }
 0x945   :  { %3670 = vmatprep.subr.bf16.mxu0 %v11657_v23  ;;  %3711 = vmatprep.subr.bf16.mxu1 %v11658_v59 }
 0x948   :  { %3671 = vmatpush1.bf16.msra.mxu0 %v11659_v39  ;;  %3712 = vmatpush1.bf16.msra.mxu1 %v11660_v63 }
 0x949   :  { %3672 = vmatprep.subr.bf16.mxu0 %v11661_v7  ;;  %3713 = vmatprep.subr.bf16.mxu1 %v11662_v0 }
 0x94c   :  { %3673 = vmatpush1.bf16.msra.mxu0 %v11663_v14  ;;  %3714 = vmatpush1.bf16.msra.mxu1 %v11664_v32 }
 0x94d   :  { %3674 = vmatprep.subr.bf16.mxu0 %v11665_v12  ;;  %3715 = vmatprep.subr.bf16.mxu1 %v11753_v24 }
 0x950   :  { %3675 = vmatpush1.bf16.msra.mxu0 %v11754_v9  ;;  %3716 = vmatpush1.bf16.msra.mxu1 %v11755_v41 }
 0x951   :  { %3676 = vmatprep.subr.bf16.mxu0 %v11669_v26  ;;  %3717 = vmatprep.subr.bf16.mxu1 %v11670_v1 }
 0x954   :  { %3677 = vmatpush1.bf16.msra.mxu0 %v11671_v22  ;;  %3718 = vmatpush1.bf16.msra.mxu1 %v11672_v38 }
 0x955   :  { %3678 = vmatprep.subr.bf16.mxu0 %v11673_v37  ;;  %3719 = vmatprep.subr.bf16.mxu1 %v11674_v31 }
 0x958   :  { %3679 = vmatpush1.bf16.msra.mxu0 %v11675_v61  ;;  %3720 = vmatpush1.bf16.msra.mxu1 %v12149_v57 }
 0x959   :  { %3680 = vmatprep.subr.bf16.mxu0 %v12150_v21  ;;  %3721 = vmatprep.subr.bf16.mxu1 %v12151_v4 }
 0x95c   :  { %3681 = vmatpush1.bf16.msra.mxu0 %v12152_v11  ;;  %3722 = vmatpush1.bf16.msra.mxu1 %v12153_v20 }
 0x95d   :  { %3682 = vmatprep.subr.bf16.mxu0 %v12154_v52  ;;  %3723 = vmatprep.subr.bf16.mxu1 %v12155_v62 }
 0x960   :  { %3683 = vmatpush1.bf16.msra.mxu0 %v12156_v40  ;;  %3724 = vmatpush1.bf16.msra.mxu1 %v12157_v29  ;;  %v12242_v29 = vld [vmem:[#allocation157_spill] sm:$0xff]  ;;  %v12243_v40 = vld [vmem:[#allocation158_spill] sm:$0xff] }
 0x961   :  { %3684 = vmatprep.subr.bf16.mxu0 %v12158_v28  ;;  %3725 = vmatprep.subr.bf16.mxu1 %v12159_v19  ;;  %v12241_v19 = vld [vmem:[#allocation156_spill] sm:$0xff] }
 0x964   :  { %3685 = vmatpush1.bf16.msra.mxu0 %v12160_v27  ;;  %3726 = vmatpush1.bf16.msra.mxu1 %v12161_v18  ;;  %v12171_v27 = vld [vmem:[#allocation128_spill] sm:$0xff]  ;;  %v12172_v18 = vld [vmem:[#allocation129_spill] sm:$0xff] }
 0x965   :  { %3686 = vmatprep.subr.bf16.mxu0 %v12162_v43  ;;  %3727 = vmatprep.subr.bf16.mxu1 %v12163_v45  ;;  %v12173_v43 = vld [vmem:[#allocation130_spill] sm:$0xff]  ;;  %v12174_v45 = vld [vmem:[#allocation3_spill] sm:$0xff] }
 0x968   :  { %3687 = vmatpush1.bf16.msra.mxu0 %v12164_v2  ;;  %3728 = vmatpush1.bf16.msra.mxu1 %v12165_v55  ;;  %v12175_v2 = vld [vmem:[#allocation4_spill] sm:$0xff]  ;;  %v12240_v55 = vld [vmem:[#allocation155_spill] sm:$0xff] }
 0x969   :  { %3688 = vmatprep.subr.bf16.mxu0 %v12166_v47  ;;  %3729 = vmatprep.subr.bf16.mxu1 %v12167_v17  ;;  %v12176_v17 = vld [vmem:[#allocation5_spill] sm:$0xff]  ;;  %v12185_v47 = vld [vmem:[#allocation14_spill] sm:$0xff] }
 0x96c   :  { %3689 = vmatpush1.bf16.msra.mxu0 %v12168_v30  ;;  %3730 = vmatpush1.bf16.msra.mxu1 %v12169_v15  ;;  %v12177_v30 = vld [vmem:[#allocation6_spill] sm:$0xff]  ;;  %v12178_v15 = vld [vmem:[#allocation7_spill] sm:$0xff] }
 0x96d   :  { %3690 = vmatprep.subr.bf16.mxu0 %v12170_v16  ;;  %3731 = vmatprep.subr.bf16.mxu1 %v12171_v27  ;;  %v12179_v16 = vld [vmem:[#allocation8_spill] sm:$0xff]  ;;  %v12180_v27 = vld [vmem:[#allocation9_spill] sm:$0xff] }
 0x970   :  { %3691 = vmatpush1.bf16.msra.mxu0 %v12172_v18  ;;  %3732 = vmatpush1.bf16.msra.mxu1 %v12173_v43  ;;  %v12181_v18 = vld [vmem:[#allocation10_spill] sm:$0xff]  ;;  %v12182_v43 = vld [vmem:[#allocation11_spill] sm:$0xff] }
 0x971   :  { %3821 = vmatprep.subr.bf16.mxu0 %v12174_v45  ;;  %3862 = vmatprep.subr.bf16.mxu1 %v12175_v2  ;;  %v12183_v45 = vld [vmem:[#allocation12_spill] sm:$0xff]  ;;  %v12184_v2 = vld [vmem:[#allocation13_spill] sm:$0xff] }
 0x973   :  { %3693 = vmatmul.mubr.bf16.vlgmr.msra.gmra.mrb[124].mxu0 %v9549_v42  ;;  %3734 = vmatmul.mubr.bf16.vlgmr.msra.gmra.mrb[124].mxu1 %v9549_v42  ;;  %v12186_v42 = vld [vmem:[#allocation15_spill] sm:$0xff] }
 0x974   :  { %3822 = vmatpush1.bf16.msra.mxu0 %v12176_v17  ;;  %3863 = vmatpush1.bf16.msra.mxu1 %v12177_v30  ;;  %v12187_v17 = vld [vmem:[#allocation16_spill] sm:$0xff]  ;;  %v12188_v30 = vld [vmem:[#allocation17_spill] sm:$0xff] }
 0x975   :  { %3823 = vmatprep.subr.bf16.mxu0 %v12178_v15  ;;  %3864 = vmatprep.subr.bf16.mxu1 %v12179_v16  ;;  %v12189_v15 = vld [vmem:[#allocation18_spill] sm:$0xff]  ;;  %v12190_v16 = vld [vmem:[#allocation19_spill] sm:$0xff] }
 0x978   :  { %3824 = vmatpush1.bf16.msra.mxu0 %v12180_v27  ;;  %3865 = vmatpush1.bf16.msra.mxu1 %v12181_v18  ;;  %v12191_v27 = vld [vmem:[#allocation20_spill] sm:$0xff]  ;;  %v12192_v18 = vld [vmem:[#allocation21_spill] sm:$0xff] }
 0x979   :  { %3825 = vmatprep.subr.bf16.mxu0 %v12182_v43  ;;  %3866 = vmatprep.subr.bf16.mxu1 %v12183_v45  ;;  %v12193_v43 = vld [vmem:[#allocation22_spill] sm:$0xff]  ;;  %v12194_v45 = vld [vmem:[#allocation23_spill] sm:$0xff] }
 0x97c   :  { %3826 = vmatpush1.bf16.msra.mxu0 %v12184_v2  ;;  %3867 = vmatpush1.bf16.msra.mxu1 %v12185_v47  ;;  %v12195_v2 = vld [vmem:[#allocation24_spill] sm:$0xff]  ;;  %v12196_v47 = vld [vmem:[#allocation25_spill] sm:$0xff] }
 0x97d   :  { %3827 = vmatprep.subr.bf16.mxu0 %v12186_v42  ;;  %3868 = vmatprep.subr.bf16.mxu1 %v12187_v17  ;;  %v12197_v42 = vld [vmem:[#allocation26_spill] sm:$0xff]  ;;  %v12198_v17 = vld [vmem:[#allocation27_spill] sm:$0xff] }
 0x980   :  { %3828 = vmatpush1.bf16.msra.mxu0 %v12188_v30  ;;  %3869 = vmatpush1.bf16.msra.mxu1 %v12189_v15  ;;  %v12199_v30 = vld [vmem:[#allocation28_spill] sm:$0xff]  ;;  %v12200_v15 = vld [vmem:[#allocation29_spill] sm:$0xff] }
 0x981   :  { %3829 = vmatprep.subr.bf16.mxu0 %v12190_v16  ;;  %3870 = vmatprep.subr.bf16.mxu1 %v12191_v27  ;;  %v12201_v16 = vld [vmem:[#allocation30_spill] sm:$0xff]  ;;  %v12202_v27 = vld [vmem:[#allocation31_spill] sm:$0xff] }
 0x984   :  { %3830 = vmatpush1.bf16.msra.mxu0 %v12192_v18  ;;  %3871 = vmatpush1.bf16.msra.mxu1 %v12193_v43  ;;  %v12203_v18 = vld [vmem:[#allocation32_spill] sm:$0xff]  ;;  %v12204_v43 = vld [vmem:[#allocation33_spill] sm:$0xff] }
 0x985   :  { %3831 = vmatprep.subr.bf16.mxu0 %v12194_v45  ;;  %3872 = vmatprep.subr.bf16.mxu1 %v12195_v2  ;;  %v12205_v45 = vld [vmem:[#allocation34_spill] sm:$0xff]  ;;  %v12206_v2 = vld [vmem:[#allocation35_spill] sm:$0xff] }
 0x988   :  { %3832 = vmatpush1.bf16.msra.mxu0 %v12196_v47  ;;  %3873 = vmatpush1.bf16.msra.mxu1 %v12197_v42  ;;  %v12207_v47 = vld [vmem:[#allocation36_spill] sm:$0xff]  ;;  %v12208_v42 = vld [vmem:[#allocation37_spill] sm:$0xff] }
 0x989   :  { %3833 = vmatprep.subr.bf16.mxu0 %v12198_v17  ;;  %3874 = vmatprep.subr.bf16.mxu1 %v12199_v30  ;;  %v12209_v17 = vld [vmem:[#allocation38_spill] sm:$0xff]  ;;  %v12210_v30 = vld [vmem:[#allocation39_spill] sm:$0xff] }
 0x98c   :  { %3834 = vmatpush1.bf16.msra.mxu0 %v12200_v15  ;;  %3875 = vmatpush1.bf16.msra.mxu1 %v12201_v16  ;;  %v12211_v15 = vld [vmem:[#allocation40_spill] sm:$0xff]  ;;  %v12212_v16 = vld [vmem:[#allocation41_spill] sm:$0xff] }
 0x98d   :  { %3835 = vmatprep.subr.bf16.mxu0 %v12202_v27  ;;  %3876 = vmatprep.subr.bf16.mxu1 %v12203_v18  ;;  %v12213_v27 = vld [vmem:[#allocation42_spill] sm:$0xff]  ;;  %v12214_v18 = vld [vmem:[#allocation43_spill] sm:$0xff] }
 0x990   :  { %3836 = vmatpush1.bf16.msra.mxu0 %v12204_v43  ;;  %3877 = vmatpush1.bf16.msra.mxu1 %v12205_v45  ;;  %v12215_v43 = vld [vmem:[#allocation44_spill] sm:$0xff]  ;;  %v12216_v45 = vld [vmem:[#allocation45_spill] sm:$0xff] }
 0x991   :  { %3837 = vmatprep.subr.bf16.mxu0 %v12206_v2  ;;  %3878 = vmatprep.subr.bf16.mxu1 %v12207_v47  ;;  %v12217_v2 = vld [vmem:[#allocation46_spill] sm:$0xff]  ;;  %v12218_v47 = vld [vmem:[#allocation47_spill] sm:$0xff] }
 0x994   :  { %3838 = vmatpush1.bf16.msra.mxu0 %v12208_v42  ;;  %3879 = vmatpush1.bf16.msra.mxu1 %v12209_v17  ;;  %v12219_v42 = vld [vmem:[#allocation48_spill] sm:$0xff]  ;;  %v12220_v17 = vld [vmem:[#allocation49_spill] sm:$0xff] }
 0x995   :  { %3839 = vmatprep.subr.bf16.mxu0 %v12210_v30  ;;  %3880 = vmatprep.subr.bf16.mxu1 %v12211_v15  ;;  %v12221_v30 = vld [vmem:[#allocation50_spill] sm:$0xff]  ;;  %v12222_v15 = vld [vmem:[#allocation51_spill] sm:$0xff] }
 0x998   :  { %3840 = vmatpush1.bf16.msra.mxu0 %v12212_v16  ;;  %3881 = vmatpush1.bf16.msra.mxu1 %v12213_v27  ;;  %v12223_v16 = vld [vmem:[#allocation52_spill] sm:$0xff]  ;;  %v12224_v27 = vld [vmem:[#allocation53_spill] sm:$0xff] }
 0x999   :  { %3841 = vmatprep.subr.bf16.mxu0 %v12214_v18  ;;  %3882 = vmatprep.subr.bf16.mxu1 %v12215_v43  ;;  %v12225_v18 = vld [vmem:[#allocation54_spill] sm:$0xff]  ;;  %v12226_v43 = vld [vmem:[#allocation55_spill] sm:$0xff] }
 0x99c   :  { %3842 = vmatpush1.bf16.msra.mxu0 %v12216_v45  ;;  %3883 = vmatpush1.bf16.msra.mxu1 %v12217_v2  ;;  %v12227_v45 = vld [vmem:[#allocation56_spill] sm:$0xff]  ;;  %v12228_v2 = vld [vmem:[#allocation57_spill] sm:$0xff] }
 0x99d   :  { %3843 = vmatprep.subr.bf16.mxu0 %v12218_v47  ;;  %3884 = vmatprep.subr.bf16.mxu1 %v12219_v42  ;;  %v12229_v47 = vld [vmem:[#allocation58_spill] sm:$0xff]  ;;  %v12230_v42 = vld [vmem:[#allocation59_spill] sm:$0xff] }
 0x9a0   :  { %3844 = vmatpush1.bf16.msra.mxu0 %v12220_v17  ;;  %3885 = vmatpush1.bf16.msra.mxu1 %v12221_v30  ;;  %v12231_v17 = vld [vmem:[#allocation60_spill] sm:$0xff]  ;;  %v12232_v30 = vld [vmem:[#allocation61_spill] sm:$0xff] }
 0x9a1   :  { %3845 = vmatprep.subr.bf16.mxu0 %v12222_v15  ;;  %3886 = vmatprep.subr.bf16.mxu1 %v12223_v16  ;;  %v12233_v15 = vld [vmem:[#allocation62_spill] sm:$0xff]  ;;  %v12234_v16 = vld [vmem:[#allocation63_spill] sm:$0xff] }
 0x9a4   :  { %3846 = vmatpush1.bf16.msra.mxu0 %v12224_v27  ;;  %3887 = vmatpush1.bf16.msra.mxu1 %v12225_v18  ;;  %v12235_v27 = vld [vmem:[#allocation64_spill] sm:$0xff]  ;;  %v12236_v18 = vld [vmem:[#allocation65_spill] sm:$0xff] }
 0x9a5   :  { %3847 = vmatprep.subr.bf16.mxu0 %v12226_v43  ;;  %3888 = vmatprep.subr.bf16.mxu1 %v12227_v45  ;;  %v12237_v43 = vld [vmem:[#allocation66_spill] sm:$0xff]  ;;  %v12238_v45 = vld [vmem:[#allocation67_spill] sm:$0xff] }
 0x9a8   :  { %3848 = vmatpush1.bf16.msra.mxu0 %v12228_v2  ;;  %3889 = vmatpush1.bf16.msra.mxu1 %v12229_v47  ;;  %v12239_v2 = vld [vmem:[#allocation68_spill] sm:$0xff] }
 0x9a9   :  { %3849 = vmatprep.subr.bf16.mxu0 %v12230_v42  ;;  %3890 = vmatprep.subr.bf16.mxu1 %v12231_v17 }
 0x9ac   :  { %3850 = vmatpush1.bf16.msra.mxu0 %v12232_v30  ;;  %3891 = vmatpush1.bf16.msra.mxu1 %v12233_v15 }
 0x9ad   :  { %3851 = vmatprep.subr.bf16.mxu0 %v12234_v16  ;;  %3892 = vmatprep.subr.bf16.mxu1 %v12235_v27 }
 0x9b0   :  { %3852 = vmatpush1.bf16.msra.mxu0 %v12236_v18  ;;  %3893 = vmatpush1.bf16.msra.mxu1 %v12237_v43 }
 0x9b1   :  { %3903 = vmatprep.subr.bf16.mxu0 %v12238_v45  ;;  %3944 = vmatprep.subr.bf16.mxu1 %v12239_v2 }
 0xa06   :  { %v3612_v47 = vpop.f32.mrb[120].mxu0  ;;  %v3653_v42 = vpop.f32.mrb[120].mxu1 }
 0xa07   :  { %v3742_v17 = vadd.f32 %v3612_v47, %v12240_v55  ;;  %v3744_v30 = vadd.f32 %v3653_v42, %v12241_v19  ;;  %v3614_v28 = vpop.f32.mrb[121].mxu0  ;;  %v3655_v15 = vpop.f32.mrb[121].mxu1 }
 0xa08   :  { %v3743_v16 = vadd.f32 %v3614_v28, %v12242_v29  ;;  %v3745_v27 = vadd.f32 %v3655_v15, %v12243_v40  ;;  %v3616_v62 = vpop.f32.mrb[122].mxu0  ;;  %v3657_v18 = vpop.f32.mrb[122].mxu1 }
 0xa09   :  { %v6226_v52 = vmul.f32 -1.442695, %v3744_v30  ;;  %v3617_v43 = vpop.f32.mrb[123].mxu0  ;;  %v3658_v20 = vpop.f32.mrb[123].mxu1  ;;  %v6224_v62 = vmul.f32 -1.442695, %v3742_v17 }
 0xa0a   :  { %v6227_v45 = vmul.f32 -1.442695, %v3745_v27  ;;  %v6225_v28 = vmul.f32 -1.442695, %v3743_v16  ;;  %v12247_v17 = vld [vmem:[#allocation218_spill] sm:$0xff] }
 0xa0b   :  { %6568 = vpow2.f32 %v6226_v52 }
 0xa0c   :  { %6570 = vpow2.f32 %v6227_v45 }
 0xa15   :  { %v6569_v2 = vpop.eup %6568 }
 0xa16   :  { %v3768_v11 = vadd.f32 1.0, %v6569_v2  ;;  %v6571_v4 = vpop.eup %6570  ;;  %v12245_v2 = vld [vmem:[#allocation216_spill] sm:$0xff] }
 0xa17   :  { %v3769_v55 = vadd.f32 1.0, %v6571_v4 }
 0xa18   :  { %6572 = vrcp.f32 %v3768_v11  ;;  %v12244_v11 = vld [vmem:[#allocation215_spill] sm:$0xff] }
 0xa19   :  { %6574 = vrcp.f32 %v3769_v55  ;;  %v12246_v55 = vld [vmem:[#allocation217_spill] sm:$0xff] }
 0xa1a   :  { %6576 = vpow2.f32 %v6224_v62 }
 0xa1b   :  { %6578 = vpow2.f32 %v6225_v28 }
 0xa22   :  { %v6573_v19 = vpop.eup %6572 }
 0xa23   :  { %v3788_v47 = vmul.f32 %v6573_v19, %v9531_v58  ;;  %v6575_v29 = vpop.eup %6574 }
 0xa24   :  { %v3789_v40 = vmul.f32 %v6575_v29, %v9535_v34  ;;  %v6577_v20 = vpop.eup %6576 }
 0xa25   :  { %v6579_v27 = vpop.eup %6578  ;;  %v3756_v52 = vadd.f32 1.0, %v6577_v20 }
 0xa26   :  { %v3757_v18 = vadd.f32 1.0, %v6579_v27 }
 0xa27   :  { %6580 = vrcp.f32 %v3756_v52 }
 0xa28   :  { %6582 = vrcp.f32 %v3757_v18 }
 0xa31   :  { %v6581_v52 = vpop.eup %6580 }
 0xa46   :  { %v3694_v43 = vpop.f32.mrb[124].mxu0  ;;  %v3735_v45 = vpop.f32.mrb[124].mxu1 }
 0xa47   :  { %v3746_v4 = vadd.f32 %v3694_v43, %v12244_v11  ;;  %v3748_v30 = vadd.f32 %v3735_v45, %v12245_v2  ;;  %v3696_v15 = vpop.f32.mrb[125].mxu0  ;;  %v3737_v42 = vpop.f32.mrb[125].mxu1 }
 0xa48   :  { %v3747_v19 = vadd.f32 %v3696_v15, %v12246_v55  ;;  %v3749_v16 = vadd.f32 %v3737_v42, %v12247_v17  ;;  %v3698_v29 = vpop.f32.mrb[126].mxu0  ;;  %v3739_v62 = vpop.f32.mrb[126].mxu1 }
 0xa49   :  { %6584 = vtanh.f32 %v3746_v4  ;;  %v6228_v28 = vmul.f32 -1.442695, %v3748_v30  ;;  %v3699_v20 = vpop.f32.mrb[127].mxu0  ;;  %v3740_v27 = vpop.f32.mrb[127].mxu1 }
 0xa4a   :  { %6586 = vtanh.f32 %v3747_v19  ;;  %v6229_v21 = vmul.f32 -1.442695, %v3749_v16  ;;  %v6583_v43 = vpop.eup %6582  ;;  %v3802_v55 = vpop.permute.xlu1 %3801  ;;  %v12250_v27 = vld [vmem:[#allocation108_spill] sm:$0xff] }
 0xa4b   :  { %6588 = vpow2.f32 %v6228_v28  ;;  %vm3803_vm8 = vcmp.eq.s32.totalorder %v3802_v55, 1  ;;  %v12258_v55 = vld [vmem:[#allocation116_spill] sm:$0xff] }
 0xa4c   :  { %6590 = vpow2.f32 %v6229_v21 }
 0xa53   :  { %v6585_v45 = vpop.eup %6584 }
 0xa54   :  { %v6587_v11 = vpop.eup %6586  ;;  %v3790_v2 = vmul.f32 %v6585_v45, %v6581_v52  ;;  %v12251_v52 = vld [vmem:[#allocation109_spill] sm:$0xff]  ;;  %v12253_v45 = vld [vmem:[#allocation111_spill] sm:$0xff] }
 0xa55   :  { %v6589_v18 = vpop.eup %6588  ;;  %v3791_v57 = vmul.f32 %v6587_v11, %v6583_v43  ;;  %v12252_v43 = vld [vmem:[#allocation110_spill] sm:$0xff]  ;;  %v12254_v11 = vld [vmem:[#allocation112_spill] sm:$0xff] }
 0xa56   :  { %v6591_v15 = vpop.eup %6590  ;;  %v3792_v42 = vadd.f32 %v3790_v2, %v3788_v47  ;;  %v3782_v17 = vadd.f32 1.0, %v6589_v18  ;;  %v12255_v2 = vld [vmem:[#allocation113_spill] sm:$0xff]  ;;  %v12256_v18 = vld [vmem:[#allocation114_spill] sm:$0xff] }
 0xa57   :  { %v3793_v4 = vadd.f32 %v3791_v57, %v3789_v40  ;;  %v3783_v30 = vadd.f32 1.0, %v6591_v15  ;;  %v12257_v15 = vld [vmem:[#allocation115_spill] sm:$0xff] }
 0xa58   :  { %6592 = vtanh.f32 %v3792_v42  ;;  %v9695_v19 = vsel %vm3803_vm8, %v3792_v42, %v9531_v58  ;;  %v12259_v42 = vld [vmem:[#allocation117_spill] sm:$0xff] }
 0xa59   :  { %6594 = vrcp.f32 %v3782_v17  ;;  %v9699_v21 = vsel %vm3803_vm8, %v3793_v4, %v9535_v34  ;;  %v12260_v17 = vld [vmem:[#allocation118_spill] sm:$0xff] }
 0xa5a   :  { %6596 = vtanh.f32 %v3793_v4  ;;  %v12261_v4 = vld [vmem:[#allocation119_spill] sm:$0xff] }
 0xa5b   :  { %6598 = vrcp.f32 %v3783_v30  ;;  %v12262_v30 = vld [vmem:[#allocation120_spill] sm:$0xff] }
 0xa62   :  { %v6593_v16 = vpop.eup %6592 }
 0xa63   :  { %v6595_v29 = vpop.eup %6594 }
 0xa64   :  { %v6597_v62 = vpop.eup %6596  ;;  %v3796_v47 = vmul.f32 %v6595_v29, %v6593_v16  ;;  %v12263_v16 = vld [vmem:[#allocation121_spill] sm:$0xff]  ;;  %v12264_v29 = vld [vmem:[#allocation122_spill] sm:$0xff] }
 0xa65   :  { %v6599_v28 = vpop.eup %6598 }
 0xa66   :  { %v3797_v20 = vmul.f32 %v6599_v28, %v6597_v62  ;;  %v9703_v57 = vsel %vm3803_vm8, %v3796_v47, %v9539_v25  ;;  %v12248_v25 = vld [vmem:[#allocation106_spill] sm:$0xff]  ;;  %v12265_v62 = vld [vmem:[#allocation123_spill] sm:$0xff]  ;;  %v12266_v47 = vld [vmem:[#allocation124_spill] sm:$0xff] }
 0xa67   :  { %v9713_v40 = vpack.c.bf16 %v9703_v57, %v9703_v57  ;;  %v12267_v28 = vld [vmem:[#allocation125_spill] sm:$0xff] }
 0xa68   :  { %v9707_v58 = vsel %vm3803_vm8, %v3797_v20, %v9543_v60  ;;  %v12249_v60 = vld [vmem:[#allocation107_spill] sm:$0xff]  ;;  %v12268_v20 = vld [vmem:[#allocation126_spill] sm:$0xff] }
 0xa69   :  { %v3820_v34 = vpack.c.bf16 %v9707_v58, %v9707_v58 }
 0xa6b   :  { %3853 = vmatprep.mubr.bf16.mxu0 %v3820_v34  ;;  %3894 = vmatprep.mubr.bf16.mxu1 %v3820_v34 }
 0xa6c   :  { %3854 = vmatmul.mubr.bf16.vlgmr.msra.gmra.mrb[128].mxu0 %v9713_v40  ;;  %3895 = vmatmul.mubr.bf16.vlgmr.msra.gmra.mrb[128].mxu1 %v9713_v40 }
 0xa6d   :  { %3904 = vmatpush1.bf16.msra.mxu0 %v11548_v53  ;;  %3945 = vmatpush1.bf16.msra.mxu1 %v11549_v10 }
 0xa6e   :  { %3935 = vmatprep.mubr.bf16.mxu0 %v3820_v34  ;;  %3976 = vmatprep.mubr.bf16.mxu1 %v3820_v34  ;;  %v12269_v34 = vld [vmem:[#allocation127_spill] sm:$0xff] }
 0xa6f   :  { %3905 = vmatprep.subr.bf16.mxu0 %v11550_v6  ;;  %3946 = vmatprep.subr.bf16.mxu1 %v11551_v44 }
 0xa71   :  { %3906 = vmatpush1.bf16.msra.mxu0 %v11552_v3  ;;  %3947 = vmatpush1.bf16.msra.mxu1 %v11553_v5 }
 0xa72   :  { %3907 = vmatprep.subr.bf16.mxu0 %v11554_v48  ;;  %3948 = vmatprep.subr.bf16.mxu1 %v11555_v8 }
 0xa75   :  { %3908 = vmatpush1.bf16.msra.mxu0 %v11556_v46  ;;  %3949 = vmatpush1.bf16.msra.mxu1 %v11557_v35 }
 0xa76   :  { %3909 = vmatprep.subr.bf16.mxu0 %v11558_v49  ;;  %3950 = vmatprep.subr.bf16.mxu1 %v11559_v36 }
 0xa79   :  { %3910 = vmatpush1.bf16.msra.mxu0 %v11560_v50  ;;  %3951 = vmatpush1.bf16.msra.mxu1 %v11561_v54 }
 0xa7a   :  { %3911 = vmatprep.subr.bf16.mxu0 %v11653_v56  ;;  %3952 = vmatprep.subr.bf16.mxu1 %v11654_v51 }
 0xa7d   :  { %3912 = vmatpush1.bf16.msra.mxu0 %v11655_v13  ;;  %3953 = vmatpush1.bf16.msra.mxu1 %v11656_v33 }
 0xa7e   :  { %3913 = vmatprep.subr.bf16.mxu0 %v11657_v23  ;;  %3954 = vmatprep.subr.bf16.mxu1 %v11658_v59 }
 0xa81   :  { %3914 = vmatpush1.bf16.msra.mxu0 %v11659_v39  ;;  %3955 = vmatpush1.bf16.msra.mxu1 %v11660_v63 }
 0xa82   :  { %3915 = vmatprep.subr.bf16.mxu0 %v11661_v7  ;;  %3956 = vmatprep.subr.bf16.mxu1 %v11662_v0 }
 0xa85   :  { %3916 = vmatpush1.bf16.msra.mxu0 %v11663_v14  ;;  %3957 = vmatpush1.bf16.msra.mxu1 %v11664_v32 }
 0xa86   :  { %3917 = vmatprep.subr.bf16.mxu0 %v11665_v12  ;;  %3958 = vmatprep.subr.bf16.mxu1 %v11753_v24 }
 0xa89   :  { %3918 = vmatpush1.bf16.msra.mxu0 %v11754_v9  ;;  %3959 = vmatpush1.bf16.msra.mxu1 %v11755_v41 }
 0xa8a   :  { %3919 = vmatprep.subr.bf16.mxu0 %v11669_v26  ;;  %3960 = vmatprep.subr.bf16.mxu1 %v11670_v1 }
 0xa8d   :  { %3920 = vmatpush1.bf16.msra.mxu0 %v11671_v22  ;;  %3961 = vmatpush1.bf16.msra.mxu1 %v11672_v38 }
 0xa8e   :  { %3921 = vmatprep.subr.bf16.mxu0 %v11673_v37  ;;  %3962 = vmatprep.subr.bf16.mxu1 %v11674_v31 }
 0xa91   :  { %3922 = vmatpush1.bf16.msra.mxu0 %v11675_v61  ;;  %3963 = vmatpush1.bf16.msra.mxu1 %v12248_v25 }
 0xa92   :  { %3923 = vmatprep.subr.bf16.mxu0 %v12249_v60  ;;  %3964 = vmatprep.subr.bf16.mxu1 %v12250_v27 }
 0xa95   :  { %3924 = vmatpush1.bf16.msra.mxu0 %v12251_v52  ;;  %3965 = vmatpush1.bf16.msra.mxu1 %v12252_v43 }
 0xa96   :  { %3925 = vmatprep.subr.bf16.mxu0 %v12253_v45  ;;  %3966 = vmatprep.subr.bf16.mxu1 %v12254_v11 }
 0xa99   :  { %3926 = vmatpush1.bf16.msra.mxu0 %v12255_v2  ;;  %3967 = vmatpush1.bf16.msra.mxu1 %v12256_v18  ;;  %v12341_v18 = vld [vmem:[#allocation161_spill] sm:$0xff]  ;;  %v12342_v2 = vld [vmem:[#allocation162_spill] sm:$0xff] }
 0xa9a   :  { %3927 = vmatprep.subr.bf16.mxu0 %v12257_v15  ;;  %3968 = vmatprep.subr.bf16.mxu1 %v12258_v55  ;;  %v12340_v55 = vld [vmem:[#allocation160_spill] sm:$0xff] }
 0xa9d   :  { %3928 = vmatpush1.bf16.msra.mxu0 %v12259_v42  ;;  %3969 = vmatpush1.bf16.msra.mxu1 %v12260_v17  ;;  %v12270_v42 = vld [vmem:[#allocation128_spill] sm:$0xff]  ;;  %v12271_v17 = vld [vmem:[#allocation129_spill] sm:$0xff] }
 0xa9e   :  { %3929 = vmatprep.subr.bf16.mxu0 %v12261_v4  ;;  %3970 = vmatprep.subr.bf16.mxu1 %v12262_v30  ;;  %v12272_v4 = vld [vmem:[#allocation130_spill] sm:$0xff]  ;;  %v12273_v30 = vld [vmem:[#allocation3_spill] sm:$0xff] }
 0xaa1   :  { %3930 = vmatpush1.bf16.msra.mxu0 %v12263_v16  ;;  %3971 = vmatpush1.bf16.msra.mxu1 %v12264_v29  ;;  %v12274_v16 = vld [vmem:[#allocation4_spill] sm:$0xff]  ;;  %v12339_v29 = vld [vmem:[#allocation159_spill] sm:$0xff] }
 0xaa2   :  { %3931 = vmatprep.subr.bf16.mxu0 %v12265_v62  ;;  %3972 = vmatprep.subr.bf16.mxu1 %v12266_v47  ;;  %v12275_v47 = vld [vmem:[#allocation5_spill] sm:$0xff]  ;;  %v12284_v62 = vld [vmem:[#allocation14_spill] sm:$0xff] }
 0xaa5   :  { %3932 = vmatpush1.bf16.msra.mxu0 %v12267_v28  ;;  %3973 = vmatpush1.bf16.msra.mxu1 %v12268_v20  ;;  %v12276_v28 = vld [vmem:[#allocation6_spill] sm:$0xff]  ;;  %v12277_v20 = vld [vmem:[#allocation7_spill] sm:$0xff] }
 0xaa6   :  { %3933 = vmatprep.subr.bf16.mxu0 %v12269_v34  ;;  %3974 = vmatprep.subr.bf16.mxu1 %v12270_v42  ;;  %v12278_v34 = vld [vmem:[#allocation8_spill] sm:$0xff]  ;;  %v12279_v42 = vld [vmem:[#allocation9_spill] sm:$0xff] }
 0xaa9   :  { %3934 = vmatpush1.bf16.msra.mxu0 %v12271_v17  ;;  %3975 = vmatpush1.bf16.msra.mxu1 %v12272_v4  ;;  %v12280_v17 = vld [vmem:[#allocation10_spill] sm:$0xff]  ;;  %v12281_v4 = vld [vmem:[#allocation11_spill] sm:$0xff] }
 0xaaa   :  { %4064 = vmatprep.subr.bf16.mxu0 %v12273_v30  ;;  %4105 = vmatprep.subr.bf16.mxu1 %v12274_v16  ;;  %v12282_v30 = vld [vmem:[#allocation12_spill] sm:$0xff]  ;;  %v12283_v16 = vld [vmem:[#allocation13_spill] sm:$0xff] }
 0xaac   :  { %3936 = vmatmul.mubr.bf16.vlgmr.msra.gmra.mrb[132].mxu0 %v9713_v40  ;;  %3977 = vmatmul.mubr.bf16.vlgmr.msra.gmra.mrb[132].mxu1 %v9713_v40  ;;  %v12285_v40 = vld [vmem:[#allocation15_spill] sm:$0xff] }
 0xaad   :  { %4065 = vmatpush1.bf16.msra.mxu0 %v12275_v47  ;;  %4106 = vmatpush1.bf16.msra.mxu1 %v12276_v28  ;;  %v12286_v47 = vld [vmem:[#allocation16_spill] sm:$0xff]  ;;  %v12287_v28 = vld [vmem:[#allocation17_spill] sm:$0xff] }
 0xaae   :  { %4066 = vmatprep.subr.bf16.mxu0 %v12277_v20  ;;  %4107 = vmatprep.subr.bf16.mxu1 %v12278_v34  ;;  %v12288_v20 = vld [vmem:[#allocation18_spill] sm:$0xff]  ;;  %v12289_v34 = vld [vmem:[#allocation19_spill] sm:$0xff] }
 0xab1   :  { %4067 = vmatpush1.bf16.msra.mxu0 %v12279_v42  ;;  %4108 = vmatpush1.bf16.msra.mxu1 %v12280_v17  ;;  %v12290_v42 = vld [vmem:[#allocation20_spill] sm:$0xff]  ;;  %v12291_v17 = vld [vmem:[#allocation21_spill] sm:$0xff] }
 0xab2   :  { %4068 = vmatprep.subr.bf16.mxu0 %v12281_v4  ;;  %4109 = vmatprep.subr.bf16.mxu1 %v12282_v30  ;;  %v12292_v4 = vld [vmem:[#allocation22_spill] sm:$0xff]  ;;  %v12293_v30 = vld [vmem:[#allocation23_spill] sm:$0xff] }
 0xab5   :  { %4069 = vmatpush1.bf16.msra.mxu0 %v12283_v16  ;;  %4110 = vmatpush1.bf16.msra.mxu1 %v12284_v62  ;;  %v12294_v16 = vld [vmem:[#allocation24_spill] sm:$0xff]  ;;  %v12295_v62 = vld [vmem:[#allocation25_spill] sm:$0xff] }
 0xab6   :  { %4070 = vmatprep.subr.bf16.mxu0 %v12285_v40  ;;  %4111 = vmatprep.subr.bf16.mxu1 %v12286_v47  ;;  %v12296_v40 = vld [vmem:[#allocation26_spill] sm:$0xff]  ;;  %v12297_v47 = vld [vmem:[#allocation27_spill] sm:$0xff] }
 0xab9   :  { %4071 = vmatpush1.bf16.msra.mxu0 %v12287_v28  ;;  %4112 = vmatpush1.bf16.msra.mxu1 %v12288_v20  ;;  %v12298_v28 = vld [vmem:[#allocation28_spill] sm:$0xff]  ;;  %v12299_v20 = vld [vmem:[#allocation29_spill] sm:$0xff] }
 0xaba   :  { %4072 = vmatprep.subr.bf16.mxu0 %v12289_v34  ;;  %4113 = vmatprep.subr.bf16.mxu1 %v12290_v42  ;;  %v12300_v34 = vld [vmem:[#allocation30_spill] sm:$0xff]  ;;  %v12301_v42 = vld [vmem:[#allocation31_spill] sm:$0xff] }
 0xabd   :  { %4073 = vmatpush1.bf16.msra.mxu0 %v12291_v17  ;;  %4114 = vmatpush1.bf16.msra.mxu1 %v12292_v4  ;;  %v12302_v17 = vld [vmem:[#allocation32_spill] sm:$0xff]  ;;  %v12303_v4 = vld [vmem:[#allocation33_spill] sm:$0xff] }
 0xabe   :  { %4074 = vmatprep.subr.bf16.mxu0 %v12293_v30  ;;  %4115 = vmatprep.subr.bf16.mxu1 %v12294_v16  ;;  %v12304_v30 = vld [vmem:[#allocation34_spill] sm:$0xff]  ;;  %v12305_v16 = vld [vmem:[#allocation35_spill] sm:$0xff] }
 0xac1   :  { %4075 = vmatpush1.bf16.msra.mxu0 %v12295_v62  ;;  %4116 = vmatpush1.bf16.msra.mxu1 %v12296_v40  ;;  %v12306_v62 = vld [vmem:[#allocation36_spill] sm:$0xff]  ;;  %v12307_v40 = vld [vmem:[#allocation37_spill] sm:$0xff] }
 0xac2   :  { %4076 = vmatprep.subr.bf16.mxu0 %v12297_v47  ;;  %4117 = vmatprep.subr.bf16.mxu1 %v12298_v28  ;;  %v12308_v47 = vld [vmem:[#allocation38_spill] sm:$0xff]  ;;  %v12309_v28 = vld [vmem:[#allocation39_spill] sm:$0xff] }
 0xac5   :  { %4077 = vmatpush1.bf16.msra.mxu0 %v12299_v20  ;;  %4118 = vmatpush1.bf16.msra.mxu1 %v12300_v34  ;;  %v12310_v20 = vld [vmem:[#allocation40_spill] sm:$0xff]  ;;  %v12311_v34 = vld [vmem:[#allocation41_spill] sm:$0xff] }
 0xac6   :  { %4078 = vmatprep.subr.bf16.mxu0 %v12301_v42  ;;  %4119 = vmatprep.subr.bf16.mxu1 %v12302_v17  ;;  %v12312_v42 = vld [vmem:[#allocation42_spill] sm:$0xff]  ;;  %v12313_v17 = vld [vmem:[#allocation43_spill] sm:$0xff] }
 0xac9   :  { %4079 = vmatpush1.bf16.msra.mxu0 %v12303_v4  ;;  %4120 = vmatpush1.bf16.msra.mxu1 %v12304_v30  ;;  %v12314_v4 = vld [vmem:[#allocation44_spill] sm:$0xff]  ;;  %v12315_v30 = vld [vmem:[#allocation45_spill] sm:$0xff] }
 0xaca   :  { %4080 = vmatprep.subr.bf16.mxu0 %v12305_v16  ;;  %4121 = vmatprep.subr.bf16.mxu1 %v12306_v62  ;;  %v12316_v16 = vld [vmem:[#allocation46_spill] sm:$0xff]  ;;  %v12317_v62 = vld [vmem:[#allocation47_spill] sm:$0xff] }
 0xacd   :  { %4081 = vmatpush1.bf16.msra.mxu0 %v12307_v40  ;;  %4122 = vmatpush1.bf16.msra.mxu1 %v12308_v47  ;;  %v12318_v40 = vld [vmem:[#allocation48_spill] sm:$0xff]  ;;  %v12319_v47 = vld [vmem:[#allocation49_spill] sm:$0xff] }
 0xace   :  { %4082 = vmatprep.subr.bf16.mxu0 %v12309_v28  ;;  %4123 = vmatprep.subr.bf16.mxu1 %v12310_v20  ;;  %v12320_v28 = vld [vmem:[#allocation50_spill] sm:$0xff]  ;;  %v12321_v20 = vld [vmem:[#allocation51_spill] sm:$0xff] }
 0xad1   :  { %4083 = vmatpush1.bf16.msra.mxu0 %v12311_v34  ;;  %4124 = vmatpush1.bf16.msra.mxu1 %v12312_v42  ;;  %v12322_v34 = vld [vmem:[#allocation52_spill] sm:$0xff]  ;;  %v12323_v42 = vld [vmem:[#allocation53_spill] sm:$0xff] }
 0xad2   :  { %4084 = vmatprep.subr.bf16.mxu0 %v12313_v17  ;;  %4125 = vmatprep.subr.bf16.mxu1 %v12314_v4  ;;  %v12324_v17 = vld [vmem:[#allocation54_spill] sm:$0xff]  ;;  %v12325_v4 = vld [vmem:[#allocation55_spill] sm:$0xff] }
 0xad5   :  { %4085 = vmatpush1.bf16.msra.mxu0 %v12315_v30  ;;  %4126 = vmatpush1.bf16.msra.mxu1 %v12316_v16  ;;  %v12326_v30 = vld [vmem:[#allocation56_spill] sm:$0xff]  ;;  %v12327_v16 = vld [vmem:[#allocation57_spill] sm:$0xff] }
 0xad6   :  { %4086 = vmatprep.subr.bf16.mxu0 %v12317_v62  ;;  %4127 = vmatprep.subr.bf16.mxu1 %v12318_v40  ;;  %v12328_v62 = vld [vmem:[#allocation58_spill] sm:$0xff]  ;;  %v12329_v40 = vld [vmem:[#allocation59_spill] sm:$0xff] }
 0xad9   :  { %4087 = vmatpush1.bf16.msra.mxu0 %v12319_v47  ;;  %4128 = vmatpush1.bf16.msra.mxu1 %v12320_v28  ;;  %v12330_v47 = vld [vmem:[#allocation60_spill] sm:$0xff]  ;;  %v12331_v28 = vld [vmem:[#allocation61_spill] sm:$0xff] }
 0xada   :  { %4088 = vmatprep.subr.bf16.mxu0 %v12321_v20  ;;  %4129 = vmatprep.subr.bf16.mxu1 %v12322_v34  ;;  %v12332_v20 = vld [vmem:[#allocation62_spill] sm:$0xff]  ;;  %v12333_v34 = vld [vmem:[#allocation63_spill] sm:$0xff] }
 0xadd   :  { %4089 = vmatpush1.bf16.msra.mxu0 %v12323_v42  ;;  %4130 = vmatpush1.bf16.msra.mxu1 %v12324_v17  ;;  %v12334_v42 = vld [vmem:[#allocation64_spill] sm:$0xff]  ;;  %v12335_v17 = vld [vmem:[#allocation65_spill] sm:$0xff] }
 0xade   :  { %4090 = vmatprep.subr.bf16.mxu0 %v12325_v4  ;;  %4131 = vmatprep.subr.bf16.mxu1 %v12326_v30  ;;  %v12336_v4 = vld [vmem:[#allocation66_spill] sm:$0xff]  ;;  %v12337_v30 = vld [vmem:[#allocation67_spill] sm:$0xff] }
 0xae1   :  { %4091 = vmatpush1.bf16.msra.mxu0 %v12327_v16  ;;  %4132 = vmatpush1.bf16.msra.mxu1 %v12328_v62  ;;  %v12338_v16 = vld [vmem:[#allocation68_spill] sm:$0xff] }
 0xae2   :  { %4092 = vmatprep.subr.bf16.mxu0 %v12329_v40  ;;  %4133 = vmatprep.subr.bf16.mxu1 %v12330_v47 }
 0xae5   :  { %4093 = vmatpush1.bf16.msra.mxu0 %v12331_v28  ;;  %4134 = vmatpush1.bf16.msra.mxu1 %v12332_v20 }
 0xae6   :  { %4094 = vmatprep.subr.bf16.mxu0 %v12333_v34  ;;  %4135 = vmatprep.subr.bf16.mxu1 %v12334_v42 }
 0xae9   :  { %4095 = vmatpush1.bf16.msra.mxu0 %v12335_v17  ;;  %4136 = vmatpush1.bf16.msra.mxu1 %v12336_v4 }
 0xaea   :  { %4146 = vmatprep.subr.bf16.mxu0 %v12337_v30  ;;  %4187 = vmatprep.subr.bf16.mxu1 %v12338_v16 }
 0xb3f   :  { %v3855_v62 = vpop.f32.mrb[128].mxu0  ;;  %v3896_v40 = vpop.f32.mrb[128].mxu1 }
 0xb40   :  { %v3985_v47 = vadd.f32 %v3855_v62, %v12339_v29  ;;  %v3987_v28 = vadd.f32 %v3896_v40, %v12340_v55  ;;  %v3857_v15 = vpop.f32.mrb[129].mxu0  ;;  %v3898_v20 = vpop.f32.mrb[129].mxu1 }
 0xb41   :  { %v3986_v34 = vadd.f32 %v3857_v15, %v12341_v18  ;;  %v3988_v42 = vadd.f32 %v3898_v20, %v12342_v2  ;;  %v3859_v11 = vpop.f32.mrb[130].mxu0  ;;  %v3900_v17 = vpop.f32.mrb[130].mxu1 }
 0xb42   :  { %v6232_v45 = vmul.f32 -1.442695, %v3987_v28  ;;  %v3860_v4 = vpop.f32.mrb[131].mxu0  ;;  %v3901_v43 = vpop.f32.mrb[131].mxu1  ;;  %v6230_v11 = vmul.f32 -1.442695, %v3985_v47 }
 0xb43   :  { %v6233_v30 = vmul.f32 -1.442695, %v3988_v42  ;;  %v6231_v15 = vmul.f32 -1.442695, %v3986_v34  ;;  %v12346_v47 = vld [vmem:[#allocation222_spill] sm:$0xff] }
 0xb44   :  { %6600 = vpow2.f32 %v6232_v45 }
 0xb45   :  { %6602 = vpow2.f32 %v6233_v30 }
 0xb4e   :  { %v6601_v16 = vpop.eup %6600 }
 0xb4f   :  { %v4011_v52 = vadd.f32 1.0, %v6601_v16  ;;  %v6603_v27 = vpop.eup %6602  ;;  %v12344_v16 = vld [vmem:[#allocation220_spill] sm:$0xff] }
 0xb50   :  { %v4012_v29 = vadd.f32 1.0, %v6603_v27 }
 0xb51   :  { %6604 = vrcp.f32 %v4011_v52  ;;  %v12343_v52 = vld [vmem:[#allocation219_spill] sm:$0xff] }
 0xb52   :  { %6606 = vrcp.f32 %v4012_v29  ;;  %v12345_v29 = vld [vmem:[#allocation221_spill] sm:$0xff] }
 0xb53   :  { %6608 = vpow2.f32 %v6230_v11 }
 0xb54   :  { %6610 = vpow2.f32 %v6231_v15 }
 0xb5b   :  { %v6605_v55 = vpop.eup %6604 }
 0xb5c   :  { %v4031_v62 = vmul.f32 %v6605_v55, %v9695_v19  ;;  %v6607_v18 = vpop.eup %6606 }
 0xb5d   :  { %v4032_v2 = vmul.f32 %v6607_v18, %v9699_v21  ;;  %v6609_v43 = vpop.eup %6608 }
 0xb5e   :  { %v6611_v42 = vpop.eup %6610  ;;  %v3999_v45 = vadd.f32 1.0, %v6609_v43 }
 0xb5f   :  { %v4000_v17 = vadd.f32 1.0, %v6611_v42 }
 0xb60   :  { %6612 = vrcp.f32 %v3999_v45 }
 0xb61   :  { %6614 = vrcp.f32 %v4000_v17 }
 0xb6a   :  { %v6613_v45 = vpop.eup %6612 }
 0xb7f   :  { %v3937_v4 = vpop.f32.mrb[132].mxu0  ;;  %v3978_v30 = vpop.f32.mrb[132].mxu1 }
 0xb80   :  { %v3989_v27 = vadd.f32 %v3937_v4, %v12343_v52  ;;  %v3991_v28 = vadd.f32 %v3978_v30, %v12344_v16  ;;  %v3939_v20 = vpop.f32.mrb[133].mxu0  ;;  %v3980_v40 = vpop.f32.mrb[133].mxu1 }
 0xb81   :  { %v3990_v55 = vadd.f32 %v3939_v20, %v12345_v29  ;;  %v3992_v34 = vadd.f32 %v3980_v40, %v12346_v47  ;;  %v3941_v18 = vpop.f32.mrb[134].mxu0  ;;  %v3982_v11 = vpop.f32.mrb[134].mxu1 }
 0xb82   :  { %6616 = vtanh.f32 %v3989_v27  ;;  %v6234_v15 = vmul.f32 -1.442695, %v3991_v28  ;;  %v3942_v43 = vpop.f32.mrb[135].mxu0  ;;  %v3983_v42 = vpop.f32.mrb[135].mxu1 }
 0xb83   :  { %6618 = vtanh.f32 %v3990_v55  ;;  %v6235_v60 = vmul.f32 -1.442695, %v3992_v34  ;;  %v6615_v4 = vpop.eup %6614  ;;  %v4045_v29 = vpop.permute.xlu0 %4044  ;;  %v12349_v42 = vld [vmem:[#allocation108_spill] sm:$0xff] }
 0xb84   :  { %6620 = vpow2.f32 %v6234_v15  ;;  %vm4046_vm9 = vcmp.eq.s32.totalorder %v4045_v29, 1  ;;  %v12357_v29 = vld [vmem:[#allocation116_spill] sm:$0xff] }
 0xb85   :  { %6622 = vpow2.f32 %v6235_v60 }
 0xb8c   :  { %v6617_v30 = vpop.eup %6616 }
 0xb8d   :  { %v6619_v52 = vpop.eup %6618  ;;  %v4033_v16 = vmul.f32 %v6617_v30, %v6613_v45  ;;  %v12350_v45 = vld [vmem:[#allocation109_spill] sm:$0xff]  ;;  %v12352_v30 = vld [vmem:[#allocation111_spill] sm:$0xff] }
 0xb8e   :  { %v6621_v17 = vpop.eup %6620  ;;  %v4034_v25 = vmul.f32 %v6619_v52, %v6615_v4  ;;  %v12351_v4 = vld [vmem:[#allocation110_spill] sm:$0xff]  ;;  %v12353_v52 = vld [vmem:[#allocation112_spill] sm:$0xff] }
 0xb8f   :  { %v6623_v20 = vpop.eup %6622  ;;  %v4035_v40 = vadd.f32 %v4033_v16, %v4031_v62  ;;  %v4025_v47 = vadd.f32 1.0, %v6621_v17  ;;  %v12354_v16 = vld [vmem:[#allocation113_spill] sm:$0xff]  ;;  %v12355_v17 = vld [vmem:[#allocation114_spill] sm:$0xff] }
 0xb90   :  { %v4036_v27 = vadd.f32 %v4034_v25, %v4032_v2  ;;  %v4026_v28 = vadd.f32 1.0, %v6623_v20  ;;  %v12356_v20 = vld [vmem:[#allocation115_spill] sm:$0xff] }
 0xb91   :  { %6624 = vtanh.f32 %v4035_v40  ;;  %v9859_v55 = vsel %vm4046_vm9, %v4035_v40, %v9695_v19  ;;  %v12358_v40 = vld [vmem:[#allocation117_spill] sm:$0xff] }
 0xb92   :  { %6626 = vrcp.f32 %v4025_v47  ;;  %v9863_v60 = vsel %vm4046_vm9, %v4036_v27, %v9699_v21  ;;  %v12359_v47 = vld [vmem:[#allocation118_spill] sm:$0xff] }
 0xb93   :  { %6628 = vtanh.f32 %v4036_v27  ;;  %v12360_v27 = vld [vmem:[#allocation119_spill] sm:$0xff] }
 0xb94   :  { %6630 = vrcp.f32 %v4026_v28  ;;  %v12361_v28 = vld [vmem:[#allocation120_spill] sm:$0xff] }
 0xb9b   :  { %v6625_v34 = vpop.eup %6624 }
 0xb9c   :  { %v6627_v18 = vpop.eup %6626 }
 0xb9d   :  { %v6629_v11 = vpop.eup %6628  ;;  %v4039_v62 = vmul.f32 %v6627_v18, %v6625_v34  ;;  %v12362_v34 = vld [vmem:[#allocation121_spill] sm:$0xff]  ;;  %v12363_v18 = vld [vmem:[#allocation122_spill] sm:$0xff] }
 0xb9e   :  { %v6631_v15 = vpop.eup %6630 }
 0xb9f   :  { %v4040_v43 = vmul.f32 %v6631_v15, %v6629_v11  ;;  %v9867_v25 = vsel %vm4046_vm9, %v4039_v62, %v9703_v57  ;;  %v12347_v57 = vld [vmem:[#allocation106_spill] sm:$0xff]  ;;  %v12364_v11 = vld [vmem:[#allocation123_spill] sm:$0xff]  ;;  %v12365_v62 = vld [vmem:[#allocation124_spill] sm:$0xff] }
 0xba0   :  { %v9877_v2 = vpack.c.bf16 %v9867_v25, %v9867_v25  ;;  %v12366_v15 = vld [vmem:[#allocation125_spill] sm:$0xff] }
 0xba1   :  { %v9871_v19 = vsel %vm4046_vm9, %v4040_v43, %v9707_v58  ;;  %v12348_v58 = vld [vmem:[#allocation107_spill] sm:$0xff]  ;;  %v12367_v43 = vld [vmem:[#allocation126_spill] sm:$0xff] }
 0xba2   :  { %v4063_v21 = vpack.c.bf16 %v9871_v19, %v9871_v19 }
 0xba4   :  { %4096 = vmatprep.mubr.bf16.mxu0 %v4063_v21  ;;  %4137 = vmatprep.mubr.bf16.mxu1 %v4063_v21 }
 0xba5   :  { %4097 = vmatmul.mubr.bf16.vlgmr.msra.gmra.mrb[136].mxu0 %v9877_v2  ;;  %4138 = vmatmul.mubr.bf16.vlgmr.msra.gmra.mrb[136].mxu1 %v9877_v2 }
 0xba6   :  { %4147 = vmatpush1.bf16.msra.mxu0 %v11548_v53  ;;  %4188 = vmatpush1.bf16.msra.mxu1 %v11549_v10 }
 0xba7   :  { %4178 = vmatprep.mubr.bf16.mxu0 %v4063_v21  ;;  %4219 = vmatprep.mubr.bf16.mxu1 %v4063_v21  ;;  %v12368_v21 = vld [vmem:[#allocation127_spill] sm:$0xff] }
 0xba8   :  { %4148 = vmatprep.subr.bf16.mxu0 %v11550_v6  ;;  %4189 = vmatprep.subr.bf16.mxu1 %v11551_v44 }
 0xbaa   :  { %4149 = vmatpush1.bf16.msra.mxu0 %v11552_v3  ;;  %4190 = vmatpush1.bf16.msra.mxu1 %v11553_v5 }
 0xbab   :  { %4150 = vmatprep.subr.bf16.mxu0 %v11554_v48  ;;  %4191 = vmatprep.subr.bf16.mxu1 %v11555_v8 }
 0xbae   :  { %4151 = vmatpush1.bf16.msra.mxu0 %v11556_v46  ;;  %4192 = vmatpush1.bf16.msra.mxu1 %v11557_v35 }
 0xbaf   :  { %4152 = vmatprep.subr.bf16.mxu0 %v11558_v49  ;;  %4193 = vmatprep.subr.bf16.mxu1 %v11559_v36 }
 0xbb2   :  { %4153 = vmatpush1.bf16.msra.mxu0 %v11560_v50  ;;  %4194 = vmatpush1.bf16.msra.mxu1 %v11561_v54 }
 0xbb3   :  { %4154 = vmatprep.subr.bf16.mxu0 %v11653_v56  ;;  %4195 = vmatprep.subr.bf16.mxu1 %v11654_v51 }
 0xbb6   :  { %4155 = vmatpush1.bf16.msra.mxu0 %v11655_v13  ;;  %4196 = vmatpush1.bf16.msra.mxu1 %v11656_v33 }
 0xbb7   :  { %4156 = vmatprep.subr.bf16.mxu0 %v11657_v23  ;;  %4197 = vmatprep.subr.bf16.mxu1 %v11658_v59 }
 0xbba   :  { %4157 = vmatpush1.bf16.msra.mxu0 %v11659_v39  ;;  %4198 = vmatpush1.bf16.msra.mxu1 %v11660_v63 }
 0xbbb   :  { %4158 = vmatprep.subr.bf16.mxu0 %v11661_v7  ;;  %4199 = vmatprep.subr.bf16.mxu1 %v11662_v0 }
 0xbbe   :  { %4159 = vmatpush1.bf16.msra.mxu0 %v11663_v14  ;;  %4200 = vmatpush1.bf16.msra.mxu1 %v11664_v32 }
 0xbbf   :  { %4160 = vmatprep.subr.bf16.mxu0 %v11665_v12  ;;  %4201 = vmatprep.subr.bf16.mxu1 %v11753_v24 }
 0xbc2   :  { %4161 = vmatpush1.bf16.msra.mxu0 %v11754_v9  ;;  %4202 = vmatpush1.bf16.msra.mxu1 %v11755_v41 }
 0xbc3   :  { %4162 = vmatprep.subr.bf16.mxu0 %v11669_v26  ;;  %4203 = vmatprep.subr.bf16.mxu1 %v11670_v1 }
 0xbc6   :  { %4163 = vmatpush1.bf16.msra.mxu0 %v11671_v22  ;;  %4204 = vmatpush1.bf16.msra.mxu1 %v11672_v38 }
 0xbc7   :  { %4164 = vmatprep.subr.bf16.mxu0 %v11673_v37  ;;  %4205 = vmatprep.subr.bf16.mxu1 %v11674_v31 }
 0xbca   :  { %4165 = vmatpush1.bf16.msra.mxu0 %v11675_v61  ;;  %4206 = vmatpush1.bf16.msra.mxu1 %v12347_v57 }
 0xbcb   :  { %4166 = vmatprep.subr.bf16.mxu0 %v12348_v58  ;;  %4207 = vmatprep.subr.bf16.mxu1 %v12349_v42 }
 0xbce   :  { %4167 = vmatpush1.bf16.msra.mxu0 %v12350_v45  ;;  %4208 = vmatpush1.bf16.msra.mxu1 %v12351_v4 }
 0xbcf   :  { %4168 = vmatprep.subr.bf16.mxu0 %v12352_v30  ;;  %4209 = vmatprep.subr.bf16.mxu1 %v12353_v52 }
 0xbd2   :  { %4169 = vmatpush1.bf16.msra.mxu0 %v12354_v16  ;;  %4210 = vmatpush1.bf16.msra.mxu1 %v12355_v17  ;;  %v12440_v17 = vld [vmem:[#allocation165_spill] sm:$0xff]  ;;  %v12441_v16 = vld [vmem:[#allocation166_spill] sm:$0xff] }
 0xbd3   :  { %4170 = vmatprep.subr.bf16.mxu0 %v12356_v20  ;;  %4211 = vmatprep.subr.bf16.mxu1 %v12357_v29  ;;  %v12439_v29 = vld [vmem:[#allocation164_spill] sm:$0xff] }
 0xbd6   :  { %4171 = vmatpush1.bf16.msra.mxu0 %v12358_v40  ;;  %4212 = vmatpush1.bf16.msra.mxu1 %v12359_v47  ;;  %v12369_v40 = vld [vmem:[#allocation128_spill] sm:$0xff]  ;;  %v12370_v47 = vld [vmem:[#allocation129_spill] sm:$0xff] }
 0xbd7   :  { %4172 = vmatprep.subr.bf16.mxu0 %v12360_v27  ;;  %4213 = vmatprep.subr.bf16.mxu1 %v12361_v28  ;;  %v12371_v27 = vld [vmem:[#allocation130_spill] sm:$0xff]  ;;  %v12372_v28 = vld [vmem:[#allocation3_spill] sm:$0xff] }
 0xbda   :  { %4173 = vmatpush1.bf16.msra.mxu0 %v12362_v34  ;;  %4214 = vmatpush1.bf16.msra.mxu1 %v12363_v18  ;;  %v12373_v34 = vld [vmem:[#allocation4_spill] sm:$0xff]  ;;  %v12438_v18 = vld [vmem:[#allocation163_spill] sm:$0xff] }
 0xbdb   :  { %4174 = vmatprep.subr.bf16.mxu0 %v12364_v11  ;;  %4215 = vmatprep.subr.bf16.mxu1 %v12365_v62  ;;  %v12374_v62 = vld [vmem:[#allocation5_spill] sm:$0xff]  ;;  %v12383_v11 = vld [vmem:[#allocation14_spill] sm:$0xff] }
 0xbde   :  { %4175 = vmatpush1.bf16.msra.mxu0 %v12366_v15  ;;  %4216 = vmatpush1.bf16.msra.mxu1 %v12367_v43  ;;  %v12375_v15 = vld [vmem:[#allocation6_spill] sm:$0xff]  ;;  %v12376_v43 = vld [vmem:[#allocation7_spill] sm:$0xff] }
 0xbdf   :  { %4176 = vmatprep.subr.bf16.mxu0 %v12368_v21  ;;  %4217 = vmatprep.subr.bf16.mxu1 %v12369_v40  ;;  %v12377_v21 = vld [vmem:[#allocation8_spill] sm:$0xff]  ;;  %v12378_v40 = vld [vmem:[#allocation9_spill] sm:$0xff] }
 0xbe2   :  { %4177 = vmatpush1.bf16.msra.mxu0 %v12370_v47  ;;  %4218 = vmatpush1.bf16.msra.mxu1 %v12371_v27  ;;  %v12379_v47 = vld [vmem:[#allocation10_spill] sm:$0xff]  ;;  %v12380_v27 = vld [vmem:[#allocation11_spill] sm:$0xff] }
 0xbe3   :  { %4307 = vmatprep.subr.bf16.mxu0 %v12372_v28  ;;  %4348 = vmatprep.subr.bf16.mxu1 %v12373_v34  ;;  %v12381_v28 = vld [vmem:[#allocation12_spill] sm:$0xff]  ;;  %v12382_v34 = vld [vmem:[#allocation13_spill] sm:$0xff] }
 0xbe5   :  { %4179 = vmatmul.mubr.bf16.vlgmr.msra.gmra.mrb[140].mxu0 %v9877_v2  ;;  %4220 = vmatmul.mubr.bf16.vlgmr.msra.gmra.mrb[140].mxu1 %v9877_v2  ;;  %v12384_v2 = vld [vmem:[#allocation15_spill] sm:$0xff] }
 0xbe6   :  { %4308 = vmatpush1.bf16.msra.mxu0 %v12374_v62  ;;  %4349 = vmatpush1.bf16.msra.mxu1 %v12375_v15  ;;  %v12385_v62 = vld [vmem:[#allocation16_spill] sm:$0xff]  ;;  %v12386_v15 = vld [vmem:[#allocation17_spill] sm:$0xff] }
 0xbe7   :  { %4309 = vmatprep.subr.bf16.mxu0 %v12376_v43  ;;  %4350 = vmatprep.subr.bf16.mxu1 %v12377_v21  ;;  %v12387_v43 = vld [vmem:[#allocation18_spill] sm:$0xff]  ;;  %v12388_v21 = vld [vmem:[#allocation19_spill] sm:$0xff] }
 0xbea   :  { %4310 = vmatpush1.bf16.msra.mxu0 %v12378_v40  ;;  %4351 = vmatpush1.bf16.msra.mxu1 %v12379_v47  ;;  %v12389_v40 = vld [vmem:[#allocation20_spill] sm:$0xff]  ;;  %v12390_v47 = vld [vmem:[#allocation21_spill] sm:$0xff] }
 0xbeb   :  { %4311 = vmatprep.subr.bf16.mxu0 %v12380_v27  ;;  %4352 = vmatprep.subr.bf16.mxu1 %v12381_v28  ;;  %v12391_v27 = vld [vmem:[#allocation22_spill] sm:$0xff]  ;;  %v12392_v28 = vld [vmem:[#allocation23_spill] sm:$0xff] }
 0xbee   :  { %4312 = vmatpush1.bf16.msra.mxu0 %v12382_v34  ;;  %4353 = vmatpush1.bf16.msra.mxu1 %v12383_v11  ;;  %v12393_v34 = vld [vmem:[#allocation24_spill] sm:$0xff]  ;;  %v12394_v11 = vld [vmem:[#allocation25_spill] sm:$0xff] }
 0xbef   :  { %4313 = vmatprep.subr.bf16.mxu0 %v12384_v2  ;;  %4354 = vmatprep.subr.bf16.mxu1 %v12385_v62  ;;  %v12395_v2 = vld [vmem:[#allocation26_spill] sm:$0xff]  ;;  %v12396_v62 = vld [vmem:[#allocation27_spill] sm:$0xff] }
 0xbf2   :  { %4314 = vmatpush1.bf16.msra.mxu0 %v12386_v15  ;;  %4355 = vmatpush1.bf16.msra.mxu1 %v12387_v43  ;;  %v12397_v15 = vld [vmem:[#allocation28_spill] sm:$0xff]  ;;  %v12398_v43 = vld [vmem:[#allocation29_spill] sm:$0xff] }
 0xbf3   :  { %4315 = vmatprep.subr.bf16.mxu0 %v12388_v21  ;;  %4356 = vmatprep.subr.bf16.mxu1 %v12389_v40  ;;  %v12399_v21 = vld [vmem:[#allocation30_spill] sm:$0xff]  ;;  %v12400_v40 = vld [vmem:[#allocation31_spill] sm:$0xff] }
 0xbf6   :  { %4316 = vmatpush1.bf16.msra.mxu0 %v12390_v47  ;;  %4357 = vmatpush1.bf16.msra.mxu1 %v12391_v27  ;;  %v12401_v47 = vld [vmem:[#allocation32_spill] sm:$0xff]  ;;  %v12402_v27 = vld [vmem:[#allocation33_spill] sm:$0xff] }
 0xbf7   :  { %4317 = vmatprep.subr.bf16.mxu0 %v12392_v28  ;;  %4358 = vmatprep.subr.bf16.mxu1 %v12393_v34  ;;  %v12403_v28 = vld [vmem:[#allocation34_spill] sm:$0xff]  ;;  %v12404_v34 = vld [vmem:[#allocation35_spill] sm:$0xff] }
 0xbfa   :  { %4318 = vmatpush1.bf16.msra.mxu0 %v12394_v11  ;;  %4359 = vmatpush1.bf16.msra.mxu1 %v12395_v2  ;;  %v12405_v11 = vld [vmem:[#allocation36_spill] sm:$0xff]  ;;  %v12406_v2 = vld [vmem:[#allocation37_spill] sm:$0xff] }
 0xbfb   :  { %4319 = vmatprep.subr.bf16.mxu0 %v12396_v62  ;;  %4360 = vmatprep.subr.bf16.mxu1 %v12397_v15  ;;  %v12407_v62 = vld [vmem:[#allocation38_spill] sm:$0xff]  ;;  %v12408_v15 = vld [vmem:[#allocation39_spill] sm:$0xff] }
 0xbfe   :  { %4320 = vmatpush1.bf16.msra.mxu0 %v12398_v43  ;;  %4361 = vmatpush1.bf16.msra.mxu1 %v12399_v21  ;;  %v12409_v43 = vld [vmem:[#allocation40_spill] sm:$0xff]  ;;  %v12410_v21 = vld [vmem:[#allocation41_spill] sm:$0xff] }
 0xbff   :  { %4321 = vmatprep.subr.bf16.mxu0 %v12400_v40  ;;  %4362 = vmatprep.subr.bf16.mxu1 %v12401_v47  ;;  %v12411_v40 = vld [vmem:[#allocation42_spill] sm:$0xff]  ;;  %v12412_v47 = vld [vmem:[#allocation43_spill] sm:$0xff] }
 0xc02   :  { %4322 = vmatpush1.bf16.msra.mxu0 %v12402_v27  ;;  %4363 = vmatpush1.bf16.msra.mxu1 %v12403_v28  ;;  %v12413_v27 = vld [vmem:[#allocation44_spill] sm:$0xff]  ;;  %v12414_v28 = vld [vmem:[#allocation45_spill] sm:$0xff] }
 0xc03   :  { %4323 = vmatprep.subr.bf16.mxu0 %v12404_v34  ;;  %4364 = vmatprep.subr.bf16.mxu1 %v12405_v11  ;;  %v12415_v34 = vld [vmem:[#allocation46_spill] sm:$0xff]  ;;  %v12416_v11 = vld [vmem:[#allocation47_spill] sm:$0xff] }
 0xc06   :  { %4324 = vmatpush1.bf16.msra.mxu0 %v12406_v2  ;;  %4365 = vmatpush1.bf16.msra.mxu1 %v12407_v62  ;;  %v12417_v2 = vld [vmem:[#allocation48_spill] sm:$0xff]  ;;  %v12418_v62 = vld [vmem:[#allocation49_spill] sm:$0xff] }
 0xc07   :  { %4325 = vmatprep.subr.bf16.mxu0 %v12408_v15  ;;  %4366 = vmatprep.subr.bf16.mxu1 %v12409_v43  ;;  %v12419_v15 = vld [vmem:[#allocation50_spill] sm:$0xff]  ;;  %v12420_v43 = vld [vmem:[#allocation51_spill] sm:$0xff] }
 0xc0a   :  { %4326 = vmatpush1.bf16.msra.mxu0 %v12410_v21  ;;  %4367 = vmatpush1.bf16.msra.mxu1 %v12411_v40  ;;  %v12421_v21 = vld [vmem:[#allocation52_spill] sm:$0xff]  ;;  %v12422_v40 = vld [vmem:[#allocation53_spill] sm:$0xff] }
 0xc0b   :  { %4327 = vmatprep.subr.bf16.mxu0 %v12412_v47  ;;  %4368 = vmatprep.subr.bf16.mxu1 %v12413_v27  ;;  %v12423_v47 = vld [vmem:[#allocation54_spill] sm:$0xff]  ;;  %v12424_v27 = vld [vmem:[#allocation55_spill] sm:$0xff] }
 0xc0e   :  { %4328 = vmatpush1.bf16.msra.mxu0 %v12414_v28  ;;  %4369 = vmatpush1.bf16.msra.mxu1 %v12415_v34  ;;  %v12425_v28 = vld [vmem:[#allocation56_spill] sm:$0xff]  ;;  %v12426_v34 = vld [vmem:[#allocation57_spill] sm:$0xff] }
 0xc0f   :  { %4329 = vmatprep.subr.bf16.mxu0 %v12416_v11  ;;  %4370 = vmatprep.subr.bf16.mxu1 %v12417_v2  ;;  %v12427_v11 = vld [vmem:[#allocation58_spill] sm:$0xff]  ;;  %v12428_v2 = vld [vmem:[#allocation59_spill] sm:$0xff] }
 0xc12   :  { %4330 = vmatpush1.bf16.msra.mxu0 %v12418_v62  ;;  %4371 = vmatpush1.bf16.msra.mxu1 %v12419_v15  ;;  %v12429_v62 = vld [vmem:[#allocation60_spill] sm:$0xff]  ;;  %v12430_v15 = vld [vmem:[#allocation61_spill] sm:$0xff] }
 0xc13   :  { %4331 = vmatprep.subr.bf16.mxu0 %v12420_v43  ;;  %4372 = vmatprep.subr.bf16.mxu1 %v12421_v21  ;;  %v12431_v43 = vld [vmem:[#allocation62_spill] sm:$0xff]  ;;  %v12432_v21 = vld [vmem:[#allocation63_spill] sm:$0xff] }
 0xc16   :  { %4332 = vmatpush1.bf16.msra.mxu0 %v12422_v40  ;;  %4373 = vmatpush1.bf16.msra.mxu1 %v12423_v47  ;;  %v12433_v40 = vld [vmem:[#allocation64_spill] sm:$0xff]  ;;  %v12434_v47 = vld [vmem:[#allocation65_spill] sm:$0xff] }
 0xc17   :  { %4333 = vmatprep.subr.bf16.mxu0 %v12424_v27  ;;  %4374 = vmatprep.subr.bf16.mxu1 %v12425_v28  ;;  %v12435_v27 = vld [vmem:[#allocation66_spill] sm:$0xff]  ;;  %v12436_v28 = vld [vmem:[#allocation67_spill] sm:$0xff] }
 0xc1a   :  { %4334 = vmatpush1.bf16.msra.mxu0 %v12426_v34  ;;  %4375 = vmatpush1.bf16.msra.mxu1 %v12427_v11  ;;  %v12437_v34 = vld [vmem:[#allocation68_spill] sm:$0xff] }
 0xc1b   :  { %4335 = vmatprep.subr.bf16.mxu0 %v12428_v2  ;;  %4376 = vmatprep.subr.bf16.mxu1 %v12429_v62 }
 0xc1e   :  { %4336 = vmatpush1.bf16.msra.mxu0 %v12430_v15  ;;  %4377 = vmatpush1.bf16.msra.mxu1 %v12431_v43 }
 0xc1f   :  { %4337 = vmatprep.subr.bf16.mxu0 %v12432_v21  ;;  %4378 = vmatprep.subr.bf16.mxu1 %v12433_v40 }
 0xc22   :  { %4338 = vmatpush1.bf16.msra.mxu0 %v12434_v47  ;;  %4379 = vmatpush1.bf16.msra.mxu1 %v12435_v27 }
 0xc23   :  { %4389 = vmatprep.subr.bf16.mxu0 %v12436_v28  ;;  %4430 = vmatprep.subr.bf16.mxu1 %v12437_v34 }
 0xc78   :  { %v4098_v11 = vpop.f32.mrb[136].mxu0  ;;  %v4139_v2 = vpop.f32.mrb[136].mxu1 }
 0xc79   :  { %v4228_v62 = vadd.f32 %v4098_v11, %v12438_v18  ;;  %v4230_v15 = vadd.f32 %v4139_v2, %v12439_v29  ;;  %v4100_v20 = vpop.f32.mrb[137].mxu0  ;;  %v4141_v43 = vpop.f32.mrb[137].mxu1 }
 0xc7a   :  { %v4229_v21 = vadd.f32 %v4100_v20, %v12440_v17  ;;  %v4231_v40 = vadd.f32 %v4141_v43, %v12441_v16  ;;  %v4102_v52 = vpop.f32.mrb[138].mxu0  ;;  %v4143_v47 = vpop.f32.mrb[138].mxu1 }
 0xc7b   :  { %v6238_v30 = vmul.f32 -1.442695, %v4230_v15  ;;  %v4103_v27 = vpop.f32.mrb[139].mxu0  ;;  %v4144_v4 = vpop.f32.mrb[139].mxu1  ;;  %v6236_v52 = vmul.f32 -1.442695, %v4228_v62 }
 0xc7c   :  { %v6239_v28 = vmul.f32 -1.442695, %v4231_v40  ;;  %v6237_v20 = vmul.f32 -1.442695, %v4229_v21  ;;  %v12445_v62 = vld [vmem:[#allocation226_spill] sm:$0xff] }
 0xc7d   :  { %6632 = vpow2.f32 %v6238_v30 }
 0xc7e   :  { %6634 = vpow2.f32 %v6239_v28 }
 0xc87   :  { %v6633_v34 = vpop.eup %6632 }
 0xc88   :  { %v4254_v45 = vadd.f32 1.0, %v6633_v34  ;;  %v6635_v42 = vpop.eup %6634  ;;  %v12443_v34 = vld [vmem:[#allocation224_spill] sm:$0xff] }
 0xc89   :  { %v4255_v18 = vadd.f32 1.0, %v6635_v42 }
 0xc8a   :  { %6636 = vrcp.f32 %v4254_v45  ;;  %v12442_v45 = vld [vmem:[#allocation223_spill] sm:$0xff] }
 0xc8b   :  { %6638 = vrcp.f32 %v4255_v18  ;;  %v12444_v18 = vld [vmem:[#allocation225_spill] sm:$0xff] }
 0xc8c   :  { %6640 = vpow2.f32 %v6236_v52 }
 0xc8d   :  { %6642 = vpow2.f32 %v6237_v20 }
 0xc94   :  { %v6637_v29 = vpop.eup %6636 }
 0xc95   :  { %v4274_v11 = vmul.f32 %v6637_v29, %v9859_v55  ;;  %v6639_v17 = vpop.eup %6638 }
 0xc96   :  { %v4275_v16 = vmul.f32 %v6639_v17, %v9863_v60  ;;  %v6641_v4 = vpop.eup %6640 }
 0xc97   :  { %v6643_v40 = vpop.eup %6642  ;;  %v4242_v30 = vadd.f32 1.0, %v6641_v4 }
 0xc98   :  { %v4243_v47 = vadd.f32 1.0, %v6643_v40 }
 0xc99   :  { %6644 = vrcp.f32 %v4242_v30 }
 0xc9a   :  { %6646 = vrcp.f32 %v4243_v47 }
 0xca3   :  { %v6645_v30 = vpop.eup %6644 }
 0xcb8   :  { %v4180_v27 = vpop.f32.mrb[140].mxu0  ;;  %v4221_v28 = vpop.f32.mrb[140].mxu1 }
 0xcb9   :  { %v4232_v42 = vadd.f32 %v4180_v27, %v12442_v45  ;;  %v4234_v15 = vadd.f32 %v4221_v28, %v12443_v34  ;;  %v4182_v43 = vpop.f32.mrb[141].mxu0  ;;  %v4223_v2 = vpop.f32.mrb[141].mxu1 }
 0xcba   :  { %v4233_v29 = vadd.f32 %v4182_v43, %v12444_v18  ;;  %v4235_v21 = vadd.f32 %v4223_v2, %v12445_v62  ;;  %v4184_v17 = vpop.f32.mrb[142].mxu0  ;;  %v4225_v52 = vpop.f32.mrb[142].mxu1 }
 0xcbb   :  { %6648 = vtanh.f32 %v4232_v42  ;;  %v6240_v20 = vmul.f32 -1.442695, %v4234_v15  ;;  %v4185_v4 = vpop.f32.mrb[143].mxu0  ;;  %v4226_v40 = vpop.f32.mrb[143].mxu1 }
 0xcbc   :  { %6650 = vtanh.f32 %v4233_v29  ;;  %v6241_v58 = vmul.f32 -1.442695, %v4235_v21  ;;  %v6647_v27 = vpop.eup %6646  ;;  %v4288_v18 = vpop.permute.xlu1 %4287  ;;  %v12448_v40 = vld [vmem:[#allocation108_spill] sm:$0xff] }
 0xcbd   :  { %6652 = vpow2.f32 %v6240_v20  ;;  %vm4289_vm10 = vcmp.eq.s32.totalorder %v4288_v18, 1  ;;  %v12456_v18 = vld [vmem:[#allocation116_spill] sm:$0xff] }
 0xcbe   :  { %6654 = vpow2.f32 %v6241_v58 }
 0xcc5   :  { %v6649_v28 = vpop.eup %6648 }
 0xcc6   :  { %v6651_v45 = vpop.eup %6650  ;;  %v4276_v34 = vmul.f32 %v6649_v28, %v6645_v30  ;;  %v12449_v30 = vld [vmem:[#allocation109_spill] sm:$0xff]  ;;  %v12451_v28 = vld [vmem:[#allocation111_spill] sm:$0xff] }
 0xcc7   :  { %v6653_v47 = vpop.eup %6652  ;;  %v4277_v57 = vmul.f32 %v6651_v45, %v6647_v27  ;;  %v12450_v27 = vld [vmem:[#allocation110_spill] sm:$0xff]  ;;  %v12452_v45 = vld [vmem:[#allocation112_spill] sm:$0xff] }
 0xcc8   :  { %v6655_v43 = vpop.eup %6654  ;;  %v4278_v2 = vadd.f32 %v4276_v34, %v4274_v11  ;;  %v4268_v62 = vadd.f32 1.0, %v6653_v47  ;;  %v12453_v34 = vld [vmem:[#allocation113_spill] sm:$0xff]  ;;  %v12454_v47 = vld [vmem:[#allocation114_spill] sm:$0xff] }
 0xcc9   :  { %v4279_v42 = vadd.f32 %v4277_v57, %v4275_v16  ;;  %v4269_v15 = vadd.f32 1.0, %v6655_v43  ;;  %v12455_v43 = vld [vmem:[#allocation115_spill] sm:$0xff] }
 0xcca   :  { %6656 = vtanh.f32 %v4278_v2  ;;  %v10023_v29 = vsel %vm4289_vm10, %v4278_v2, %v9859_v55  ;;  %v12457_v2 = vld [vmem:[#allocation117_spill] sm:$0xff] }
 0xccb   :  { %6658 = vrcp.f32 %v4268_v62  ;;  %v10027_v58 = vsel %vm4289_vm10, %v4279_v42, %v9863_v60  ;;  %v12458_v62 = vld [vmem:[#allocation118_spill] sm:$0xff] }
 0xccc   :  { %6660 = vtanh.f32 %v4279_v42  ;;  %v12459_v42 = vld [vmem:[#allocation119_spill] sm:$0xff] }
 0xccd   :  { %6662 = vrcp.f32 %v4269_v15  ;;  %v12460_v15 = vld [vmem:[#allocation120_spill] sm:$0xff] }
 0xcd4   :  { %v6657_v21 = vpop.eup %6656 }
 0xcd5   :  { %v6659_v17 = vpop.eup %6658 }
 0xcd6   :  { %v6661_v52 = vpop.eup %6660  ;;  %v4282_v11 = vmul.f32 %v6659_v17, %v6657_v21  ;;  %v12461_v21 = vld [vmem:[#allocation121_spill] sm:$0xff]  ;;  %v12462_v17 = vld [vmem:[#allocation122_spill] sm:$0xff] }
 0xcd7   :  { %v6663_v20 = vpop.eup %6662 }
 0xcd8   :  { %v4283_v4 = vmul.f32 %v6663_v20, %v6661_v52  ;;  %v10031_v57 = vsel %vm4289_vm10, %v4282_v11, %v9867_v25  ;;  %v12446_v25 = vld [vmem:[#allocation106_spill] sm:$0xff]  ;;  %v12463_v52 = vld [vmem:[#allocation123_spill] sm:$0xff]  ;;  %v12464_v11 = vld [vmem:[#allocation124_spill] sm:$0xff] }
 0xcd9   :  { %v10041_v16 = vpack.c.bf16 %v10031_v57, %v10031_v57  ;;  %v12465_v20 = vld [vmem:[#allocation125_spill] sm:$0xff] }
 0xcda   :  { %v10035_v55 = vsel %vm4289_vm10, %v4283_v4, %v9871_v19  ;;  %v12447_v19 = vld [vmem:[#allocation107_spill] sm:$0xff]  ;;  %v12466_v4 = vld [vmem:[#allocation126_spill] sm:$0xff] }
 0xcdb   :  { %v4306_v60 = vpack.c.bf16 %v10035_v55, %v10035_v55 }
 0xcdd   :  { %4339 = vmatprep.mubr.bf16.mxu0 %v4306_v60  ;;  %4380 = vmatprep.mubr.bf16.mxu1 %v4306_v60 }
 0xcde   :  { %4340 = vmatmul.mubr.bf16.vlgmr.msra.gmra.mrb[144].mxu0 %v10041_v16  ;;  %4381 = vmatmul.mubr.bf16.vlgmr.msra.gmra.mrb[144].mxu1 %v10041_v16 }
 0xcdf   :  { %4390 = vmatpush1.bf16.msra.mxu0 %v11548_v53  ;;  %4431 = vmatpush1.bf16.msra.mxu1 %v11549_v10 }
 0xce0   :  { %4421 = vmatprep.mubr.bf16.mxu0 %v4306_v60  ;;  %4462 = vmatprep.mubr.bf16.mxu1 %v4306_v60  ;;  %v12467_v60 = vld [vmem:[#allocation127_spill] sm:$0xff] }
 0xce1   :  { %4391 = vmatprep.subr.bf16.mxu0 %v11550_v6  ;;  %4432 = vmatprep.subr.bf16.mxu1 %v11551_v44 }
 0xce3   :  { %4392 = vmatpush1.bf16.msra.mxu0 %v11552_v3  ;;  %4433 = vmatpush1.bf16.msra.mxu1 %v11553_v5 }
 0xce4   :  { %4393 = vmatprep.subr.bf16.mxu0 %v11554_v48  ;;  %4434 = vmatprep.subr.bf16.mxu1 %v11555_v8 }
 0xce7   :  { %4394 = vmatpush1.bf16.msra.mxu0 %v11556_v46  ;;  %4435 = vmatpush1.bf16.msra.mxu1 %v11557_v35 }
 0xce8   :  { %4395 = vmatprep.subr.bf16.mxu0 %v11558_v49  ;;  %4436 = vmatprep.subr.bf16.mxu1 %v11559_v36 }
 0xceb   :  { %4396 = vmatpush1.bf16.msra.mxu0 %v11560_v50  ;;  %4437 = vmatpush1.bf16.msra.mxu1 %v11561_v54 }
 0xcec   :  { %4397 = vmatprep.subr.bf16.mxu0 %v11653_v56  ;;  %4438 = vmatprep.subr.bf16.mxu1 %v11654_v51 }
 0xcef   :  { %4398 = vmatpush1.bf16.msra.mxu0 %v11655_v13  ;;  %4439 = vmatpush1.bf16.msra.mxu1 %v11656_v33 }
 0xcf0   :  { %4399 = vmatprep.subr.bf16.mxu0 %v11657_v23  ;;  %4440 = vmatprep.subr.bf16.mxu1 %v11658_v59 }
 0xcf3   :  { %4400 = vmatpush1.bf16.msra.mxu0 %v11659_v39  ;;  %4441 = vmatpush1.bf16.msra.mxu1 %v11660_v63 }
 0xcf4   :  { %4401 = vmatprep.subr.bf16.mxu0 %v11661_v7  ;;  %4442 = vmatprep.subr.bf16.mxu1 %v11662_v0 }
 0xcf7   :  { %4402 = vmatpush1.bf16.msra.mxu0 %v11663_v14  ;;  %4443 = vmatpush1.bf16.msra.mxu1 %v11664_v32 }
 0xcf8   :  { %4403 = vmatprep.subr.bf16.mxu0 %v11665_v12  ;;  %4444 = vmatprep.subr.bf16.mxu1 %v11753_v24 }
 0xcfb   :  { %4404 = vmatpush1.bf16.msra.mxu0 %v11754_v9  ;;  %4445 = vmatpush1.bf16.msra.mxu1 %v11755_v41 }
 0xcfc   :  { %4405 = vmatprep.subr.bf16.mxu0 %v11669_v26  ;;  %4446 = vmatprep.subr.bf16.mxu1 %v11670_v1 }
 0xcff   :  { %4406 = vmatpush1.bf16.msra.mxu0 %v11671_v22  ;;  %4447 = vmatpush1.bf16.msra.mxu1 %v11672_v38 }
 0xd00   :  { %4407 = vmatprep.subr.bf16.mxu0 %v11673_v37  ;;  %4448 = vmatprep.subr.bf16.mxu1 %v11674_v31 }
 0xd03   :  { %4408 = vmatpush1.bf16.msra.mxu0 %v11675_v61  ;;  %4449 = vmatpush1.bf16.msra.mxu1 %v12446_v25 }
 0xd04   :  { %4409 = vmatprep.subr.bf16.mxu0 %v12447_v19  ;;  %4450 = vmatprep.subr.bf16.mxu1 %v12448_v40 }
 0xd07   :  { %4410 = vmatpush1.bf16.msra.mxu0 %v12449_v30  ;;  %4451 = vmatpush1.bf16.msra.mxu1 %v12450_v27 }
 0xd08   :  { %4411 = vmatprep.subr.bf16.mxu0 %v12451_v28  ;;  %4452 = vmatprep.subr.bf16.mxu1 %v12452_v45 }
 0xd0b   :  { %4412 = vmatpush1.bf16.msra.mxu0 %v12453_v34  ;;  %4453 = vmatpush1.bf16.msra.mxu1 %v12454_v47  ;;  %v12539_v47 = vld [vmem:[#allocation169_spill] sm:$0xff]  ;;  %v12540_v34 = vld [vmem:[#allocation170_spill] sm:$0xff] }
 0xd0c   :  { %4413 = vmatprep.subr.bf16.mxu0 %v12455_v43  ;;  %4454 = vmatprep.subr.bf16.mxu1 %v12456_v18  ;;  %v12538_v18 = vld [vmem:[#allocation168_spill] sm:$0xff] }
 0xd0f   :  { %4414 = vmatpush1.bf16.msra.mxu0 %v12457_v2  ;;  %4455 = vmatpush1.bf16.msra.mxu1 %v12458_v62  ;;  %v12468_v2 = vld [vmem:[#allocation128_spill] sm:$0xff]  ;;  %v12469_v62 = vld [vmem:[#allocation129_spill] sm:$0xff] }
 0xd10   :  { %4415 = vmatprep.subr.bf16.mxu0 %v12459_v42  ;;  %4456 = vmatprep.subr.bf16.mxu1 %v12460_v15  ;;  %v12470_v42 = vld [vmem:[#allocation130_spill] sm:$0xff]  ;;  %v12471_v15 = vld [vmem:[#allocation3_spill] sm:$0xff] }
 0xd13   :  { %4416 = vmatpush1.bf16.msra.mxu0 %v12461_v21  ;;  %4457 = vmatpush1.bf16.msra.mxu1 %v12462_v17  ;;  %v12472_v21 = vld [vmem:[#allocation4_spill] sm:$0xff]  ;;  %v12537_v17 = vld [vmem:[#allocation167_spill] sm:$0xff] }
 0xd14   :  { %4417 = vmatprep.subr.bf16.mxu0 %v12463_v52  ;;  %4458 = vmatprep.subr.bf16.mxu1 %v12464_v11  ;;  %v12473_v11 = vld [vmem:[#allocation5_spill] sm:$0xff]  ;;  %v12482_v52 = vld [vmem:[#allocation14_spill] sm:$0xff] }
 0xd17   :  { %4418 = vmatpush1.bf16.msra.mxu0 %v12465_v20  ;;  %4459 = vmatpush1.bf16.msra.mxu1 %v12466_v4  ;;  %v12474_v20 = vld [vmem:[#allocation6_spill] sm:$0xff]  ;;  %v12475_v4 = vld [vmem:[#allocation7_spill] sm:$0xff] }
 0xd18   :  { %4419 = vmatprep.subr.bf16.mxu0 %v12467_v60  ;;  %4460 = vmatprep.subr.bf16.mxu1 %v12468_v2  ;;  %v12476_v60 = vld [vmem:[#allocation8_spill] sm:$0xff]  ;;  %v12477_v2 = vld [vmem:[#allocation9_spill] sm:$0xff] }
 0xd1b   :  { %4420 = vmatpush1.bf16.msra.mxu0 %v12469_v62  ;;  %4461 = vmatpush1.bf16.msra.mxu1 %v12470_v42  ;;  %v12478_v62 = vld [vmem:[#allocation10_spill] sm:$0xff]  ;;  %v12479_v42 = vld [vmem:[#allocation11_spill] sm:$0xff] }
 0xd1c   :  { %4550 = vmatprep.subr.bf16.mxu0 %v12471_v15  ;;  %4591 = vmatprep.subr.bf16.mxu1 %v12472_v21  ;;  %v12480_v15 = vld [vmem:[#allocation12_spill] sm:$0xff]  ;;  %v12481_v21 = vld [vmem:[#allocation13_spill] sm:$0xff] }
 0xd1e   :  { %4422 = vmatmul.mubr.bf16.vlgmr.msra.gmra.mrb[148].mxu0 %v10041_v16  ;;  %4463 = vmatmul.mubr.bf16.vlgmr.msra.gmra.mrb[148].mxu1 %v10041_v16  ;;  %v12483_v16 = vld [vmem:[#allocation15_spill] sm:$0xff] }
 0xd1f   :  { %4551 = vmatpush1.bf16.msra.mxu0 %v12473_v11  ;;  %4592 = vmatpush1.bf16.msra.mxu1 %v12474_v20  ;;  %v12484_v11 = vld [vmem:[#allocation16_spill] sm:$0xff]  ;;  %v12485_v20 = vld [vmem:[#allocation17_spill] sm:$0xff] }
 0xd20   :  { %4552 = vmatprep.subr.bf16.mxu0 %v12475_v4  ;;  %4593 = vmatprep.subr.bf16.mxu1 %v12476_v60  ;;  %v12486_v4 = vld [vmem:[#allocation18_spill] sm:$0xff]  ;;  %v12487_v60 = vld [vmem:[#allocation19_spill] sm:$0xff] }
 0xd23   :  { %4553 = vmatpush1.bf16.msra.mxu0 %v12477_v2  ;;  %4594 = vmatpush1.bf16.msra.mxu1 %v12478_v62  ;;  %v12488_v2 = vld [vmem:[#allocation20_spill] sm:$0xff]  ;;  %v12489_v62 = vld [vmem:[#allocation21_spill] sm:$0xff] }
 0xd24   :  { %4554 = vmatprep.subr.bf16.mxu0 %v12479_v42  ;;  %4595 = vmatprep.subr.bf16.mxu1 %v12480_v15  ;;  %v12490_v42 = vld [vmem:[#allocation22_spill] sm:$0xff]  ;;  %v12491_v15 = vld [vmem:[#allocation23_spill] sm:$0xff] }
 0xd27   :  { %4555 = vmatpush1.bf16.msra.mxu0 %v12481_v21  ;;  %4596 = vmatpush1.bf16.msra.mxu1 %v12482_v52  ;;  %v12492_v21 = vld [vmem:[#allocation24_spill] sm:$0xff]  ;;  %v12493_v52 = vld [vmem:[#allocation25_spill] sm:$0xff] }
 0xd28   :  { %4556 = vmatprep.subr.bf16.mxu0 %v12483_v16  ;;  %4597 = vmatprep.subr.bf16.mxu1 %v12484_v11  ;;  %v12494_v16 = vld [vmem:[#allocation26_spill] sm:$0xff]  ;;  %v12495_v11 = vld [vmem:[#allocation27_spill] sm:$0xff] }
 0xd2b   :  { %4557 = vmatpush1.bf16.msra.mxu0 %v12485_v20  ;;  %4598 = vmatpush1.bf16.msra.mxu1 %v12486_v4  ;;  %v12496_v20 = vld [vmem:[#allocation28_spill] sm:$0xff]  ;;  %v12497_v4 = vld [vmem:[#allocation29_spill] sm:$0xff] }
 0xd2c   :  { %4558 = vmatprep.subr.bf16.mxu0 %v12487_v60  ;;  %4599 = vmatprep.subr.bf16.mxu1 %v12488_v2  ;;  %v12498_v60 = vld [vmem:[#allocation30_spill] sm:$0xff]  ;;  %v12499_v2 = vld [vmem:[#allocation31_spill] sm:$0xff] }
 0xd2f   :  { %4559 = vmatpush1.bf16.msra.mxu0 %v12489_v62  ;;  %4600 = vmatpush1.bf16.msra.mxu1 %v12490_v42  ;;  %v12500_v62 = vld [vmem:[#allocation32_spill] sm:$0xff]  ;;  %v12501_v42 = vld [vmem:[#allocation33_spill] sm:$0xff] }
 0xd30   :  { %4560 = vmatprep.subr.bf16.mxu0 %v12491_v15  ;;  %4601 = vmatprep.subr.bf16.mxu1 %v12492_v21  ;;  %v12502_v15 = vld [vmem:[#allocation34_spill] sm:$0xff]  ;;  %v12503_v21 = vld [vmem:[#allocation35_spill] sm:$0xff] }
 0xd33   :  { %4561 = vmatpush1.bf16.msra.mxu0 %v12493_v52  ;;  %4602 = vmatpush1.bf16.msra.mxu1 %v12494_v16  ;;  %v12504_v52 = vld [vmem:[#allocation36_spill] sm:$0xff]  ;;  %v12505_v16 = vld [vmem:[#allocation37_spill] sm:$0xff] }
 0xd34   :  { %4562 = vmatprep.subr.bf16.mxu0 %v12495_v11  ;;  %4603 = vmatprep.subr.bf16.mxu1 %v12496_v20  ;;  %v12506_v11 = vld [vmem:[#allocation38_spill] sm:$0xff]  ;;  %v12507_v20 = vld [vmem:[#allocation39_spill] sm:$0xff] }
 0xd37   :  { %4563 = vmatpush1.bf16.msra.mxu0 %v12497_v4  ;;  %4604 = vmatpush1.bf16.msra.mxu1 %v12498_v60  ;;  %v12508_v4 = vld [vmem:[#allocation40_spill] sm:$0xff]  ;;  %v12509_v60 = vld [vmem:[#allocation41_spill] sm:$0xff] }
 0xd38   :  { %4564 = vmatprep.subr.bf16.mxu0 %v12499_v2  ;;  %4605 = vmatprep.subr.bf16.mxu1 %v12500_v62  ;;  %v12510_v2 = vld [vmem:[#allocation42_spill] sm:$0xff]  ;;  %v12511_v62 = vld [vmem:[#allocation43_spill] sm:$0xff] }
 0xd3b   :  { %4565 = vmatpush1.bf16.msra.mxu0 %v12501_v42  ;;  %4606 = vmatpush1.bf16.msra.mxu1 %v12502_v15  ;;  %v12512_v42 = vld [vmem:[#allocation44_spill] sm:$0xff]  ;;  %v12513_v15 = vld [vmem:[#allocation45_spill] sm:$0xff] }
 0xd3c   :  { %4566 = vmatprep.subr.bf16.mxu0 %v12503_v21  ;;  %4607 = vmatprep.subr.bf16.mxu1 %v12504_v52  ;;  %v12514_v21 = vld [vmem:[#allocation46_spill] sm:$0xff]  ;;  %v12515_v52 = vld [vmem:[#allocation47_spill] sm:$0xff] }
 0xd3f   :  { %4567 = vmatpush1.bf16.msra.mxu0 %v12505_v16  ;;  %4608 = vmatpush1.bf16.msra.mxu1 %v12506_v11  ;;  %v12516_v16 = vld [vmem:[#allocation48_spill] sm:$0xff]  ;;  %v12517_v11 = vld [vmem:[#allocation49_spill] sm:$0xff] }
 0xd40   :  { %4568 = vmatprep.subr.bf16.mxu0 %v12507_v20  ;;  %4609 = vmatprep.subr.bf16.mxu1 %v12508_v4  ;;  %v12518_v20 = vld [vmem:[#allocation50_spill] sm:$0xff]  ;;  %v12519_v4 = vld [vmem:[#allocation51_spill] sm:$0xff] }
 0xd43   :  { %4569 = vmatpush1.bf16.msra.mxu0 %v12509_v60  ;;  %4610 = vmatpush1.bf16.msra.mxu1 %v12510_v2  ;;  %v12520_v60 = vld [vmem:[#allocation52_spill] sm:$0xff]  ;;  %v12521_v2 = vld [vmem:[#allocation53_spill] sm:$0xff] }
 0xd44   :  { %4570 = vmatprep.subr.bf16.mxu0 %v12511_v62  ;;  %4611 = vmatprep.subr.bf16.mxu1 %v12512_v42  ;;  %v12522_v62 = vld [vmem:[#allocation54_spill] sm:$0xff]  ;;  %v12523_v42 = vld [vmem:[#allocation55_spill] sm:$0xff] }
 0xd47   :  { %4571 = vmatpush1.bf16.msra.mxu0 %v12513_v15  ;;  %4612 = vmatpush1.bf16.msra.mxu1 %v12514_v21  ;;  %v12524_v15 = vld [vmem:[#allocation56_spill] sm:$0xff]  ;;  %v12525_v21 = vld [vmem:[#allocation57_spill] sm:$0xff] }
 0xd48   :  { %4572 = vmatprep.subr.bf16.mxu0 %v12515_v52  ;;  %4613 = vmatprep.subr.bf16.mxu1 %v12516_v16  ;;  %v12526_v52 = vld [vmem:[#allocation58_spill] sm:$0xff]  ;;  %v12527_v16 = vld [vmem:[#allocation59_spill] sm:$0xff] }
 0xd4b   :  { %4573 = vmatpush1.bf16.msra.mxu0 %v12517_v11  ;;  %4614 = vmatpush1.bf16.msra.mxu1 %v12518_v20  ;;  %v12528_v11 = vld [vmem:[#allocation60_spill] sm:$0xff]  ;;  %v12529_v20 = vld [vmem:[#allocation61_spill] sm:$0xff] }
 0xd4c   :  { %4574 = vmatprep.subr.bf16.mxu0 %v12519_v4  ;;  %4615 = vmatprep.subr.bf16.mxu1 %v12520_v60  ;;  %v12530_v4 = vld [vmem:[#allocation62_spill] sm:$0xff]  ;;  %v12531_v60 = vld [vmem:[#allocation63_spill] sm:$0xff] }
 0xd4f   :  { %4575 = vmatpush1.bf16.msra.mxu0 %v12521_v2  ;;  %4616 = vmatpush1.bf16.msra.mxu1 %v12522_v62  ;;  %v12532_v2 = vld [vmem:[#allocation64_spill] sm:$0xff]  ;;  %v12533_v62 = vld [vmem:[#allocation65_spill] sm:$0xff] }
 0xd50   :  { %4576 = vmatprep.subr.bf16.mxu0 %v12523_v42  ;;  %4617 = vmatprep.subr.bf16.mxu1 %v12524_v15  ;;  %v12534_v42 = vld [vmem:[#allocation66_spill] sm:$0xff]  ;;  %v12535_v15 = vld [vmem:[#allocation67_spill] sm:$0xff] }
 0xd53   :  { %4577 = vmatpush1.bf16.msra.mxu0 %v12525_v21  ;;  %4618 = vmatpush1.bf16.msra.mxu1 %v12526_v52  ;;  %v12536_v21 = vld [vmem:[#allocation68_spill] sm:$0xff] }
 0xd54   :  { %4578 = vmatprep.subr.bf16.mxu0 %v12527_v16  ;;  %4619 = vmatprep.subr.bf16.mxu1 %v12528_v11 }
 0xd57   :  { %4579 = vmatpush1.bf16.msra.mxu0 %v12529_v20  ;;  %4620 = vmatpush1.bf16.msra.mxu1 %v12530_v4 }
 0xd58   :  { %4580 = vmatprep.subr.bf16.mxu0 %v12531_v60  ;;  %4621 = vmatprep.subr.bf16.mxu1 %v12532_v2 }
 0xd5b   :  { %4581 = vmatpush1.bf16.msra.mxu0 %v12533_v62  ;;  %4622 = vmatpush1.bf16.msra.mxu1 %v12534_v42 }
 0xd5c   :  { %4632 = vmatprep.subr.bf16.mxu0 %v12535_v15  ;;  %4673 = vmatprep.subr.bf16.mxu1 %v12536_v21 }
 0xdb1   :  { %v4341_v52 = vpop.f32.mrb[144].mxu0  ;;  %v4382_v16 = vpop.f32.mrb[144].mxu1 }
 0xdb2   :  { %v4471_v11 = vadd.f32 %v4341_v52, %v12537_v17  ;;  %v4473_v20 = vadd.f32 %v4382_v16, %v12538_v18  ;;  %v4343_v43 = vpop.f32.mrb[145].mxu0  ;;  %v4384_v4 = vpop.f32.mrb[145].mxu1 }
 0xdb3   :  { %v4472_v60 = vadd.f32 %v4343_v43, %v12539_v47  ;;  %v4474_v2 = vadd.f32 %v4384_v4, %v12540_v34  ;;  %v4345_v45 = vpop.f32.mrb[146].mxu0  ;;  %v4386_v62 = vpop.f32.mrb[146].mxu1 }
 0xdb4   :  { %v6244_v28 = vmul.f32 -1.442695, %v4473_v20  ;;  %v4346_v42 = vpop.f32.mrb[147].mxu0  ;;  %v4387_v27 = vpop.f32.mrb[147].mxu1  ;;  %v6242_v45 = vmul.f32 -1.442695, %v4471_v11 }
 0xdb5   :  { %v6245_v15 = vmul.f32 -1.442695, %v4474_v2  ;;  %v6243_v43 = vmul.f32 -1.442695, %v4472_v60  ;;  %v12544_v11 = vld [vmem:[#allocation230_spill] sm:$0xff] }
 0xdb6   :  { %6664 = vpow2.f32 %v6244_v28 }
 0xdb7   :  { %6666 = vpow2.f32 %v6245_v15 }
 0xdc0   :  { %v6665_v21 = vpop.eup %6664 }
 0xdc1   :  { %v4497_v30 = vadd.f32 1.0, %v6665_v21  ;;  %v6667_v40 = vpop.eup %6666  ;;  %v12542_v21 = vld [vmem:[#allocation228_spill] sm:$0xff] }
 0xdc2   :  { %v4498_v17 = vadd.f32 1.0, %v6667_v40 }
 0xdc3   :  { %6668 = vrcp.f32 %v4497_v30  ;;  %v12541_v30 = vld [vmem:[#allocation227_spill] sm:$0xff] }
 0xdc4   :  { %6670 = vrcp.f32 %v4498_v17  ;;  %v12543_v17 = vld [vmem:[#allocation229_spill] sm:$0xff] }
 0xdc5   :  { %6672 = vpow2.f32 %v6242_v45 }
 0xdc6   :  { %6674 = vpow2.f32 %v6243_v43 }
 0xdcd   :  { %v6669_v18 = vpop.eup %6668 }
 0xdce   :  { %v4517_v52 = vmul.f32 %v6669_v18, %v10023_v29  ;;  %v6671_v47 = vpop.eup %6670 }
 0xdcf   :  { %v4518_v34 = vmul.f32 %v6671_v47, %v10027_v58  ;;  %v6673_v27 = vpop.eup %6672 }
 0xdd0   :  { %v6675_v2 = vpop.eup %6674  ;;  %v4485_v28 = vadd.f32 1.0, %v6673_v27 }
 0xdd1   :  { %v4486_v62 = vadd.f32 1.0, %v6675_v2 }
 0xdd2   :  { %6676 = vrcp.f32 %v4485_v28 }
 0xdd3   :  { %6678 = vrcp.f32 %v4486_v62 }
 0xddc   :  { %v6677_v28 = vpop.eup %6676 }
 0xdf1   :  { %v4423_v42 = vpop.f32.mrb[148].mxu0  ;;  %v4464_v15 = vpop.f32.mrb[148].mxu1 }
 0xdf2   :  { %v4475_v40 = vadd.f32 %v4423_v42, %v12541_v30  ;;  %v4477_v20 = vadd.f32 %v4464_v15, %v12542_v21  ;;  %v4425_v4 = vpop.f32.mrb[149].mxu0  ;;  %v4466_v16 = vpop.f32.mrb[149].mxu1 }
 0xdf3   :  { %v4476_v18 = vadd.f32 %v4425_v4, %v12543_v17  ;;  %v4478_v60 = vadd.f32 %v4466_v16, %v12544_v11  ;;  %v4427_v47 = vpop.f32.mrb[150].mxu0  ;;  %v4468_v45 = vpop.f32.mrb[150].mxu1 }
 0xdf4   :  { %6680 = vtanh.f32 %v4475_v40  ;;  %v6246_v43 = vmul.f32 -1.442695, %v4477_v20  ;;  %v4428_v27 = vpop.f32.mrb[151].mxu0  ;;  %v4469_v2 = vpop.f32.mrb[151].mxu1 }
 0xdf5   :  { %6682 = vtanh.f32 %v4476_v18  ;;  %v6247_v19 = vmul.f32 -1.442695, %v4478_v60  ;;  %v6679_v42 = vpop.eup %6678  ;;  %v4531_v17 = vpop.permute.xlu0 %4530  ;;  %v12547_v2 = vld [vmem:[#allocation108_spill] sm:$0xff] }
 0xdf6   :  { %6684 = vpow2.f32 %v6246_v43  ;;  %vm4532_vm11 = vcmp.eq.s32.totalorder %v4531_v17, 1  ;;  %v12555_v17 = vld [vmem:[#allocation116_spill] sm:$0xff] }
 0xdf7   :  { %6686 = vpow2.f32 %v6247_v19 }
 0xdfe   :  { %v6681_v15 = vpop.eup %6680 }
 0xdff   :  { %v6683_v30 = vpop.eup %6682  ;;  %v4519_v21 = vmul.f32 %v6681_v15, %v6677_v28  ;;  %v12548_v28 = vld [vmem:[#allocation109_spill] sm:$0xff]  ;;  %v12550_v15 = vld [vmem:[#allocation111_spill] sm:$0xff] }
 0xe00   :  { %v6685_v62 = vpop.eup %6684  ;;  %v4520_v25 = vmul.f32 %v6683_v30, %v6679_v42  ;;  %v12549_v42 = vld [vmem:[#allocation110_spill] sm:$0xff]  ;;  %v12551_v30 = vld [vmem:[#allocation112_spill] sm:$0xff] }
 0xe01   :  { %v6687_v4 = vpop.eup %6686  ;;  %v4521_v16 = vadd.f32 %v4519_v21, %v4517_v52  ;;  %v4511_v11 = vadd.f32 1.0, %v6685_v62  ;;  %v12552_v21 = vld [vmem:[#allocation113_spill] sm:$0xff]  ;;  %v12553_v62 = vld [vmem:[#allocation114_spill] sm:$0xff] }
 0xe02   :  { %v4522_v40 = vadd.f32 %v4520_v25, %v4518_v34  ;;  %v4512_v20 = vadd.f32 1.0, %v6687_v4  ;;  %v12554_v4 = vld [vmem:[#allocation115_spill] sm:$0xff] }
 0xe03   :  { %6688 = vtanh.f32 %v4521_v16  ;;  %v10187_v18 = vsel %vm4532_vm11, %v4521_v16, %v10023_v29  ;;  %v12556_v16 = vld [vmem:[#allocation117_spill] sm:$0xff] }
 0xe04   :  { %6690 = vrcp.f32 %v4511_v11  ;;  %v10191_v19 = vsel %vm4532_vm11, %v4522_v40, %v10027_v58  ;;  %v12557_v11 = vld [vmem:[#allocation118_spill] sm:$0xff] }
 0xe05   :  { %6692 = vtanh.f32 %v4522_v40  ;;  %v12558_v40 = vld [vmem:[#allocation119_spill] sm:$0xff] }
 0xe06   :  { %6694 = vrcp.f32 %v4512_v20  ;;  %v12559_v20 = vld [vmem:[#allocation120_spill] sm:$0xff] }
 0xe0d   :  { %v6689_v60 = vpop.eup %6688 }
 0xe0e   :  { %v6691_v47 = vpop.eup %6690 }
 0xe0f   :  { %v6693_v45 = vpop.eup %6692  ;;  %v4525_v52 = vmul.f32 %v6691_v47, %v6689_v60  ;;  %v12560_v60 = vld [vmem:[#allocation121_spill] sm:$0xff]  ;;  %v12561_v47 = vld [vmem:[#allocation122_spill] sm:$0xff] }
 0xe10   :  { %v6695_v43 = vpop.eup %6694 }
 0xe11   :  { %v4526_v27 = vmul.f32 %v6695_v43, %v6693_v45  ;;  %v10195_v25 = vsel %vm4532_vm11, %v4525_v52, %v10031_v57  ;;  %v12545_v57 = vld [vmem:[#allocation106_spill] sm:$0xff]  ;;  %v12562_v45 = vld [vmem:[#allocation123_spill] sm:$0xff]  ;;  %v12563_v52 = vld [vmem:[#allocation124_spill] sm:$0xff] }
 0xe12   :  { %v10205_v34 = vpack.c.bf16 %v10195_v25, %v10195_v25  ;;  %v12564_v43 = vld [vmem:[#allocation125_spill] sm:$0xff] }
 0xe13   :  { %v10199_v29 = vsel %vm4532_vm11, %v4526_v27, %v10035_v55  ;;  %v12546_v55 = vld [vmem:[#allocation107_spill] sm:$0xff]  ;;  %v12565_v27 = vld [vmem:[#allocation126_spill] sm:$0xff] }
 0xe14   :  { %v4549_v58 = vpack.c.bf16 %v10199_v29, %v10199_v29 }
 0xe16   :  { %4582 = vmatprep.mubr.bf16.mxu0 %v4549_v58  ;;  %4623 = vmatprep.mubr.bf16.mxu1 %v4549_v58 }
 0xe17   :  { %4583 = vmatmul.mubr.bf16.vlgmr.msra.gmra.mrb[152].mxu0 %v10205_v34  ;;  %4624 = vmatmul.mubr.bf16.vlgmr.msra.gmra.mrb[152].mxu1 %v10205_v34 }
 0xe18   :  { %4633 = vmatpush1.bf16.msra.mxu0 %v11548_v53  ;;  %4674 = vmatpush1.bf16.msra.mxu1 %v11549_v10 }
 0xe19   :  { %4664 = vmatprep.mubr.bf16.mxu0 %v4549_v58  ;;  %4705 = vmatprep.mubr.bf16.mxu1 %v4549_v58  ;;  %v12566_v58 = vld [vmem:[#allocation127_spill] sm:$0xff] }
 0xe1a   :  { %4634 = vmatprep.subr.bf16.mxu0 %v11550_v6  ;;  %4675 = vmatprep.subr.bf16.mxu1 %v11551_v44 }
 0xe1c   :  { %4635 = vmatpush1.bf16.msra.mxu0 %v11552_v3  ;;  %4676 = vmatpush1.bf16.msra.mxu1 %v11553_v5 }
 0xe1d   :  { %4636 = vmatprep.subr.bf16.mxu0 %v11554_v48  ;;  %4677 = vmatprep.subr.bf16.mxu1 %v11555_v8 }
 0xe20   :  { %4637 = vmatpush1.bf16.msra.mxu0 %v11556_v46  ;;  %4678 = vmatpush1.bf16.msra.mxu1 %v11557_v35 }
 0xe21   :  { %4638 = vmatprep.subr.bf16.mxu0 %v11558_v49  ;;  %4679 = vmatprep.subr.bf16.mxu1 %v11559_v36 }
 0xe24   :  { %4639 = vmatpush1.bf16.msra.mxu0 %v11560_v50  ;;  %4680 = vmatpush1.bf16.msra.mxu1 %v11561_v54 }
 0xe25   :  { %4640 = vmatprep.subr.bf16.mxu0 %v11653_v56  ;;  %4681 = vmatprep.subr.bf16.mxu1 %v11654_v51 }
 0xe28   :  { %4641 = vmatpush1.bf16.msra.mxu0 %v11655_v13  ;;  %4682 = vmatpush1.bf16.msra.mxu1 %v11656_v33 }
 0xe29   :  { %4642 = vmatprep.subr.bf16.mxu0 %v11657_v23  ;;  %4683 = vmatprep.subr.bf16.mxu1 %v11658_v59 }
 0xe2c   :  { %4643 = vmatpush1.bf16.msra.mxu0 %v11659_v39  ;;  %4684 = vmatpush1.bf16.msra.mxu1 %v11660_v63 }
 0xe2d   :  { %4644 = vmatprep.subr.bf16.mxu0 %v11661_v7  ;;  %4685 = vmatprep.subr.bf16.mxu1 %v11662_v0 }
 0xe30   :  { %4645 = vmatpush1.bf16.msra.mxu0 %v11663_v14  ;;  %4686 = vmatpush1.bf16.msra.mxu1 %v11664_v32 }
 0xe31   :  { %4646 = vmatprep.subr.bf16.mxu0 %v11665_v12  ;;  %4687 = vmatprep.subr.bf16.mxu1 %v11753_v24 }
 0xe34   :  { %4647 = vmatpush1.bf16.msra.mxu0 %v11754_v9  ;;  %4688 = vmatpush1.bf16.msra.mxu1 %v11755_v41 }
 0xe35   :  { %4648 = vmatprep.subr.bf16.mxu0 %v11669_v26  ;;  %4689 = vmatprep.subr.bf16.mxu1 %v11670_v1 }
 0xe38   :  { %4649 = vmatpush1.bf16.msra.mxu0 %v11671_v22  ;;  %4690 = vmatpush1.bf16.msra.mxu1 %v11672_v38 }
 0xe39   :  { %4650 = vmatprep.subr.bf16.mxu0 %v11673_v37  ;;  %4691 = vmatprep.subr.bf16.mxu1 %v11674_v31 }
 0xe3c   :  { %4651 = vmatpush1.bf16.msra.mxu0 %v11675_v61  ;;  %4692 = vmatpush1.bf16.msra.mxu1 %v12545_v57 }
 0xe3d   :  { %4652 = vmatprep.subr.bf16.mxu0 %v12546_v55  ;;  %4693 = vmatprep.subr.bf16.mxu1 %v12547_v2 }
 0xe40   :  { %4653 = vmatpush1.bf16.msra.mxu0 %v12548_v28  ;;  %4694 = vmatpush1.bf16.msra.mxu1 %v12549_v42 }
 0xe41   :  { %4654 = vmatprep.subr.bf16.mxu0 %v12550_v15  ;;  %4695 = vmatprep.subr.bf16.mxu1 %v12551_v30 }
 0xe44   :  { %4655 = vmatpush1.bf16.msra.mxu0 %v12552_v21  ;;  %4696 = vmatpush1.bf16.msra.mxu1 %v12553_v62  ;;  %v12638_v62 = vld [vmem:[#allocation173_spill] sm:$0xff]  ;;  %v12639_v21 = vld [vmem:[#allocation174_spill] sm:$0xff] }
 0xe45   :  { %4656 = vmatprep.subr.bf16.mxu0 %v12554_v4  ;;  %4697 = vmatprep.subr.bf16.mxu1 %v12555_v17  ;;  %v12637_v17 = vld [vmem:[#allocation172_spill] sm:$0xff] }
 0xe48   :  { %4657 = vmatpush1.bf16.msra.mxu0 %v12556_v16  ;;  %4698 = vmatpush1.bf16.msra.mxu1 %v12557_v11  ;;  %v12567_v16 = vld [vmem:[#allocation128_spill] sm:$0xff]  ;;  %v12568_v11 = vld [vmem:[#allocation129_spill] sm:$0xff] }
 0xe49   :  { %4658 = vmatprep.subr.bf16.mxu0 %v12558_v40  ;;  %4699 = vmatprep.subr.bf16.mxu1 %v12559_v20  ;;  %v12569_v40 = vld [vmem:[#allocation130_spill] sm:$0xff]  ;;  %v12570_v20 = vld [vmem:[#allocation3_spill] sm:$0xff] }
 0xe4c   :  { %4659 = vmatpush1.bf16.msra.mxu0 %v12560_v60  ;;  %4700 = vmatpush1.bf16.msra.mxu1 %v12561_v47  ;;  %v12571_v60 = vld [vmem:[#allocation4_spill] sm:$0xff]  ;;  %v12636_v47 = vld [vmem:[#allocation171_spill] sm:$0xff] }
 0xe4d   :  { %4660 = vmatprep.subr.bf16.mxu0 %v12562_v45  ;;  %4701 = vmatprep.subr.bf16.mxu1 %v12563_v52  ;;  %v12572_v52 = vld [vmem:[#allocation5_spill] sm:$0xff]  ;;  %v12581_v45 = vld [vmem:[#allocation14_spill] sm:$0xff] }
 0xe50   :  { %4661 = vmatpush1.bf16.msra.mxu0 %v12564_v43  ;;  %4702 = vmatpush1.bf16.msra.mxu1 %v12565_v27  ;;  %v12573_v43 = vld [vmem:[#allocation6_spill] sm:$0xff]  ;;  %v12574_v27 = vld [vmem:[#allocation7_spill] sm:$0xff] }
 0xe51   :  { %4662 = vmatprep.subr.bf16.mxu0 %v12566_v58  ;;  %4703 = vmatprep.subr.bf16.mxu1 %v12567_v16  ;;  %v12575_v58 = vld [vmem:[#allocation8_spill] sm:$0xff]  ;;  %v12576_v16 = vld [vmem:[#allocation9_spill] sm:$0xff] }
 0xe54   :  { %4663 = vmatpush1.bf16.msra.mxu0 %v12568_v11  ;;  %4704 = vmatpush1.bf16.msra.mxu1 %v12569_v40  ;;  %v12577_v11 = vld [vmem:[#allocation10_spill] sm:$0xff]  ;;  %v12578_v40 = vld [vmem:[#allocation11_spill] sm:$0xff] }
 0xe55   :  { %4793 = vmatprep.subr.bf16.mxu0 %v12570_v20  ;;  %4834 = vmatprep.subr.bf16.mxu1 %v12571_v60  ;;  %v12579_v20 = vld [vmem:[#allocation12_spill] sm:$0xff]  ;;  %v12580_v60 = vld [vmem:[#allocation13_spill] sm:$0xff] }
 0xe57   :  { %4665 = vmatmul.mubr.bf16.vlgmr.msra.gmra.mrb[156].mxu0 %v10205_v34  ;;  %4706 = vmatmul.mubr.bf16.vlgmr.msra.gmra.mrb[156].mxu1 %v10205_v34  ;;  %v12582_v34 = vld [vmem:[#allocation15_spill] sm:$0xff] }
 0xe58   :  { %4794 = vmatpush1.bf16.msra.mxu0 %v12572_v52  ;;  %4835 = vmatpush1.bf16.msra.mxu1 %v12573_v43  ;;  %v12583_v52 = vld [vmem:[#allocation16_spill] sm:$0xff]  ;;  %v12584_v43 = vld [vmem:[#allocation17_spill] sm:$0xff] }
 0xe59   :  { %4795 = vmatprep.subr.bf16.mxu0 %v12574_v27  ;;  %4836 = vmatprep.subr.bf16.mxu1 %v12575_v58  ;;  %v12585_v27 = vld [vmem:[#allocation18_spill] sm:$0xff]  ;;  %v12586_v58 = vld [vmem:[#allocation19_spill] sm:$0xff] }
 0xe5c   :  { %4796 = vmatpush1.bf16.msra.mxu0 %v12576_v16  ;;  %4837 = vmatpush1.bf16.msra.mxu1 %v12577_v11  ;;  %v12587_v16 = vld [vmem:[#allocation20_spill] sm:$0xff]  ;;  %v12588_v11 = vld [vmem:[#allocation21_spill] sm:$0xff] }
 0xe5d   :  { %4797 = vmatprep.subr.bf16.mxu0 %v12578_v40  ;;  %4838 = vmatprep.subr.bf16.mxu1 %v12579_v20  ;;  %v12589_v40 = vld [vmem:[#allocation22_spill] sm:$0xff]  ;;  %v12590_v20 = vld [vmem:[#allocation23_spill] sm:$0xff] }
 0xe60   :  { %4798 = vmatpush1.bf16.msra.mxu0 %v12580_v60  ;;  %4839 = vmatpush1.bf16.msra.mxu1 %v12581_v45  ;;  %v12591_v60 = vld [vmem:[#allocation24_spill] sm:$0xff]  ;;  %v12592_v45 = vld [vmem:[#allocation25_spill] sm:$0xff] }
 0xe61   :  { %4799 = vmatprep.subr.bf16.mxu0 %v12582_v34  ;;  %4840 = vmatprep.subr.bf16.mxu1 %v12583_v52  ;;  %v12593_v34 = vld [vmem:[#allocation26_spill] sm:$0xff]  ;;  %v12594_v52 = vld [vmem:[#allocation27_spill] sm:$0xff] }
 0xe64   :  { %4800 = vmatpush1.bf16.msra.mxu0 %v12584_v43  ;;  %4841 = vmatpush1.bf16.msra.mxu1 %v12585_v27  ;;  %v12595_v43 = vld [vmem:[#allocation28_spill] sm:$0xff]  ;;  %v12596_v27 = vld [vmem:[#allocation29_spill] sm:$0xff] }
 0xe65   :  { %4801 = vmatprep.subr.bf16.mxu0 %v12586_v58  ;;  %4842 = vmatprep.subr.bf16.mxu1 %v12587_v16  ;;  %v12597_v58 = vld [vmem:[#allocation30_spill] sm:$0xff]  ;;  %v12598_v16 = vld [vmem:[#allocation31_spill] sm:$0xff] }
 0xe68   :  { %4802 = vmatpush1.bf16.msra.mxu0 %v12588_v11  ;;  %4843 = vmatpush1.bf16.msra.mxu1 %v12589_v40  ;;  %v12599_v11 = vld [vmem:[#allocation32_spill] sm:$0xff]  ;;  %v12600_v40 = vld [vmem:[#allocation33_spill] sm:$0xff] }
 0xe69   :  { %4803 = vmatprep.subr.bf16.mxu0 %v12590_v20  ;;  %4844 = vmatprep.subr.bf16.mxu1 %v12591_v60  ;;  %v12601_v20 = vld [vmem:[#allocation34_spill] sm:$0xff]  ;;  %v12602_v60 = vld [vmem:[#allocation35_spill] sm:$0xff] }
 0xe6c   :  { %4804 = vmatpush1.bf16.msra.mxu0 %v12592_v45  ;;  %4845 = vmatpush1.bf16.msra.mxu1 %v12593_v34  ;;  %v12603_v45 = vld [vmem:[#allocation36_spill] sm:$0xff]  ;;  %v12604_v34 = vld [vmem:[#allocation37_spill] sm:$0xff] }
 0xe6d   :  { %4805 = vmatprep.subr.bf16.mxu0 %v12594_v52  ;;  %4846 = vmatprep.subr.bf16.mxu1 %v12595_v43  ;;  %v12605_v52 = vld [vmem:[#allocation38_spill] sm:$0xff]  ;;  %v12606_v43 = vld [vmem:[#allocation39_spill] sm:$0xff] }
 0xe70   :  { %4806 = vmatpush1.bf16.msra.mxu0 %v12596_v27  ;;  %4847 = vmatpush1.bf16.msra.mxu1 %v12597_v58  ;;  %v12607_v27 = vld [vmem:[#allocation40_spill] sm:$0xff]  ;;  %v12608_v58 = vld [vmem:[#allocation41_spill] sm:$0xff] }
 0xe71   :  { %4807 = vmatprep.subr.bf16.mxu0 %v12598_v16  ;;  %4848 = vmatprep.subr.bf16.mxu1 %v12599_v11  ;;  %v12609_v16 = vld [vmem:[#allocation42_spill] sm:$0xff]  ;;  %v12610_v11 = vld [vmem:[#allocation43_spill] sm:$0xff] }
 0xe74   :  { %4808 = vmatpush1.bf16.msra.mxu0 %v12600_v40  ;;  %4849 = vmatpush1.bf16.msra.mxu1 %v12601_v20  ;;  %v12611_v40 = vld [vmem:[#allocation44_spill] sm:$0xff]  ;;  %v12612_v20 = vld [vmem:[#allocation45_spill] sm:$0xff] }
 0xe75   :  { %4809 = vmatprep.subr.bf16.mxu0 %v12602_v60  ;;  %4850 = vmatprep.subr.bf16.mxu1 %v12603_v45  ;;  %v12613_v60 = vld [vmem:[#allocation46_spill] sm:$0xff]  ;;  %v12614_v45 = vld [vmem:[#allocation47_spill] sm:$0xff] }
 0xe78   :  { %4810 = vmatpush1.bf16.msra.mxu0 %v12604_v34  ;;  %4851 = vmatpush1.bf16.msra.mxu1 %v12605_v52  ;;  %v12615_v34 = vld [vmem:[#allocation48_spill] sm:$0xff]  ;;  %v12616_v52 = vld [vmem:[#allocation49_spill] sm:$0xff] }
 0xe79   :  { %4811 = vmatprep.subr.bf16.mxu0 %v12606_v43  ;;  %4852 = vmatprep.subr.bf16.mxu1 %v12607_v27  ;;  %v12617_v43 = vld [vmem:[#allocation50_spill] sm:$0xff]  ;;  %v12618_v27 = vld [vmem:[#allocation51_spill] sm:$0xff] }
 0xe7c   :  { %4812 = vmatpush1.bf16.msra.mxu0 %v12608_v58  ;;  %4853 = vmatpush1.bf16.msra.mxu1 %v12609_v16  ;;  %v12619_v58 = vld [vmem:[#allocation52_spill] sm:$0xff]  ;;  %v12620_v16 = vld [vmem:[#allocation53_spill] sm:$0xff] }
 0xe7d   :  { %4813 = vmatprep.subr.bf16.mxu0 %v12610_v11  ;;  %4854 = vmatprep.subr.bf16.mxu1 %v12611_v40  ;;  %v12621_v11 = vld [vmem:[#allocation54_spill] sm:$0xff]  ;;  %v12622_v40 = vld [vmem:[#allocation55_spill] sm:$0xff] }
 0xe80   :  { %4814 = vmatpush1.bf16.msra.mxu0 %v12612_v20  ;;  %4855 = vmatpush1.bf16.msra.mxu1 %v12613_v60  ;;  %v12623_v20 = vld [vmem:[#allocation56_spill] sm:$0xff]  ;;  %v12624_v60 = vld [vmem:[#allocation57_spill] sm:$0xff] }
 0xe81   :  { %4815 = vmatprep.subr.bf16.mxu0 %v12614_v45  ;;  %4856 = vmatprep.subr.bf16.mxu1 %v12615_v34  ;;  %v12625_v45 = vld [vmem:[#allocation58_spill] sm:$0xff]  ;;  %v12626_v34 = vld [vmem:[#allocation59_spill] sm:$0xff] }
 0xe84   :  { %4816 = vmatpush1.bf16.msra.mxu0 %v12616_v52  ;;  %4857 = vmatpush1.bf16.msra.mxu1 %v12617_v43  ;;  %v12627_v52 = vld [vmem:[#allocation60_spill] sm:$0xff]  ;;  %v12628_v43 = vld [vmem:[#allocation61_spill] sm:$0xff] }
 0xe85   :  { %4817 = vmatprep.subr.bf16.mxu0 %v12618_v27  ;;  %4858 = vmatprep.subr.bf16.mxu1 %v12619_v58  ;;  %v12629_v27 = vld [vmem:[#allocation62_spill] sm:$0xff]  ;;  %v12630_v58 = vld [vmem:[#allocation63_spill] sm:$0xff] }
 0xe88   :  { %4818 = vmatpush1.bf16.msra.mxu0 %v12620_v16  ;;  %4859 = vmatpush1.bf16.msra.mxu1 %v12621_v11  ;;  %v12631_v16 = vld [vmem:[#allocation64_spill] sm:$0xff]  ;;  %v12632_v11 = vld [vmem:[#allocation65_spill] sm:$0xff] }
 0xe89   :  { %4819 = vmatprep.subr.bf16.mxu0 %v12622_v40  ;;  %4860 = vmatprep.subr.bf16.mxu1 %v12623_v20  ;;  %v12633_v40 = vld [vmem:[#allocation66_spill] sm:$0xff]  ;;  %v12634_v20 = vld [vmem:[#allocation67_spill] sm:$0xff] }
 0xe8c   :  { %4820 = vmatpush1.bf16.msra.mxu0 %v12624_v60  ;;  %4861 = vmatpush1.bf16.msra.mxu1 %v12625_v45  ;;  %v12635_v60 = vld [vmem:[#allocation68_spill] sm:$0xff] }
 0xe8d   :  { %4821 = vmatprep.subr.bf16.mxu0 %v12626_v34  ;;  %4862 = vmatprep.subr.bf16.mxu1 %v12627_v52 }
 0xe90   :  { %4822 = vmatpush1.bf16.msra.mxu0 %v12628_v43  ;;  %4863 = vmatpush1.bf16.msra.mxu1 %v12629_v27 }
 0xe91   :  { %4823 = vmatprep.subr.bf16.mxu0 %v12630_v58  ;;  %4864 = vmatprep.subr.bf16.mxu1 %v12631_v16 }
 0xe94   :  { %4824 = vmatpush1.bf16.msra.mxu0 %v12632_v11  ;;  %4865 = vmatpush1.bf16.msra.mxu1 %v12633_v40 }
 0xe95   :  { %4875 = vmatprep.subr.bf16.mxu0 %v12634_v20  ;;  %4916 = vmatprep.subr.bf16.mxu1 %v12635_v60 }
 0xeea   :  { %v4584_v45 = vpop.f32.mrb[152].mxu0  ;;  %v4625_v34 = vpop.f32.mrb[152].mxu1 }
 0xeeb   :  { %v4714_v52 = vadd.f32 %v4584_v45, %v12636_v47  ;;  %v4716_v43 = vadd.f32 %v4625_v34, %v12637_v17  ;;  %v4586_v4 = vpop.f32.mrb[153].mxu0  ;;  %v4627_v27 = vpop.f32.mrb[153].mxu1 }
 0xeec   :  { %v4715_v58 = vadd.f32 %v4586_v4, %v12638_v62  ;;  %v4717_v16 = vadd.f32 %v4627_v27, %v12639_v21  ;;  %v4588_v30 = vpop.f32.mrb[154].mxu0  ;;  %v4629_v11 = vpop.f32.mrb[154].mxu1 }
 0xeed   :  { %v6250_v15 = vmul.f32 -1.442695, %v4716_v43  ;;  %v4589_v40 = vpop.f32.mrb[155].mxu0  ;;  %v4630_v42 = vpop.f32.mrb[155].mxu1  ;;  %v6248_v30 = vmul.f32 -1.442695, %v4714_v52 }
 0xeee   :  { %v6251_v20 = vmul.f32 -1.442695, %v4717_v16  ;;  %v6249_v4 = vmul.f32 -1.442695, %v4715_v58  ;;  %v12643_v52 = vld [vmem:[#allocation234_spill] sm:$0xff] }
 0xeef   :  { %6696 = vpow2.f32 %v6250_v15 }
 0xef0   :  { %6698 = vpow2.f32 %v6251_v20 }
 0xef9   :  { %v6697_v60 = vpop.eup %6696 }
 0xefa   :  { %v4740_v28 = vadd.f32 1.0, %v6697_v60  ;;  %v6699_v2 = vpop.eup %6698  ;;  %v12641_v60 = vld [vmem:[#allocation232_spill] sm:$0xff] }
 0xefb   :  { %v4741_v47 = vadd.f32 1.0, %v6699_v2 }
 0xefc   :  { %6700 = vrcp.f32 %v4740_v28  ;;  %v12640_v28 = vld [vmem:[#allocation231_spill] sm:$0xff] }
 0xefd   :  { %6702 = vrcp.f32 %v4741_v47  ;;  %v12642_v47 = vld [vmem:[#allocation233_spill] sm:$0xff] }
 0xefe   :  { %6704 = vpow2.f32 %v6248_v30 }
 0xeff   :  { %6706 = vpow2.f32 %v6249_v4 }
 0xf06   :  { %v6701_v17 = vpop.eup %6700 }
 0xf07   :  { %v4760_v45 = vmul.f32 %v6701_v17, %v10187_v18  ;;  %v6703_v62 = vpop.eup %6702 }
 0xf08   :  { %v4761_v21 = vmul.f32 %v6703_v62, %v10191_v19  ;;  %v6705_v42 = vpop.eup %6704 }
 0xf09   :  { %v6707_v16 = vpop.eup %6706  ;;  %v4728_v15 = vadd.f32 1.0, %v6705_v42 }
 0xf0a   :  { %v4729_v11 = vadd.f32 1.0, %v6707_v16 }
 0xf0b   :  { %6708 = vrcp.f32 %v4728_v15 }
 0xf0c   :  { %6710 = vrcp.f32 %v4729_v11 }
 0xf15   :  { %v6709_v15 = vpop.eup %6708 }
 0xf2a   :  { %v4666_v40 = vpop.f32.mrb[156].mxu0  ;;  %v4707_v20 = vpop.f32.mrb[156].mxu1 }
 0xf2b   :  { %v4718_v2 = vadd.f32 %v4666_v40, %v12640_v28  ;;  %v4720_v43 = vadd.f32 %v4707_v20, %v12641_v60  ;;  %v4668_v27 = vpop.f32.mrb[157].mxu0  ;;  %v4709_v34 = vpop.f32.mrb[157].mxu1 }
 0xf2c   :  { %v4719_v17 = vadd.f32 %v4668_v27, %v12642_v47  ;;  %v4721_v58 = vadd.f32 %v4709_v34, %v12643_v52  ;;  %v4670_v62 = vpop.f32.mrb[158].mxu0  ;;  %v4711_v30 = vpop.f32.mrb[158].mxu1 }
 0xf2d   :  { %6712 = vtanh.f32 %v4718_v2  ;;  %v6252_v4 = vmul.f32 -1.442695, %v4720_v43  ;;  %v4671_v42 = vpop.f32.mrb[159].mxu0  ;;  %v4712_v16 = vpop.f32.mrb[159].mxu1 }
 0xf2e   :  { %6714 = vtanh.f32 %v4719_v17  ;;  %v6253_v55 = vmul.f32 -1.442695, %v4721_v58  ;;  %v6711_v40 = vpop.eup %6710  ;;  %v4774_v47 = vpop.permute.xlu1 %4773  ;;  %v12646_v16 = vld [vmem:[#allocation108_spill] sm:$0xff] }
 0xf2f   :  { %6716 = vpow2.f32 %v6252_v4  ;;  %vm4775_vm12 = vcmp.eq.s32.totalorder %v4774_v47, 1  ;;  %v12654_v47 = vld [vmem:[#allocation116_spill] sm:$0xff] }
 0xf30   :  { %6718 = vpow2.f32 %v6253_v55 }
 0xf37   :  { %v6713_v20 = vpop.eup %6712 }
 0xf38   :  { %v6715_v28 = vpop.eup %6714  ;;  %v4762_v60 = vmul.f32 %v6713_v20, %v6709_v15  ;;  %v12647_v15 = vld [vmem:[#allocation109_spill] sm:$0xff]  ;;  %v12649_v20 = vld [vmem:[#allocation111_spill] sm:$0xff] }
 0xf39   :  { %v6717_v11 = vpop.eup %6716  ;;  %v4763_v57 = vmul.f32 %v6715_v28, %v6711_v40  ;;  %v12648_v40 = vld [vmem:[#allocation110_spill] sm:$0xff]  ;;  %v12650_v28 = vld [vmem:[#allocation112_spill] sm:$0xff] }
 0xf3a   :  { %v6719_v27 = vpop.eup %6718  ;;  %v4764_v34 = vadd.f32 %v4762_v60, %v4760_v45  ;;  %v4754_v52 = vadd.f32 1.0, %v6717_v11  ;;  %v12651_v60 = vld [vmem:[#allocation113_spill] sm:$0xff]  ;;  %v12652_v11 = vld [vmem:[#allocation114_spill] sm:$0xff] }
 0xf3b   :  { %v4765_v2 = vadd.f32 %v4763_v57, %v4761_v21  ;;  %v4755_v43 = vadd.f32 1.0, %v6719_v27  ;;  %v12653_v27 = vld [vmem:[#allocation115_spill] sm:$0xff] }
 0xf3c   :  { %6720 = vtanh.f32 %v4764_v34  ;;  %v10351_v17 = vsel %vm4775_vm12, %v4764_v34, %v10187_v18  ;;  %v12655_v34 = vld [vmem:[#allocation117_spill] sm:$0xff] }
 0xf3d   :  { %6722 = vrcp.f32 %v4754_v52  ;;  %v10355_v55 = vsel %vm4775_vm12, %v4765_v2, %v10191_v19  ;;  %v12656_v52 = vld [vmem:[#allocation118_spill] sm:$0xff] }
 0xf3e   :  { %6724 = vtanh.f32 %v4765_v2  ;;  %v12657_v2 = vld [vmem:[#allocation119_spill] sm:$0xff] }
 0xf3f   :  { %6726 = vrcp.f32 %v4755_v43  ;;  %v12658_v43 = vld [vmem:[#allocation120_spill] sm:$0xff] }
 0xf46   :  { %v6721_v58 = vpop.eup %6720 }
 0xf47   :  { %v6723_v62 = vpop.eup %6722 }
 0xf48   :  { %v6725_v30 = vpop.eup %6724  ;;  %v4768_v45 = vmul.f32 %v6723_v62, %v6721_v58  ;;  %v12659_v58 = vld [vmem:[#allocation121_spill] sm:$0xff]  ;;  %v12660_v62 = vld [vmem:[#allocation122_spill] sm:$0xff] }
 0xf49   :  { %v6727_v4 = vpop.eup %6726 }
 0xf4a   :  { %v4769_v42 = vmul.f32 %v6727_v4, %v6725_v30  ;;  %v10359_v57 = vsel %vm4775_vm12, %v4768_v45, %v10195_v25  ;;  %v12644_v25 = vld [vmem:[#allocation106_spill] sm:$0xff]  ;;  %v12661_v30 = vld [vmem:[#allocation123_spill] sm:$0xff]  ;;  %v12662_v45 = vld [vmem:[#allocation124_spill] sm:$0xff] }
 0xf4b   :  { %v10369_v21 = vpack.c.bf16 %v10359_v57, %v10359_v57  ;;  %v12663_v4 = vld [vmem:[#allocation125_spill] sm:$0xff] }
 0xf4c   :  { %v10363_v18 = vsel %vm4775_vm12, %v4769_v42, %v10199_v29  ;;  %v12645_v29 = vld [vmem:[#allocation107_spill] sm:$0xff]  ;;  %v12664_v42 = vld [vmem:[#allocation126_spill] sm:$0xff] }
 0xf4d   :  { %v4792_v19 = vpack.c.bf16 %v10363_v18, %v10363_v18 }
 0xf4f   :  { %4825 = vmatprep.mubr.bf16.mxu0 %v4792_v19  ;;  %4866 = vmatprep.mubr.bf16.mxu1 %v4792_v19 }
 0xf50   :  { %4826 = vmatmul.mubr.bf16.vlgmr.msra.gmra.mrb[160].mxu0 %v10369_v21  ;;  %4867 = vmatmul.mubr.bf16.vlgmr.msra.gmra.mrb[160].mxu1 %v10369_v21 }
 0xf51   :  { %4876 = vmatpush1.bf16.msra.mxu0 %v11548_v53  ;;  %4917 = vmatpush1.bf16.msra.mxu1 %v11549_v10 }
 0xf52   :  { %4907 = vmatprep.mubr.bf16.mxu0 %v4792_v19  ;;  %4948 = vmatprep.mubr.bf16.mxu1 %v4792_v19  ;;  %v12665_v19 = vld [vmem:[#allocation127_spill] sm:$0xff] }
 0xf53   :  { %4877 = vmatprep.subr.bf16.mxu0 %v11550_v6  ;;  %4918 = vmatprep.subr.bf16.mxu1 %v11551_v44 }
 0xf55   :  { %4878 = vmatpush1.bf16.msra.mxu0 %v11552_v3  ;;  %4919 = vmatpush1.bf16.msra.mxu1 %v11553_v5 }
 0xf56   :  { %4879 = vmatprep.subr.bf16.mxu0 %v11554_v48  ;;  %4920 = vmatprep.subr.bf16.mxu1 %v11555_v8 }
 0xf59   :  { %4880 = vmatpush1.bf16.msra.mxu0 %v11556_v46  ;;  %4921 = vmatpush1.bf16.msra.mxu1 %v11557_v35 }
 0xf5a   :  { %4881 = vmatprep.subr.bf16.mxu0 %v11558_v49  ;;  %4922 = vmatprep.subr.bf16.mxu1 %v11559_v36 }
 0xf5d   :  { %4882 = vmatpush1.bf16.msra.mxu0 %v11560_v50  ;;  %4923 = vmatpush1.bf16.msra.mxu1 %v11561_v54 }
 0xf5e   :  { %4883 = vmatprep.subr.bf16.mxu0 %v11653_v56  ;;  %4924 = vmatprep.subr.bf16.mxu1 %v11654_v51 }
 0xf61   :  { %4884 = vmatpush1.bf16.msra.mxu0 %v11655_v13  ;;  %4925 = vmatpush1.bf16.msra.mxu1 %v11656_v33 }
 0xf62   :  { %4885 = vmatprep.subr.bf16.mxu0 %v11657_v23  ;;  %4926 = vmatprep.subr.bf16.mxu1 %v11658_v59 }
 0xf65   :  { %4886 = vmatpush1.bf16.msra.mxu0 %v11659_v39  ;;  %4927 = vmatpush1.bf16.msra.mxu1 %v11660_v63 }
 0xf66   :  { %4887 = vmatprep.subr.bf16.mxu0 %v11661_v7  ;;  %4928 = vmatprep.subr.bf16.mxu1 %v11662_v0 }
 0xf69   :  { %4888 = vmatpush1.bf16.msra.mxu0 %v11663_v14  ;;  %4929 = vmatpush1.bf16.msra.mxu1 %v11664_v32 }
 0xf6a   :  { %4889 = vmatprep.subr.bf16.mxu0 %v11665_v12  ;;  %4930 = vmatprep.subr.bf16.mxu1 %v11753_v24 }
 0xf6d   :  { %4890 = vmatpush1.bf16.msra.mxu0 %v11754_v9  ;;  %4931 = vmatpush1.bf16.msra.mxu1 %v11755_v41 }
 0xf6e   :  { %4891 = vmatprep.subr.bf16.mxu0 %v11669_v26  ;;  %4932 = vmatprep.subr.bf16.mxu1 %v11670_v1 }
 0xf71   :  { %4892 = vmatpush1.bf16.msra.mxu0 %v11671_v22  ;;  %4933 = vmatpush1.bf16.msra.mxu1 %v11672_v38 }
 0xf72   :  { %4893 = vmatprep.subr.bf16.mxu0 %v11673_v37  ;;  %4934 = vmatprep.subr.bf16.mxu1 %v11674_v31 }
 0xf75   :  { %4894 = vmatpush1.bf16.msra.mxu0 %v11675_v61  ;;  %4935 = vmatpush1.bf16.msra.mxu1 %v12644_v25 }
 0xf76   :  { %4895 = vmatprep.subr.bf16.mxu0 %v12645_v29  ;;  %4936 = vmatprep.subr.bf16.mxu1 %v12646_v16 }
 0xf79   :  { %4896 = vmatpush1.bf16.msra.mxu0 %v12647_v15  ;;  %4937 = vmatpush1.bf16.msra.mxu1 %v12648_v40 }
 0xf7a   :  { %4897 = vmatprep.subr.bf16.mxu0 %v12649_v20  ;;  %4938 = vmatprep.subr.bf16.mxu1 %v12650_v28 }
 0xf7d   :  { %4898 = vmatpush1.bf16.msra.mxu0 %v12651_v60  ;;  %4939 = vmatpush1.bf16.msra.mxu1 %v12652_v11  ;;  %v12737_v11 = vld [vmem:[#allocation177_spill] sm:$0xff]  ;;  %v12738_v60 = vld [vmem:[#allocation178_spill] sm:$0xff] }
 0xf7e   :  { %4899 = vmatprep.subr.bf16.mxu0 %v12653_v27  ;;  %4940 = vmatprep.subr.bf16.mxu1 %v12654_v47  ;;  %v12736_v47 = vld [vmem:[#allocation176_spill] sm:$0xff] }
 0xf81   :  { %4900 = vmatpush1.bf16.msra.mxu0 %v12655_v34  ;;  %4941 = vmatpush1.bf16.msra.mxu1 %v12656_v52  ;;  %v12666_v34 = vld [vmem:[#allocation128_spill] sm:$0xff]  ;;  %v12667_v52 = vld [vmem:[#allocation129_spill] sm:$0xff] }
 0xf82   :  { %4901 = vmatprep.subr.bf16.mxu0 %v12657_v2  ;;  %4942 = vmatprep.subr.bf16.mxu1 %v12658_v43  ;;  %v12668_v2 = vld [vmem:[#allocation130_spill] sm:$0xff]  ;;  %v12669_v43 = vld [vmem:[#allocation3_spill] sm:$0xff] }
 0xf85   :  { %4902 = vmatpush1.bf16.msra.mxu0 %v12659_v58  ;;  %4943 = vmatpush1.bf16.msra.mxu1 %v12660_v62  ;;  %v12670_v58 = vld [vmem:[#allocation4_spill] sm:$0xff]  ;;  %v12735_v62 = vld [vmem:[#allocation175_spill] sm:$0xff] }
 0xf86   :  { %4903 = vmatprep.subr.bf16.mxu0 %v12661_v30  ;;  %4944 = vmatprep.subr.bf16.mxu1 %v12662_v45  ;;  %v12671_v45 = vld [vmem:[#allocation5_spill] sm:$0xff]  ;;  %v12680_v30 = vld [vmem:[#allocation14_spill] sm:$0xff] }
 0xf89   :  { %4904 = vmatpush1.bf16.msra.mxu0 %v12663_v4  ;;  %4945 = vmatpush1.bf16.msra.mxu1 %v12664_v42  ;;  %v12672_v4 = vld [vmem:[#allocation6_spill] sm:$0xff]  ;;  %v12673_v42 = vld [vmem:[#allocation7_spill] sm:$0xff] }
 0xf8a   :  { %4905 = vmatprep.subr.bf16.mxu0 %v12665_v19  ;;  %4946 = vmatprep.subr.bf16.mxu1 %v12666_v34  ;;  %v12674_v19 = vld [vmem:[#allocation8_spill] sm:$0xff]  ;;  %v12675_v34 = vld [vmem:[#allocation9_spill] sm:$0xff] }
 0xf8d   :  { %4906 = vmatpush1.bf16.msra.mxu0 %v12667_v52  ;;  %4947 = vmatpush1.bf16.msra.mxu1 %v12668_v2  ;;  %v12676_v52 = vld [vmem:[#allocation10_spill] sm:$0xff]  ;;  %v12677_v2 = vld [vmem:[#allocation11_spill] sm:$0xff] }
 0xf8e   :  { %5036 = vmatprep.subr.bf16.mxu0 %v12669_v43  ;;  %5077 = vmatprep.subr.bf16.mxu1 %v12670_v58  ;;  %v12678_v43 = vld [vmem:[#allocation12_spill] sm:$0xff]  ;;  %v12679_v58 = vld [vmem:[#allocation13_spill] sm:$0xff] }
 0xf90   :  { %4908 = vmatmul.mubr.bf16.vlgmr.msra.gmra.mrb[164].mxu0 %v10369_v21  ;;  %4949 = vmatmul.mubr.bf16.vlgmr.msra.gmra.mrb[164].mxu1 %v10369_v21  ;;  %v12681_v21 = vld [vmem:[#allocation15_spill] sm:$0xff] }
 0xf91   :  { %5037 = vmatpush1.bf16.msra.mxu0 %v12671_v45  ;;  %5078 = vmatpush1.bf16.msra.mxu1 %v12672_v4  ;;  %v12682_v45 = vld [vmem:[#allocation16_spill] sm:$0xff]  ;;  %v12683_v4 = vld [vmem:[#allocation17_spill] sm:$0xff] }
 0xf92   :  { %5038 = vmatprep.subr.bf16.mxu0 %v12673_v42  ;;  %5079 = vmatprep.subr.bf16.mxu1 %v12674_v19  ;;  %v12684_v42 = vld [vmem:[#allocation18_spill] sm:$0xff]  ;;  %v12685_v19 = vld [vmem:[#allocation19_spill] sm:$0xff] }
 0xf95   :  { %5039 = vmatpush1.bf16.msra.mxu0 %v12675_v34  ;;  %5080 = vmatpush1.bf16.msra.mxu1 %v12676_v52  ;;  %v12686_v34 = vld [vmem:[#allocation20_spill] sm:$0xff]  ;;  %v12687_v52 = vld [vmem:[#allocation21_spill] sm:$0xff] }
 0xf96   :  { %5040 = vmatprep.subr.bf16.mxu0 %v12677_v2  ;;  %5081 = vmatprep.subr.bf16.mxu1 %v12678_v43  ;;  %v12688_v2 = vld [vmem:[#allocation22_spill] sm:$0xff]  ;;  %v12689_v43 = vld [vmem:[#allocation23_spill] sm:$0xff] }
 0xf99   :  { %5041 = vmatpush1.bf16.msra.mxu0 %v12679_v58  ;;  %5082 = vmatpush1.bf16.msra.mxu1 %v12680_v30  ;;  %v12690_v58 = vld [vmem:[#allocation24_spill] sm:$0xff]  ;;  %v12691_v30 = vld [vmem:[#allocation25_spill] sm:$0xff] }
 0xf9a   :  { %5042 = vmatprep.subr.bf16.mxu0 %v12681_v21  ;;  %5083 = vmatprep.subr.bf16.mxu1 %v12682_v45  ;;  %v12692_v21 = vld [vmem:[#allocation26_spill] sm:$0xff]  ;;  %v12693_v45 = vld [vmem:[#allocation27_spill] sm:$0xff] }
 0xf9d   :  { %5043 = vmatpush1.bf16.msra.mxu0 %v12683_v4  ;;  %5084 = vmatpush1.bf16.msra.mxu1 %v12684_v42  ;;  %v12694_v4 = vld [vmem:[#allocation28_spill] sm:$0xff]  ;;  %v12695_v42 = vld [vmem:[#allocation29_spill] sm:$0xff] }
 0xf9e   :  { %5044 = vmatprep.subr.bf16.mxu0 %v12685_v19  ;;  %5085 = vmatprep.subr.bf16.mxu1 %v12686_v34  ;;  %v12696_v19 = vld [vmem:[#allocation30_spill] sm:$0xff]  ;;  %v12697_v34 = vld [vmem:[#allocation31_spill] sm:$0xff] }
 0xfa1   :  { %5045 = vmatpush1.bf16.msra.mxu0 %v12687_v52  ;;  %5086 = vmatpush1.bf16.msra.mxu1 %v12688_v2  ;;  %v12698_v52 = vld [vmem:[#allocation32_spill] sm:$0xff]  ;;  %v12699_v2 = vld [vmem:[#allocation33_spill] sm:$0xff] }
 0xfa2   :  { %5046 = vmatprep.subr.bf16.mxu0 %v12689_v43  ;;  %5087 = vmatprep.subr.bf16.mxu1 %v12690_v58  ;;  %v12700_v43 = vld [vmem:[#allocation34_spill] sm:$0xff]  ;;  %v12701_v58 = vld [vmem:[#allocation35_spill] sm:$0xff] }
 0xfa5   :  { %5047 = vmatpush1.bf16.msra.mxu0 %v12691_v30  ;;  %5088 = vmatpush1.bf16.msra.mxu1 %v12692_v21  ;;  %v12702_v30 = vld [vmem:[#allocation36_spill] sm:$0xff]  ;;  %v12703_v21 = vld [vmem:[#allocation37_spill] sm:$0xff] }
 0xfa6   :  { %5048 = vmatprep.subr.bf16.mxu0 %v12693_v45  ;;  %5089 = vmatprep.subr.bf16.mxu1 %v12694_v4  ;;  %v12704_v45 = vld [vmem:[#allocation38_spill] sm:$0xff]  ;;  %v12705_v4 = vld [vmem:[#allocation39_spill] sm:$0xff] }
 0xfa9   :  { %5049 = vmatpush1.bf16.msra.mxu0 %v12695_v42  ;;  %5090 = vmatpush1.bf16.msra.mxu1 %v12696_v19  ;;  %v12706_v42 = vld [vmem:[#allocation40_spill] sm:$0xff]  ;;  %v12707_v19 = vld [vmem:[#allocation41_spill] sm:$0xff] }
 0xfaa   :  { %5050 = vmatprep.subr.bf16.mxu0 %v12697_v34  ;;  %5091 = vmatprep.subr.bf16.mxu1 %v12698_v52  ;;  %v12708_v34 = vld [vmem:[#allocation42_spill] sm:$0xff]  ;;  %v12709_v52 = vld [vmem:[#allocation43_spill] sm:$0xff] }
 0xfad   :  { %5051 = vmatpush1.bf16.msra.mxu0 %v12699_v2  ;;  %5092 = vmatpush1.bf16.msra.mxu1 %v12700_v43  ;;  %v12710_v2 = vld [vmem:[#allocation44_spill] sm:$0xff]  ;;  %v12711_v43 = vld [vmem:[#allocation45_spill] sm:$0xff] }
 0xfae   :  { %5052 = vmatprep.subr.bf16.mxu0 %v12701_v58  ;;  %5093 = vmatprep.subr.bf16.mxu1 %v12702_v30  ;;  %v12712_v58 = vld [vmem:[#allocation46_spill] sm:$0xff]  ;;  %v12713_v30 = vld [vmem:[#allocation47_spill] sm:$0xff] }
 0xfb1   :  { %5053 = vmatpush1.bf16.msra.mxu0 %v12703_v21  ;;  %5094 = vmatpush1.bf16.msra.mxu1 %v12704_v45  ;;  %v12714_v21 = vld [vmem:[#allocation48_spill] sm:$0xff]  ;;  %v12715_v45 = vld [vmem:[#allocation49_spill] sm:$0xff] }
 0xfb2   :  { %5054 = vmatprep.subr.bf16.mxu0 %v12705_v4  ;;  %5095 = vmatprep.subr.bf16.mxu1 %v12706_v42  ;;  %v12716_v4 = vld [vmem:[#allocation50_spill] sm:$0xff]  ;;  %v12717_v42 = vld [vmem:[#allocation51_spill] sm:$0xff] }
 0xfb5   :  { %5055 = vmatpush1.bf16.msra.mxu0 %v12707_v19  ;;  %5096 = vmatpush1.bf16.msra.mxu1 %v12708_v34  ;;  %v12718_v19 = vld [vmem:[#allocation52_spill] sm:$0xff]  ;;  %v12719_v34 = vld [vmem:[#allocation53_spill] sm:$0xff] }
 0xfb6   :  { %5056 = vmatprep.subr.bf16.mxu0 %v12709_v52  ;;  %5097 = vmatprep.subr.bf16.mxu1 %v12710_v2  ;;  %v12720_v52 = vld [vmem:[#allocation54_spill] sm:$0xff]  ;;  %v12721_v2 = vld [vmem:[#allocation55_spill] sm:$0xff] }
 0xfb9   :  { %5057 = vmatpush1.bf16.msra.mxu0 %v12711_v43  ;;  %5098 = vmatpush1.bf16.msra.mxu1 %v12712_v58  ;;  %v12722_v43 = vld [vmem:[#allocation56_spill] sm:$0xff]  ;;  %v12723_v58 = vld [vmem:[#allocation57_spill] sm:$0xff] }
 0xfba   :  { %5058 = vmatprep.subr.bf16.mxu0 %v12713_v30  ;;  %5099 = vmatprep.subr.bf16.mxu1 %v12714_v21  ;;  %v12724_v30 = vld [vmem:[#allocation58_spill] sm:$0xff]  ;;  %v12725_v21 = vld [vmem:[#allocation59_spill] sm:$0xff] }
 0xfbd   :  { %5059 = vmatpush1.bf16.msra.mxu0 %v12715_v45  ;;  %5100 = vmatpush1.bf16.msra.mxu1 %v12716_v4  ;;  %v12726_v45 = vld [vmem:[#allocation60_spill] sm:$0xff]  ;;  %v12727_v4 = vld [vmem:[#allocation61_spill] sm:$0xff] }
 0xfbe   :  { %5060 = vmatprep.subr.bf16.mxu0 %v12717_v42  ;;  %5101 = vmatprep.subr.bf16.mxu1 %v12718_v19  ;;  %v12728_v42 = vld [vmem:[#allocation62_spill] sm:$0xff]  ;;  %v12729_v19 = vld [vmem:[#allocation63_spill] sm:$0xff] }
 0xfc1   :  { %5061 = vmatpush1.bf16.msra.mxu0 %v12719_v34  ;;  %5102 = vmatpush1.bf16.msra.mxu1 %v12720_v52  ;;  %v12730_v34 = vld [vmem:[#allocation64_spill] sm:$0xff]  ;;  %v12731_v52 = vld [vmem:[#allocation65_spill] sm:$0xff] }
 0xfc2   :  { %5062 = vmatprep.subr.bf16.mxu0 %v12721_v2  ;;  %5103 = vmatprep.subr.bf16.mxu1 %v12722_v43  ;;  %v12732_v2 = vld [vmem:[#allocation66_spill] sm:$0xff]  ;;  %v12733_v43 = vld [vmem:[#allocation67_spill] sm:$0xff] }
 0xfc5   :  { %5063 = vmatpush1.bf16.msra.mxu0 %v12723_v58  ;;  %5104 = vmatpush1.bf16.msra.mxu1 %v12724_v30  ;;  %v12734_v58 = vld [vmem:[#allocation68_spill] sm:$0xff] }
 0xfc6   :  { %5064 = vmatprep.subr.bf16.mxu0 %v12725_v21  ;;  %5105 = vmatprep.subr.bf16.mxu1 %v12726_v45 }
 0xfc9   :  { %5065 = vmatpush1.bf16.msra.mxu0 %v12727_v4  ;;  %5106 = vmatpush1.bf16.msra.mxu1 %v12728_v42 }
 0xfca   :  { %5066 = vmatprep.subr.bf16.mxu0 %v12729_v19  ;;  %5107 = vmatprep.subr.bf16.mxu1 %v12730_v34 }
 0xfcd   :  { %5067 = vmatpush1.bf16.msra.mxu0 %v12731_v52  ;;  %5108 = vmatpush1.bf16.msra.mxu1 %v12732_v2 }
 0xfce   :  { %5118 = vmatprep.subr.bf16.mxu0 %v12733_v43  ;;  %5159 = vmatprep.subr.bf16.mxu1 %v12734_v58 }
0x1023   :  { %v4827_v30 = vpop.f32.mrb[160].mxu0  ;;  %v4868_v21 = vpop.f32.mrb[160].mxu1 }
0x1024   :  { %v4957_v45 = vadd.f32 %v4827_v30, %v12735_v62  ;;  %v4959_v4 = vadd.f32 %v4868_v21, %v12736_v47  ;;  %v4829_v27 = vpop.f32.mrb[161].mxu0  ;;  %v4870_v42 = vpop.f32.mrb[161].mxu1 }
0x1025   :  { %v4958_v19 = vadd.f32 %v4829_v27, %v12737_v11  ;;  %v4960_v34 = vadd.f32 %v4870_v42, %v12738_v60  ;;  %v4831_v28 = vpop.f32.mrb[162].mxu0  ;;  %v4872_v52 = vpop.f32.mrb[162].mxu1 }
0x1026   :  { %v6256_v20 = vmul.f32 -1.442695, %v4959_v4  ;;  %v4832_v2 = vpop.f32.mrb[163].mxu0  ;;  %v4873_v40 = vpop.f32.mrb[163].mxu1  ;;  %v6254_v28 = vmul.f32 -1.442695, %v4957_v45 }
0x1027   :  { %v6257_v43 = vmul.f32 -1.442695, %v4960_v34  ;;  %v6255_v27 = vmul.f32 -1.442695, %v4958_v19  ;;  %v12742_v45 = vld [vmem:[#allocation238_spill] sm:$0xff] }
0x1028   :  { %6728 = vpow2.f32 %v6256_v20 }
0x1029   :  { %6730 = vpow2.f32 %v6257_v43 }
0x1032   :  { %v6729_v58 = vpop.eup %6728 }
0x1033   :  { %v4983_v15 = vadd.f32 1.0, %v6729_v58  ;;  %v6731_v16 = vpop.eup %6730  ;;  %v12740_v58 = vld [vmem:[#allocation236_spill] sm:$0xff] }
0x1034   :  { %v4984_v62 = vadd.f32 1.0, %v6731_v16 }
0x1035   :  { %6732 = vrcp.f32 %v4983_v15  ;;  %v12739_v15 = vld [vmem:[#allocation235_spill] sm:$0xff] }
0x1036   :  { %6734 = vrcp.f32 %v4984_v62  ;;  %v12741_v62 = vld [vmem:[#allocation237_spill] sm:$0xff] }
0x1037   :  { %6736 = vpow2.f32 %v6254_v28 }
0x1038   :  { %6738 = vpow2.f32 %v6255_v27 }
0x103f   :  { %v6733_v47 = vpop.eup %6732 }
0x1040   :  { %v5003_v30 = vmul.f32 %v6733_v47, %v10351_v17  ;;  %v6735_v11 = vpop.eup %6734 }
0x1041   :  { %v5004_v60 = vmul.f32 %v6735_v11, %v10355_v55  ;;  %v6737_v40 = vpop.eup %6736 }
0x1042   :  { %v6739_v34 = vpop.eup %6738  ;;  %v4971_v20 = vadd.f32 1.0, %v6737_v40 }
0x1043   :  { %v4972_v52 = vadd.f32 1.0, %v6739_v34 }
0x1044   :  { %6740 = vrcp.f32 %v4971_v20 }
0x1045   :  { %6742 = vrcp.f32 %v4972_v52 }
0x104e   :  { %v6741_v20 = vpop.eup %6740 }
0x1063   :  { %v4909_v2 = vpop.f32.mrb[164].mxu0  ;;  %v4950_v43 = vpop.f32.mrb[164].mxu1 }
0x1064   :  { %v4961_v16 = vadd.f32 %v4909_v2, %v12739_v15  ;;  %v4963_v4 = vadd.f32 %v4950_v43, %v12740_v58  ;;  %v4911_v42 = vpop.f32.mrb[165].mxu0  ;;  %v4952_v21 = vpop.f32.mrb[165].mxu1 }
0x1065   :  { %v4962_v47 = vadd.f32 %v4911_v42, %v12741_v62  ;;  %v4964_v19 = vadd.f32 %v4952_v21, %v12742_v45  ;;  %v4913_v11 = vpop.f32.mrb[166].mxu0  ;;  %v4954_v28 = vpop.f32.mrb[166].mxu1 }
0x1066   :  { %6744 = vtanh.f32 %v4961_v16  ;;  %v6258_v27 = vmul.f32 -1.442695, %v4963_v4  ;;  %v4914_v40 = vpop.f32.mrb[167].mxu0  ;;  %v4955_v34 = vpop.f32.mrb[167].mxu1 }
0x1067   :  { %6746 = vtanh.f32 %v4962_v47  ;;  %v6259_v29 = vmul.f32 -1.442695, %v4964_v19  ;;  %v6743_v2 = vpop.eup %6742  ;;  %v5017_v62 = vpop.permute.xlu0 %5016  ;;  %v12745_v34 = vld [vmem:[#allocation108_spill] sm:$0xff] }
0x1068   :  { %6748 = vpow2.f32 %v6258_v27  ;;  %vm5018_vm13 = vcmp.eq.s32.totalorder %v5017_v62, 1  ;;  %v12753_v62 = vld [vmem:[#allocation116_spill] sm:$0xff] }
0x1069   :  { %6750 = vpow2.f32 %v6259_v29 }
0x1070   :  { %v6745_v43 = vpop.eup %6744 }
0x1071   :  { %v6747_v15 = vpop.eup %6746  ;;  %v5005_v58 = vmul.f32 %v6745_v43, %v6741_v20  ;;  %v12746_v20 = vld [vmem:[#allocation109_spill] sm:$0xff]  ;;  %v12748_v43 = vld [vmem:[#allocation111_spill] sm:$0xff] }
0x1072   :  { %v6749_v52 = vpop.eup %6748  ;;  %v5006_v25 = vmul.f32 %v6747_v15, %v6743_v2  ;;  %v12747_v2 = vld [vmem:[#allocation110_spill] sm:$0xff]  ;;  %v12749_v15 = vld [vmem:[#allocation112_spill] sm:$0xff] }
0x1073   :  { %v6751_v42 = vpop.eup %6750  ;;  %v5007_v21 = vadd.f32 %v5005_v58, %v5003_v30  ;;  %v4997_v45 = vadd.f32 1.0, %v6749_v52  ;;  %v12750_v58 = vld [vmem:[#allocation113_spill] sm:$0xff]  ;;  %v12751_v52 = vld [vmem:[#allocation114_spill] sm:$0xff] }
0x1074   :  { %v5008_v16 = vadd.f32 %v5006_v25, %v5004_v60  ;;  %v4998_v4 = vadd.f32 1.0, %v6751_v42  ;;  %v12752_v42 = vld [vmem:[#allocation115_spill] sm:$0xff] }
0x1075   :  { %6752 = vtanh.f32 %v5007_v21  ;;  %v10515_v47 = vsel %vm5018_vm13, %v5007_v21, %v10351_v17  ;;  %v12754_v21 = vld [vmem:[#allocation117_spill] sm:$0xff] }
0x1076   :  { %6754 = vrcp.f32 %v4997_v45  ;;  %v10519_v29 = vsel %vm5018_vm13, %v5008_v16, %v10355_v55  ;;  %v12755_v45 = vld [vmem:[#allocation118_spill] sm:$0xff] }
0x1077   :  { %6756 = vtanh.f32 %v5008_v16  ;;  %v12756_v16 = vld [vmem:[#allocation119_spill] sm:$0xff] }
0x1078   :  { %6758 = vrcp.f32 %v4998_v4  ;;  %v12757_v4 = vld [vmem:[#allocation120_spill] sm:$0xff] }
0x107f   :  { %v6753_v19 = vpop.eup %6752 }
0x1080   :  { %v6755_v11 = vpop.eup %6754 }
0x1081   :  { %v6757_v28 = vpop.eup %6756  ;;  %v5011_v30 = vmul.f32 %v6755_v11, %v6753_v19  ;;  %v12758_v19 = vld [vmem:[#allocation121_spill] sm:$0xff]  ;;  %v12759_v11 = vld [vmem:[#allocation122_spill] sm:$0xff] }
0x1082   :  { %v6759_v27 = vpop.eup %6758 }
0x1083   :  { %v5012_v40 = vmul.f32 %v6759_v27, %v6757_v28  ;;  %v10523_v25 = vsel %vm5018_vm13, %v5011_v30, %v10359_v57  ;;  %v12743_v57 = vld [vmem:[#allocation106_spill] sm:$0xff]  ;;  %v12760_v28 = vld [vmem:[#allocation123_spill] sm:$0xff]  ;;  %v12761_v30 = vld [vmem:[#allocation124_spill] sm:$0xff] }
0x1084   :  { %v10533_v60 = vpack.c.bf16 %v10523_v25, %v10523_v25  ;;  %v12762_v27 = vld [vmem:[#allocation125_spill] sm:$0xff] }
0x1085   :  { %v10527_v17 = vsel %vm5018_vm13, %v5012_v40, %v10363_v18  ;;  %v12744_v18 = vld [vmem:[#allocation107_spill] sm:$0xff]  ;;  %v12763_v40 = vld [vmem:[#allocation126_spill] sm:$0xff] }
0x1086   :  { %v5035_v55 = vpack.c.bf16 %v10527_v17, %v10527_v17 }
0x1088   :  { %5068 = vmatprep.mubr.bf16.mxu0 %v5035_v55  ;;  %5109 = vmatprep.mubr.bf16.mxu1 %v5035_v55 }
0x1089   :  { %5069 = vmatmul.mubr.bf16.vlgmr.msra.gmra.mrb[168].mxu0 %v10533_v60  ;;  %5110 = vmatmul.mubr.bf16.vlgmr.msra.gmra.mrb[168].mxu1 %v10533_v60 }
0x108a   :  { %5119 = vmatpush1.bf16.msra.mxu0 %v11548_v53  ;;  %5160 = vmatpush1.bf16.msra.mxu1 %v11549_v10 }
0x108b   :  { %5150 = vmatprep.mubr.bf16.mxu0 %v5035_v55  ;;  %5191 = vmatprep.mubr.bf16.mxu1 %v5035_v55  ;;  %v12764_v55 = vld [vmem:[#allocation127_spill] sm:$0xff] }
0x108c   :  { %5120 = vmatprep.subr.bf16.mxu0 %v11550_v6  ;;  %5161 = vmatprep.subr.bf16.mxu1 %v11551_v44 }
0x108e   :  { %5121 = vmatpush1.bf16.msra.mxu0 %v11552_v3  ;;  %5162 = vmatpush1.bf16.msra.mxu1 %v11553_v5 }
0x108f   :  { %5122 = vmatprep.subr.bf16.mxu0 %v11554_v48  ;;  %5163 = vmatprep.subr.bf16.mxu1 %v11555_v8 }
0x1092   :  { %5123 = vmatpush1.bf16.msra.mxu0 %v11556_v46  ;;  %5164 = vmatpush1.bf16.msra.mxu1 %v11557_v35 }
0x1093   :  { %5124 = vmatprep.subr.bf16.mxu0 %v11558_v49  ;;  %5165 = vmatprep.subr.bf16.mxu1 %v11559_v36 }
0x1096   :  { %5125 = vmatpush1.bf16.msra.mxu0 %v11560_v50  ;;  %5166 = vmatpush1.bf16.msra.mxu1 %v11561_v54 }
0x1097   :  { %5126 = vmatprep.subr.bf16.mxu0 %v11653_v56  ;;  %5167 = vmatprep.subr.bf16.mxu1 %v11654_v51 }
0x109a   :  { %5127 = vmatpush1.bf16.msra.mxu0 %v11655_v13  ;;  %5168 = vmatpush1.bf16.msra.mxu1 %v11656_v33 }
0x109b   :  { %5128 = vmatprep.subr.bf16.mxu0 %v11657_v23  ;;  %5169 = vmatprep.subr.bf16.mxu1 %v11658_v59 }
0x109e   :  { %5129 = vmatpush1.bf16.msra.mxu0 %v11659_v39  ;;  %5170 = vmatpush1.bf16.msra.mxu1 %v11660_v63 }
0x109f   :  { %5130 = vmatprep.subr.bf16.mxu0 %v11661_v7  ;;  %5171 = vmatprep.subr.bf16.mxu1 %v11662_v0 }
0x10a2   :  { %5131 = vmatpush1.bf16.msra.mxu0 %v11663_v14  ;;  %5172 = vmatpush1.bf16.msra.mxu1 %v11664_v32 }
0x10a3   :  { %5132 = vmatprep.subr.bf16.mxu0 %v11665_v12  ;;  %5173 = vmatprep.subr.bf16.mxu1 %v11753_v24 }
0x10a6   :  { %5133 = vmatpush1.bf16.msra.mxu0 %v11754_v9  ;;  %5174 = vmatpush1.bf16.msra.mxu1 %v11755_v41 }
0x10a7   :  { %5134 = vmatprep.subr.bf16.mxu0 %v11669_v26  ;;  %5175 = vmatprep.subr.bf16.mxu1 %v11670_v1 }
0x10aa   :  { %5135 = vmatpush1.bf16.msra.mxu0 %v11671_v22  ;;  %5176 = vmatpush1.bf16.msra.mxu1 %v11672_v38 }
0x10ab   :  { %5136 = vmatprep.subr.bf16.mxu0 %v11673_v37  ;;  %5177 = vmatprep.subr.bf16.mxu1 %v11674_v31 }
0x10ae   :  { %5137 = vmatpush1.bf16.msra.mxu0 %v11675_v61  ;;  %5178 = vmatpush1.bf16.msra.mxu1 %v12743_v57 }
0x10af   :  { %5138 = vmatprep.subr.bf16.mxu0 %v12744_v18  ;;  %5179 = vmatprep.subr.bf16.mxu1 %v12745_v34 }
0x10b2   :  { %5139 = vmatpush1.bf16.msra.mxu0 %v12746_v20  ;;  %5180 = vmatpush1.bf16.msra.mxu1 %v12747_v2 }
0x10b3   :  { %5140 = vmatprep.subr.bf16.mxu0 %v12748_v43  ;;  %5181 = vmatprep.subr.bf16.mxu1 %v12749_v15 }
0x10b6   :  { %5141 = vmatpush1.bf16.msra.mxu0 %v12750_v58  ;;  %5182 = vmatpush1.bf16.msra.mxu1 %v12751_v52  ;;  %v12836_v52 = vld [vmem:[#allocation181_spill] sm:$0xff]  ;;  %v12837_v58 = vld [vmem:[#allocation182_spill] sm:$0xff] }
0x10b7   :  { %5142 = vmatprep.subr.bf16.mxu0 %v12752_v42  ;;  %5183 = vmatprep.subr.bf16.mxu1 %v12753_v62  ;;  %v12835_v62 = vld [vmem:[#allocation180_spill] sm:$0xff] }
0x10ba   :  { %5143 = vmatpush1.bf16.msra.mxu0 %v12754_v21  ;;  %5184 = vmatpush1.bf16.msra.mxu1 %v12755_v45  ;;  %v12765_v21 = vld [vmem:[#allocation128_spill] sm:$0xff]  ;;  %v12766_v45 = vld [vmem:[#allocation129_spill] sm:$0xff] }
0x10bb   :  { %5144 = vmatprep.subr.bf16.mxu0 %v12756_v16  ;;  %5185 = vmatprep.subr.bf16.mxu1 %v12757_v4  ;;  %v12767_v16 = vld [vmem:[#allocation130_spill] sm:$0xff]  ;;  %v12768_v4 = vld [vmem:[#allocation3_spill] sm:$0xff] }
0x10be   :  { %5145 = vmatpush1.bf16.msra.mxu0 %v12758_v19  ;;  %5186 = vmatpush1.bf16.msra.mxu1 %v12759_v11  ;;  %v12769_v19 = vld [vmem:[#allocation4_spill] sm:$0xff]  ;;  %v12834_v11 = vld [vmem:[#allocation179_spill] sm:$0xff] }
0x10bf   :  { %5146 = vmatprep.subr.bf16.mxu0 %v12760_v28  ;;  %5187 = vmatprep.subr.bf16.mxu1 %v12761_v30  ;;  %v12770_v30 = vld [vmem:[#allocation5_spill] sm:$0xff]  ;;  %v12779_v28 = vld [vmem:[#allocation14_spill] sm:$0xff] }
0x10c2   :  { %5147 = vmatpush1.bf16.msra.mxu0 %v12762_v27  ;;  %5188 = vmatpush1.bf16.msra.mxu1 %v12763_v40  ;;  %v12771_v27 = vld [vmem:[#allocation6_spill] sm:$0xff]  ;;  %v12772_v40 = vld [vmem:[#allocation7_spill] sm:$0xff] }
0x10c3   :  { %5148 = vmatprep.subr.bf16.mxu0 %v12764_v55  ;;  %5189 = vmatprep.subr.bf16.mxu1 %v12765_v21  ;;  %v12773_v55 = vld [vmem:[#allocation8_spill] sm:$0xff]  ;;  %v12774_v21 = vld [vmem:[#allocation9_spill] sm:$0xff] }
0x10c6   :  { %5149 = vmatpush1.bf16.msra.mxu0 %v12766_v45  ;;  %5190 = vmatpush1.bf16.msra.mxu1 %v12767_v16  ;;  %v12775_v45 = vld [vmem:[#allocation10_spill] sm:$0xff]  ;;  %v12776_v16 = vld [vmem:[#allocation11_spill] sm:$0xff] }
0x10c7   :  { %5279 = vmatprep.subr.bf16.mxu0 %v12768_v4  ;;  %5320 = vmatprep.subr.bf16.mxu1 %v12769_v19  ;;  %v12777_v4 = vld [vmem:[#allocation12_spill] sm:$0xff]  ;;  %v12778_v19 = vld [vmem:[#allocation13_spill] sm:$0xff] }
0x10c9   :  { %5151 = vmatmul.mubr.bf16.vlgmr.msra.gmra.mrb[172].mxu0 %v10533_v60  ;;  %5192 = vmatmul.mubr.bf16.vlgmr.msra.gmra.mrb[172].mxu1 %v10533_v60  ;;  %v12780_v60 = vld [vmem:[#allocation15_spill] sm:$0xff] }
0x10ca   :  { %5280 = vmatpush1.bf16.msra.mxu0 %v12770_v30  ;;  %5321 = vmatpush1.bf16.msra.mxu1 %v12771_v27  ;;  %v12781_v30 = vld [vmem:[#allocation16_spill] sm:$0xff]  ;;  %v12782_v27 = vld [vmem:[#allocation17_spill] sm:$0xff] }
0x10cb   :  { %5281 = vmatprep.subr.bf16.mxu0 %v12772_v40  ;;  %5322 = vmatprep.subr.bf16.mxu1 %v12773_v55  ;;  %v12783_v40 = vld [vmem:[#allocation18_spill] sm:$0xff]  ;;  %v12784_v55 = vld [vmem:[#allocation19_spill] sm:$0xff] }
0x10ce   :  { %5282 = vmatpush1.bf16.msra.mxu0 %v12774_v21  ;;  %5323 = vmatpush1.bf16.msra.mxu1 %v12775_v45  ;;  %v12785_v21 = vld [vmem:[#allocation20_spill] sm:$0xff]  ;;  %v12786_v45 = vld [vmem:[#allocation21_spill] sm:$0xff] }
0x10cf   :  { %5283 = vmatprep.subr.bf16.mxu0 %v12776_v16  ;;  %5324 = vmatprep.subr.bf16.mxu1 %v12777_v4  ;;  %v12787_v16 = vld [vmem:[#allocation22_spill] sm:$0xff]  ;;  %v12788_v4 = vld [vmem:[#allocation23_spill] sm:$0xff] }
0x10d2   :  { %5284 = vmatpush1.bf16.msra.mxu0 %v12778_v19  ;;  %5325 = vmatpush1.bf16.msra.mxu1 %v12779_v28  ;;  %v12789_v19 = vld [vmem:[#allocation24_spill] sm:$0xff]  ;;  %v12790_v28 = vld [vmem:[#allocation25_spill] sm:$0xff] }
0x10d3   :  { %5285 = vmatprep.subr.bf16.mxu0 %v12780_v60  ;;  %5326 = vmatprep.subr.bf16.mxu1 %v12781_v30  ;;  %v12791_v60 = vld [vmem:[#allocation26_spill] sm:$0xff]  ;;  %v12792_v30 = vld [vmem:[#allocation27_spill] sm:$0xff] }
0x10d6   :  { %5286 = vmatpush1.bf16.msra.mxu0 %v12782_v27  ;;  %5327 = vmatpush1.bf16.msra.mxu1 %v12783_v40  ;;  %v12793_v27 = vld [vmem:[#allocation28_spill] sm:$0xff]  ;;  %v12794_v40 = vld [vmem:[#allocation29_spill] sm:$0xff] }
0x10d7   :  { %5287 = vmatprep.subr.bf16.mxu0 %v12784_v55  ;;  %5328 = vmatprep.subr.bf16.mxu1 %v12785_v21  ;;  %v12795_v55 = vld [vmem:[#allocation30_spill] sm:$0xff]  ;;  %v12796_v21 = vld [vmem:[#allocation31_spill] sm:$0xff] }
0x10da   :  { %5288 = vmatpush1.bf16.msra.mxu0 %v12786_v45  ;;  %5329 = vmatpush1.bf16.msra.mxu1 %v12787_v16  ;;  %v12797_v45 = vld [vmem:[#allocation32_spill] sm:$0xff]  ;;  %v12798_v16 = vld [vmem:[#allocation33_spill] sm:$0xff] }
0x10db   :  { %5289 = vmatprep.subr.bf16.mxu0 %v12788_v4  ;;  %5330 = vmatprep.subr.bf16.mxu1 %v12789_v19  ;;  %v12799_v4 = vld [vmem:[#allocation34_spill] sm:$0xff]  ;;  %v12800_v19 = vld [vmem:[#allocation35_spill] sm:$0xff] }
0x10de   :  { %5290 = vmatpush1.bf16.msra.mxu0 %v12790_v28  ;;  %5331 = vmatpush1.bf16.msra.mxu1 %v12791_v60  ;;  %v12801_v28 = vld [vmem:[#allocation36_spill] sm:$0xff]  ;;  %v12802_v60 = vld [vmem:[#allocation37_spill] sm:$0xff] }
0x10df   :  { %5291 = vmatprep.subr.bf16.mxu0 %v12792_v30  ;;  %5332 = vmatprep.subr.bf16.mxu1 %v12793_v27  ;;  %v12803_v30 = vld [vmem:[#allocation38_spill] sm:$0xff]  ;;  %v12804_v27 = vld [vmem:[#allocation39_spill] sm:$0xff] }
0x10e2   :  { %5292 = vmatpush1.bf16.msra.mxu0 %v12794_v40  ;;  %5333 = vmatpush1.bf16.msra.mxu1 %v12795_v55  ;;  %v12805_v40 = vld [vmem:[#allocation40_spill] sm:$0xff]  ;;  %v12806_v55 = vld [vmem:[#allocation41_spill] sm:$0xff] }
0x10e3   :  { %5293 = vmatprep.subr.bf16.mxu0 %v12796_v21  ;;  %5334 = vmatprep.subr.bf16.mxu1 %v12797_v45  ;;  %v12807_v21 = vld [vmem:[#allocation42_spill] sm:$0xff]  ;;  %v12808_v45 = vld [vmem:[#allocation43_spill] sm:$0xff] }
0x10e6   :  { %5294 = vmatpush1.bf16.msra.mxu0 %v12798_v16  ;;  %5335 = vmatpush1.bf16.msra.mxu1 %v12799_v4  ;;  %v12809_v16 = vld [vmem:[#allocation44_spill] sm:$0xff]  ;;  %v12810_v4 = vld [vmem:[#allocation45_spill] sm:$0xff] }
0x10e7   :  { %5295 = vmatprep.subr.bf16.mxu0 %v12800_v19  ;;  %5336 = vmatprep.subr.bf16.mxu1 %v12801_v28  ;;  %v12811_v19 = vld [vmem:[#allocation46_spill] sm:$0xff]  ;;  %v12812_v28 = vld [vmem:[#allocation47_spill] sm:$0xff] }
0x10ea   :  { %5296 = vmatpush1.bf16.msra.mxu0 %v12802_v60  ;;  %5337 = vmatpush1.bf16.msra.mxu1 %v12803_v30  ;;  %v12813_v60 = vld [vmem:[#allocation48_spill] sm:$0xff]  ;;  %v12814_v30 = vld [vmem:[#allocation49_spill] sm:$0xff] }
0x10eb   :  { %5297 = vmatprep.subr.bf16.mxu0 %v12804_v27  ;;  %5338 = vmatprep.subr.bf16.mxu1 %v12805_v40  ;;  %v12815_v27 = vld [vmem:[#allocation50_spill] sm:$0xff]  ;;  %v12816_v40 = vld [vmem:[#allocation51_spill] sm:$0xff] }
0x10ee   :  { %5298 = vmatpush1.bf16.msra.mxu0 %v12806_v55  ;;  %5339 = vmatpush1.bf16.msra.mxu1 %v12807_v21  ;;  %v12817_v55 = vld [vmem:[#allocation52_spill] sm:$0xff]  ;;  %v12818_v21 = vld [vmem:[#allocation53_spill] sm:$0xff] }
0x10ef   :  { %5299 = vmatprep.subr.bf16.mxu0 %v12808_v45  ;;  %5340 = vmatprep.subr.bf16.mxu1 %v12809_v16  ;;  %v12819_v45 = vld [vmem:[#allocation54_spill] sm:$0xff]  ;;  %v12820_v16 = vld [vmem:[#allocation55_spill] sm:$0xff] }
0x10f2   :  { %5300 = vmatpush1.bf16.msra.mxu0 %v12810_v4  ;;  %5341 = vmatpush1.bf16.msra.mxu1 %v12811_v19  ;;  %v12821_v4 = vld [vmem:[#allocation56_spill] sm:$0xff]  ;;  %v12822_v19 = vld [vmem:[#allocation57_spill] sm:$0xff] }
0x10f3   :  { %5301 = vmatprep.subr.bf16.mxu0 %v12812_v28  ;;  %5342 = vmatprep.subr.bf16.mxu1 %v12813_v60  ;;  %v12823_v28 = vld [vmem:[#allocation58_spill] sm:$0xff]  ;;  %v12824_v60 = vld [vmem:[#allocation59_spill] sm:$0xff] }
0x10f6   :  { %5302 = vmatpush1.bf16.msra.mxu0 %v12814_v30  ;;  %5343 = vmatpush1.bf16.msra.mxu1 %v12815_v27  ;;  %v12825_v30 = vld [vmem:[#allocation60_spill] sm:$0xff]  ;;  %v12826_v27 = vld [vmem:[#allocation61_spill] sm:$0xff] }
0x10f7   :  { %5303 = vmatprep.subr.bf16.mxu0 %v12816_v40  ;;  %5344 = vmatprep.subr.bf16.mxu1 %v12817_v55  ;;  %v12827_v40 = vld [vmem:[#allocation62_spill] sm:$0xff]  ;;  %v12828_v55 = vld [vmem:[#allocation63_spill] sm:$0xff] }
0x10fa   :  { %5304 = vmatpush1.bf16.msra.mxu0 %v12818_v21  ;;  %5345 = vmatpush1.bf16.msra.mxu1 %v12819_v45  ;;  %v12829_v21 = vld [vmem:[#allocation64_spill] sm:$0xff]  ;;  %v12830_v45 = vld [vmem:[#allocation65_spill] sm:$0xff] }
0x10fb   :  { %5305 = vmatprep.subr.bf16.mxu0 %v12820_v16  ;;  %5346 = vmatprep.subr.bf16.mxu1 %v12821_v4  ;;  %v12831_v16 = vld [vmem:[#allocation66_spill] sm:$0xff]  ;;  %v12832_v4 = vld [vmem:[#allocation67_spill] sm:$0xff] }
0x10fe   :  { %5306 = vmatpush1.bf16.msra.mxu0 %v12822_v19  ;;  %5347 = vmatpush1.bf16.msra.mxu1 %v12823_v28  ;;  %v12833_v19 = vld [vmem:[#allocation68_spill] sm:$0xff] }
0x10ff   :  { %5307 = vmatprep.subr.bf16.mxu0 %v12824_v60  ;;  %5348 = vmatprep.subr.bf16.mxu1 %v12825_v30 }
0x1102   :  { %5308 = vmatpush1.bf16.msra.mxu0 %v12826_v27  ;;  %5349 = vmatpush1.bf16.msra.mxu1 %v12827_v40 }
0x1103   :  { %5309 = vmatprep.subr.bf16.mxu0 %v12828_v55  ;;  %5350 = vmatprep.subr.bf16.mxu1 %v12829_v21 }
0x1106   :  { %5310 = vmatpush1.bf16.msra.mxu0 %v12830_v45  ;;  %5351 = vmatpush1.bf16.msra.mxu1 %v12831_v16 }
0x1107   :  { %5361 = vmatprep.subr.bf16.mxu0 %v12832_v4  ;;  %5402 = vmatprep.subr.bf16.mxu1 %v12833_v19 }
0x115c   :  { %v5070_v28 = vpop.f32.mrb[168].mxu0  ;;  %v5111_v60 = vpop.f32.mrb[168].mxu1 }
0x115d   :  { %v5200_v30 = vadd.f32 %v5070_v28, %v12834_v11  ;;  %v5202_v27 = vadd.f32 %v5111_v60, %v12835_v62  ;;  %v5072_v42 = vpop.f32.mrb[169].mxu0  ;;  %v5113_v40 = vpop.f32.mrb[169].mxu1 }
0x115e   :  { %v5201_v55 = vadd.f32 %v5072_v42, %v12836_v52  ;;  %v5203_v21 = vadd.f32 %v5113_v40, %v12837_v58  ;;  %v5074_v15 = vpop.f32.mrb[170].mxu0  ;;  %v5115_v45 = vpop.f32.mrb[170].mxu1 }
0x115f   :  { %v6262_v43 = vmul.f32 -1.442695, %v5202_v27  ;;  %v5075_v16 = vpop.f32.mrb[171].mxu0  ;;  %v5116_v2 = vpop.f32.mrb[171].mxu1  ;;  %v6260_v15 = vmul.f32 -1.442695, %v5200_v30 }
0x1160   :  { %v6263_v4 = vmul.f32 -1.442695, %v5203_v21  ;;  %v6261_v42 = vmul.f32 -1.442695, %v5201_v55  ;;  %v12841_v30 = vld [vmem:[#allocation242_spill] sm:$0xff] }
0x1161   :  { %6760 = vpow2.f32 %v6262_v43 }
0x1162   :  { %6762 = vpow2.f32 %v6263_v4 }
0x116b   :  { %v6761_v19 = vpop.eup %6760 }
0x116c   :  { %v5226_v20 = vadd.f32 1.0, %v6761_v19  ;;  %v6763_v34 = vpop.eup %6762  ;;  %v12839_v19 = vld [vmem:[#allocation240_spill] sm:$0xff] }
0x116d   :  { %v5227_v11 = vadd.f32 1.0, %v6763_v34 }
0x116e   :  { %6764 = vrcp.f32 %v5226_v20  ;;  %v12838_v20 = vld [vmem:[#allocation239_spill] sm:$0xff] }
0x116f   :  { %6766 = vrcp.f32 %v5227_v11  ;;  %v12840_v11 = vld [vmem:[#allocation241_spill] sm:$0xff] }
0x1170   :  { %6768 = vpow2.f32 %v6260_v15 }
0x1171   :  { %6770 = vpow2.f32 %v6261_v42 }
0x1178   :  { %v6765_v62 = vpop.eup %6764 }
0x1179   :  { %v5246_v28 = vmul.f32 %v6765_v62, %v10515_v47  ;;  %v6767_v52 = vpop.eup %6766 }
0x117a   :  { %v5247_v58 = vmul.f32 %v6767_v52, %v10519_v29  ;;  %v6769_v2 = vpop.eup %6768 }
0x117b   :  { %v6771_v21 = vpop.eup %6770  ;;  %v5214_v43 = vadd.f32 1.0, %v6769_v2 }
0x117c   :  { %v5215_v45 = vadd.f32 1.0, %v6771_v21 }
0x117d   :  { %6772 = vrcp.f32 %v5214_v43 }
0x117e   :  { %6774 = vrcp.f32 %v5215_v45 }
0x1187   :  { %v6773_v43 = vpop.eup %6772 }
0x119c   :  { %v5152_v16 = vpop.f32.mrb[172].mxu0  ;;  %v5193_v4 = vpop.f32.mrb[172].mxu1 }
0x119d   :  { %v5204_v34 = vadd.f32 %v5152_v16, %v12838_v20  ;;  %v5206_v27 = vadd.f32 %v5193_v4, %v12839_v19  ;;  %v5154_v40 = vpop.f32.mrb[173].mxu0  ;;  %v5195_v60 = vpop.f32.mrb[173].mxu1 }
0x119e   :  { %v5205_v62 = vadd.f32 %v5154_v40, %v12840_v11  ;;  %v5207_v55 = vadd.f32 %v5195_v60, %v12841_v30  ;;  %v5156_v52 = vpop.f32.mrb[174].mxu0  ;;  %v5197_v15 = vpop.f32.mrb[174].mxu1 }
0x119f   :  { %6776 = vtanh.f32 %v5204_v34  ;;  %v6264_v42 = vmul.f32 -1.442695, %v5206_v27  ;;  %v5157_v2 = vpop.f32.mrb[175].mxu0  ;;  %v5198_v21 = vpop.f32.mrb[175].mxu1 }
0x11a0   :  { %6778 = vtanh.f32 %v5205_v62  ;;  %v6265_v18 = vmul.f32 -1.442695, %v5207_v55  ;;  %v6775_v16 = vpop.eup %6774  ;;  %v5260_v11 = vpop.permute.xlu1 %5259  ;;  %v12844_v21 = vld [vmem:[#allocation108_spill] sm:$0xff] }
0x11a1   :  { %6780 = vpow2.f32 %v6264_v42  ;;  %vm5261_vm14 = vcmp.eq.s32.totalorder %v5260_v11, 1  ;;  %v12852_v11 = vld [vmem:[#allocation116_spill] sm:$0xff] }
0x11a2   :  { %6782 = vpow2.f32 %v6265_v18 }
0x11a9   :  { %v6777_v4 = vpop.eup %6776 }
0x11aa   :  { %v6779_v20 = vpop.eup %6778  ;;  %v5248_v19 = vmul.f32 %v6777_v4, %v6773_v43  ;;  %v12845_v43 = vld [vmem:[#allocation109_spill] sm:$0xff]  ;;  %v12847_v4 = vld [vmem:[#allocation111_spill] sm:$0xff] }
0x11ab   :  { %v6781_v45 = vpop.eup %6780  ;;  %v5249_v57 = vmul.f32 %v6779_v20, %v6775_v16  ;;  %v12846_v16 = vld [vmem:[#allocation110_spill] sm:$0xff]  ;;  %v12848_v20 = vld [vmem:[#allocation112_spill] sm:$0xff] }
0x11ac   :  { %v6783_v40 = vpop.eup %6782  ;;  %v5250_v60 = vadd.f32 %v5248_v19, %v5246_v28  ;;  %v5240_v30 = vadd.f32 1.0, %v6781_v45  ;;  %v12849_v19 = vld [vmem:[#allocation113_spill] sm:$0xff]  ;;  %v12850_v45 = vld [vmem:[#allocation114_spill] sm:$0xff] }
0x11ad   :  { %v5251_v34 = vadd.f32 %v5249_v57, %v5247_v58  ;;  %v5241_v27 = vadd.f32 1.0, %v6783_v40  ;;  %v12851_v40 = vld [vmem:[#allocation115_spill] sm:$0xff] }
0x11ae   :  { %6784 = vtanh.f32 %v5250_v60  ;;  %v10679_v62 = vsel %vm5261_vm14, %v5250_v60, %v10515_v47  ;;  %v12853_v60 = vld [vmem:[#allocation117_spill] sm:$0xff] }
0x11af   :  { %6786 = vrcp.f32 %v5240_v30  ;;  %v10683_v18 = vsel %vm5261_vm14, %v5251_v34, %v10519_v29  ;;  %v12854_v30 = vld [vmem:[#allocation118_spill] sm:$0xff] }
0x11b0   :  { %6788 = vtanh.f32 %v5251_v34  ;;  %v12855_v34 = vld [vmem:[#allocation119_spill] sm:$0xff] }
0x11b1   :  { %6790 = vrcp.f32 %v5241_v27  ;;  %v12856_v27 = vld [vmem:[#allocation120_spill] sm:$0xff] }
0x11b8   :  { %v6785_v55 = vpop.eup %6784 }
0x11b9   :  { %v6787_v52 = vpop.eup %6786 }
0x11ba   :  { %v6789_v15 = vpop.eup %6788  ;;  %v5254_v28 = vmul.f32 %v6787_v52, %v6785_v55  ;;  %v12857_v55 = vld [vmem:[#allocation121_spill] sm:$0xff]  ;;  %v12858_v52 = vld [vmem:[#allocation122_spill] sm:$0xff] }
0x11bb   :  { %v6791_v42 = vpop.eup %6790 }
0x11bc   :  { %v5255_v2 = vmul.f32 %v6791_v42, %v6789_v15  ;;  %v10687_v57 = vsel %vm5261_vm14, %v5254_v28, %v10523_v25  ;;  %v12842_v25 = vld [vmem:[#allocation106_spill] sm:$0xff]  ;;  %v12859_v15 = vld [vmem:[#allocation123_spill] sm:$0xff]  ;;  %v12860_v28 = vld [vmem:[#allocation124_spill] sm:$0xff] }
0x11bd   :  { %v10697_v58 = vpack.c.bf16 %v10687_v57, %v10687_v57  ;;  %v12861_v42 = vld [vmem:[#allocation125_spill] sm:$0xff] }
0x11be   :  { %v10691_v47 = vsel %vm5261_vm14, %v5255_v2, %v10527_v17  ;;  %v12843_v17 = vld [vmem:[#allocation107_spill] sm:$0xff]  ;;  %v12862_v2 = vld [vmem:[#allocation126_spill] sm:$0xff] }
0x11bf   :  { %v5278_v29 = vpack.c.bf16 %v10691_v47, %v10691_v47 }
0x11c1   :  { %5311 = vmatprep.mubr.bf16.mxu0 %v5278_v29  ;;  %5352 = vmatprep.mubr.bf16.mxu1 %v5278_v29 }
0x11c2   :  { %5312 = vmatmul.mubr.bf16.vlgmr.msra.gmra.mrb[176].mxu0 %v10697_v58  ;;  %5353 = vmatmul.mubr.bf16.vlgmr.msra.gmra.mrb[176].mxu1 %v10697_v58 }
0x11c3   :  { %5362 = vmatpush1.bf16.msra.mxu0 %v11548_v53  ;;  %5403 = vmatpush1.bf16.msra.mxu1 %v11549_v10 }
0x11c4   :  { %5393 = vmatprep.mubr.bf16.mxu0 %v5278_v29  ;;  %5434 = vmatprep.mubr.bf16.mxu1 %v5278_v29  ;;  %v12863_v29 = vld [vmem:[#allocation127_spill] sm:$0xff] }
0x11c5   :  { %5363 = vmatprep.subr.bf16.mxu0 %v11550_v6  ;;  %5404 = vmatprep.subr.bf16.mxu1 %v11551_v44 }
0x11c7   :  { %5364 = vmatpush1.bf16.msra.mxu0 %v11552_v3  ;;  %5405 = vmatpush1.bf16.msra.mxu1 %v11553_v5 }
0x11c8   :  { %5365 = vmatprep.subr.bf16.mxu0 %v11554_v48  ;;  %5406 = vmatprep.subr.bf16.mxu1 %v11555_v8 }
0x11cb   :  { %5366 = vmatpush1.bf16.msra.mxu0 %v11556_v46  ;;  %5407 = vmatpush1.bf16.msra.mxu1 %v11557_v35 }
0x11cc   :  { %5367 = vmatprep.subr.bf16.mxu0 %v11558_v49  ;;  %5408 = vmatprep.subr.bf16.mxu1 %v11559_v36 }
0x11cf   :  { %5368 = vmatpush1.bf16.msra.mxu0 %v11560_v50  ;;  %5409 = vmatpush1.bf16.msra.mxu1 %v11561_v54 }
0x11d0   :  { %5369 = vmatprep.subr.bf16.mxu0 %v11653_v56  ;;  %5410 = vmatprep.subr.bf16.mxu1 %v11654_v51 }
0x11d3   :  { %5370 = vmatpush1.bf16.msra.mxu0 %v11655_v13  ;;  %5411 = vmatpush1.bf16.msra.mxu1 %v11656_v33 }
0x11d4   :  { %5371 = vmatprep.subr.bf16.mxu0 %v11657_v23  ;;  %5412 = vmatprep.subr.bf16.mxu1 %v11658_v59 }
0x11d7   :  { %5372 = vmatpush1.bf16.msra.mxu0 %v11659_v39  ;;  %5413 = vmatpush1.bf16.msra.mxu1 %v11660_v63 }
0x11d8   :  { %5373 = vmatprep.subr.bf16.mxu0 %v11661_v7  ;;  %5414 = vmatprep.subr.bf16.mxu1 %v11662_v0 }
0x11db   :  { %5374 = vmatpush1.bf16.msra.mxu0 %v11663_v14  ;;  %5415 = vmatpush1.bf16.msra.mxu1 %v11664_v32 }
0x11dc   :  { %5375 = vmatprep.subr.bf16.mxu0 %v11665_v12  ;;  %5416 = vmatprep.subr.bf16.mxu1 %v11753_v24 }
0x11df   :  { %5376 = vmatpush1.bf16.msra.mxu0 %v11754_v9  ;;  %5417 = vmatpush1.bf16.msra.mxu1 %v11755_v41 }
0x11e0   :  { %5377 = vmatprep.subr.bf16.mxu0 %v11669_v26  ;;  %5418 = vmatprep.subr.bf16.mxu1 %v11670_v1 }
0x11e3   :  { %5378 = vmatpush1.bf16.msra.mxu0 %v11671_v22  ;;  %5419 = vmatpush1.bf16.msra.mxu1 %v11672_v38 }
0x11e4   :  { %5379 = vmatprep.subr.bf16.mxu0 %v11673_v37  ;;  %5420 = vmatprep.subr.bf16.mxu1 %v11674_v31 }
0x11e7   :  { %5380 = vmatpush1.bf16.msra.mxu0 %v11675_v61  ;;  %5421 = vmatpush1.bf16.msra.mxu1 %v12842_v25 }
0x11e8   :  { %5381 = vmatprep.subr.bf16.mxu0 %v12843_v17  ;;  %5422 = vmatprep.subr.bf16.mxu1 %v12844_v21 }
0x11eb   :  { %5382 = vmatpush1.bf16.msra.mxu0 %v12845_v43  ;;  %5423 = vmatpush1.bf16.msra.mxu1 %v12846_v16 }
0x11ec   :  { %5383 = vmatprep.subr.bf16.mxu0 %v12847_v4  ;;  %5424 = vmatprep.subr.bf16.mxu1 %v12848_v20 }
0x11ef   :  { %5384 = vmatpush1.bf16.msra.mxu0 %v12849_v19  ;;  %5425 = vmatpush1.bf16.msra.mxu1 %v12850_v45  ;;  %v12935_v45 = vld [vmem:[#allocation185_spill] sm:$0xff]  ;;  %v12936_v19 = vld [vmem:[#allocation186_spill] sm:$0xff] }
0x11f0   :  { %5385 = vmatprep.subr.bf16.mxu0 %v12851_v40  ;;  %5426 = vmatprep.subr.bf16.mxu1 %v12852_v11  ;;  %v12934_v11 = vld [vmem:[#allocation184_spill] sm:$0xff] }
0x11f3   :  { %5386 = vmatpush1.bf16.msra.mxu0 %v12853_v60  ;;  %5427 = vmatpush1.bf16.msra.mxu1 %v12854_v30  ;;  %v12864_v60 = vld [vmem:[#allocation128_spill] sm:$0xff]  ;;  %v12865_v30 = vld [vmem:[#allocation129_spill] sm:$0xff] }
0x11f4   :  { %5387 = vmatprep.subr.bf16.mxu0 %v12855_v34  ;;  %5428 = vmatprep.subr.bf16.mxu1 %v12856_v27  ;;  %v12866_v34 = vld [vmem:[#allocation130_spill] sm:$0xff]  ;;  %v12867_v27 = vld [vmem:[#allocation3_spill] sm:$0xff] }
0x11f7   :  { %5388 = vmatpush1.bf16.msra.mxu0 %v12857_v55  ;;  %5429 = vmatpush1.bf16.msra.mxu1 %v12858_v52  ;;  %v12868_v55 = vld [vmem:[#allocation4_spill] sm:$0xff]  ;;  %v12933_v52 = vld [vmem:[#allocation183_spill] sm:$0xff] }
0x11f8   :  { %5389 = vmatprep.subr.bf16.mxu0 %v12859_v15  ;;  %5430 = vmatprep.subr.bf16.mxu1 %v12860_v28  ;;  %v12869_v28 = vld [vmem:[#allocation5_spill] sm:$0xff]  ;;  %v12878_v15 = vld [vmem:[#allocation14_spill] sm:$0xff] }
0x11fb   :  { %5390 = vmatpush1.bf16.msra.mxu0 %v12861_v42  ;;  %5431 = vmatpush1.bf16.msra.mxu1 %v12862_v2  ;;  %v12870_v42 = vld [vmem:[#allocation6_spill] sm:$0xff]  ;;  %v12871_v2 = vld [vmem:[#allocation7_spill] sm:$0xff] }
0x11fc   :  { %5391 = vmatprep.subr.bf16.mxu0 %v12863_v29  ;;  %5432 = vmatprep.subr.bf16.mxu1 %v12864_v60  ;;  %v12872_v29 = vld [vmem:[#allocation8_spill] sm:$0xff]  ;;  %v12873_v60 = vld [vmem:[#allocation9_spill] sm:$0xff] }
0x11ff   :  { %5392 = vmatpush1.bf16.msra.mxu0 %v12865_v30  ;;  %5433 = vmatpush1.bf16.msra.mxu1 %v12866_v34  ;;  %v12874_v30 = vld [vmem:[#allocation10_spill] sm:$0xff]  ;;  %v12875_v34 = vld [vmem:[#allocation11_spill] sm:$0xff] }
0x1200   :  { %5522 = vmatprep.subr.bf16.mxu0 %v12867_v27  ;;  %5563 = vmatprep.subr.bf16.mxu1 %v12868_v55  ;;  %v12876_v27 = vld [vmem:[#allocation12_spill] sm:$0xff]  ;;  %v12877_v55 = vld [vmem:[#allocation13_spill] sm:$0xff] }
0x1202   :  { %5394 = vmatmul.mubr.bf16.vlgmr.msra.gmra.mrb[180].mxu0 %v10697_v58  ;;  %5435 = vmatmul.mubr.bf16.vlgmr.msra.gmra.mrb[180].mxu1 %v10697_v58  ;;  %v12879_v58 = vld [vmem:[#allocation15_spill] sm:$0xff] }
0x1203   :  { %5523 = vmatpush1.bf16.msra.mxu0 %v12869_v28  ;;  %5564 = vmatpush1.bf16.msra.mxu1 %v12870_v42  ;;  %v12880_v28 = vld [vmem:[#allocation16_spill] sm:$0xff]  ;;  %v12881_v42 = vld [vmem:[#allocation17_spill] sm:$0xff] }
0x1204   :  { %5524 = vmatprep.subr.bf16.mxu0 %v12871_v2  ;;  %5565 = vmatprep.subr.bf16.mxu1 %v12872_v29  ;;  %v12882_v2 = vld [vmem:[#allocation18_spill] sm:$0xff]  ;;  %v12883_v29 = vld [vmem:[#allocation19_spill] sm:$0xff] }
0x1207   :  { %5525 = vmatpush1.bf16.msra.mxu0 %v12873_v60  ;;  %5566 = vmatpush1.bf16.msra.mxu1 %v12874_v30  ;;  %v12884_v60 = vld [vmem:[#allocation20_spill] sm:$0xff]  ;;  %v12885_v30 = vld [vmem:[#allocation21_spill] sm:$0xff] }
0x1208   :  { %5526 = vmatprep.subr.bf16.mxu0 %v12875_v34  ;;  %5567 = vmatprep.subr.bf16.mxu1 %v12876_v27  ;;  %v12886_v34 = vld [vmem:[#allocation22_spill] sm:$0xff]  ;;  %v12887_v27 = vld [vmem:[#allocation23_spill] sm:$0xff] }
0x120b   :  { %5527 = vmatpush1.bf16.msra.mxu0 %v12877_v55  ;;  %5568 = vmatpush1.bf16.msra.mxu1 %v12878_v15  ;;  %v12888_v55 = vld [vmem:[#allocation24_spill] sm:$0xff]  ;;  %v12889_v15 = vld [vmem:[#allocation25_spill] sm:$0xff] }
0x120c   :  { %5528 = vmatprep.subr.bf16.mxu0 %v12879_v58  ;;  %5569 = vmatprep.subr.bf16.mxu1 %v12880_v28  ;;  %v12890_v58 = vld [vmem:[#allocation26_spill] sm:$0xff]  ;;  %v12891_v28 = vld [vmem:[#allocation27_spill] sm:$0xff] }
0x120f   :  { %5529 = vmatpush1.bf16.msra.mxu0 %v12881_v42  ;;  %5570 = vmatpush1.bf16.msra.mxu1 %v12882_v2  ;;  %v12892_v42 = vld [vmem:[#allocation28_spill] sm:$0xff]  ;;  %v12893_v2 = vld [vmem:[#allocation29_spill] sm:$0xff] }
0x1210   :  { %5530 = vmatprep.subr.bf16.mxu0 %v12883_v29  ;;  %5571 = vmatprep.subr.bf16.mxu1 %v12884_v60  ;;  %v12894_v29 = vld [vmem:[#allocation30_spill] sm:$0xff]  ;;  %v12895_v60 = vld [vmem:[#allocation31_spill] sm:$0xff] }
0x1213   :  { %5531 = vmatpush1.bf16.msra.mxu0 %v12885_v30  ;;  %5572 = vmatpush1.bf16.msra.mxu1 %v12886_v34  ;;  %v12896_v30 = vld [vmem:[#allocation32_spill] sm:$0xff]  ;;  %v12897_v34 = vld [vmem:[#allocation33_spill] sm:$0xff] }
0x1214   :  { %5532 = vmatprep.subr.bf16.mxu0 %v12887_v27  ;;  %5573 = vmatprep.subr.bf16.mxu1 %v12888_v55  ;;  %v12898_v27 = vld [vmem:[#allocation34_spill] sm:$0xff]  ;;  %v12899_v55 = vld [vmem:[#allocation35_spill] sm:$0xff] }
0x1217   :  { %5533 = vmatpush1.bf16.msra.mxu0 %v12889_v15  ;;  %5574 = vmatpush1.bf16.msra.mxu1 %v12890_v58  ;;  %v12900_v15 = vld [vmem:[#allocation36_spill] sm:$0xff]  ;;  %v12901_v58 = vld [vmem:[#allocation37_spill] sm:$0xff] }
0x1218   :  { %5534 = vmatprep.subr.bf16.mxu0 %v12891_v28  ;;  %5575 = vmatprep.subr.bf16.mxu1 %v12892_v42  ;;  %v12902_v28 = vld [vmem:[#allocation38_spill] sm:$0xff]  ;;  %v12903_v42 = vld [vmem:[#allocation39_spill] sm:$0xff] }
0x121b   :  { %5535 = vmatpush1.bf16.msra.mxu0 %v12893_v2  ;;  %5576 = vmatpush1.bf16.msra.mxu1 %v12894_v29  ;;  %v12904_v2 = vld [vmem:[#allocation40_spill] sm:$0xff]  ;;  %v12905_v29 = vld [vmem:[#allocation41_spill] sm:$0xff] }
0x121c   :  { %5536 = vmatprep.subr.bf16.mxu0 %v12895_v60  ;;  %5577 = vmatprep.subr.bf16.mxu1 %v12896_v30  ;;  %v12906_v60 = vld [vmem:[#allocation42_spill] sm:$0xff]  ;;  %v12907_v30 = vld [vmem:[#allocation43_spill] sm:$0xff] }
0x121f   :  { %5537 = vmatpush1.bf16.msra.mxu0 %v12897_v34  ;;  %5578 = vmatpush1.bf16.msra.mxu1 %v12898_v27  ;;  %v12908_v34 = vld [vmem:[#allocation44_spill] sm:$0xff]  ;;  %v12909_v27 = vld [vmem:[#allocation45_spill] sm:$0xff] }
0x1220   :  { %5538 = vmatprep.subr.bf16.mxu0 %v12899_v55  ;;  %5579 = vmatprep.subr.bf16.mxu1 %v12900_v15  ;;  %v12910_v55 = vld [vmem:[#allocation46_spill] sm:$0xff]  ;;  %v12911_v15 = vld [vmem:[#allocation47_spill] sm:$0xff] }
0x1223   :  { %5539 = vmatpush1.bf16.msra.mxu0 %v12901_v58  ;;  %5580 = vmatpush1.bf16.msra.mxu1 %v12902_v28  ;;  %v12912_v58 = vld [vmem:[#allocation48_spill] sm:$0xff]  ;;  %v12913_v28 = vld [vmem:[#allocation49_spill] sm:$0xff] }
0x1224   :  { %5540 = vmatprep.subr.bf16.mxu0 %v12903_v42  ;;  %5581 = vmatprep.subr.bf16.mxu1 %v12904_v2  ;;  %v12914_v42 = vld [vmem:[#allocation50_spill] sm:$0xff]  ;;  %v12915_v2 = vld [vmem:[#allocation51_spill] sm:$0xff] }
0x1227   :  { %5541 = vmatpush1.bf16.msra.mxu0 %v12905_v29  ;;  %5582 = vmatpush1.bf16.msra.mxu1 %v12906_v60  ;;  %v12916_v29 = vld [vmem:[#allocation52_spill] sm:$0xff]  ;;  %v12917_v60 = vld [vmem:[#allocation53_spill] sm:$0xff] }
0x1228   :  { %5542 = vmatprep.subr.bf16.mxu0 %v12907_v30  ;;  %5583 = vmatprep.subr.bf16.mxu1 %v12908_v34  ;;  %v12918_v30 = vld [vmem:[#allocation54_spill] sm:$0xff]  ;;  %v12919_v34 = vld [vmem:[#allocation55_spill] sm:$0xff] }
0x122b   :  { %5543 = vmatpush1.bf16.msra.mxu0 %v12909_v27  ;;  %5584 = vmatpush1.bf16.msra.mxu1 %v12910_v55  ;;  %v12920_v27 = vld [vmem:[#allocation56_spill] sm:$0xff]  ;;  %v12921_v55 = vld [vmem:[#allocation57_spill] sm:$0xff] }
0x122c   :  { %5544 = vmatprep.subr.bf16.mxu0 %v12911_v15  ;;  %5585 = vmatprep.subr.bf16.mxu1 %v12912_v58  ;;  %v12922_v15 = vld [vmem:[#allocation58_spill] sm:$0xff]  ;;  %v12923_v58 = vld [vmem:[#allocation59_spill] sm:$0xff] }
0x122f   :  { %5545 = vmatpush1.bf16.msra.mxu0 %v12913_v28  ;;  %5586 = vmatpush1.bf16.msra.mxu1 %v12914_v42  ;;  %v12924_v28 = vld [vmem:[#allocation60_spill] sm:$0xff]  ;;  %v12925_v42 = vld [vmem:[#allocation61_spill] sm:$0xff] }
0x1230   :  { %5546 = vmatprep.subr.bf16.mxu0 %v12915_v2  ;;  %5587 = vmatprep.subr.bf16.mxu1 %v12916_v29  ;;  %v12926_v2 = vld [vmem:[#allocation62_spill] sm:$0xff]  ;;  %v12927_v29 = vld [vmem:[#allocation63_spill] sm:$0xff] }
0x1233   :  { %5547 = vmatpush1.bf16.msra.mxu0 %v12917_v60  ;;  %5588 = vmatpush1.bf16.msra.mxu1 %v12918_v30  ;;  %v12928_v60 = vld [vmem:[#allocation64_spill] sm:$0xff]  ;;  %v12929_v30 = vld [vmem:[#allocation65_spill] sm:$0xff] }
0x1234   :  { %5548 = vmatprep.subr.bf16.mxu0 %v12919_v34  ;;  %5589 = vmatprep.subr.bf16.mxu1 %v12920_v27  ;;  %v12930_v34 = vld [vmem:[#allocation66_spill] sm:$0xff]  ;;  %v12931_v27 = vld [vmem:[#allocation67_spill] sm:$0xff] }
0x1237   :  { %5549 = vmatpush1.bf16.msra.mxu0 %v12921_v55  ;;  %5590 = vmatpush1.bf16.msra.mxu1 %v12922_v15  ;;  %v12932_v55 = vld [vmem:[#allocation68_spill] sm:$0xff] }
0x1238   :  { %5550 = vmatprep.subr.bf16.mxu0 %v12923_v58  ;;  %5591 = vmatprep.subr.bf16.mxu1 %v12924_v28 }
0x123b   :  { %5551 = vmatpush1.bf16.msra.mxu0 %v12925_v42  ;;  %5592 = vmatpush1.bf16.msra.mxu1 %v12926_v2 }
0x123c   :  { %5552 = vmatprep.subr.bf16.mxu0 %v12927_v29  ;;  %5593 = vmatprep.subr.bf16.mxu1 %v12928_v60 }
0x123f   :  { %5553 = vmatpush1.bf16.msra.mxu0 %v12929_v30  ;;  %5594 = vmatpush1.bf16.msra.mxu1 %v12930_v34 }
0x1240   :  { %5604 = vmatprep.subr.bf16.mxu0 %v12931_v27  ;;  %5645 = vmatprep.subr.bf16.mxu1 %v12932_v55 }
0x1295   :  { %v5313_v15 = vpop.f32.mrb[176].mxu0  ;;  %v5354_v58 = vpop.f32.mrb[176].mxu1 }
0x1296   :  { %v5443_v28 = vadd.f32 %v5313_v15, %v12933_v52  ;;  %v5445_v42 = vadd.f32 %v5354_v58, %v12934_v11  ;;  %v5315_v40 = vpop.f32.mrb[177].mxu0  ;;  %v5356_v2 = vpop.f32.mrb[177].mxu1 }
0x1297   :  { %v5444_v29 = vadd.f32 %v5315_v40, %v12935_v45  ;;  %v5446_v60 = vadd.f32 %v5356_v2, %v12936_v19  ;;  %v5317_v20 = vpop.f32.mrb[178].mxu0  ;;  %v5358_v30 = vpop.f32.mrb[178].mxu1 }
0x1298   :  { %v6268_v4 = vmul.f32 -1.442695, %v5445_v42  ;;  %v5318_v34 = vpop.f32.mrb[179].mxu0  ;;  %v5359_v16 = vpop.f32.mrb[179].mxu1  ;;  %v6266_v20 = vmul.f32 -1.442695, %v5443_v28 }
0x1299   :  { %v6269_v27 = vmul.f32 -1.442695, %v5446_v60  ;;  %v6267_v40 = vmul.f32 -1.442695, %v5444_v29  ;;  %v12938_v30 = vld [vmem:[#allocation244_spill] sm:$0xff]  ;;  %v12940_v28 = vld [vmem:[#allocation246_spill] sm:$0xff] }
0x129a   :  { %6792 = vpow2.f32 %v6268_v4 }
0x129b   :  { %6794 = vpow2.f32 %v6269_v27 }
0x12a4   :  { %v6793_v55 = vpop.eup %6792 }
0x12a5   :  { %v5469_v43 = vadd.f32 1.0, %v6793_v55  ;;  %v6795_v21 = vpop.eup %6794 }
0x12a6   :  { %v5470_v52 = vadd.f32 1.0, %v6795_v21 }
0x12a7   :  { %6796 = vrcp.f32 %v5469_v43  ;;  %v12937_v43 = vld [vmem:[#allocation243_spill] sm:$0xff] }
0x12a8   :  { %6798 = vrcp.f32 %v5470_v52  ;;  %v12939_v52 = vld [vmem:[#allocation245_spill] sm:$0xff] }
0x12a9   :  { %6800 = vpow2.f32 %v6266_v20 }
0x12aa   :  { %6802 = vpow2.f32 %v6267_v40 }
0x12b1   :  { %v6797_v11 = vpop.eup %6796 }
0x12b2   :  { %v5489_v15 = vmul.f32 %v6797_v11, %v10679_v62  ;;  %v6799_v45 = vpop.eup %6798 }
0x12b3   :  { %v5490_v19 = vmul.f32 %v6799_v45, %v10683_v18  ;;  %v6801_v16 = vpop.eup %6800 }
0x12b4   :  { %v6803_v58 = vpop.eup %6802  ;;  %v5457_v4 = vadd.f32 1.0, %v6801_v16 }
0x12b5   :  { %v5458_v42 = vadd.f32 1.0, %v6803_v58 }
0x12b6   :  { %6804 = vrcp.f32 %v5457_v4 }
0x12b7   :  { %6806 = vrcp.f32 %v5458_v42 }
0x12c0   :  { %v6805_v4 = vpop.eup %6804 }
0x12d5   :  { %v5395_v2 = vpop.f32.mrb[180].mxu0  ;;  %v5436_v60 = vpop.f32.mrb[180].mxu1 }
0x12d6   :  { %v5447_v21 = vadd.f32 %v5395_v2, %v12937_v43  ;;  %v5449_v34 = vadd.f32 %v5436_v60, %v12938_v30  ;;  %v5397_v27 = vpop.f32.mrb[181].mxu0  ;;  %v5438_v55 = vpop.f32.mrb[181].mxu1 }
0x12d7   :  { %v5448_v11 = vadd.f32 %v5397_v27, %v12939_v52  ;;  %v5450_v29 = vadd.f32 %v5438_v55, %v12940_v28  ;;  %v5399_v45 = vpop.f32.mrb[182].mxu0  ;;  %v5440_v20 = vpop.f32.mrb[182].mxu1 }
0x12d8   :  { %6808 = vtanh.f32 %v5447_v21  ;;  %v6270_v40 = vmul.f32 -1.442695, %v5449_v34  ;;  %v5400_v16 = vpop.f32.mrb[183].mxu0  ;;  %v5441_v58 = vpop.f32.mrb[183].mxu1 }
0x12d9   :  { %6810 = vtanh.f32 %v5448_v11  ;;  %v6271_v17 = vmul.f32 -1.442695, %v5450_v29  ;;  %v6807_v2 = vpop.eup %6806  ;;  %v5503_v30 = vpop.permute.xlu0 %5502  ;;  %v6342_v58 = vld [vmem:[%s11000_s5 + $0x78] sm:$0xff]  }
0x12da   :  { %6812 = vpow2.f32 %v6270_v40  ;;  %vm5504_vm15 = vcmp.eq.s32.totalorder %v5503_v30, 1 }
0x12db   :  { %6814 = vpow2.f32 %v6271_v17 }
0x12e2   :  { %v6809_v60 = vpop.eup %6808 }
0x12e3   :  { %v6811_v43 = vpop.eup %6810  ;;  %v5491_v42 = vmul.f32 %v6809_v60, %v6805_v4  ;;  %v6343_v4 = vld [vmem:[%s11000_s5 + $0x38] sm:$0xff]  }
0x12e4   :  { %v6813_v25 = vpop.eup %6812  ;;  %v5492_v27 = vmul.f32 %v6811_v43, %v6807_v2  ;;  %v12966_v43 = vld [vmem:[#allocation187_spill] sm:$0xff] }
0x12e5   :  { %v6815_v52 = vpop.eup %6814  ;;  %v5493_v55 = vadd.f32 %v5491_v42, %v5489_v15  ;;  %v5483_v28 = vadd.f32 1.0, %v6813_v25  ;;  %v12967_v42 = vld [vmem:[#allocation188_spill] sm:$0xff] }
0x12e6   :  { %v5494_v21 = vadd.f32 %v5492_v27, %v5490_v19  ;;  %v5484_v34 = vadd.f32 1.0, %v6815_v52 }
0x12e7   :  { %6816 = vtanh.f32 %v5493_v55  ;;  %v10843_v11 = vsel %vm5504_vm15, %v5493_v55, %v10679_v62 }
0x12e8   :  { %6818 = vrcp.f32 %v5483_v28  ;;  %v10847_v17 = vsel %vm5504_vm15, %v5494_v21, %v10683_v18  ;;  %v12968_v28 = vld [vmem:[#allocation189_spill] sm:$0xff] }
0x12e9   :  { %6820 = vtanh.f32 %v5494_v21 }
0x12ea   :  { %6822 = vrcp.f32 %v5484_v34  ;;  %v12969_v34 = vld [vmem:[#allocation190_spill] sm:$0xff] }
0x12f1   :  { %v6817_v29 = vpop.eup %6816 }
0x12f2   :  { %v6819_v45 = vpop.eup %6818 }
0x12f3   :  { %v6821_v20 = vpop.eup %6820  ;;  %v5497_v15 = vmul.f32 %v6819_v45, %v6817_v29 }
0x12f4   :  { %v6823_v25 = vpop.eup %6822 }
0x12f5   :  { %v5498_v40 = vmul.f32 %v6823_v25, %v6821_v20  ;;  %v10851_v19 = vsel %vm5504_vm15, %v5497_v15, %v10687_v57  ;;  %v6340_v57 = vld [vmem:[%s11000_s5 + $0x70] sm:$0xff]  }
0x12f6   :  { %v10861_v16 = vpack.c.bf16 %v10851_v19, %v10851_v19 }
0x12f7   :  { %v10855_v62 = vsel %vm5504_vm15, %v5498_v40, %v10691_v47  ;;  %v6341_v47 = vld [vmem:[%s11000_s5 + $0x30] sm:$0xff]  }
0x12f8   :  { %v5521_v18 = vpack.c.bf16 %v10855_v62, %v10855_v62 }
0x12fa   :  { %5554 = vmatprep.mubr.bf16.mxu0 %v5521_v18  ;;  %5595 = vmatprep.mubr.bf16.mxu1 %v5521_v18 }
0x12fb   :  { %5555 = vmatmul.mubr.bf16.vlgmr.msra.gmra.mrb[184].mxu0 %v10861_v16  ;;  %5596 = vmatmul.mubr.bf16.vlgmr.msra.gmra.mrb[184].mxu1 %v10861_v16 }
0x12fc   :  { %5605 = vmatpush1.bf16.msra.mxu0 %v11548_v53  ;;  %5646 = vmatpush1.bf16.msra.mxu1 %v11549_v10  ;;  %v12941_v53 = vld [vmem:[#allocation106_spill] sm:$0xff]  ;;  %v12942_v10 = vld [vmem:[#allocation107_spill] sm:$0xff] }
0x12fd   :  { %5636 = vmatprep.mubr.bf16.mxu0 %v5521_v18  ;;  %5677 = vmatprep.mubr.bf16.mxu1 %v5521_v18 }
0x12fe   :  { %5606 = vmatprep.subr.bf16.mxu0 %v11550_v6  ;;  %5647 = vmatprep.subr.bf16.mxu1 %v11551_v44  ;;  %v12943_v6 = vld [vmem:[#allocation108_spill] sm:$0xff]  ;;  %v12944_v44 = vld [vmem:[#allocation109_spill] sm:$0xff] }
0x1300   :  { %5607 = vmatpush1.bf16.msra.mxu0 %v11552_v3  ;;  %5648 = vmatpush1.bf16.msra.mxu1 %v11553_v5  ;;  %v12945_v3 = vld [vmem:[#allocation110_spill] sm:$0xff]  ;;  %v12946_v5 = vld [vmem:[#allocation111_spill] sm:$0xff] }
0x1301   :  { %5608 = vmatprep.subr.bf16.mxu0 %v11554_v48  ;;  %5649 = vmatprep.subr.bf16.mxu1 %v11555_v8  ;;  %v12947_v48 = vld [vmem:[#allocation112_spill] sm:$0xff]  ;;  %v12948_v8 = vld [vmem:[#allocation113_spill] sm:$0xff] }
0x1304   :  { %5609 = vmatpush1.bf16.msra.mxu0 %v11556_v46  ;;  %5650 = vmatpush1.bf16.msra.mxu1 %v11557_v35  ;;  %v12949_v46 = vld [vmem:[#allocation114_spill] sm:$0xff]  ;;  %v12950_v35 = vld [vmem:[#allocation115_spill] sm:$0xff] }
0x1305   :  { %5610 = vmatprep.subr.bf16.mxu0 %v11558_v49  ;;  %5651 = vmatprep.subr.bf16.mxu1 %v11559_v36  ;;  %v12951_v49 = vld [vmem:[#allocation116_spill] sm:$0xff]  ;;  %v12952_v36 = vld [vmem:[#allocation117_spill] sm:$0xff] }
0x1308   :  { %5611 = vmatpush1.bf16.msra.mxu0 %v11560_v50  ;;  %5652 = vmatpush1.bf16.msra.mxu1 %v11561_v54  ;;  %v12953_v50 = vld [vmem:[#allocation118_spill] sm:$0xff]  ;;  %v12954_v54 = vld [vmem:[#allocation119_spill] sm:$0xff] }
0x1309   :  { %5612 = vmatprep.subr.bf16.mxu0 %v11653_v56  ;;  %5653 = vmatprep.subr.bf16.mxu1 %v11654_v51  ;;  %v12955_v56 = vld [vmem:[#allocation120_spill] sm:$0xff]  ;;  %v12956_v51 = vld [vmem:[#allocation121_spill] sm:$0xff] }
0x130c   :  { %5613 = vmatpush1.bf16.msra.mxu0 %v11655_v13  ;;  %5654 = vmatpush1.bf16.msra.mxu1 %v11656_v33  ;;  %v12957_v13 = vld [vmem:[#allocation122_spill] sm:$0xff]  ;;  %v12958_v33 = vld [vmem:[#allocation123_spill] sm:$0xff] }
0x130d   :  { %5614 = vmatprep.subr.bf16.mxu0 %v11657_v23  ;;  %5655 = vmatprep.subr.bf16.mxu1 %v11658_v59  ;;  %v12959_v23 = vld [vmem:[#allocation124_spill] sm:$0xff]  ;;  %v12960_v59 = vld [vmem:[#allocation125_spill] sm:$0xff] }
0x1310   :  { %5615 = vmatpush1.bf16.msra.mxu0 %v11659_v39  ;;  %5656 = vmatpush1.bf16.msra.mxu1 %v11660_v63  ;;  %v12961_v39 = vld [vmem:[#allocation126_spill] sm:$0xff]  ;;  %v12962_v63 = vld [vmem:[#allocation127_spill] sm:$0xff] }
0x1311   :  { %5616 = vmatprep.subr.bf16.mxu0 %v11661_v7  ;;  %5657 = vmatprep.subr.bf16.mxu1 %v11662_v0  ;;  %v12963_v7 = vld [vmem:[#allocation128_spill] sm:$0xff]  ;;  %v12964_v0 = vld [vmem:[#allocation129_spill] sm:$0xff] }
0x1314   :  { %5617 = vmatpush1.bf16.msra.mxu0 %v11663_v14  ;;  %5658 = vmatpush1.bf16.msra.mxu1 %v11664_v32  ;;  %v12965_v14 = vld [vmem:[#allocation130_spill] sm:$0xff]  ;;  %v6328_v32 = vld [vmem:[%s11000_s5 + $0x40] sm:$0xff]  }
0x1315   :  { %5618 = vmatprep.subr.bf16.mxu0 %v11665_v12  ;;  %5659 = vmatprep.subr.bf16.mxu1 %v11753_v24  ;;  %v6329_v12 = vld [vmem:[%s11000_s5] sm:$0xff]  }
0x1316   :  { %v6337_v24 = vld [vmem:[%s11000_s5 + $0x20] sm:$0xff]  }
0x1318   :  { %5619 = vmatpush1.bf16.msra.mxu0 %v11754_v9  ;;  %5660 = vmatpush1.bf16.msra.mxu1 %v11755_v41  ;;  %v6338_v9 = vld [vmem:[%s11000_s5 + $0x68] sm:$0xff]  }
0x1319   :  { %5620 = vmatprep.subr.bf16.mxu0 %v11669_v26  ;;  %5661 = vmatprep.subr.bf16.mxu1 %v11670_v1  ;;  %v6330_v26 = vld [vmem:[%s11000_s5 + $0x48] sm:$0xff]  }
0x131a   :  { %v6331_v1 = vld [vmem:[%s11000_s5 + $0x8] sm:$0xff]  }
0x131b   :  { %v6339_v41 = vld [vmem:[%s11000_s5 + $0x28] sm:$0xff]  }
0x131c   :  { %5621 = vmatpush1.bf16.msra.mxu0 %v11671_v22  ;;  %5662 = vmatpush1.bf16.msra.mxu1 %v11672_v38  ;;  %v6332_v22 = vld [vmem:[%s11000_s5 + $0x50] sm:$0xff]  }
0x131d   :  { %5622 = vmatprep.subr.bf16.mxu0 %v11673_v37  ;;  %5663 = vmatprep.subr.bf16.mxu1 %v11674_v31  ;;  %v6333_v38 = vld [vmem:[%s11000_s5 + $0x10] sm:$0xff]   ;;  %v6334_v37 = vld [vmem:[%s11000_s5 + $0x58] sm:$0xff]  }
0x131e   :  { %v6335_v31 = vld [vmem:[%s11000_s5 + $0x18] sm:$0xff]  }
0x1320   :  { %5623 = vmatpush1.bf16.msra.mxu0 %v11675_v61  ;;  %5664 = vmatpush1.bf16.msra.mxu1 %v12941_v53  ;;  %v6336_v61 = vld [vmem:[%s11000_s5 + $0x60] sm:$0xff]  }
0x1321   :  { %5624 = vmatprep.subr.bf16.mxu0 %v12942_v10  ;;  %5665 = vmatprep.subr.bf16.mxu1 %v12943_v6 }
0x1324   :  { %5625 = vmatpush1.bf16.msra.mxu0 %v12944_v44  ;;  %5666 = vmatpush1.bf16.msra.mxu1 %v12945_v3 }
0x1325   :  { %5626 = vmatprep.subr.bf16.mxu0 %v12946_v5  ;;  %5667 = vmatprep.subr.bf16.mxu1 %v12947_v48 }
0x1328   :  { %5627 = vmatpush1.bf16.msra.mxu0 %v12948_v8  ;;  %5668 = vmatpush1.bf16.msra.mxu1 %v12949_v46 }
0x1329   :  { %5628 = vmatprep.subr.bf16.mxu0 %v12950_v35  ;;  %5669 = vmatprep.subr.bf16.mxu1 %v12951_v49 }
0x132c   :  { %5629 = vmatpush1.bf16.msra.mxu0 %v12952_v36  ;;  %5670 = vmatpush1.bf16.msra.mxu1 %v12953_v50 }
0x132d   :  { %5630 = vmatprep.subr.bf16.mxu0 %v12954_v54  ;;  %5671 = vmatprep.subr.bf16.mxu1 %v12955_v56 }
0x1330   :  { %5631 = vmatpush1.bf16.msra.mxu0 %v12956_v51  ;;  %5672 = vmatpush1.bf16.msra.mxu1 %v12957_v13  ;;  %v12970_v51 = vld [vmem:[#allocation247_spill] sm:$0xff] }
0x1331   :  { %5632 = vmatprep.subr.bf16.mxu0 %v12958_v33  ;;  %5673 = vmatprep.subr.bf16.mxu1 %v12959_v23  ;;  %v12971_v33 = vld [vmem:[#allocation248_spill] sm:$0xff] }
0x1334   :  { %5633 = vmatpush1.bf16.msra.mxu0 %v12960_v59  ;;  %5674 = vmatpush1.bf16.msra.mxu1 %v12961_v39  ;;  %v12972_v39 = vld [vmem:[#allocation249_spill] sm:$0xff] }
0x1335   :  { %5634 = vmatprep.subr.bf16.mxu0 %v12962_v63  ;;  %5675 = vmatprep.subr.bf16.mxu1 %v12963_v7  ;;  %v12973_v63 = vld [vmem:[#allocation250_spill] sm:$0xff] }
0x1338   :  { %5635 = vmatpush1.bf16.msra.mxu0 %v12964_v0  ;;  %5676 = vmatpush1.bf16.msra.mxu1 %v12965_v14 }
0x1339   :  { %6295 = vmatprep.subr.bf16.mxu0 %v6328_v32 }
0x133b   :  { %5637 = vmatmul.mubr.bf16.vlgmr.msra.gmra.mrb[188].mxu0 %v10861_v16  ;;  %5678 = vmatmul.mubr.bf16.vlgmr.msra.gmra.mrb[188].mxu1 %v10861_v16 }
0x133c   :  { %6296 = vmatpush3.bf16.msra.mxu0 %v6329_v12 }
0x133d   :  { %6297 = vmatprep.subr.bf16.mxu0 %v6330_v26 }
0x1340   :  { %6298 = vmatpush3.bf16.msra.mxu0 %v6331_v1 }
0x1341   :  { %6299 = vmatprep.subr.bf16.mxu0 %v6332_v22 }
0x1344   :  { %6300 = vmatpush3.bf16.msra.mxu0 %v6333_v38 }
0x1345   :  { %6301 = vmatprep.subr.bf16.mxu0 %v6334_v37 }
0x1348   :  { %6302 = vmatpush3.bf16.msra.mxu0 %v6335_v31 }
0x1349   :  { %6303 = vmatprep.subr.bf16.mxu0 %v6336_v61 }
0x134c   :  { %6304 = vmatpush3.bf16.msra.mxu0 %v6337_v24 }
0x134d   :  { %6305 = vmatprep.subr.bf16.mxu0 %v6338_v9 }
0x1350   :  { %6306 = vmatpush3.bf16.msra.mxu0 %v6339_v41 }
0x1351   :  { %6307 = vmatprep.subr.bf16.mxu0 %v6340_v57 }
0x1354   :  { %6308 = vmatpush3.bf16.msra.mxu0 %v6341_v47 }
0x1355   :  { %6309 = vmatprep.subr.bf16.mxu0 %v6342_v58 }
0x1358   :  { %6310 = vmatpush3.bf16.msra.mxu0 %v6343_v4 }
0x13ce   :  { %v5556_v2 = vpop.f32.mrb[184].mxu0  ;;  %v5597_v60 = vpop.f32.mrb[184].mxu1 }
0x13cf   :  { %v5686_v30 = vadd.f32 %v5556_v2, %v12966_v43  ;;  %v5688_v27 = vadd.f32 %v5597_v60, %v12967_v42  ;;  %v5558_v52 = vpop.f32.mrb[185].mxu0  ;;  %v5599_v55 = vpop.f32.mrb[185].mxu1 }
0x13d0   :  { %v5687_v21 = vadd.f32 %v5558_v52, %v12968_v28  ;;  %v5689_v29 = vadd.f32 %v5599_v55, %v12969_v34  ;;  %v5560_v45 = vpop.f32.mrb[186].mxu0  ;;  %v5601_v20 = vpop.f32.mrb[186].mxu1 }
0x13d1   :  { %v6274_v15 = vmul.f32 -1.442695, %v5688_v27  ;;  %v5561_v25 = vpop.f32.mrb[187].mxu0  ;;  %v5602_v40 = vpop.f32.mrb[187].mxu1  ;;  %v6272_v8 = vmul.f32 -1.442695, %v5686_v30 }
0x13d2   :  { %v6275_v18 = vmul.f32 -1.442695, %v5689_v29  ;;  %v6273_v46 = vmul.f32 -1.442695, %v5687_v21  ;;  %v5746_v43 = vpop.permute.xlu1 %5745  ;;  %v6278_v45 = vld [vmem:[%s11001_s6] ss:$0 sm:$0xff] }
0x13d3   :  { %6824 = vpow2.f32 %v6274_v15  ;;  %vm5747_vm0 = vcmp.eq.s32.totalorder %v5746_v43, 1 }
0x13d4   :  { %6826 = vpow2.f32 %v6275_v18 }
0x13dd   :  { %v6825_v16 = vpop.eup %6824 }
0x13de   :  { %v5712_v53 = vadd.f32 1.0, %v6825_v16  ;;  %v6827_v10 = vpop.eup %6826 }
0x13df   :  { %v5713_v6 = vadd.f32 1.0, %v6827_v10 }
0x13e0   :  { %6828 = vrcp.f32 %v5712_v53 }
0x13e1   :  { %6830 = vrcp.f32 %v5713_v6 }
0x13e2   :  { %6832 = vpow2.f32 %v6272_v8 }
0x13e3   :  { %6834 = vpow2.f32 %v6273_v46 }
0x13ea   :  { %v6829_v44 = vpop.eup %6828 }
0x13eb   :  { %v5732_v3 = vmul.f32 %v6829_v44, %v10843_v11  ;;  %v6831_v5 = vpop.eup %6830 }
0x13ec   :  { %v5733_v48 = vmul.f32 %v6831_v5, %v10847_v17  ;;  %v6833_v35 = vpop.eup %6832 }
0x13ed   :  { %v6835_v49 = vpop.eup %6834  ;;  %v5700_v36 = vadd.f32 1.0, %v6833_v35 }
0x13ee   :  { %v5701_v50 = vadd.f32 1.0, %v6835_v49 }
0x13ef   :  { %6836 = vrcp.f32 %v5700_v36 }
0x13f0   :  { %6838 = vrcp.f32 %v5701_v50 }
0x13f9   :  { %v6837_v22 = vpop.eup %6836 }
0x13fa   :  { %v6839_v38 = vpop.eup %6838 }
0x140e   :  { %v5638_v54 = vpop.f32.mrb[188].mxu0  ;;  %v5679_v56 = vpop.f32.mrb[188].mxu1 }
0x140f   :  { %v5690_v13 = vadd.f32 %v5638_v54, %v12970_v51  ;;  %v5692_v23 = vadd.f32 %v5679_v56, %v12971_v33  ;;  %v5640_v59 = vpop.f32.mrb[189].mxu0  ;;  %v5681_v11 = vpop.f32.mrb[189].mxu1 }
0x1410   :  { %v5691_v17 = vadd.f32 %v5640_v59, %v12972_v39  ;;  %v5693_v7 = vadd.f32 %v5681_v11, %v12973_v63  ;;  %v5642_v0 = vpop.f32.mrb[190].mxu0  ;;  %v5683_v14 = vpop.f32.mrb[190].mxu1 }
0x1411   :  { %6840 = vtanh.f32 %v5690_v13  ;;  %v6276_v32 = vmul.f32 -1.442695, %v5692_v23  ;;  %v5643_v12 = vpop.f32.mrb[191].mxu0  ;;  %v5684_v26 = vpop.f32.mrb[191].mxu1 }
0x1412   :  { %6842 = vtanh.f32 %v5691_v17  ;;  %v6277_v1 = vmul.f32 -1.442695, %v5693_v7 }
0x1413   :  { %6844 = vpow2.f32 %v6276_v32 }
0x1414   :  { %6846 = vpow2.f32 %v6277_v1 }
0x141b   :  { %v6841_v37 = vpop.eup %6840 }
0x141c   :  { %v6843_v31 = vpop.eup %6842  ;;  %v5734_v61 = vmul.f32 %v6841_v37, %v6837_v22 }
0x141d   :  { %v6845_v24 = vpop.eup %6844  ;;  %v5735_v9 = vmul.f32 %v6843_v31, %v6839_v38 }
0x141e   :  { %v6847_v41 = vpop.eup %6846  ;;  %v5736_v57 = vadd.f32 %v5734_v61, %v5732_v3  ;;  %v5726_v47 = vadd.f32 1.0, %v6845_v24 }
0x141f   :  { %v5737_v58 = vadd.f32 %v5735_v9, %v5733_v48  ;;  %v5727_v4 = vadd.f32 1.0, %v6847_v41 }
0x1420   :  { %6848 = vtanh.f32 %v5736_v57 }
0x1421   :  { %6850 = vrcp.f32 %v5726_v47 }
0x1422   :  { %6852 = vtanh.f32 %v5737_v58 }
0x1423   :  { %6854 = vrcp.f32 %v5727_v4 }
0x142a   :  { %v6849_v2 = vpop.eup %6848 }
0x142b   :  { %v6851_v60 = vpop.eup %6850 }
0x142c   :  { %v6853_v30 = vpop.eup %6852  ;;  %v5740_v42 = vmul.f32 %v6851_v60, %v6849_v2 }
0x142d   :  { %v6855_v27 = vpop.eup %6854 }
0x142e   :  { %v5741_v52 = vmul.f32 %v6855_v27, %v6853_v30  ;;  %v5748_v55 = vsel %vm5747_vm0, %v5740_v42, %v10851_v19 }
0x142f   :  { %v5750_v34 = vpack.c.bf16 %v5748_v55, %v5748_v55 }
0x1430   :  { %v5749_v28 = vsel %vm5747_vm0, %v5741_v52, %v10855_v62 }
0x1431   :  { %v5751_v21 = vpack.c.bf16 %v5749_v28, %v5749_v28 }
0x1433   :  { %5919 = vmatprep.mubr.bf16.mxu0 %v5751_v21 }
0x1434   :  { %5920 = vmatmul.mubr.bf16.vlgmr.msra.gmra.mrb[192].mxu0 %v5750_v34 }
0x1507   :  { %v6311_v29 = vpop.f32.mrb[192].mxu0 }
0x1508   :  { %v6312_v20 = vpop.f32.mrb[193].mxu0 }
0x1509   :  { %v6313_v15 = vadd.f32 %v6312_v20, %v6311_v29  ;;  %v6314_v25 = vpop.f32.mrb[194].mxu0 }
0x150a   :  { %v6315_v40 = vpop.f32.mrb[195].mxu0 }
0x150b   :  { %v5922_v18 = vadd.f32 %v6313_v15, %v6278_v45 }
0x150d   :  { %5927 = vmax.xlane.f32.xlu0 %v5922_v18 }
0x159a   :  { %v5928_v16 = vpop.xlane.xlu0 %5927 }
0x159b   :  { %v5929_v53 = vsub.f32 %v5922_v18, %v5928_v16 }
0x159d   :  { %v5930_v19 = vmul.f32 1.442695, %v5929_v53 }
0x159f   :  { %6856 = vpow2.f32 %v5930_v19 }
0x15a9   :  { %v6857_v62 = vpop.eup %6856 }
0x15aa   :  { %5932 = vadd.xlane.f32.xlu1 %v6857_v62 }
0x1637   :  { %v5933_v10 = vpop.xlane.xlu1 %5932 }
0x1638   :  { %6858 = vlog2.f32 %v5933_v10 }
0x1642   :  { %v6859_v6 = vpop.eup %6858 }
0x1643   :  { %v5935_v44 = vmul.f32 0.6931472, %v6859_v6 }
0x1645   :  { %v5936_v3 = vadd.f32 %v5935_v44, %v5928_v16 }
0x1647   :  { %v5937_v5 = vsub.f32 %v5922_v18, %v5936_v3 }
0x1649   :  { %5938 = vst [vmem:[%s11002_s7] sm:$0xff] %v5937_v5 }

</bundles_post_ra>
